<compile_context>
chip_gen: v5e
topology: v5e:2x2
jax: 0.10.0
libtpu: 0.0.40
codegen_flags: <defaults>
</compile_context>

<pallas_src>
import numpy as np
import jax
import jax.numpy as jnp
from jax import lax
from jax.experimental import pallas as pl
from jax.experimental.pallas import tpu as pltpu


# ----------------------------- fused Pallas kernel ---------------------------

def _make_inception_kernel(H, W, cin, Kc, Cout):
    """Kc = n3c + n5c + 2*cin stacked feature channels; Cout = n1+n3+n5+pool_c."""
    NEG = float(jnp.finfo(jnp.float32).min)
    COL0 = 8  # sublane-aligned column origin of the valid data inside scratch

    def kernel(x_ref, wred_ref, bred_ref, wbig_ref, ball_ref, o_ref, padc, padp):
        x3d = x_ref[0]                               # (H, W, cin)
        x2d = x3d.reshape(H * W, cin)

        # (1) fused 1x1 reduce convs for the 3x3 / 5x5 branches (BN+bias+ReLU folded)
        y_red = jnp.dot(x2d, wred_ref[...], preferred_element_type=jnp.float32)
        y_red = jnp.maximum(y_red + bred_ref[...], 0.0)           # (H*W, n3c+n5c)

        # (2) 3x3 / stride 1 / pad 1 max-pool, separable: col-max then row-max.
        padp[...] = jnp.full(padp.shape, NEG, dtype=padp.dtype)
        padp[1:H + 1, COL0:COL0 + W, :] = x3d
        cmax = jnp.maximum(
            jnp.maximum(padp[:, COL0 - 1:COL0 - 1 + W, :], padp[:, COL0:COL0 + W, :]),
            padp[:, COL0 + 1:COL0 + 1 + W, :])                    # (H+2, W, cin)
        pooled = jnp.maximum(jnp.maximum(cmax[0:H], cmax[1:H + 1]), cmax[2:H + 2])
        pooled2d = pooled.reshape(H * W, cin)

        # (3) stack [reduce3 | reduce5 | x | maxpool(x)] and zero-pad (by 2) in VMEM.
        feat = jnp.concatenate([y_red, x2d, pooled2d], axis=-1)   # (H*W, Kc)
        padc[...] = jnp.zeros(padc.shape, dtype=padc.dtype)
        padc[2:H + 2, COL0:COL0 + W, :] = feat.reshape(H, W, Kc)

        # (4) all four branches as one 25-tap shifted-matmul accumulation.
        #     (3x3 weights occupy the inner 3x3 taps; 1x1 / pool-proj weights only
        #      the center tap; zero blocks elsewhere — built host-side.)
        acc = jnp.zeros((H * W, Cout), jnp.float32)
        for dy in range(5):
            for dx in range(5):
                t = dy * 5 + dx
                patch = padc[dy:dy + H, COL0 - 2 + dx:COL0 - 2 + dx + W, :]
                acc = acc + jnp.dot(patch.reshape(H * W, Kc),
                                    wbig_ref[t * Kc:(t + 1) * Kc, :],
                                    preferred_element_type=jnp.float32)

        out = jnp.maximum(acc + ball_ref[...], 0.0)               # bias+BN+ReLU, all branches
        o_ref[0] = out.reshape(H, W, Cout).astype(o_ref.dtype)

    return kernel


def inception_forward(x_nchw, fused):
    """Fused Inception forward. x: NCHW; returns NCHW (channel-concat of branches)."""
    x = jnp.transpose(x_nchw, (0, 2, 3, 1))                       # NCHW -> NHWC
    N, H, W, cin = x.shape
    Kc = fused["w_big"].shape[0] // 25
    Cout = fused["w_big"].shape[1]

    kernel = _make_inception_kernel(H, W, cin, Kc, Cout)
    out_nhwc = pl.pallas_call(
        kernel,
        out_shape=jax.ShapeDtypeStruct((N, H, W, Cout), jnp.float32),
        grid_spec=pltpu.PrefetchScalarGridSpec(
            num_scalar_prefetch=0,
            grid=(N,),
            in_specs=[
                pl.BlockSpec((1, H, W, cin), lambda n: (n, 0, 0, 0)),
                pl.BlockSpec(fused["w_red"].shape, lambda n: (0, 0)),
                pl.BlockSpec(fused["b_red"].shape, lambda n: (0, 0)),
                pl.BlockSpec(fused["w_big"].shape, lambda n: (0, 0)),
                pl.BlockSpec(fused["b_all"].shape, lambda n: (0, 0)),
            ],
            out_specs=pl.BlockSpec((1, H, W, Cout), lambda n: (n, 0, 0, 0)),
            scratch_shapes=[
                pltpu.VMEM((H + 4, W + 16, Kc), jnp.float32),   # padded stacked features
                pltpu.VMEM((H + 2, W + 16, cin), jnp.float32),  # padded input for max-pool
            ],
        ),
        compiler_params=pltpu.CompilerParams(dimension_semantics=("parallel",)),
    )(x, fused["w_red"], fused["b_red"], fused["w_big"], fused["b_all"])
    # TODO(synk): output stays NHWC in-kernel; final NCHW transpose is one small XLA op.
    return jnp.transpose(out_nhwc, (0, 3, 1, 2))


# --------------------------- parameter preparation ---------------------------

def fold_bn(w, b, gamma, beta, mean, var, eps=1e-5):
    # inference-mode BatchNorm folded into conv weight/bias
    scale = gamma / jnp.sqrt(var + eps)
    return w * scale[:, None, None, None], (b - mean) * scale + beta


def to_mat(w):
    # (Cout, Cin, kH, kW) -> (kH*kW*Cin, Cout), row order (dy, dx, c)
    Cout, Cin, kH, kW = w.shape
    return jnp.transpose(w, (2, 3, 1, 0)).reshape(kH * kW * Cin, Cout)


def make_conv_bn(key, cin, cout, k):
    ks = jax.random.split(key, 6)
    w = 0.1 * jax.random.normal(ks[0], (cout, cin, k, k), jnp.float32)
    b = 0.1 * jax.random.normal(ks[1], (cout,), jnp.float32)
    gamma = 1.0 + 0.1 * jax.random.normal(ks[2], (cout,), jnp.float32)
    beta = 0.1 * jax.random.normal(ks[3], (cout,), jnp.float32)
    mean = 0.1 * jax.random.normal(ks[4], (cout,), jnp.float32)
    var = jnp.abs(jax.random.normal(ks[5], (cout,), jnp.float32)) + 0.5
    wf, bf = fold_bn(w, b, gamma, beta, mean, var)
    return {"w": w, "b": b, "gamma": gamma, "beta": beta, "mean": mean,
            "var": var, "w_mat": to_mat(wf), "b_fold": bf}


def prepare_fused(params, in_channels, n1, n3c, n3, n5c, n5, pool_c):
    """Build the fused weight matrices consumed by the single Pallas kernel."""
    p1, p2r, p2 = params["b1"], params["b2_red"], params["b2"]
    p3r, p3, p4 = params["b3_red"], params["b3"], params["b4"]

    Kc = n3c + n5c + 2 * in_channels       # [reduce3 | reduce5 | x | pooled]
    Cout = n1 + n3 + n5 + pool_c

    # stage 1: the two 1x1 reduce convs share one matmul
    w_red = jnp.concatenate([p2r["w_mat"], p3r["w_mat"]], axis=1)        # (Cin, n3c+n5c)
    b_red = jnp.concatenate([p2r["b_fold"], p3r["b_fold"]])[None, :]

    # stage 2: one 5x5 "tap" weight carrying all four branches
    w3 = np.asarray(p2["w_mat"])   # (9*n3c,  n3)
    w5 = np.asarray(p3["w_mat"])   # (25*n5c, n5)
    w1 = np.asarray(p1["w_mat"])   # (Cin, n1)
    w4 = np.asarray(p4["w_mat"])   # (Cin, pool_c)
    c_r2, c_r3, c_x, c_pool = 0, n3c, n3c + n5c, n3c + n5c + in_channels
    o1, o3, o5, o4 = 0, n1, n1 + n3, n1 + n3 + n5

    w_big = np.zeros((25 * Kc, Cout), np.float32)
    for dy in range(5):
        for dx in range(5):
            t = (dy * 5 + dx) * Kc
            # 5x5 conv: every tap
            s5 = (dy * 5 + dx) * n5c
            w_big[t + c_r3:t + c_r3 + n5c, o5:o5 + n5] = w5[s5:s5 + n5c]
            # 3x3 conv: inner 3x3 taps only (its zero padding == outer ring of zeros)
            if 1 <= dy <= 3 and 1 <= dx <= 3:
                s3 = ((dy - 1) * 3 + (dx - 1)) * n3c
                w_big[t + c_r2:t + c_r2 + n3c, o3:o3 + n3] = w3[s3:s3 + n3c]
            # 1x1 branch and pool-projection: center tap only
            if dy == 2 and dx == 2:
                w_big[t + c_x:t + c_x + in_channels, o1:o1 + n1] = w1
                w_big[t + c_pool:t + c_pool + in_channels, o4:o4 + pool_c] = w4

    b_all = jnp.concatenate([p1["b_fold"], p2["b_fold"],
                             p3["b_fold"], p4["b_fold"]])[None, :]
    return {"w_red": w_red, "b_red": b_red,
            "w_big": jnp.asarray(w_big), "b_all": b_all}


# ----------------------------- pure-JAX reference ----------------------------

def _branch_ref(x_nhwc, p, k, eps=1e-5):
    whwio = jnp.transpose(p["w"], (2, 3, 1, 0))
    pad = k // 2
    y = lax.conv_general_dilated(
        x_nhwc, whwio, (1, 1), [(pad, pad), (pad, pad)],
        dimension_numbers=("NHWC", "HWIO", "NHWC")) + p["b"]
    y = (y - p["mean"]) / jnp.sqrt(p["var"] + eps) * p["gamma"] + p["beta"]
    return jnp.maximum(y, 0.0)


def inception_ref(x_nchw, params):
    x = jnp.transpose(x_nchw, (0, 2, 3, 1))
    b1 = _branch_ref(x, params["b1"], 1)
    b2 = _branch_ref(_branch_ref(x, params["b2_red"], 1), params["b2"], 3)
    b3 = _branch_ref(_branch_ref(x, params["b3_red"], 1), params["b3"], 5)
    pooled = lax.reduce_window(x, -jnp.inf, lax.max, (1, 3, 3, 1), (1, 1, 1, 1),
                               [(0, 0), (1, 1), (1, 1), (0, 0)])
    b4 = _branch_ref(pooled, params["b4"], 1)
    return jnp.transpose(jnp.concatenate([b1, b2, b3, b4], axis=-1), (0, 3, 1, 2))


# ----------------------------------- main ------------------------------------

if __name__ == "__main__":
    # Inception(in_channels=4, n1=8, n3c=4, n3=8, n5c=4, n5=8, pool_c=8)
    in_channels, n1, n3c, n3, n5c, n5, pool_c = 4, 8, 4, 8, 4, 8, 8
    key = jax.random.PRNGKey(0)
    kx, k1, k2a, k2b, k3a, k3b, k4 = jax.random.split(key, 7)

    params = {
        "b1":     make_conv_bn(k1,  in_channels, n1,     1),
        "b2_red": make_conv_bn(k2a, in_channels, n3c,    1),
        "b2":     make_conv_bn(k2b, n3c,         n3,     3),
        "b3_red": make_conv_bn(k3a, in_channels, n5c,    1),
        "b3":     make_conv_bn(k3b, n5c,         n5,     5),
        "b4":     make_conv_bn(k4,  in_channels, pool_c, 1),
    }
    fused = prepare_fused(params, in_channels, n1, n3c, n3, n5c, n5, pool_c)

    x = jax.random.normal(kx, (2, in_channels, 16, 16), jnp.float32)  # NCHW

    fwd = jax.jit(inception_forward)
    out = jax.block_until_ready(fwd(x, fused))
    ref = jax.block_until_ready(inception_ref(x, params))

    assert out.shape == (2, n1 + n3 + n5 + pool_c, 16, 16), out.shape
    assert jnp.allclose(out, ref, rtol=1e-4, atol=2e-4), float(jnp.max(jnp.abs(out - ref)))
    print("KERNEL_OK")
</pallas_src>

<mosaic_0001>
module attributes {stable_mosaic.version = 11 : i64} {
  func.func @kernel(%arg0: i32, %arg1: memref<1x16x16x4xf32, #tpu.memory_space<vmem>>, %arg2: memref<4x8xf32, #tpu.memory_space<vmem>>, %arg3: memref<1x8xf32, #tpu.memory_space<vmem>>, %arg4: memref<400x32xf32, #tpu.memory_space<vmem>>, %arg5: memref<1x32xf32, #tpu.memory_space<vmem>>, %arg6: memref<1x16x16x32xf32, #tpu.memory_space<vmem>>, %arg7: memref<20x32x16xf32, #tpu.memory_space<vmem>>, %arg8: memref<18x32x4xf32, #tpu.memory_space<vmem>>) attributes {dimension_semantics = [#tpu.dimension_semantics<parallel>], iteration_bounds = array<i64: 2>, scalar_prefetch = 0 : i64, scratch_operands = 2 : i64, tpu.core_type = #tpu.core_type<tc>, window_params = [{transform_indices = @transform_0, window_bounds = array<i64: 1, 16, 16, 4>}, {pipeline_mode = #tpu.pipeline_mode<synchronous>, transform_indices = @transform_1, window_bounds = array<i64: 4, 8>}, {pipeline_mode = #tpu.pipeline_mode<synchronous>, transform_indices = @transform_2, window_bounds = array<i64: 1, 8>}, {pipeline_mode = #tpu.pipeline_mode<synchronous>, transform_indices = @transform_3, window_bounds = array<i64: 400, 32>}, {pipeline_mode = #tpu.pipeline_mode<synchronous>, transform_indices = @transform_4, window_bounds = array<i64: 1, 32>}, {transform_indices = @transform_5, window_bounds = array<i64: 1, 16, 16, 32>}]} {
    %c0 = arith.constant 0 : index
    %c0_0 = arith.constant 0 : index
    %c0_1 = arith.constant 0 : index
    %c0_2 = arith.constant 0 : index
    %0 = vector.load %arg1[%c0, %c0_0, %c0_1, %c0_2] : memref<1x16x16x4xf32, #tpu.memory_space<vmem>>, vector<1x16x16x4xf32>
    %1 = vector.shape_cast %0 : vector<1x16x16x4xf32> to vector<16x16x4xf32>
    %2 = vector.shape_cast %1 : vector<16x16x4xf32> to vector<256x4xf32>
    %c0_3 = arith.constant 0 : index
    %c0_4 = arith.constant 0 : index
    %3 = vector.load %arg2[%c0_3, %c0_4] : memref<4x8xf32, #tpu.memory_space<vmem>>, vector<4x8xf32>
    %cst = arith.constant dense<0.000000e+00> : vector<256x8xf32>
    %4 = tpu.matmul %2, %3, %cst {dimension_numbers = #tpu.dot_dimension_numbers<[1], [0], [0], [1], [0, 0, 1, 1], [], []>} : vector<256x4xf32>, vector<4x8xf32>, vector<256x8xf32> -> vector<256x8xf32>
    %c0_5 = arith.constant 0 : index
    %c0_6 = arith.constant 0 : index
    %5 = vector.load %arg3[%c0_5, %c0_6] : memref<1x8xf32, #tpu.memory_space<vmem>>, vector<1x8xf32>
    %6 = vector.broadcast %5 : vector<1x8xf32> to vector<256x8xf32>
    %7 = arith.addf %4, %6 : vector<256x8xf32>
    %cst_7 = arith.constant 0.000000e+00 : f32
    %8 = vector.broadcast %cst_7 : f32 to vector<256x8xf32>
    %9 = arith.maximumf %7, %8 : vector<256x8xf32>
    %cst_8 = arith.constant -3.40282347E+38 : f32
    %10 = vector.broadcast %cst_8 : f32 to vector<18x32x4xf32>
    %c0_9 = arith.constant 0 : index
    %c0_10 = arith.constant 0 : index
    %c0_11 = arith.constant 0 : index
    %11 = vector.load %arg8[%c0_9, %c0_10, %c0_11] : memref<18x32x4xf32, #tpu.memory_space<vmem>>, vector<18x32x4xf32>
    tpu.vector_store %arg8[%c0_9, %c0_10, %c0_11], %10 {strides = array<i32>} : memref<18x32x4xf32, #tpu.memory_space<vmem>>, vector<18x32x4xf32>,
    %c1 = arith.constant 1 : index
    %c8 = arith.constant 8 : index
    %c0_12 = arith.constant 0 : index
    %12 = vector.load %arg8[%c1, %c8, %c0_12] : memref<18x32x4xf32, #tpu.memory_space<vmem>>, vector<16x16x4xf32>
    tpu.vector_store %arg8[%c1, %c8, %c0_12], %1 {strides = array<i32>} : memref<18x32x4xf32, #tpu.memory_space<vmem>>, vector<16x16x4xf32>,
    %c0_13 = arith.constant 0 : index
    %c7 = arith.constant 7 : index
    %c0_14 = arith.constant 0 : index
    %13 = vector.load %arg8[%c0_13, %c7, %c0_14] : memref<18x32x4xf32, #tpu.memory_space<vmem>>, vector<18x16x4xf32>
    %c0_15 = arith.constant 0 : index
    %c8_16 = arith.constant 8 : index
    %c0_17 = arith.constant 0 : index
    %14 = vector.load %arg8[%c0_15, %c8_16, %c0_17] : memref<18x32x4xf32, #tpu.memory_space<vmem>>, vector<18x16x4xf32>
    %15 = arith.maximumf %13, %14 : vector<18x16x4xf32>
    %c0_18 = arith.constant 0 : index
    %c9 = arith.constant 9 : index
    %c0_19 = arith.constant 0 : index
    %16 = vector.load %arg8[%c0_18, %c9, %c0_19] : memref<18x32x4xf32, #tpu.memory_space<vmem>>, vector<18x16x4xf32>
    %17 = arith.maximumf %15, %16 : vector<18x16x4xf32>
    %18 = vector.extract_strided_slice %17 {offsets = [0, 0, 0], sizes = [16, 16, 4], strides = [1, 1, 1]} : vector<18x16x4xf32> to vector<16x16x4xf32>
    %19 = vector.extract_strided_slice %17 {offsets = [1, 0, 0], sizes = [16, 16, 4], strides = [1, 1, 1]} : vector<18x16x4xf32> to vector<16x16x4xf32>
    %20 = arith.maximumf %18, %19 : vector<16x16x4xf32>
    %21 = vector.extract_strided_slice %17 {offsets = [2, 0, 0], sizes = [16, 16, 4], strides = [1, 1, 1]} : vector<18x16x4xf32> to vector<16x16x4xf32>
    %22 = arith.maximumf %20, %21 : vector<16x16x4xf32>
    %23 = vector.shape_cast %22 : vector<16x16x4xf32> to vector<256x4xf32>
    %24 = tpu.concatenate %9, %2, %23 in 1 : vector<256x8xf32>, vector<256x4xf32>, vector<256x4xf32> -> vector<256x16xf32>
    %cst_20 = arith.constant 0.000000e+00 : f32
    %25 = vector.broadcast %cst_20 : f32 to vector<20x32x16xf32>
    %c0_21 = arith.constant 0 : index
    %c0_22 = arith.constant 0 : index
    %c0_23 = arith.constant 0 : index
    %26 = vector.load %arg7[%c0_21, %c0_22, %c0_23] : memref<20x32x16xf32, #tpu.memory_space<vmem>>, vector<20x32x16xf32>
    tpu.vector_store %arg7[%c0_21, %c0_22, %c0_23], %25 {strides = array<i32>} : memref<20x32x16xf32, #tpu.memory_space<vmem>>, vector<20x32x16xf32>,
    %27 = vector.shape_cast %24 : vector<256x16xf32> to vector<16x16x16xf32>
    %c2 = arith.constant 2 : index
    %c8_24 = arith.constant 8 : index
    %c0_25 = arith.constant 0 : index
    %28 = vector.load %arg7[%c2, %c8_24, %c0_25] : memref<20x32x16xf32, #tpu.memory_space<vmem>>, vector<16x16x16xf32>
    tpu.vector_store %arg7[%c2, %c8_24, %c0_25], %27 {strides = array<i32>} : memref<20x32x16xf32, #tpu.memory_space<vmem>>, vector<16x16x16xf32>,
    %cst_26 = arith.constant 0.000000e+00 : f32
    %29 = vector.broadcast %cst_26 : f32 to vector<256x32xf32>
    %c0_27 = arith.constant 0 : index
    %c6 = arith.constant 6 : index
    %c0_28 = arith.constant 0 : index
    %30 = vector.load %arg7[%c0_27, %c6, %c0_28] : memref<20x32x16xf32, #tpu.memory_space<vmem>>, vector<16x16x16xf32>
    %31 = vector.shape_cast %30 : vector<16x16x16xf32> to vector<256x16xf32>
    %c0_29 = arith.constant 0 : index
    %c0_30 = arith.constant 0 : index
    %32 = vector.load %arg4[%c0_29, %c0_30] : memref<400x32xf32, #tpu.memory_space<vmem>>, vector<16x32xf32>
    %cst_31 = arith.constant dense<0.000000e+00> : vector<256x32xf32>
    %33 = tpu.matmul %31, %32, %cst_31 {dimension_numbers = #tpu.dot_dimension_numbers<[1], [0], [0], [1], [0, 0, 1, 1], [], []>} : vector<256x16xf32>, vector<16x32xf32>, vector<256x32xf32> -> vector<256x32xf32>
    %34 = arith.addf %29, %33 : vector<256x32xf32>
    %c0_32 = arith.constant 0 : index
    %c7_33 = arith.constant 7 : index
    %c0_34 = arith.constant 0 : index
    %35 = vector.load %arg7[%c0_32, %c7_33, %c0_34] : memref<20x32x16xf32, #tpu.memory_space<vmem>>, vector<16x16x16xf32>
    %36 = vector.shape_cast %35 : vector<16x16x16xf32> to vector<256x16xf32>
    %c16 = arith.constant 16 : index
    %c0_35 = arith.constant 0 : index
    %37 = vector.load %arg4[%c16, %c0_35] : memref<400x32xf32, #tpu.memory_space<vmem>>, vector<16x32xf32>
    %cst_36 = arith.constant dense<0.000000e+00> : vector<256x32xf32>
    %38 = tpu.matmul %36, %37, %cst_36 {dimension_numbers = #tpu.dot_dimension_numbers<[1], [0], [0], [1], [0, 0, 1, 1], [], []>} : vector<256x16xf32>, vector<16x32xf32>, vector<256x32xf32> -> vector<256x32xf32>
    %39 = arith.addf %34, %38 : vector<256x32xf32>
    %c0_37 = arith.constant 0 : index
    %c8_38 = arith.constant 8 : index
    %c0_39 = arith.constant 0 : index
    %40 = vector.load %arg7[%c0_37, %c8_38, %c0_39] : memref<20x32x16xf32, #tpu.memory_space<vmem>>, vector<16x16x16xf32>
    %41 = vector.shape_cast %40 : vector<16x16x16xf32> to vector<256x16xf32>
    %c32 = arith.constant 32 : index
    %c0_40 = arith.constant 0 : index
    %42 = vector.load %arg4[%c32, %c0_40] : memref<400x32xf32, #tpu.memory_space<vmem>>, vector<16x32xf32>
    %cst_41 = arith.constant dense<0.000000e+00> : vector<256x32xf32>
    %43 = tpu.matmul %41, %42, %cst_41 {dimension_numbers = #tpu.dot_dimension_numbers<[1], [0], [0], [1], [0, 0, 1, 1], [], []>} : vector<256x16xf32>, vector<16x32xf32>, vector<256x32xf32> -> vector<256x32xf32>
    %44 = arith.addf %39, %43 : vector<256x32xf32>
    %c0_42 = arith.constant 0 : index
    %c9_43 = arith.constant 9 : index
    %c0_44 = arith.constant 0 : index
    %45 = vector.load %arg7[%c0_42, %c9_43, %c0_44] : memref<20x32x16xf32, #tpu.memory_space<vmem>>, vector<16x16x16xf32>
    %46 = vector.shape_cast %45 : vector<16x16x16xf32> to vector<256x16xf32>
    %c48 = arith.constant 48 : index
    %c0_45 = arith.constant 0 : index
    %47 = vector.load %arg4[%c48, %c0_45] : memref<400x32xf32, #tpu.memory_space<vmem>>, vector<16x32xf32>
    %cst_46 = arith.constant dense<0.000000e+00> : vector<256x32xf32>
    %48 = tpu.matmul %46, %47, %cst_46 {dimension_numbers = #tpu.dot_dimension_numbers<[1], [0], [0], [1], [0, 0, 1, 1], [], []>} : vector<256x16xf32>, vector<16x32xf32>, vector<256x32xf32> -> vector<256x32xf32>
    %49 = arith.addf %44, %48 : vector<256x32xf32>
    %c0_47 = arith.constant 0 : index
    %c10 = arith.constant 10 : index
    %c0_48 = arith.constant 0 : index
    %50 = vector.load %arg7[%c0_47, %c10, %c0_48] : memref<20x32x16xf32, #tpu.memory_space<vmem>>, vector<16x16x16xf32>
    %51 = vector.shape_cast %50 : vector<16x16x16xf32> to vector<256x16xf32>
    %c64 = arith.constant 64 : index
    %c0_49 = arith.constant 0 : index
    %52 = vector.load %arg4[%c64, %c0_49] : memref<400x32xf32, #tpu.memory_space<vmem>>, vector<16x32xf32>
    %cst_50 = arith.constant dense<0.000000e+00> : vector<256x32xf32>
    %53 = tpu.matmul %51, %52, %cst_50 {dimension_numbers = #tpu.dot_dimension_numbers<[1], [0], [0], [1], [0, 0, 1, 1], [], []>} : vector<256x16xf32>, vector<16x32xf32>, vector<256x32xf32> -> vector<256x32xf32>
    %54 = arith.addf %49, %53 : vector<256x32xf32>
    %c1_51 = arith.constant 1 : index
    %c6_52 = arith.constant 6 : index
    %c0_53 = arith.constant 0 : index
    %55 = vector.load %arg7[%c1_51, %c6_52, %c0_53] : memref<20x32x16xf32, #tpu.memory_space<vmem>>, vector<16x16x16xf32>
    %56 = vector.shape_cast %55 : vector<16x16x16xf32> to vector<256x16xf32>
    %c80 = arith.constant 80 : index
    %c0_54 = arith.constant 0 : index
    %57 = vector.load %arg4[%c80, %c0_54] : memref<400x32xf32, #tpu.memory_space<vmem>>, vector<16x32xf32>
    %cst_55 = arith.constant dense<0.000000e+00> : vector<256x32xf32>
    %58 = tpu.matmul %56, %57, %cst_55 {dimension_numbers = #tpu.dot_dimension_numbers<[1], [0], [0], [1], [0, 0, 1, 1], [], []>} : vector<256x16xf32>, vector<16x32xf32>, vector<256x32xf32> -> vector<256x32xf32>
    %59 = arith.addf %54, %58 : vector<256x32xf32>
    %c1_56 = arith.constant 1 : index
    %c7_57 = arith.constant 7 : index
    %c0_58 = arith.constant 0 : index
    %60 = vector.load %arg7[%c1_56, %c7_57, %c0_58] : memref<20x32x16xf32, #tpu.memory_space<vmem>>, vector<16x16x16xf32>
    %61 = vector.shape_cast %60 : vector<16x16x16xf32> to vector<256x16xf32>
    %c96 = arith.constant 96 : index
    %c0_59 = arith.constant 0 : index
    %62 = vector.load %arg4[%c96, %c0_59] : memref<400x32xf32, #tpu.memory_space<vmem>>, vector<16x32xf32>
    %cst_60 = arith.constant dense<0.000000e+00> : vector<256x32xf32>
    %63 = tpu.matmul %61, %62, %cst_60 {dimension_numbers = #tpu.dot_dimension_numbers<[1], [0], [0], [1], [0, 0, 1, 1], [], []>} : vector<256x16xf32>, vector<16x32xf32>, vector<256x32xf32> -> vector<256x32xf32>
    %64 = arith.addf %59, %63 : vector<256x32xf32>
    %c1_61 = arith.constant 1 : index
    %c8_62 = arith.constant 8 : index
    %c0_63 = arith.constant 0 : index
    %65 = vector.load %arg7[%c1_61, %c8_62, %c0_63] : memref<20x32x16xf32, #tpu.memory_space<vmem>>, vector<16x16x16xf32>
    %66 = vector.shape_cast %65 : vector<16x16x16xf32> to vector<256x16xf32>
    %c112 = arith.constant 112 : index
    %c0_64 = arith.constant 0 : index
    %67 = vector.load %arg4[%c112, %c0_64] : memref<400x32xf32, #tpu.memory_space<vmem>>, vector<16x32xf32>
    %cst_65 = arith.constant dense<0.000000e+00> : vector<256x32xf32>
    %68 = tpu.matmul %66, %67, %cst_65 {dimension_numbers = #tpu.dot_dimension_numbers<[1], [0], [0], [1], [0, 0, 1, 1], [], []>} : vector<256x16xf32>, vector<16x32xf32>, vector<256x32xf32> -> vector<256x32xf32>
    %69 = arith.addf %64, %68 : vector<256x32xf32>
    %c1_66 = arith.constant 1 : index
    %c9_67 = arith.constant 9 : index
    %c0_68 = arith.constant 0 : index
    %70 = vector.load %arg7[%c1_66, %c9_67, %c0_68] : memref<20x32x16xf32, #tpu.memory_space<vmem>>, vector<16x16x16xf32>
    %71 = vector.shape_cast %70 : vector<16x16x16xf32> to vector<256x16xf32>
    %c128 = arith.constant 128 : index
    %c0_69 = arith.constant 0 : index
    %72 = vector.load %arg4[%c128, %c0_69] : memref<400x32xf32, #tpu.memory_space<vmem>>, vector<16x32xf32>
    %cst_70 = arith.constant dense<0.000000e+00> : vector<256x32xf32>
    %73 = tpu.matmul %71, %72, %cst_70 {dimension_numbers = #tpu.dot_dimension_numbers<[1], [0], [0], [1], [0, 0, 1, 1], [], []>} : vector<256x16xf32>, vector<16x32xf32>, vector<256x32xf32> -> vector<256x32xf32>
    %74 = arith.addf %69, %73 : vector<256x32xf32>
    %c1_71 = arith.constant 1 : index
    %c10_72 = arith.constant 10 : index
    %c0_73 = arith.constant 0 : index
    %75 = vector.load %arg7[%c1_71, %c10_72, %c0_73] : memref<20x32x16xf32, #tpu.memory_space<vmem>>, vector<16x16x16xf32>
    %76 = vector.shape_cast %75 : vector<16x16x16xf32> to vector<256x16xf32>
    %c144 = arith.constant 144 : index
    %c0_74 = arith.constant 0 : index
    %77 = vector.load %arg4[%c144, %c0_74] : memref<400x32xf32, #tpu.memory_space<vmem>>, vector<16x32xf32>
    %cst_75 = arith.constant dense<0.000000e+00> : vector<256x32xf32>
    %78 = tpu.matmul %76, %77, %cst_75 {dimension_numbers = #tpu.dot_dimension_numbers<[1], [0], [0], [1], [0, 0, 1, 1], [], []>} : vector<256x16xf32>, vector<16x32xf32>, vector<256x32xf32> -> vector<256x32xf32>
    %79 = arith.addf %74, %78 : vector<256x32xf32>
    %c2_76 = arith.constant 2 : index
    %c6_77 = arith.constant 6 : index
    %c0_78 = arith.constant 0 : index
    %80 = vector.load %arg7[%c2_76, %c6_77, %c0_78] : memref<20x32x16xf32, #tpu.memory_space<vmem>>, vector<16x16x16xf32>
    %81 = vector.shape_cast %80 : vector<16x16x16xf32> to vector<256x16xf32>
    %c160 = arith.constant 160 : index
    %c0_79 = arith.constant 0 : index
    %82 = vector.load %arg4[%c160, %c0_79] : memref<400x32xf32, #tpu.memory_space<vmem>>, vector<16x32xf32>
    %cst_80 = arith.constant dense<0.000000e+00> : vector<256x32xf32>
    %83 = tpu.matmul %81, %82, %cst_80 {dimension_numbers = #tpu.dot_dimension_numbers<[1], [0], [0], [1], [0, 0, 1, 1], [], []>} : vector<256x16xf32>, vector<16x32xf32>, vector<256x32xf32> -> vector<256x32xf32>
    %84 = arith.addf %79, %83 : vector<256x32xf32>
    %c2_81 = arith.constant 2 : index
    %c7_82 = arith.constant 7 : index
    %c0_83 = arith.constant 0 : index
    %85 = vector.load %arg7[%c2_81, %c7_82, %c0_83] : memref<20x32x16xf32, #tpu.memory_space<vmem>>, vector<16x16x16xf32>
    %86 = vector.shape_cast %85 : vector<16x16x16xf32> to vector<256x16xf32>
    %c176 = arith.constant 176 : index
    %c0_84 = arith.constant 0 : index
    %87 = vector.load %arg4[%c176, %c0_84] : memref<400x32xf32, #tpu.memory_space<vmem>>, vector<16x32xf32>
    %cst_85 = arith.constant dense<0.000000e+00> : vector<256x32xf32>
    %88 = tpu.matmul %86, %87, %cst_85 {dimension_numbers = #tpu.dot_dimension_numbers<[1], [0], [0], [1], [0, 0, 1, 1], [], []>} : vector<256x16xf32>, vector<16x32xf32>, vector<256x32xf32> -> vector<256x32xf32>
    %89 = arith.addf %84, %88 : vector<256x32xf32>
    %c2_86 = arith.constant 2 : index
    %c8_87 = arith.constant 8 : index
    %c0_88 = arith.constant 0 : index
    %90 = vector.load %arg7[%c2_86, %c8_87, %c0_88] : memref<20x32x16xf32, #tpu.memory_space<vmem>>, vector<16x16x16xf32>
    %91 = vector.shape_cast %90 : vector<16x16x16xf32> to vector<256x16xf32>
    %c192 = arith.constant 192 : index
    %c0_89 = arith.constant 0 : index
    %92 = vector.load %arg4[%c192, %c0_89] : memref<400x32xf32, #tpu.memory_space<vmem>>, vector<16x32xf32>
    %cst_90 = arith.constant dense<0.000000e+00> : vector<256x32xf32>
    %93 = tpu.matmul %91, %92, %cst_90 {dimension_numbers = #tpu.dot_dimension_numbers<[1], [0], [0], [1], [0, 0, 1, 1], [], []>} : vector<256x16xf32>, vector<16x32xf32>, vector<256x32xf32> -> vector<256x32xf32>
    %94 = arith.addf %89, %93 : vector<256x32xf32>
    %c2_91 = arith.constant 2 : index
    %c9_92 = arith.constant 9 : index
    %c0_93 = arith.constant 0 : index
    %95 = vector.load %arg7[%c2_91, %c9_92, %c0_93] : memref<20x32x16xf32, #tpu.memory_space<vmem>>, vector<16x16x16xf32>
    %96 = vector.shape_cast %95 : vector<16x16x16xf32> to vector<256x16xf32>
    %c208 = arith.constant 208 : index
    %c0_94 = arith.constant 0 : index
    %97 = vector.load %arg4[%c208, %c0_94] : memref<400x32xf32, #tpu.memory_space<vmem>>, vector<16x32xf32>
    %cst_95 = arith.constant dense<0.000000e+00> : vector<256x32xf32>
    %98 = tpu.matmul %96, %97, %cst_95 {dimension_numbers = #tpu.dot_dimension_numbers<[1], [0], [0], [1], [0, 0, 1, 1], [], []>} : vector<256x16xf32>, vector<16x32xf32>, vector<256x32xf32> -> vector<256x32xf32>
    %99 = arith.addf %94, %98 : vector<256x32xf32>
    %c2_96 = arith.constant 2 : index
    %c10_97 = arith.constant 10 : index
    %c0_98 = arith.constant 0 : index
    %100 = vector.load %arg7[%c2_96, %c10_97, %c0_98] : memref<20x32x16xf32, #tpu.memory_space<vmem>>, vector<16x16x16xf32>
    %101 = vector.shape_cast %100 : vector<16x16x16xf32> to vector<256x16xf32>
    %c224 = arith.constant 224 : index
    %c0_99 = arith.constant 0 : index
    %102 = vector.load %arg4[%c224, %c0_99] : memref<400x32xf32, #tpu.memory_space<vmem>>, vector<16x32xf32>
    %cst_100 = arith.constant dense<0.000000e+00> : vector<256x32xf32>
    %103 = tpu.matmul %101, %102, %cst_100 {dimension_numbers = #tpu.dot_dimension_numbers<[1], [0], [0], [1], [0, 0, 1, 1], [], []>} : vector<256x16xf32>, vector<16x32xf32>, vector<256x32xf32> -> vector<256x32xf32>
    %104 = arith.addf %99, %103 : vector<256x32xf32>
    %c3 = arith.constant 3 : index
    %c6_101 = arith.constant 6 : index
    %c0_102 = arith.constant 0 : index
    %105 = vector.load %arg7[%c3, %c6_101, %c0_102] : memref<20x32x16xf32, #tpu.memory_space<vmem>>, vector<16x16x16xf32>
    %106 = vector.shape_cast %105 : vector<16x16x16xf32> to vector<256x16xf32>
    %c240 = arith.constant 240 : index
    %c0_103 = arith.constant 0 : index
    %107 = vector.load %arg4[%c240, %c0_103] : memref<400x32xf32, #tpu.memory_space<vmem>>, vector<16x32xf32>
    %cst_104 = arith.constant dense<0.000000e+00> : vector<256x32xf32>
    %108 = tpu.matmul %106, %107, %cst_104 {dimension_numbers = #tpu.dot_dimension_numbers<[1], [0], [0], [1], [0, 0, 1, 1], [], []>} : vector<256x16xf32>, vector<16x32xf32>, vector<256x32xf32> -> vector<256x32xf32>
    %109 = arith.addf %104, %108 : vector<256x32xf32>
    %c3_105 = arith.constant 3 : index
    %c7_106 = arith.constant 7 : index
    %c0_107 = arith.constant 0 : index
    %110 = vector.load %arg7[%c3_105, %c7_106, %c0_107] : memref<20x32x16xf32, #tpu.memory_space<vmem>>, vector<16x16x16xf32>
    %111 = vector.shape_cast %110 : vector<16x16x16xf32> to vector<256x16xf32>
    %c256 = arith.constant 256 : index
    %c0_108 = arith.constant 0 : index
    %112 = vector.load %arg4[%c256, %c0_108] : memref<400x32xf32, #tpu.memory_space<vmem>>, vector<16x32xf32>
    %cst_109 = arith.constant dense<0.000000e+00> : vector<256x32xf32>
    %113 = tpu.matmul %111, %112, %cst_109 {dimension_numbers = #tpu.dot_dimension_numbers<[1], [0], [0], [1], [0, 0, 1, 1], [], []>} : vector<256x16xf32>, vector<16x32xf32>, vector<256x32xf32> -> vector<256x32xf32>
    %114 = arith.addf %109, %113 : vector<256x32xf32>
    %c3_110 = arith.constant 3 : index
    %c8_111 = arith.constant 8 : index
    %c0_112 = arith.constant 0 : index
    %115 = vector.load %arg7[%c3_110, %c8_111, %c0_112] : memref<20x32x16xf32, #tpu.memory_space<vmem>>, vector<16x16x16xf32>
    %116 = vector.shape_cast %115 : vector<16x16x16xf32> to vector<256x16xf32>
    %c272 = arith.constant 272 : index
    %c0_113 = arith.constant 0 : index
    %117 = vector.load %arg4[%c272, %c0_113] : memref<400x32xf32, #tpu.memory_space<vmem>>, vector<16x32xf32>
    %cst_114 = arith.constant dense<0.000000e+00> : vector<256x32xf32>
    %118 = tpu.matmul %116, %117, %cst_114 {dimension_numbers = #tpu.dot_dimension_numbers<[1], [0], [0], [1], [0, 0, 1, 1], [], []>} : vector<256x16xf32>, vector<16x32xf32>, vector<256x32xf32> -> vector<256x32xf32>
    %119 = arith.addf %114, %118 : vector<256x32xf32>
    %c3_115 = arith.constant 3 : index
    %c9_116 = arith.constant 9 : index
    %c0_117 = arith.constant 0 : index
    %120 = vector.load %arg7[%c3_115, %c9_116, %c0_117] : memref<20x32x16xf32, #tpu.memory_space<vmem>>, vector<16x16x16xf32>
    %121 = vector.shape_cast %120 : vector<16x16x16xf32> to vector<256x16xf32>
    %c288 = arith.constant 288 : index
    %c0_118 = arith.constant 0 : index
    %122 = vector.load %arg4[%c288, %c0_118] : memref<400x32xf32, #tpu.memory_space<vmem>>, vector<16x32xf32>
    %cst_119 = arith.constant dense<0.000000e+00> : vector<256x32xf32>
    %123 = tpu.matmul %121, %122, %cst_119 {dimension_numbers = #tpu.dot_dimension_numbers<[1], [0], [0], [1], [0, 0, 1, 1], [], []>} : vector<256x16xf32>, vector<16x32xf32>, vector<256x32xf32> -> vector<256x32xf32>
    %124 = arith.addf %119, %123 : vector<256x32xf32>
    %c3_120 = arith.constant 3 : index
    %c10_121 = arith.constant 10 : index
    %c0_122 = arith.constant 0 : index
    %125 = vector.load %arg7[%c3_120, %c10_121, %c0_122] : memref<20x32x16xf32, #tpu.memory_space<vmem>>, vector<16x16x16xf32>
    %126 = vector.shape_cast %125 : vector<16x16x16xf32> to vector<256x16xf32>
    %c304 = arith.constant 304 : index
    %c0_123 = arith.constant 0 : index
    %127 = vector.load %arg4[%c304, %c0_123] : memref<400x32xf32, #tpu.memory_space<vmem>>, vector<16x32xf32>
    %cst_124 = arith.constant dense<0.000000e+00> : vector<256x32xf32>
    %128 = tpu.matmul %126, %127, %cst_124 {dimension_numbers = #tpu.dot_dimension_numbers<[1], [0], [0], [1], [0, 0, 1, 1], [], []>} : vector<256x16xf32>, vector<16x32xf32>, vector<256x32xf32> -> vector<256x32xf32>
    %129 = arith.addf %124, %128 : vector<256x32xf32>
    %c4 = arith.constant 4 : index
    %c6_125 = arith.constant 6 : index
    %c0_126 = arith.constant 0 : index
    %130 = vector.load %arg7[%c4, %c6_125, %c0_126] : memref<20x32x16xf32, #tpu.memory_space<vmem>>, vector<16x16x16xf32>
    %131 = vector.shape_cast %130 : vector<16x16x16xf32> to vector<256x16xf32>
    %c320 = arith.constant 320 : index
    %c0_127 = arith.constant 0 : index
    %132 = vector.load %arg4[%c320, %c0_127] : memref<400x32xf32, #tpu.memory_space<vmem>>, vector<16x32xf32>
    %cst_128 = arith.constant dense<0.000000e+00> : vector<256x32xf32>
    %133 = tpu.matmul %131, %132, %cst_128 {dimension_numbers = #tpu.dot_dimension_numbers<[1], [0], [0], [1], [0, 0, 1, 1], [], []>} : vector<256x16xf32>, vector<16x32xf32>, vector<256x32xf32> -> vector<256x32xf32>
    %134 = arith.addf %129, %133 : vector<256x32xf32>
    %c4_129 = arith.constant 4 : index
    %c7_130 = arith.constant 7 : index
    %c0_131 = arith.constant 0 : index
    %135 = vector.load %arg7[%c4_129, %c7_130, %c0_131] : memref<20x32x16xf32, #tpu.memory_space<vmem>>, vector<16x16x16xf32>
    %136 = vector.shape_cast %135 : vector<16x16x16xf32> to vector<256x16xf32>
    %c336 = arith.constant 336 : index
    %c0_132 = arith.constant 0 : index
    %137 = vector.load %arg4[%c336, %c0_132] : memref<400x32xf32, #tpu.memory_space<vmem>>, vector<16x32xf32>
    %cst_133 = arith.constant dense<0.000000e+00> : vector<256x32xf32>
    %138 = tpu.matmul %136, %137, %cst_133 {dimension_numbers = #tpu.dot_dimension_numbers<[1], [0], [0], [1], [0, 0, 1, 1], [], []>} : vector<256x16xf32>, vector<16x32xf32>, vector<256x32xf32> -> vector<256x32xf32>
    %139 = arith.addf %134, %138 : vector<256x32xf32>
    %c4_134 = arith.constant 4 : index
    %c8_135 = arith.constant 8 : index
    %c0_136 = arith.constant 0 : index
    %140 = vector.load %arg7[%c4_134, %c8_135, %c0_136] : memref<20x32x16xf32, #tpu.memory_space<vmem>>, vector<16x16x16xf32>
    %141 = vector.shape_cast %140 : vector<16x16x16xf32> to vector<256x16xf32>
    %c352 = arith.constant 352 : index
    %c0_137 = arith.constant 0 : index
    %142 = vector.load %arg4[%c352, %c0_137] : memref<400x32xf32, #tpu.memory_space<vmem>>, vector<16x32xf32>
    %cst_138 = arith.constant dense<0.000000e+00> : vector<256x32xf32>
    %143 = tpu.matmul %141, %142, %cst_138 {dimension_numbers = #tpu.dot_dimension_numbers<[1], [0], [0], [1], [0, 0, 1, 1], [], []>} : vector<256x16xf32>, vector<16x32xf32>, vector<256x32xf32> -> vector<256x32xf32>
    %144 = arith.addf %139, %143 : vector<256x32xf32>
    %c4_139 = arith.constant 4 : index
    %c9_140 = arith.constant 9 : index
    %c0_141 = arith.constant 0 : index
    %145 = vector.load %arg7[%c4_139, %c9_140, %c0_141] : memref<20x32x16xf32, #tpu.memory_space<vmem>>, vector<16x16x16xf32>
    %146 = vector.shape_cast %145 : vector<16x16x16xf32> to vector<256x16xf32>
    %c368 = arith.constant 368 : index
    %c0_142 = arith.constant 0 : index
    %147 = vector.load %arg4[%c368, %c0_142] : memref<400x32xf32, #tpu.memory_space<vmem>>, vector<16x32xf32>
    %cst_143 = arith.constant dense<0.000000e+00> : vector<256x32xf32>
    %148 = tpu.matmul %146, %147, %cst_143 {dimension_numbers = #tpu.dot_dimension_numbers<[1], [0], [0], [1], [0, 0, 1, 1], [], []>} : vector<256x16xf32>, vector<16x32xf32>, vector<256x32xf32> -> vector<256x32xf32>
    %149 = arith.addf %144, %148 : vector<256x32xf32>
    %c4_144 = arith.constant 4 : index
    %c10_145 = arith.constant 10 : index
    %c0_146 = arith.constant 0 : index
    %150 = vector.load %arg7[%c4_144, %c10_145, %c0_146] : memref<20x32x16xf32, #tpu.memory_space<vmem>>, vector<16x16x16xf32>
    %151 = vector.shape_cast %150 : vector<16x16x16xf32> to vector<256x16xf32>
    %c384 = arith.constant 384 : index
    %c0_147 = arith.constant 0 : index
    %152 = vector.load %arg4[%c384, %c0_147] : memref<400x32xf32, #tpu.memory_space<vmem>>, vector<16x32xf32>
    %cst_148 = arith.constant dense<0.000000e+00> : vector<256x32xf32>
    %153 = tpu.matmul %151, %152, %cst_148 {dimension_numbers = #tpu.dot_dimension_numbers<[1], [0], [0], [1], [0, 0, 1, 1], [], []>} : vector<256x16xf32>, vector<16x32xf32>, vector<256x32xf32> -> vector<256x32xf32>
    %154 = arith.addf %149, %153 : vector<256x32xf32>
    %c0_149 = arith.constant 0 : index
    %c0_150 = arith.constant 0 : index
    %155 = vector.load %arg5[%c0_149, %c0_150] : memref<1x32xf32, #tpu.memory_space<vmem>>, vector<1x32xf32>
    %156 = vector.broadcast %155 : vector<1x32xf32> to vector<256x32xf32>
    %157 = arith.addf %154, %156 : vector<256x32xf32>
    %cst_151 = arith.constant 0.000000e+00 : f32
    %158 = vector.broadcast %cst_151 : f32 to vector<256x32xf32>
    %159 = arith.maximumf %157, %158 : vector<256x32xf32>
    %160 = vector.shape_cast %159 : vector<256x32xf32> to vector<16x16x32xf32>
    %c0_152 = arith.constant 0 : index
    %c0_153 = arith.constant 0 : index
    %c0_154 = arith.constant 0 : index
    %c0_155 = arith.constant 0 : index
    %161 = vector.load %arg6[%c0_152, %c0_153, %c0_154, %c0_155] : memref<1x16x16x32xf32, #tpu.memory_space<vmem>>, vector<1x16x16x32xf32>
    %162 = vector.shape_cast %161 : vector<1x16x16x32xf32> to vector<16x16x32xf32>
    %163 = vector.shape_cast %160 : vector<16x16x32xf32> to vector<1x16x16x32xf32>
    tpu.vector_store %arg6[%c0_152, %c0_153, %c0_154, %c0_155], %163 {strides = array<i32>} : memref<1x16x16x32xf32, #tpu.memory_space<vmem>>, vector<1x16x16x32xf32>,
    return
  }
  func.func @transform_0(%arg0: i32) -> (i32, i32, i32, i32) {
    %c0_i32 = arith.constant 0 : i32
    %c0_i32_0 = arith.constant 0 : i32
    %c0_i32_1 = arith.constant 0 : i32
    %c0_i32_2 = arith.constant 0 : i32
    return %arg0, %c0_i32, %c0_i32_0, %c0_i32_1 : i32, i32, i32, i32
  }
  func.func @transform_1(%arg0: i32) -> (i32, i32) {
    %c0_i32 = arith.constant 0 : i32
    %c0_i32_0 = arith.constant 0 : i32
    %c0_i32_1 = arith.constant 0 : i32
    return %c0_i32, %c0_i32_0 : i32, i32
  }
  func.func @transform_2(%arg0: i32) -> (i32, i32) {
    %c0_i32 = arith.constant 0 : i32
    %c0_i32_0 = arith.constant 0 : i32
    %c0_i32_1 = arith.constant 0 : i32
    return %c0_i32, %c0_i32_0 : i32, i32
  }
  func.func @transform_3(%arg0: i32) -> (i32, i32) {
    %c0_i32 = arith.constant 0 : i32
    %c0_i32_0 = arith.constant 0 : i32
    %c0_i32_1 = arith.constant 0 : i32
    return %c0_i32, %c0_i32_0 : i32, i32
  }
  func.func @transform_4(%arg0: i32) -> (i32, i32) {
    %c0_i32 = arith.constant 0 : i32
    %c0_i32_0 = arith.constant 0 : i32
    %c0_i32_1 = arith.constant 0 : i32
    return %c0_i32, %c0_i32_0 : i32, i32
  }
  func.func @transform_5(%arg0: i32) -> (i32, i32, i32, i32) {
    %c0_i32 = arith.constant 0 : i32
    %c0_i32_0 = arith.constant 0 : i32
    %c0_i32_1 = arith.constant 0 : i32
    %c0_i32_2 = arith.constant 0 : i32
    return %arg0, %c0_i32, %c0_i32_0, %c0_i32_1 : i32, i32, i32, i32
  }
}

</mosaic_0001>

<bundles_post_ra>
// kernel: inception_forward.1
= control target key start
LH: loop header
LB: loop body
LE: loop exit
PB: predicated region body
PF: predicated region fallthrough
CT: control target
= control target key end

     0   :  { %10 = vsyncpa [#allocation5], 0  ;;  %s14330_s0 = inlined_call_operand.vmem [shape: f32[2,16,16,4], index: 0, kind: input, shape index: {}]   ;;  %s14331_s1 = inlined_call_operand.vmem [shape: f32[4,8], index: 1, kind: input, shape index: {}]   ;;  %s14332_s2 = inlined_call_operand.vmem [shape: f32[1,8], index: 2, kind: input, shape index: {}]   ;;  %s14333_s3 = inlined_call_operand.vmem [shape: f32[400,32], index: 3, kind: input, shape index: {}]   ;;  %s14334_s4 = inlined_call_operand.vmem [shape: f32[1,32], index: 4, kind: input, shape index: {}]   ;;  %s14335_s5 = inlined_call_operand.hbm [shape: f32[2,16,16,32], index: 5, kind: output, shape index: {}]  }
   0x1   :  { %12 = vsyncpa [#allocation5 + $0x1], 0  ;;  %s9250_s18 = smov 0   ;;  %s9252_s19 = smov 0  }
   0x2   :  { %s9254_s20 = smov 0   ;;  %s9256_s21 = smov 0  }
   0x3 LB: > { %s9271_s22 = sadd.s32 4294967295, %s9213_s21   ;;  %s8252_s23 = sadd.s32 4294967294, %s9213_s21   ;;  %s9213_s21 = sphi %s9256_s21, %s15367_s21   ;;  %s9209_s20 = sphi %s9254_s20, %s15366_s20   ;;  %s9205_s19 = sphi %s9252_s19, %s15365_s19   ;;  %s9201_s18 = sphi %s9250_s18, %s15364_s18  }
   0x4   : > { %s9275_s24 = sadd.s32 1, %s9213_s21   ;;  %s135_s25 = sadd.s32 1, %s9209_s20 }
   0x5   : > { %s132_s26 = ssub.s32 %s9213_s21, %s9275_s24  ;;  %p145_p0 = scmp.ne.s32.totalorder %s9209_s20, %s9205_s19 }
   0x6   : > { %p133_p1 = scmp.eq.s32.totalorder %s132_s26, 0  ;;  %p146_p2 = scmp.eq.s32.totalorder %s9271_s22, 1 }
   0x7   : > { %p151_p3 = scmp.ne.s32.totalorder %s9205_s19, %s9201_s18  ;;  %p152_p4 = scmp.eq.s32.totalorder %s8252_s23, 1 }
   0x8   : > { %s9286_s27 = scalar_select %p133_p1, %s9209_s20, %s135_s25  }
   0x9   : > { %p9288_p5 = por %p146_p2, %p145_p0  ;;  %p9292_p6 = por %p152_p4, %p151_p3 }
   0xa   : > { %p8255_p7 = scmp.ge.s32.totalorder %s9213_s21, 1  ;;  %p190_p8 = scmp.lt.s32.totalorder %s9213_s21, 3 }
   0xc   : > { %p191_p9 = pnand %p8255_p7, %p190_p8 }
   0xe   : > { %194 = sbr.rel (%p191_p9) target bundleno = 2132 (0x854), region = 40 }
  0x13   : > { %v255_v0 = vld [vmem:[%s14331_s1] sm:$0xf]  ;;  %vm357_vm0 = vcmask 1043456   ;;  %p218_p10 = scmp.lt.s32.totalorder %s9271_s22, 1  ;;  %vm260_vm1 = vcmask 31744   ;;  %s9216_s12 = smov 8  }
  0x14   : > { %8259 = vmatpush.msk.msra.mxu0 %vm357_vm0, %v255_v0  ;;  %9099 = vmatpush.msk.msra.mxu3 %vm357_vm0, %v255_v0  ;;  %v9215_v1 = vmov -3.4028235e+38   ;;  %s9217_s13 = smov 12   ;;  %vm1145_vm2 = vcmask 130048   ;;  %vm1079_vm3 = vcmask 64512   ;;  %vm1112_vm4 = vcmask 97280  }
  0x15   : > { %s219_s7 = scalar_select %p218_p10, %s9271_s22, 1  ;;  %539 = vst.msk [vmem:[#allocation3 + $0x108] sm:$0xff] %vm260_vm1, %v9215_v1  ;;  %vm8141_vm5 = vcmask 261120  }
  0x16   : > { %506 = vst.msk [vmem:[#allocation3] sm:$0xff] %vm260_vm1, %v9215_v1  ;;  %s215_s15 = sand.u32 1, %s9205_s19   ;;  %s9098_s25 = sshll.u32 %s9271_s22, 8 }
  0x17   : > { %s9097_s8 = sshll.u32 %s219_s7, 8  ;;  %507 = vst.msk [vmem:[#allocation3 + $0x8] sm:$0xff] %vm260_vm1, %v9215_v1  ;;  %s8256_s17 = sshll.u32 %s215_s15, 8 }
  0x18   : > { %s9312_s11 = scalar_lea.vmem %s14330_s0, %s9097_s8  ;;  %508 = vst.msk [vmem:[#allocation3 + $0x10] sm:$0xff] %vm260_vm1, %v9215_v1  ;;  %s13960_s23 = scalar_lea.vmem [#allocation4], %s8256_s17 }
  0x19   : > { %v9317_v2 = vld [vmem:[%s9312_s11 + $0x70] sm:$0xff]  ;;  %509 = vst.msk [vmem:[#allocation3 + $0x18] sm:$0xff] %vm260_vm1, %v9215_v1  ;;  %v9322_v3 = vld [vmem:[%s9312_s11 + $0x60] sm:$0xff]  ;;  %v9404_v5 = vld [vmem:[%s9312_s11 + $0x68] sm:$0xff]  ;;  %s8186_s6 = scalar_lea.hbm %s14335_s5, %s9098_s25  ;;  %s8187_s7 = sshll.u32 %s13960_s23, 4  ;;  %s8188_s7 = int_to_ptr.vmem [resolvable:$true] %s8187_s7 }
  0x1a   : > { %883 = vrot.lane.b32.xlu2 %v9317_v2, %s9216_s12  ;;  %593 = vst.msk [vmem:[#allocation3 + $0x108] sm:$0xff] %vm260_vm1, %v9317_v2  ;;  %879 = vrot.lane.b32.xlu0 %v9322_v3, %s9216_s12  ;;  %v9401_v4 = vld [vmem:[%s9312_s11] sm:$0xff]  ;;  %v9424_v7 = vld [vmem:[%s9312_s11 + $0x78] sm:$0xff]  ;;  %s8189_s8 = sshll.u32 %s8186_s6, 4  ;;  %s8175_s22 = scalar_lea.sflag [#allocation5], %s215_s15  ;;  %s8190_s8 = int_to_ptr.hbm [resolvable:$true] %s8189_s8 }
  0x1b   : > { %510 = vst.msk [vmem:[#allocation3 + $0x20] sm:$0xff] %vm260_vm1, %v9215_v1  ;;  %8260 = vmatmul.msk.f32.vlgmr.msra.gmra.mxu0 %vm260_vm1, %v9401_v4  ;;  %881 = vrot.lane.b32.xlu1 %v9404_v5, %s9216_s12  ;;  %v9415_v6 = vld [vmem:[%s9312_s11 + $0x80] sm:$0xff]  ;;  %v9433_v8 = vld [vmem:[%s9312_s11 + $0x8] sm:$0xff]  ;;  %v9467_v10 = vld [vmem:[%s9312_s11 + $0x90] sm:$0xff]  ;;  %s9165_s9 = sshra.s32 %s8190_s8, 4  ;;  %s9166_s9 = int_to_ptr.hbm [resolvable:$true] %s9165_s9 }
  0x1c   : > { %511 = vst.msk [vmem:[#allocation3 + $0x28] sm:$0xff] %vm260_vm1, %v9215_v1  ;;  %v9436_v9 = vld [vmem:[%s9312_s11 + $0x88] sm:$0xff]  ;;  %v9484_v11 = vld [vmem:[%s9312_s11 + $0x10] sm:$0xff]  ;;  %v9493_v12 = vld [vmem:[%s9312_s11 + $0x98] sm:$0xff]  ;;  %s9167_s10 = scalar_lea.hbm %s9166_s9, 256  ;;  %p9172_p0 = scmp.lt.s32.totalorder %s9166_s9, %s14335_s5 }
  0x1d   : > { %512 = vst.msk [vmem:[#allocation3 + $0x30] sm:$0xff] %vm260_vm1, %v9215_v1  ;;  %8277 = vmatmul.msk.f32.vlgmr.msra.gmra.mxu3 %vm260_vm1, %v9436_v9  ;;  %v9510_v13 = vld [vmem:[%s9312_s11 + $0x18] sm:$0xff]  ;;  %v9519_v14 = vld [vmem:[%s9312_s11 + $0xa0] sm:$0xff]  ;;  %v9530_v15 = vld [vmem:[%s9312_s11 + $0x50] sm:$0xff]  ;;  %p9168_p11 = scmp.ne.s32.totalorder %s9166_s9, %s9167_s10 }
  0x1e   : > { %513 = vst.msk [vmem:[#allocation3 + $0x38] sm:$0xff] %vm260_vm1, %v9215_v1  ;;  %v9535_v18 = vld [vmem:[%s9312_s11 + $0x58] sm:$0xff]  ;;  %v9542_v21 = vld [vmem:[%s9312_s11 + $0x20] sm:$0xff]  ;;  %v9551_v26 = vld [vmem:[%s9312_s11 + $0xa8] sm:$0xff] }
  0x1f   : > { %514 = vst.msk [vmem:[#allocation3 + $0x40] sm:$0xff] %vm260_vm1, %v9215_v1  ;;  %p9169_p12 = pnand %p9168_p11, %p9288_p5 }
  0x20   : > { %515 = vst.msk [vmem:[#allocation3 + $0x48] sm:$0xff] %vm260_vm1, %v9215_v1 }
  0x21   : > { %516 = vst.msk [vmem:[#allocation3 + $0x50] sm:$0xff] %vm260_vm1, %v9215_v1  ;;  %v663_v17 = vld [vmem:[#allocation3 + $0x108] sm:$0xff]  ;;  %p9170_p13 = pneg %p9169_p12 }
  0x22   : > { %517 = vst.msk [vmem:[#allocation3 + $0x58] sm:$0xff] %vm260_vm1, %v9215_v1  ;;  %887 = vrot.lane.b32.xlu2 %v9415_v6, %s9216_s12  ;;  %885 = vrot.lane.b32.xlu0 %v9424_v7, %s9216_s12 }
  0x23   : > { %518 = vst.msk [vmem:[#allocation3 + $0x60] sm:$0xff] %vm260_vm1, %v9215_v1  ;;  %8261 = vmatmul.msk.f32.gmra.mxu0 %vm260_vm1, %v9433_v8 }
  0x24   : > { %519 = vst.msk [vmem:[#allocation3 + $0x68] sm:$0xff] %vm260_vm1, %v9215_v1 }
  0x25   : > { %520 = vst.msk [vmem:[#allocation3 + $0x70] sm:$0xff] %vm260_vm1, %v9215_v1  ;;  %8278 = vmatmul.msk.f32.gmra.mxu3 %vm260_vm1, %v9467_v10 }
  0x26   : > { %521 = vst.msk [vmem:[#allocation3 + $0x78] sm:$0xff] %vm260_vm1, %v9215_v1 }
  0x27   : > { %522 = vst.msk [vmem:[#allocation3 + $0x80] sm:$0xff] %vm260_vm1, %v9215_v1 }
  0x28   : > { %523 = vst.msk [vmem:[#allocation3 + $0x88] sm:$0xff] %vm260_vm1, %v9215_v1 }
  0x29   : > { %524 = vst.msk [vmem:[#allocation3 + $0x90] sm:$0xff] %vm260_vm1, %v9215_v1 }
  0x2a   : > { %525 = vst.msk [vmem:[#allocation3 + $0x98] sm:$0xff] %vm260_vm1, %v9215_v1 }
  0x2b   : > { %526 = vst.msk [vmem:[#allocation3 + $0xa0] sm:$0xff] %vm260_vm1, %v9215_v1  ;;  %8262 = vmatmul.msk.f32.gmra.mxu0 %vm260_vm1, %v9484_v11 }
  0x2c   : > { %527 = vst.msk [vmem:[#allocation3 + $0xa8] sm:$0xff] %vm260_vm1, %v9215_v1 }
  0x2d   : > { %528 = vst.msk [vmem:[#allocation3 + $0xb0] sm:$0xff] %vm260_vm1, %v9215_v1  ;;  %8279 = vmatmul.msk.f32.gmra.mxu3 %vm260_vm1, %v9493_v12 }
  0x2e   : > { %529 = vst.msk [vmem:[#allocation3 + $0xb8] sm:$0xff] %vm260_vm1, %v9215_v1 }
  0x2f   : > { %530 = vst.msk [vmem:[#allocation3 + $0xc0] sm:$0xff] %vm260_vm1, %v9215_v1 }
  0x30   : > { %531 = vst.msk [vmem:[#allocation3 + $0xc8] sm:$0xff] %vm260_vm1, %v9215_v1 }
  0x31   : > { %532 = vst.msk [vmem:[#allocation3 + $0xd0] sm:$0xff] %vm260_vm1, %v9215_v1 }
  0x32   : > { %533 = vst.msk [vmem:[#allocation3 + $0xd8] sm:$0xff] %vm260_vm1, %v9215_v1 }
  0x33   : > { %534 = vst.msk [vmem:[#allocation3 + $0xe0] sm:$0xff] %vm260_vm1, %v9215_v1  ;;  %8263 = vmatmul.msk.f32.gmra.mxu0 %vm260_vm1, %v9510_v13 }
  0x34   : > { %535 = vst.msk [vmem:[#allocation3 + $0xe8] sm:$0xff] %vm260_vm1, %v9215_v1 }
  0x35   : > { %536 = vst.msk [vmem:[#allocation3 + $0xf0] sm:$0xff] %vm260_vm1, %v9215_v1  ;;  %8280 = vmatmul.msk.f32.gmra.mxu3 %vm260_vm1, %v9519_v14 }
  0x36   : > { %537 = vst.msk [vmem:[#allocation3 + $0xf8] sm:$0xff] %vm260_vm1, %v9215_v1 }
  0x37   : > { %538 = vst.msk [vmem:[#allocation3 + $0x100] sm:$0xff] %vm260_vm1, %v9215_v1 }
  0x38   : > { %540 = vst.msk [vmem:[#allocation3 + $0x110] sm:$0xff] %vm260_vm1, %v9215_v1 }
  0x39   : > { %541 = vst.msk [vmem:[#allocation3 + $0x118] sm:$0xff] %vm260_vm1, %v9215_v1 }
  0x3a   : > { %542 = vst.msk [vmem:[#allocation3 + $0x120] sm:$0xff] %vm260_vm1, %v9215_v1 }
  0x3b   : > { %543 = vst.msk [vmem:[#allocation3 + $0x128] sm:$0xff] %vm260_vm1, %v9215_v1  ;;  %8264 = vmatmul.msk.f32.gmra.mxu0 %vm260_vm1, %v9542_v21 }
  0x3c   : > { %544 = vst.msk [vmem:[#allocation3 + $0x130] sm:$0xff] %vm260_vm1, %v9215_v1 }
  0x3d   : > { %545 = vst.msk [vmem:[#allocation3 + $0x138] sm:$0xff] %vm260_vm1, %v9215_v1  ;;  %8281 = vmatmul.msk.f32.gmra.mxu3 %vm260_vm1, %v9551_v26 }
  0x3e   : > { %546 = vst.msk [vmem:[#allocation3 + $0x140] sm:$0xff] %vm260_vm1, %v9215_v1  ;;  %v627_v16 = vld [vmem:[#allocation3 + $0x107] sm:$0xff] }
  0x3f   : > { %547 = vst.msk [vmem:[#allocation3 + $0x148] sm:$0xff] %vm260_vm1, %v9215_v1  ;;  %v699_v23 = vmax.f32 %v627_v16, %v663_v17 }
  0x40   : > { %548 = vst.msk [vmem:[#allocation3 + $0x150] sm:$0xff] %vm260_vm1, %v9215_v1 }
  0x41   : > { %549 = vst.msk [vmem:[#allocation3 + $0x158] sm:$0xff] %vm260_vm1, %v9215_v1 }
  0x42   : > { %550 = vst.msk [vmem:[#allocation3 + $0x160] sm:$0xff] %vm260_vm1, %v9215_v1 }
  0x43   : > { %551 = vst.msk [vmem:[#allocation3 + $0x168] sm:$0xff] %vm260_vm1, %v9215_v1 }
  0x44   : > { %552 = vst.msk [vmem:[#allocation3 + $0x170] sm:$0xff] %vm260_vm1, %v9215_v1 }
  0x45   : > { %553 = vst.msk [vmem:[#allocation3 + $0x178] sm:$0xff] %vm260_vm1, %v9215_v1 }
  0x46   : > { %554 = vst.msk [vmem:[#allocation3 + $0x180] sm:$0xff] %vm260_vm1, %v9215_v1 }
  0x47   : > { %555 = vst.msk [vmem:[#allocation3 + $0x188] sm:$0xff] %vm260_vm1, %v9215_v1 }
  0x48   : > { %556 = vst.msk [vmem:[#allocation3 + $0x190] sm:$0xff] %vm260_vm1, %v9215_v1 }
  0x49   : > { %557 = vst.msk [vmem:[#allocation3 + $0x198] sm:$0xff] %vm260_vm1, %v9215_v1 }
  0x4a   : > { %558 = vst.msk [vmem:[#allocation3 + $0x1a0] sm:$0xff] %vm260_vm1, %v9215_v1 }
  0x4b   : > { %559 = vst.msk [vmem:[#allocation3 + $0x1a8] sm:$0xff] %vm260_vm1, %v9215_v1 }
  0x4c   : > { %560 = vst.msk [vmem:[#allocation3 + $0x1b0] sm:$0xff] %vm260_vm1, %v9215_v1 }
  0x4d   : > { %561 = vst.msk [vmem:[#allocation3 + $0x1b8] sm:$0xff] %vm260_vm1, %v9215_v1 }
  0x4e   : > { %562 = vst.msk [vmem:[#allocation3 + $0x1c0] sm:$0xff] %vm260_vm1, %v9215_v1 }
  0x4f   : > { %563 = vst.msk [vmem:[#allocation3 + $0x1c8] sm:$0xff] %vm260_vm1, %v9215_v1 }
  0x50   : > { %564 = vst.msk [vmem:[#allocation3 + $0x1d0] sm:$0xff] %vm260_vm1, %v9215_v1 }
  0x51   : > { %565 = vst.msk [vmem:[#allocation3 + $0x1d8] sm:$0xff] %vm260_vm1, %v9215_v1 }
  0x52   : > { %566 = vst.msk [vmem:[#allocation3 + $0x1e0] sm:$0xff] %vm260_vm1, %v9215_v1 }
  0x53   : > { %567 = vst.msk [vmem:[#allocation3 + $0x1e8] sm:$0xff] %vm260_vm1, %v9215_v1 }
  0x54   : > { %568 = vst.msk [vmem:[#allocation3 + $0x1f0] sm:$0xff] %vm260_vm1, %v9215_v1 }
  0x55   : > { %569 = vst.msk [vmem:[#allocation3 + $0x1f8] sm:$0xff] %vm260_vm1, %v9215_v1 }
  0x56   : > { %570 = vst.msk [vmem:[#allocation3 + $0x200] sm:$0xff] %vm260_vm1, %v9215_v1 }
  0x57   : > { %571 = vst.msk [vmem:[#allocation3 + $0x208] sm:$0xff] %vm260_vm1, %v9215_v1 }
  0x58   : > { %572 = vst.msk [vmem:[#allocation3 + $0x210] sm:$0xff] %vm260_vm1, %v9215_v1 }
  0x59   : > { %573 = vst.msk [vmem:[#allocation3 + $0x218] sm:$0xff] %vm260_vm1, %v9215_v1 }
  0x5a   : > { %574 = vst.msk [vmem:[#allocation3 + $0x220] sm:$0xff] %vm260_vm1, %v9215_v1 }
  0x5b   : > { %575 = vst.msk [vmem:[#allocation3 + $0x228] sm:$0xff] %vm260_vm1, %v9215_v1 }
  0x5c   : > { %576 = vst.msk [vmem:[#allocation3 + $0x230] sm:$0xff] %vm260_vm1, %v9215_v1 }
  0x5d   : > { %577 = vst.msk [vmem:[#allocation3 + $0x238] sm:$0xff] %vm260_vm1, %v9215_v1 }
  0x5e   : > { %591 = vst.msk [vmem:[#allocation3 + $0xe8] sm:$0xff] %vm260_vm1, %v9322_v3 }
  0x5f   : > { %579 = vst.msk [vmem:[#allocation3 + $0x28] sm:$0xff] %vm260_vm1, %v9401_v4 }
  0x60   : > { %595 = vst.msk [vmem:[#allocation3 + $0x128] sm:$0xff] %vm260_vm1, %v9415_v6 }
  0x61   : > { %592 = vst.msk [vmem:[#allocation3 + $0xf0] sm:$0xff] %vm260_vm1, %v9404_v5 }
  0x62   : > { %594 = vst.msk [vmem:[#allocation3 + $0x110] sm:$0xff] %vm260_vm1, %v9424_v7 }
  0x63   : > { %580 = vst.msk [vmem:[#allocation3 + $0x30] sm:$0xff] %vm260_vm1, %v9433_v8 }
  0x64   : > { %596 = vst.msk [vmem:[#allocation3 + $0x130] sm:$0xff] %vm260_vm1, %v9436_v9 }
  0x65   : > { %v625_v19 = vld [vmem:[#allocation3 + $0xe7] sm:$0xff]  ;;  %589 = vst.msk [vmem:[#allocation3 + $0xc8] sm:$0xff] %vm260_vm1, %v9530_v15 }
  0x66   : > { %v661_v20 = vld [vmem:[#allocation3 + $0xe8] sm:$0xff]  ;;  %590 = vst.msk [vmem:[#allocation3 + $0xd0] sm:$0xff] %vm260_vm1, %v9535_v18 }
  0x67   : > { %v697_v22 = vmax.f32 %v625_v19, %v661_v20  ;;  %v629_v24 = vld [vmem:[#allocation3 + $0x127] sm:$0xff]  ;;  %581 = vst.msk [vmem:[#allocation3 + $0x48] sm:$0xff] %vm260_vm1, %v9484_v11 }
  0x68   : > { %v665_v25 = vld [vmem:[#allocation3 + $0x128] sm:$0xff]  ;;  %v662_v30 = vld [vmem:[#allocation3 + $0xf0] sm:$0xff]  ;;  %597 = vst.msk [vmem:[#allocation3 + $0x148] sm:$0xff] %vm260_vm1, %v9467_v10 }
  0x69   : > { %v701_v27 = vmax.f32 %v629_v24, %v665_v25  ;;  %v733_v28 = vld [vmem:[#allocation3 + $0xe9] sm:$0xff]  ;;  %598 = vst.msk [vmem:[#allocation3 + $0x150] sm:$0xff] %vm260_vm1, %v9493_v12  ;;  %v734_v37 = vld [vmem:[#allocation3 + $0xf1] sm:$0xff] }
  0x6a   : > { %v626_v29 = vld [vmem:[#allocation3 + $0xef] sm:$0xff]  ;;  %v9557_v32 = vmax.f32 %v697_v22, %v733_v28  ;;  %582 = vst.msk [vmem:[#allocation3 + $0x50] sm:$0xff] %vm260_vm1, %v9510_v13 }
  0x6b   : > { %v735_v31 = vld [vmem:[#allocation3 + $0x109] sm:$0xff]  ;;  %v698_v36 = vmax.f32 %v626_v29, %v662_v30  ;;  %v736_v38 = vld [vmem:[#allocation3 + $0x111] sm:$0xff]  ;;  %583 = vst.msk [vmem:[#allocation3 + $0x68] sm:$0xff] %vm260_vm1, %v9542_v21 }
  0x6c   : > { %v628_v33 = vld [vmem:[#allocation3 + $0x10f] sm:$0xff]  ;;  %v9561_v35 = vmax.f32 %v699_v23, %v735_v31  ;;  %v623_v45 = vld [vmem:[#allocation3 + $0xc7] sm:$0xff]  ;;  %599 = vst.msk [vmem:[#allocation3 + $0x168] sm:$0xff] %vm260_vm1, %v9519_v14 }
  0x6d   : > { %v664_v34 = vld [vmem:[#allocation3 + $0x110] sm:$0xff]  ;;  %v659_v46 = vld [vmem:[#allocation3 + $0xc8] sm:$0xff]  ;;  %600 = vst.msk [vmem:[#allocation3 + $0x170] sm:$0xff] %vm260_vm1, %v9551_v26  ;;  %v9576_v55 = vmax.f32 %v698_v36, %v734_v37 }
  0x6e   : > { %v737_v39 = vld [vmem:[#allocation3 + $0x129] sm:$0xff]  ;;  %v700_v40 = vmax.f32 %v628_v33, %v664_v34  ;;  %v805_v44 = vmax.f32 %v9557_v32, %v9561_v35  ;;  %v738_v48 = vld [vmem:[#allocation3 + $0x131] sm:$0xff]  ;;  %v695_v52 = vmax.f32 %v623_v45, %v659_v46 }
  0x6f   : > { %v630_v41 = vld [vmem:[#allocation3 + $0x12f] sm:$0xff]  ;;  %v9567_v43 = vmax.f32 %v701_v27, %v737_v39  ;;  %v631_v60 = vld [vmem:[#allocation3 + $0x147] sm:$0xff] }
  0x70   : > { %v666_v42 = vld [vmem:[#allocation3 + $0x130] sm:$0xff]  ;;  %v772_v58 = vmax.f32 %v700_v40, %v736_v38  ;;  %v667_v61 = vld [vmem:[#allocation3 + $0x148] sm:$0xff] }
  0x71   : > { %v702_v47 = vmax.f32 %v630_v41, %v666_v42  ;;  %v624_v49 = vld [vmem:[#allocation3 + $0xcf] sm:$0xff]  ;;  %v837_v53 = vmax.f32 %v805_v44, %v9567_v43  ;;  %v703_v20 = vmax.f32 %v631_v60, %v667_v61  ;;  %v807_v33 = vmax.f32 %v9561_v35, %v9567_v43  ;;  %v9615_v41 = vld [vmem:[%s9312_s11 + $0xb8] sm:$0xff] }
  0x72   : > { %v660_v50 = vld [vmem:[#allocation3 + $0xd0] sm:$0xff]  ;;  %v9600_v37 = vld [vmem:[%s9312_s11 + $0x28] sm:$0xff]  ;;  %v806_v38 = vmax.f32 %v9576_v55, %v772_v58  ;;  %602 = vst.msk [vmem:[#allocation3 + $0x190] sm:$0xff] %vm260_vm1, %v9615_v41  ;;  %v9632_v61 = vld [vmem:[%s9312_s11 + $0x38] sm:$0xff] }
  0x73   : > { %v732_v51 = vld [vmem:[#allocation3 + $0xd1] sm:$0xff]  ;;  %v696_v54 = vmax.f32 %v624_v49, %v660_v50  ;;  %v731_v56 = vld [vmem:[#allocation3 + $0xc9] sm:$0xff]  ;;  %v9578_v57 = vmax.f32 %v702_v47, %v738_v48  ;;  %1011 = vrot.lane.b32.xlu2 %v837_v53, %s9217_s13  ;;  %8265 = vmatmul.msk.f32.gmra.mxu0 %vm260_vm1, %v9600_v37  ;;  %584 = vst.msk [vmem:[#allocation3 + $0x70] sm:$0xff] %vm260_vm1, %v9600_v37 }
  0x74   : > { %v9580_v59 = vmax.f32 %v695_v52, %v731_v56  ;;  %v632_v63 = vld [vmem:[#allocation3 + $0x14f] sm:$0xff]  ;;  %v611_v50 = vld [vmem:[#allocation3 + $0x7] sm:$0xff]  ;;  %586 = vst.msk [vmem:[#allocation3 + $0x90] sm:$0xff] %vm260_vm1, %v9632_v61 }
  0x75   : > { %v9583_v62 = vmax.f32 %v696_v54, %v732_v51  ;;  %v668_v0 = vld [vmem:[#allocation3 + $0x150] sm:$0xff]  ;;  %v808_v19 = vmax.f32 %v772_v58, %v9578_v57  ;;  %v838_v49 = vmax.f32 %v806_v38, %v9578_v57  ;;  %v613_v51 = vld [vmem:[#allocation3 + $0x27] sm:$0xff] }
  0x76   : > { %v740_v1 = vld [vmem:[#allocation3 + $0x151] sm:$0xff]  ;;  %v803_v16 = vmax.f32 %v9580_v59, %v9557_v32  ;;  %v704_v17 = vmax.f32 %v632_v63, %v668_v0  ;;  %v739_v23 = vld [vmem:[#allocation3 + $0x149] sm:$0xff] }
  0x77   : > { %v804_v22 = vmax.f32 %v9583_v62, %v9576_v55  ;;  %v612_v28 = vld [vmem:[#allocation3 + $0xf] sm:$0xff]  ;;  %v9595_v31 = vmax.f32 %v703_v20, %v739_v23  ;;  %v633_v63 = vld [vmem:[#allocation3 + $0x167] sm:$0xff] }
  0x78   : > { %v835_v24 = vmax.f32 %v803_v16, %v9561_v35  ;;  %v9591_v25 = vmax.f32 %v704_v17, %v740_v1  ;;  %v648_v29 = vld [vmem:[#allocation3 + $0x10] sm:$0xff]  ;;  %v647_v52 = vld [vmem:[#allocation3 + $0x8] sm:$0xff] }
  0x79   : > { %v836_v27 = vmax.f32 %v804_v22, %v772_v58  ;;  %v614_v34 = vld [vmem:[#allocation3 + $0x2f] sm:$0xff]  ;;  %v684_v35 = vmax.f32 %v612_v28, %v648_v29  ;;  %v839_v45 = vmax.f32 %v807_v33, %v9595_v31  ;;  %v615_v1 = vld [vmem:[#allocation3 + $0x47] sm:$0xff]  ;;  %v683_v16 = vmax.f32 %v611_v50, %v647_v52 }
  0x7a   : > { %1007 = vrot.lane.b32.xlu0 %v835_v24, %s9217_s13  ;;  %v840_v30 = vmax.f32 %v808_v19, %v9591_v25  ;;  %v650_v36 = vld [vmem:[#allocation3 + $0x30] sm:$0xff]  ;;  %v649_v53 = vld [vmem:[#allocation3 + $0x28] sm:$0xff] }
  0x7b   : > { %1009 = vrot.lane.b32.xlu1 %v836_v27, %s9217_s13  ;;  %v9609_v39 = vld [vmem:[%s9312_s11 + $0x30] sm:$0xff]  ;;  %v686_v42 = vmax.f32 %v614_v34, %v650_v36  ;;  %v669_v0 = vld [vmem:[#allocation3 + $0x168] sm:$0xff]  ;;  %v685_v17 = vmax.f32 %v613_v51, %v649_v53 }
  0x7c   : > { %v9612_v40 = vld [vmem:[%s9312_s11 + $0xb0] sm:$0xff]  ;;  %585 = vst.msk [vmem:[#allocation3 + $0x88] sm:$0xff] %vm260_vm1, %v9609_v39  ;;  %1017 = vrot.lane.b32.xlu2 %v840_v30, %s9217_s13  ;;  %8266 = vmatmul.msk.f32.gmra.mxu0 %vm260_vm1, %v9609_v39  ;;  %v651_v19 = vld [vmem:[#allocation3 + $0x48] sm:$0xff]  ;;  %v705_v27 = vmax.f32 %v633_v63, %v669_v0 }
  0x7d   : > { %8282 = vmatmul.msk.f32.gmra.mxu3 %vm260_vm1, %v9612_v40  ;;  %v720_v44 = vld [vmem:[#allocation3 + $0x11] sm:$0xff]  ;;  %601 = vst.msk [vmem:[#allocation3 + $0x188] sm:$0xff] %vm260_vm1, %v9612_v40  ;;  %v719_v20 = vld [vmem:[#allocation3 + $0x9] sm:$0xff]  ;;  %v687_v29 = vmax.f32 %v615_v1, %v651_v19 }
  0x7e   : > { %v616_v46 = vld [vmem:[#allocation3 + $0x4f] sm:$0xff]  ;;  %v756_v56 = vmax.f32 %v684_v35, %v720_v44  ;;  %v755_v30 = vmax.f32 %v683_v16, %v719_v20  ;;  %v9654_v35 = vld [vmem:[%s9312_s11 + $0x40] sm:$0xff] }
  0x7f   : > { %v652_v47 = vld [vmem:[#allocation3 + $0x50] sm:$0xff]  ;;  %587 = vst.msk [vmem:[#allocation3 + $0xa8] sm:$0xff] %vm260_vm1, %v9654_v35  ;;  %v617_v50 = vld [vmem:[#allocation3 + $0x67] sm:$0xff] }
  0x80   : > { %v722_v48 = vld [vmem:[#allocation3 + $0x31] sm:$0xff]  ;;  %v688_v54 = vmax.f32 %v616_v46, %v652_v47  ;;  %v721_v22 = vld [vmem:[#allocation3 + $0x29] sm:$0xff] }
  0x81   : > { %v9628_v58 = vmax.f32 %v686_v42, %v722_v48  ;;  %v724_v60 = vld [vmem:[#allocation3 + $0x51] sm:$0xff]  ;;  %v741_v28 = vld [vmem:[#allocation3 + $0x169] sm:$0xff]  ;;  %v757_v33 = vmax.f32 %v685_v17, %v721_v22 }
  0x82   : > { %1015 = vrot.lane.b32.xlu0 %v839_v45, %s9217_s13  ;;  %v9643_v23 = vmax.f32 %v688_v54, %v724_v60  ;;  %v723_v34 = vld [vmem:[#allocation3 + $0x49] sm:$0xff]  ;;  %v9649_v38 = vmax.f32 %v705_v27, %v741_v28  ;;  %v742_v16 = vld [vmem:[#allocation3 + $0x171] sm:$0xff] }
  0x83   : > { %1013 = vrot.lane.b32.xlu1 %v838_v49, %s9217_s13  ;;  %v792_v24 = vmax.f32 %v756_v56, %v9628_v58  ;;  %v9658_v42 = vmax.f32 %v687_v29, %v723_v34  ;;  %v791_v44 = vmax.f32 %v755_v30, %v757_v33  ;;  %v9676_v49 = vld [vmem:[%s9312_s11 + $0x48] sm:$0xff]  ;;  %v670_v54 = vld [vmem:[#allocation3 + $0x170] sm:$0xff] }
  0x84   : > { %891 = vrot.lane.b32.xlu2 %v9467_v10, %s9216_s12  ;;  %v809_v10 = vmax.f32 %v9567_v43, %v9595_v31  ;;  %8267 = vmatmul.msk.f32.gmra.mxu0 %vm260_vm1, %v9632_v61  ;;  %v635_v43 = vld [vmem:[#allocation3 + $0x187] sm:$0xff]  ;;  %588 = vst.msk [vmem:[#allocation3 + $0xb0] sm:$0xff] %vm260_vm1, %v9676_v49  ;;  %v634_v53 = vld [vmem:[#allocation3 + $0x16f] sm:$0xff]  ;;  %v811_v60 = vmax.f32 %v9595_v31, %v9649_v38 }
  0x85   : > { %8283 = vmatmul.msk.f32.gmra.mxu3 %vm260_vm1, %v9615_v41  ;;  %v824_v36 = vmax.f32 %v792_v24, %v9643_v23  ;;  %v671_v45 = vld [vmem:[#allocation3 + $0x188] sm:$0xff]  ;;  %v823_v46 = vmax.f32 %v791_v44, %v9658_v42  ;;  %v706_v1 = vmax.f32 %v634_v53, %v670_v54  ;;  %v793_v20 = vmax.f32 %v757_v33, %v9658_v42  ;;  %v9711_v22 = vld [vmem:[%s9312_s11 + $0xd0] sm:$0xff]  ;;  %v9725_v33 = vld [vmem:[%s9312_s11 + $0xd8] sm:$0xff] }
  0x86   : > { %v707_v47 = vmax.f32 %v635_v43, %v671_v45  ;;  %v743_v48 = vld [vmem:[#allocation3 + $0x189] sm:$0xff]  ;;  %v810_v31 = vmax.f32 %v9578_v57, %v9591_v25  ;;  %605 = vst.msk [vmem:[#allocation3 + $0x1c8] sm:$0xff] %vm260_vm1, %v9711_v22  ;;  %v744_v43 = vld [vmem:[#allocation3 + $0x191] sm:$0xff] }
  0x87   : > { %v653_v51 = vld [vmem:[#allocation3 + $0x68] sm:$0xff]  ;;  %v672_v30 = vld [vmem:[#allocation3 + $0x190] sm:$0xff]  ;;  %606 = vst.msk [vmem:[#allocation3 + $0x1d0] sm:$0xff] %vm260_vm1, %v9725_v33 }
  0x88   : > { %v9684_v52 = vld [vmem:[%s9312_s11 + $0xc8] sm:$0xff]  ;;  %v9692_v56 = vmax.f32 %v707_v47, %v743_v48  ;;  %v689_v63 = vmax.f32 %v617_v50, %v653_v51  ;;  %v9753_v51 = vld [vmem:[%s9312_s11 + $0xe0] sm:$0xff] }
  0x89   : > { %604 = vst.msk [vmem:[#allocation3 + $0x1b0] sm:$0xff] %vm260_vm1, %v9684_v52  ;;  %v725_v0 = vld [vmem:[#allocation3 + $0x69] sm:$0xff] }
  0x8a   : > { %855 = vrot.lane.b32.xlu0 %v9401_v4, %s9216_s12  ;;  %v9665_v4 = vld [vmem:[%s9312_s11 + $0xc0] sm:$0xff]  ;;  %v843_v17 = vmax.f32 %v811_v60, %v9692_v56  ;;  %v9699_v19 = vmax.f32 %v689_v63, %v725_v0  ;;  %v655_v24 = vld [vmem:[#allocation3 + $0x88] sm:$0xff]  ;;  %607 = vst.msk [vmem:[#allocation3 + $0x1e8] sm:$0xff] %vm260_vm1, %v9753_v51  ;;  %v656_v63 = vld [vmem:[#allocation3 + $0x90] sm:$0xff] }
  0x8b   : > { %889 = vrot.lane.b32.xlu1 %v9436_v9, %s9216_s12  ;;  %603 = vst.msk [vmem:[#allocation3 + $0x1a8] sm:$0xff] %vm260_vm1, %v9665_v4  ;;  %v841_v9 = vmax.f32 %v809_v10, %v9649_v38  ;;  %v727_v28 = vld [vmem:[#allocation3 + $0x89] sm:$0xff] }
  0x8c   : > { %985 = vrot.lane.b32.xlu2 %v824_v36, %s9217_s13  ;;  %8268 = vmatmul.msk.f32.gmra.mxu0 %vm260_vm1, %v9654_v35  ;;  %v636_v29 = vld [vmem:[#allocation3 + $0x18f] sm:$0xff]  ;;  %v795_v44 = vmax.f32 %v9658_v42, %v9699_v19  ;;  %v794_v42 = vmax.f32 %v9628_v58, %v9643_v23 }
  0x8d   : > { %8284 = vmatmul.msk.f32.gmra.mxu3 %vm260_vm1, %v9665_v4  ;;  %v618_v34 = vld [vmem:[#allocation3 + $0x6f] sm:$0xff] }
  0x8e   : > { %v654_v36 = vld [vmem:[#allocation3 + $0x70] sm:$0xff]  ;;  %v9767_v0 = vld [vmem:[%s9312_s11 + $0xe8] sm:$0xff] }
  0x8f   : > { %v690_v45 = vmax.f32 %v618_v34, %v654_v36  ;;  %v620_v60 = vld [vmem:[#allocation3 + $0x8f] sm:$0xff]  ;;  %608 = vst.msk [vmem:[#allocation3 + $0x1f0] sm:$0xff] %vm260_vm1, %v9767_v0  ;;  %v639_v34 = vld [vmem:[#allocation3 + $0x1c7] sm:$0xff] }
  0x90   : > { %v746_v54 = vld [vmem:[#allocation3 + $0x1b1] sm:$0xff]  ;;  %v675_v36 = vld [vmem:[#allocation3 + $0x1c8] sm:$0xff] }
  0x92   : > { %1019 = vrot.lane.b32.xlu0 %v841_v9, %s9217_s13  ;;  %v708_v9 = vmax.f32 %v636_v29, %v672_v30  ;;  %v9806_v30 = vpop.permute.xlu2 %883 }
  0x93   : > { %983 = vrot.lane.b32.xlu1 %v823_v46, %s9217_s13  ;;  %v726_v46 = vld [vmem:[#allocation3 + $0x71] sm:$0xff] }
  0x94   : > { %859 = vrot.lane.b32.xlu2 %v9484_v11, %s9216_s12  ;;  %v9704_v11 = vmax.f32 %v706_v1, %v742_v16  ;;  %8269 = vmatmul.msk.f32.gmra.mxu0 %vm260_vm1, %v9676_v49  ;;  %v9740_v48 = vmax.f32 %v708_v9, %v744_v43  ;;  %v637_v1 = vld [vmem:[#allocation3 + $0x1a7] sm:$0xff] }
  0x95   : > { %8285 = vmatmul.msk.f32.gmra.mxu3 %vm260_vm1, %v9684_v52  ;;  %v673_v16 = vld [vmem:[#allocation3 + $0x1a8] sm:$0xff] }
  0x96   : > { %v842_v57 = vmax.f32 %v810_v31, %v9704_v11  ;;  %v812_v50 = vmax.f32 %v9591_v25, %v9704_v11  ;;  %v674_v25 = vld [vmem:[#allocation3 + $0x1b0] sm:$0xff]  ;;  %v621_v9 = vld [vmem:[#allocation3 + $0xa7] sm:$0xff] }
  0x97   : > { %v728_v31 = vld [vmem:[#allocation3 + $0x91] sm:$0xff]  ;;  %v657_v43 = vld [vmem:[#allocation3 + $0xa8] sm:$0xff] }
  0x9a   : > { %893 = vrot.lane.b32.xlu0 %v9493_v12, %s9216_s12  ;;  %v619_v12 = vld [vmem:[#allocation3 + $0x87] sm:$0xff] }
  0x9b   : > { %857 = vrot.lane.b32.xlu1 %v9433_v8, %s9216_s12  ;;  %v825_v8 = vmax.f32 %v793_v20, %v9699_v19  ;;  %v691_v27 = vmax.f32 %v619_v12, %v655_v24  ;;  %v814_v20 = vmax.f32 %v9704_v11, %v9740_v48  ;;  %v745_v12 = vld [vmem:[#allocation3 + $0x1a9] sm:$0xff]  ;;  %v813_v11 = vmax.f32 %v9649_v38, %v9692_v56 }
  0x9c   : > { %1023 = vrot.lane.b32.xlu2 %v843_v17, %s9217_s13  ;;  %8270 = vmatmul.msk.f32.gmra.mxu0 %vm260_vm1, %v9530_v15 }
  0x9d   : > { %8286 = vmatmul.msk.f32.gmra.mxu3 %vm260_vm1, %v9711_v22  ;;  %v9733_v10 = vmax.f32 %v691_v27, %v727_v28  ;;  %v9795_v28 = vld [vmem:[%s9312_s11 + $0xf0] sm:$0xff] }
  0x9e   : > { %609 = vst.msk [vmem:[#allocation3 + $0x208] sm:$0xff] %vm260_vm1, %v9795_v28 }
  0x9f   : > { %v827_v47 = vmax.f32 %v795_v44, %v9733_v10  ;;  %v9811_v44 = vld [vmem:[%s9312_s11 + $0xf8] sm:$0xff] }
  0xa0   : > { %610 = vst.msk [vmem:[#allocation3 + $0x210] sm:$0xff] %vm260_vm1, %v9811_v44 }
  0xa2   : > { %987 = vrot.lane.b32.xlu0 %v825_v8, %s9217_s13  ;;  %v709_v8 = vmax.f32 %v637_v1, %v673_v16  ;;  %v9877_v1 = vpop.f32.mrf.mxu0  ;;  %v640_v16 = vld [vmem:[#allocation3 + $0x1cf] sm:$0xff] }
  0xa3   : > { %1021 = vrot.lane.b32.xlu1 %v842_v57, %s9217_s13 }
  0xa4   : > { %897 = vrot.lane.b32.xlu2 %v9551_v26, %s9216_s12  ;;  %v9746_v26 = vmax.f32 %v690_v45, %v726_v46  ;;  %8271 = vmatmul.msk.f32.gmra.mxu0 %vm260_vm1, %v9535_v18 }
  0xa5   : > { %8287 = vmatmul.msk.f32.gmra.mxu3 %vm260_vm1, %v9725_v33 }
  0xa6   : > { %v826_v58 = vmax.f32 %v794_v42, %v9746_v26  ;;  %v796_v27 = vmax.f32 %v9643_v23, %v9746_v26  ;;  %v658_v23 = vld [vmem:[#allocation3 + $0xb0] sm:$0xff]  ;;  %v9218_v42 = vmov 0.0  }
  0xa7   : > { %1146 = vst.msk [vmem:[#allocation2] sm:$0xff] %vm1145_vm2, %v9218_v42 }
  0xa8   : > { %1147 = vst.msk [vmem:[#allocation2 + $0x8] sm:$0xff] %vm1145_vm2, %v9218_v42 }
  0xa9   : > { %1148 = vst.msk [vmem:[#allocation2 + $0x10] sm:$0xff] %vm1145_vm2, %v9218_v42 }
  0xaa   : > { %861 = vrot.lane.b32.xlu0 %v9510_v13, %s9216_s12  ;;  %v844_v13 = vmax.f32 %v812_v50, %v9740_v48  ;;  %v693_v50 = vmax.f32 %v621_v9, %v657_v43  ;;  %1149 = vst.msk [vmem:[#allocation2 + $0x18] sm:$0xff] %vm1145_vm2, %v9218_v42 }
  0xab   : > { %895 = vrot.lane.b32.xlu1 %v9519_v14, %s9216_s12  ;;  %v638_v14 = vld [vmem:[#allocation3 + $0x1af] sm:$0xff]  ;;  %1150 = vst.msk [vmem:[#allocation2 + $0x20] sm:$0xff] %vm1145_vm2, %v9218_v42 }
  0xac   : > { %991 = vrot.lane.b32.xlu2 %v827_v47, %s9217_s13  ;;  %v710_v53 = vmax.f32 %v638_v14, %v674_v25  ;;  %8272 = vmatmul.msk.f32.gmra.mxu0 %vm260_vm1, %v9322_v3  ;;  %v692_v3 = vmax.f32 %v620_v60, %v656_v63  ;;  %v711_v47 = vmax.f32 %v639_v34, %v675_v36  ;;  %v749_v36 = vld [vmem:[#allocation3 + $0x1e9] sm:$0xff] }
  0xad   : > { %8288 = vmatmul.msk.f32.gmra.mxu3 %vm260_vm1, %v9753_v51  ;;  %1151 = vst.msk [vmem:[#allocation2 + $0x28] sm:$0xff] %vm1145_vm2, %v9218_v42 }
  0xae   : > { %v9775_v17 = vmax.f32 %v710_v53, %v746_v54  ;;  %v9782_v57 = vmax.f32 %v692_v3, %v728_v31  ;;  %1152 = vst.msk [vmem:[#allocation2 + $0x30] sm:$0xff] %vm1145_vm2, %v9218_v42  ;;  %v2053_v3 = vld [vmem:[%s14333_s3 + $0x38] sm:$0xff] }
  0xaf   : > { %1153 = vst.msk [vmem:[#allocation2 + $0x38] sm:$0xff] %vm1145_vm2, %v9218_v42  ;;  %v1293_v60 = vld [vmem:[#allocation2 + $0x7] sm:$0xff]  ;;  %2164 = vmatpush.msrb.mxu0 %v2053_v3 }
  0xb0   : > { %v846_v24 = vmax.f32 %v814_v20, %v9775_v17  ;;  %v798_v46 = vmax.f32 %v9746_v26, %v9782_v57  ;;  %1154 = vst.msk [vmem:[#allocation2 + $0x40] sm:$0xff] %vm1145_vm2, %v9218_v42  ;;  %v1745_v63 = vld [vmem:[#allocation2 + $0x8] sm:$0xff]  ;;  %v676_v20 = vld [vmem:[#allocation3 + $0x1d0] sm:$0xff] }
  0xb1   : > { %1155 = vst.msk [vmem:[#allocation2 + $0x48] sm:$0xff] %vm1145_vm2, %v9218_v42  ;;  %v1746_v31 = vld [vmem:[#allocation2 + $0x10] sm:$0xff] }
  0xb2   : > { %1025 = vrot.lane.b32.xlu0 %v844_v13, %s9217_s13  ;;  %v729_v13 = vld [vmem:[#allocation3 + $0xa9] sm:$0xff]  ;;  %1156 = vst.msk [vmem:[#allocation2 + $0x50] sm:$0xff] %vm1145_vm2, %v9218_v42  ;;  %v2021_v9 = vld [vmem:[#allocation2 + $0x11] sm:$0xff] }
  0xb3   : > { %989 = vrot.lane.b32.xlu1 %v826_v58, %s9217_s13  ;;  %v9840_v25 = vmax.f32 %v693_v50, %v729_v13  ;;  %v797_v58 = vmax.f32 %v9699_v19, %v9733_v10  ;;  %v1777_v19 = vld [vmem:[%s14333_s3 + $0x20] sm:$0xff]  ;;  %1157 = vst.msk [vmem:[#allocation2 + $0x58] sm:$0xff] %vm1145_vm2, %v9218_v42  ;;  %v9961_v13 = vpop.permute.xlu1 %881 }
  0xb4   : > { %865 = vrot.lane.b32.xlu2 %v9600_v37, %s9216_s12  ;;  %v9788_v37 = vmax.f32 %v709_v8, %v745_v12  ;;  %8273 = vmatmul.msk.f32.gmra.mxu0 %vm260_vm1, %v9404_v5  ;;  %v730_v5 = vld [vmem:[#allocation3 + $0xb1] sm:$0xff]  ;;  %1158 = vst.msk [vmem:[#allocation2 + $0x60] sm:$0xff] %vm1145_vm2, %v9218_v42 }
  0xb5   : > { %8289 = vmatmul.msk.f32.gmra.mxu3 %vm260_vm1, %v9767_v0  ;;  %v829_v54 = vmax.f32 %v797_v58, %v9840_v25  ;;  %1159 = vst.msk [vmem:[#allocation2 + $0x68] sm:$0xff] %vm1145_vm2, %v9218_v42  ;;  %v2052_v8 = vld [vmem:[%s14333_s3 + $0x30] sm:$0xff] }
  0xb6   : > { %v845_v38 = vmax.f32 %v813_v11, %v9788_v37  ;;  %v815_v26 = vmax.f32 %v9692_v56, %v9788_v37  ;;  %v1778_v56 = vld [vmem:[%s14333_s3 + $0x28] sm:$0xff]  ;;  %1160 = vst.msk [vmem:[#allocation2 + $0x70] sm:$0xff] %vm1145_vm2, %v9218_v42  ;;  %2165 = vmatpush.msrb.mxu0 %v2052_v8 }
  0xb7   : > { %1889 = vmatpush.msrb.mxu3 %v1778_v56  ;;  %1161 = vst.msk [vmem:[#allocation2 + $0x78] sm:$0xff] %vm1145_vm2, %v9218_v42  ;;  %v2020_v11 = vld [vmem:[#allocation2 + $0x9] sm:$0xff]  ;;  %v750_v56 = vld [vmem:[#allocation3 + $0x1f1] sm:$0xff] }
  0xb8   : > { %1162 = vst.msk [vmem:[#allocation2 + $0x80] sm:$0xff] %vm1145_vm2, %v9218_v42  ;;  %v1296_v3 = vld [vmem:[#allocation2 + $0x2f] sm:$0xff] }
  0xb9   : > { %1890 = vmatpush.msrb.mxu3 %v1777_v19  ;;  %1163 = vst.msk [vmem:[#allocation2 + $0x88] sm:$0xff] %vm1145_vm2, %v9218_v42  ;;  %v2022_v8 = vld [vmem:[#allocation2 + $0x29] sm:$0xff] }
  0xba   : > { %899 = vrot.lane.b32.xlu0 %v9612_v40, %s9216_s12  ;;  %v622_v40 = vld [vmem:[#allocation3 + $0xaf] sm:$0xff]  ;;  %1164 = vst.msk [vmem:[#allocation2 + $0x90] sm:$0xff] %vm1145_vm2, %v9218_v42 }
  0xbb   : > { %863 = vrot.lane.b32.xlu1 %v9542_v21, %s9216_s12  ;;  %v828_v21 = vmax.f32 %v796_v27, %v9782_v57  ;;  %v694_v29 = vmax.f32 %v622_v40, %v658_v23  ;;  %v748_v27 = vld [vmem:[#allocation3 + $0x1d1] sm:$0xff]  ;;  %1165 = vst.msk [vmem:[#allocation2 + $0x98] sm:$0xff] %vm1145_vm2, %v9218_v42  ;;  %v816_v23 = vmax.f32 %v9740_v48, %v9775_v17  ;;  %v1295_v48 = vld [vmem:[#allocation2 + $0x27] sm:$0xff] }
  0xbc   : > { %1029 = vrot.lane.b32.xlu2 %v846_v24, %s9217_s13  ;;  %8274 = vmatmul.msk.f32.gmra.mxu0 %vm260_vm1, %v9317_v2  ;;  %v747_v2 = vld [vmem:[#allocation3 + $0x1c9] sm:$0xff]  ;;  %v712_v24 = vmax.f32 %v640_v16, %v676_v20  ;;  %1166 = vst.msk [vmem:[#allocation2 + $0xa0] sm:$0xff] %vm1145_vm2, %v9218_v42 }
  0xbd   : > { %8290 = vmatmul.msk.f32.gmra.mxu3 %vm260_vm1, %v9795_v28  ;;  %v9819_v45 = vmax.f32 %v694_v29, %v730_v5  ;;  %1167 = vst.msk [vmem:[#allocation2 + $0xa8] sm:$0xff] %vm1145_vm2, %v9218_v42  ;;  %v1747_v29 = vld [vmem:[#allocation2 + $0x28] sm:$0xff] }
  0xbe   : > { %v9923_v40 = vmax.f32 %v712_v24, %v748_v27  ;;  %1168 = vst.msk [vmem:[#allocation2 + $0xb0] sm:$0xff] %vm1145_vm2, %v9218_v42 }
  0xbf   : > { %v830_v14 = vmax.f32 %v798_v46, %v9819_v45  ;;  %1169 = vst.msk [vmem:[#allocation2 + $0xb8] sm:$0xff] %vm1145_vm2, %v9218_v42  ;;  %v802_v27 = vmax.f32 %v9819_v45, %v9583_v62 }
  0xc0   : > { %v848_v34 = vmax.f32 %v816_v23, %v9923_v40  ;;  %1170 = vst.msk [vmem:[#allocation2 + $0xc0] sm:$0xff] %vm1145_vm2, %v9218_v42  ;;  %v818_v19 = vmax.f32 %v9775_v17, %v9923_v40  ;;  %v801_v23 = vmax.f32 %v9840_v25, %v9580_v59 }
  0xc1   : > { %1171 = vst.msk [vmem:[#allocation2 + $0xc8] sm:$0xff] %vm1145_vm2, %v9218_v42 }
  0xc2   : > { %993 = vrot.lane.b32.xlu0 %v828_v21, %s9217_s13  ;;  %v799_v21 = vmax.f32 %v9733_v10, %v9840_v25  ;;  %1172 = vst.msk [vmem:[#allocation2 + $0xd0] sm:$0xff] %vm1145_vm2, %v9218_v42  ;;  %v10098_v25 = vld [vmem:[%s14332_s2] ss:$0 sm:$0xff] }
  0xc3   : > { %1027 = vrot.lane.b32.xlu1 %v845_v38, %s9217_s13  ;;  %v9929_v38 = vpop.f32.mrf.mxu0  ;;  %1173 = vst.msk [vmem:[#allocation2 + $0xd8] sm:$0xff] %vm1145_vm2, %v9218_v42 }
  0xc4   : > { %903 = vrot.lane.b32.xlu2 %v9665_v4, %s9216_s12  ;;  %v9832_v4 = vmax.f32 %v711_v47, %v747_v2  ;;  %8275 = vmatmul.msk.f32.gmra.mxu0 %vm260_vm1, %v9424_v7  ;;  %v1325_v7 = vld [vmem:[%s14333_s3 + $0x10] sm:$0xff]  ;;  %v831_v10 = vmax.f32 %v799_v21, %v9580_v59  ;;  %1174 = vst.msk [vmem:[#allocation2 + $0xe0] sm:$0xff] %vm1145_vm2, %v9218_v42 }
  0xc5   : > { %8291 = vmatmul.msk.f32.gmra.mxu3 %vm260_vm1, %v9811_v44  ;;  %1175 = vst.msk [vmem:[#allocation2 + $0xe8] sm:$0xff] %vm1145_vm2, %v9218_v42 }
  0xc6   : > { %v847_v53 = vmax.f32 %v815_v26, %v9832_v4  ;;  %v817_v46 = vmax.f32 %v9788_v37, %v9832_v4  ;;  %v642_v37 = vld [vmem:[#allocation3 + $0x1ef] sm:$0xff]  ;;  %1176 = vst.msk [vmem:[#allocation2 + $0xf0] sm:$0xff] %vm1145_vm2, %v9218_v42 }
  0xc7   : > { %1177 = vst.msk [vmem:[#allocation2 + $0xf8] sm:$0xff] %vm1145_vm2, %v9218_v42 }
  0xc8   : > { %1178 = vst.msk [vmem:[#allocation2 + $0x100] sm:$0xff] %vm1145_vm2, %v9218_v42 }
  0xc9   : > { %1179 = vst.msk [vmem:[#allocation2 + $0x108] sm:$0xff] %vm1145_vm2, %v9218_v42 }
  0xca   : > { %867 = vrot.lane.b32.xlu0 %v9609_v39, %s9216_s12  ;;  %v1326_v39 = vld [vmem:[%s14333_s3 + $0x18] sm:$0xff]  ;;  %1180 = vst.msk [vmem:[#allocation2 + $0x110] sm:$0xff] %vm1145_vm2, %v9218_v42 }
  0xcb   : > { %901 = vrot.lane.b32.xlu1 %v9615_v41, %s9216_s12  ;;  %1437 = vmatpush.msra.mxu1 %v1326_v39  ;;  %v9856_v41 = vpop.permute.xlu2 %887  ;;  %v9971_v26 = vpop.f32.mrf.mxu0  ;;  %1181 = vst.msk [vmem:[#allocation2 + $0x118] sm:$0xff] %vm1145_vm2, %v9218_v42 }
  0xcc   : > { %997 = vrot.lane.b32.xlu2 %v830_v14, %s9217_s13  ;;  %9100 = vmatpush.msra.mxu2 %v1326_v39  ;;  %v678_v14 = vld [vmem:[#allocation3 + $0x1f0] sm:$0xff]  ;;  %v9975_v39 = vpop.f32.mrf.mxu3  ;;  %1182 = vst.msk [vmem:[#allocation2 + $0x120] sm:$0xff] %vm1145_vm2, %v9218_v42 }
  0xcd   : > { %1438 = vmatpush.msra.mxu1 %v1325_v7  ;;  %8356 = vmatmul.msk.f32.vlgmr.msrb.gmra.mxu3 %vm1145_vm2, %v1745_v63  ;;  %v714_v58 = vmax.f32 %v642_v37, %v678_v14  ;;  %1183 = vst.msk [vmem:[#allocation2 + $0x128] sm:$0xff] %vm1145_vm2, %v9218_v42  ;;  %v379_v37 = vadd.f32 %v10098_v25, %v9877_v1 }
  0xce   : > { %9101 = vmatpush.msra.mxu2 %v1325_v7  ;;  %8292 = vmatmul.msk.f32.vlgmr.msra.gmra.mxu1 %vm1145_vm2, %v1293_v60  ;;  %1184 = vst.msk [vmem:[#allocation2 + $0x130] sm:$0xff] %vm1145_vm2, %v9218_v42  ;;  %v385_v14 = vadd.f32 %v10098_v25, %v9971_v26 }
  0xcf   : > { %8276 = vmatmul.msk.f32.gmra.mxu0 %vm260_vm1, %v9415_v6  ;;  %v1294_v6 = vld [vmem:[#allocation2 + $0xf] sm:$0xff]  ;;  %v9987_v7 = vmax.f32 %v714_v58, %v750_v56  ;;  %1185 = vst.msk [vmem:[#allocation2 + $0x138] sm:$0xff] %vm1145_vm2, %v9218_v42  ;;  %v474_v26 = vmax.f32 %v379_v37, 0.0 }
  0xd0   : > { %1186 = vst.msk [vmem:[#allocation2 + $0x140] sm:$0xff] %vm1145_vm2, %v9218_v42  ;;  %v476_v56 = vmax.f32 %v385_v14, 0.0 }
  0xd1   : > { %1187 = vst.msk [vmem:[#allocation2 + $0x148] sm:$0xff] %vm1145_vm2, %v9218_v42 }
  0xd2   : > { %1031 = vrot.lane.b32.xlu0 %v847_v53, %s9217_s13  ;;  %1188 = vst.msk [vmem:[#allocation2 + $0x150] sm:$0xff] %vm1145_vm2, %v9218_v42 }
  0xd3   : > { %995 = vrot.lane.b32.xlu1 %v829_v54, %s9217_s13  ;;  %v9903_v12 = vpop.permute.xlu2 %1011  ;;  %v800_v54 = vmax.f32 %v9782_v57, %v9819_v45  ;;  %v10015_v60 = vpop.f32.mrf.mxu0  ;;  %1189 = vst.msk [vmem:[#allocation2 + $0x158] sm:$0xff] %vm1145_vm2, %v9218_v42  ;;  %v2023_v45 = vld [vmem:[#allocation2 + $0x31] sm:$0xff] }
  0xd4   : > { %871 = vrot.lane.b32.xlu2 %v9654_v35, %s9216_s12  ;;  %v9907_v35 = vpop.permute.xlu0 %879  ;;  %1190 = vst.msk [vmem:[#allocation2 + $0x160] sm:$0xff] %vm1145_vm2, %v9218_v42 }
  0xd5   : > { %8357 = vmatmul.msk.f32.gmra.mxu3 %vm1145_vm2, %v1746_v31  ;;  %v832_v57 = vmax.f32 %v800_v54, %v9583_v62  ;;  %1191 = vst.msk [vmem:[#allocation2 + $0x168] sm:$0xff] %vm1145_vm2, %v9218_v42 }
  0xd6   : > { %8293 = vmatmul.msk.f32.gmra.mxu1 %vm1145_vm2, %v1294_v6  ;;  %1192 = vst.msk [vmem:[#allocation2 + $0x170] sm:$0xff] %vm1145_vm2, %v9218_v42  ;;  %v1748_v6 = vld [vmem:[#allocation2 + $0x30] sm:$0xff] }
  0xd7   : > { %8388 = vmatmul.msk.f32.vlgmr.msrb.gmra.mxu0 %vm1145_vm2, %v2020_v11  ;;  %1193 = vst.msk [vmem:[#allocation2 + $0x178] sm:$0xff] %vm1145_vm2, %v9218_v42 }
  0xd8   : > { %1194 = vst.msk [vmem:[#allocation2 + $0x180] sm:$0xff] %vm1145_vm2, %v9218_v42 }
  0xd9   : > { %1195 = vst.msk [vmem:[#allocation2 + $0x188] sm:$0xff] %vm1145_vm2, %v9218_v42 }
  0xda   : > { %905 = vrot.lane.b32.xlu0 %v9684_v52, %s9216_s12  ;;  %v641_v52 = vld [vmem:[#allocation3 + $0x1e7] sm:$0xff]  ;;  %1196 = vst.msk [vmem:[#allocation2 + $0x190] sm:$0xff] %vm1145_vm2, %v9218_v42 }
  0xdb   : > { %869 = vrot.lane.b32.xlu1 %v9632_v61, %s9216_s12  ;;  %v677_v61 = vld [vmem:[#allocation3 + $0x1e8] sm:$0xff]  ;;  %v9950_v47 = vpop.permute.xlu2 %1017  ;;  %v10047_v31 = vpop.f32.mrf.mxu0  ;;  %1197 = vst.msk [vmem:[#allocation2 + $0x198] sm:$0xff] %vm1145_vm2, %v9218_v42 }
  0xdc   : > { %v713_v5 = vmax.f32 %v641_v52, %v677_v61  ;;  %v9955_v2 = vpop.permute.xlu0 %885  ;;  %1198 = vst.msk [vmem:[#allocation2 + $0x1a0] sm:$0xff] %vm1145_vm2, %v9218_v42 }
  0xdd   : > { %8358 = vmatmul.msk.f32.gmra.mxu3 %vm1145_vm2, %v1747_v29  ;;  %1199 = vst.msk [vmem:[#allocation2 + $0x1a8] sm:$0xff] %vm1145_vm2, %v9218_v42 }
  0xde   : > { %8294 = vmatmul.msk.f32.gmra.mxu1 %vm1145_vm2, %v1295_v48  ;;  %v9946_v43 = vmax.f32 %v713_v5, %v749_v36  ;;  %1200 = vst.msk [vmem:[#allocation2 + $0x1b0] sm:$0xff] %vm1145_vm2, %v9218_v42 }
  0xdf   : > { %8389 = vmatmul.msk.f32.gmra.mxu0 %vm1145_vm2, %v2021_v9  ;;  %1201 = vst.msk [vmem:[#allocation2 + $0x1b8] sm:$0xff] %vm1145_vm2, %v9218_v42  ;;  %v382_v9 = vadd.f32 %v10098_v25, %v9929_v38 }
  0xe0   : > { %v849_v50 = vmax.f32 %v817_v46, %v9946_v43  ;;  %1202 = vst.msk [vmem:[#allocation2 + $0x1c0] sm:$0xff] %vm1145_vm2, %v9218_v42 }
  0xe1   : > { %1203 = vst.msk [vmem:[#allocation2 + $0x1c8] sm:$0xff] %vm1145_vm2, %v9218_v42  ;;  %v475_v1 = vmax.f32 %v382_v9, 0.0 }
  0xe2   : > { %999 = vrot.lane.b32.xlu0 %v831_v10, %s9217_s13  ;;  %1035 = vrot.lane.b32.xlu2 %v849_v50, %s9217_s13  ;;  %1204 = vst.msk [vmem:[#allocation2 + $0x1d0] sm:$0xff] %vm1145_vm2, %v9218_v42 }
  0xe3   : > { %1033 = vrot.lane.b32.xlu1 %v848_v34, %s9217_s13  ;;  %v9991_v53 = vpop.permute.xlu2 %891  ;;  %1205 = vst.msk [vmem:[#allocation2 + $0x1d8] sm:$0xff] %vm1145_vm2, %v9218_v42 }
  0xe4   : > { %1206 = vst.msk [vmem:[#allocation2 + $0x1e0] sm:$0xff] %vm1145_vm2, %v9218_v42 }
  0xe5   : > { %8359 = vmatmul.msk.f32.gmra.mxu3 %vm1145_vm2, %v1748_v6  ;;  %1207 = vst.msk [vmem:[#allocation2 + $0x1e8] sm:$0xff] %vm1145_vm2, %v9218_v42 }
  0xe6   : > { %8295 = vmatmul.msk.f32.gmra.mxu1 %vm1145_vm2, %v1296_v3  ;;  %1208 = vst.msk [vmem:[#allocation2 + $0x1f0] sm:$0xff] %vm1145_vm2, %v9218_v42 }
  0xe7   : > { %8390 = vmatmul.msk.f32.gmra.mxu0 %vm1145_vm2, %v2022_v8  ;;  %1209 = vst.msk [vmem:[#allocation2 + $0x1f8] sm:$0xff] %vm1145_vm2, %v9218_v42 }
  0xe8   : > { %1210 = vst.msk [vmem:[#allocation2 + $0x200] sm:$0xff] %vm1145_vm2, %v9218_v42 }
  0xe9   : > { %1211 = vst.msk [vmem:[#allocation2 + $0x208] sm:$0xff] %vm1145_vm2, %v9218_v42 }
  0xea   : > { %873 = vrot.lane.b32.xlu0 %v9676_v49, %s9216_s12  ;;  %909 = vrot.lane.b32.xlu2 %v9725_v33, %s9216_s12  ;;  %v432_v33 = vpop.f32.mrf.mxu3  ;;  %1212 = vst.msk [vmem:[#allocation2 + $0x210] sm:$0xff] %vm1145_vm2, %v9218_v42 }
  0xeb   : > { %907 = vrot.lane.b32.xlu1 %v9711_v22, %s9216_s12  ;;  %v850_v22 = vmax.f32 %v818_v19, %v9987_v7  ;;  %v10031_v16 = vpop.permute.xlu2 %985  ;;  %1213 = vst.msk [vmem:[#allocation2 + $0x218] sm:$0xff] %vm1145_vm2, %v9218_v42  ;;  %v433_v29 = vadd.f32 %v10098_v25, %v432_v33 }
  0xec   : > { %v9999_v49 = vpop.permute.xlu0 %1007  ;;  %1214 = vst.msk [vmem:[#allocation2 + $0x220] sm:$0xff] %vm1145_vm2, %v9218_v42 }
  0xed   : > { %v10005_v17 = vpop.permute.xlu1 %1009  ;;  %1215 = vst.msk [vmem:[#allocation2 + $0x228] sm:$0xff] %vm1145_vm2, %v9218_v42  ;;  %v492_v46 = vmax.f32 %v433_v29, 0.0 }
  0xee   : > { %1216 = vst.msk [vmem:[#allocation2 + $0x230] sm:$0xff] %vm1145_vm2, %v9218_v42 }
  0xef   : > { %8391 = vmatmul.msk.f32.gmra.mxu0 %vm1145_vm2, %v2023_v45  ;;  %1217 = vst.msk [vmem:[#allocation2 + $0x238] sm:$0xff] %vm1145_vm2, %v9218_v42  ;;  %v1098_v58 = vsel %vm1079_vm3, %v492_v46, %v9991_v53 }
  0xf0   : > { %v10077_v62 = vpop.f32.mrf.mxu0  ;;  %1218 = vst.msk [vmem:[#allocation2 + $0x240] sm:$0xff] %vm1145_vm2, %v9218_v42 }
  0xf1   : > { %1219 = vst.msk [vmem:[#allocation2 + $0x248] sm:$0xff] %vm1145_vm2, %v9218_v42 }
  0xf2   : > { %1037 = vrot.lane.b32.xlu0 %v850_v22, %s9217_s13  ;;  %v435_v24 = vpop.f32.mrf.mxu3  ;;  %1220 = vst.msk [vmem:[#allocation2 + $0x250] sm:$0xff] %vm1145_vm2, %v9218_v42 }
  0xf3   : > { %1001 = vrot.lane.b32.xlu1 %v832_v57, %s9217_s13  ;;  %v10070_v21 = vpop.permute.xlu2 %859  ;;  %1221 = vst.msk [vmem:[#allocation2 + $0x258] sm:$0xff] %vm1145_vm2, %v9218_v42 }
  0xf4   : > { %v10029_v63 = vpop.permute.xlu0 %1015  ;;  %1222 = vst.msk [vmem:[#allocation2 + $0x260] sm:$0xff] %vm1145_vm2, %v9218_v42 }
  0xf5   : > { %v10035_v20 = vpop.permute.xlu1 %1013  ;;  %1223 = vst.msk [vmem:[#allocation2 + $0x268] sm:$0xff] %vm1145_vm2, %v9218_v42 }
  0xf6   : > { %1224 = vst.msk [vmem:[#allocation2 + $0x270] sm:$0xff] %vm1145_vm2, %v9218_v42 }
  0xf7   : > { %1225 = vst.msk [vmem:[#allocation2 + $0x278] sm:$0xff] %vm1145_vm2, %v9218_v42 }
  0xf9   : > { %v10110_v48 = vpop.f32.mrf.mxu0 }
  0xfa   : > { %877 = vrot.lane.b32.xlu0 %v9535_v18, %s9216_s12  ;;  %v438_v61 = vpop.f32.mrf.mxu3 }
  0xfb   : > { %875 = vrot.lane.b32.xlu1 %v9530_v15, %s9216_s12  ;;  %v834_v15 = vmax.f32 %v802_v27, %v9576_v55  ;;  %v833_v55 = vmax.f32 %v801_v23, %v9557_v32  ;;  %v430_v32 = vadd.f32 %v10098_v25, %v9975_v39  ;;  %v10108_v10 = vpop.permute.xlu2 %1023  ;;  %v1082_v27 = vsel %vm1079_vm3, %v476_v56, %v10070_v21 }
  0xfc   : > { %v10062_v11 = vpop.permute.xlu0 %855 }
  0xfd   : > { %v890_v18 = vpop.permute.xlu1 %889  ;;  %1003 = vrot.lane.b32.xlu2 %v833_v55, %s9217_s13  ;;  %v491_v34 = vmax.f32 %v430_v32, 0.0  ;;  %v1080_v53 = vsel %vm1079_vm3, %v474_v26, %v10062_v11 }
 0x101   : > { %v10141_v38 = vpop.f32.mrf.mxu0 }
 0x102   : > { %v441_v50 = vpop.f32.mrf.mxu3 }
 0x103   : > { %1005 = vrot.lane.b32.xlu1 %v834_v15, %s9217_s13  ;;  %v898_v19 = vpop.permute.xlu2 %897  ;;  %v442_v23 = vadd.f32 %v10098_v25, %v441_v50 }
 0x104   : > { %v1020_v52 = vpop.permute.xlu0 %1019 }
 0x105   : > { %v984_v59 = vpop.permute.xlu1 %983  ;;  %911 = vrot.lane.b32.xlu2 %v9753_v51, %s9216_s12  ;;  %v1097_v51 = vsel %vm1079_vm3, %v491_v34, %v890_v18  ;;  %v1131_v33 = vsel %vm1112_vm4, %v1098_v58, %v1020_v52  ;;  %v495_v52 = vmax.f32 %v442_v23, 0.0 }
 0x106   : > { %v1130_v54 = vsel %vm1112_vm4, %v1097_v51, %v9950_v47  ;;  %v1113_v6 = vsel %vm1112_vm4, %v1080_v53, %v984_v59  ;;  %v439_v47 = vadd.f32 %v10098_v25, %v438_v61  ;;  %1245 = vst.msk [vmem:[#allocation2 + $0x168] sm:$0xff] %vm1145_vm2, %v1131_v33  ;;  %v388_v59 = vadd.f32 %v10098_v25, %v10015_v60 }
 0x107   : > { %1244 = vst.msk [vmem:[#allocation2 + $0x150] sm:$0xff] %vm1145_vm2, %v1130_v54  ;;  %v1101_v9 = vsel %vm1079_vm3, %v495_v52, %v898_v19 }
 0x108   : > { %1227 = vst.msk [vmem:[#allocation2 + $0x48] sm:$0xff] %vm1145_vm2, %v1113_v6  ;;  %v494_v45 = vmax.f32 %v439_v47, 0.0  ;;  %v477_v60 = vmax.f32 %v388_v59, 0.0 }
 0x109   : > { %v10173_v15 = vpop.f32.mrf.mxu0 }
 0x10a   : > { %v444_v18 = vpop.f32.mrf.mxu3 }
 0x10b   : > { %913 = vrot.lane.b32.xlu1 %v9767_v0, %s9216_s12  ;;  %v436_v0 = vadd.f32 %v10098_v25, %v435_v24  ;;  %v992_v21 = vpop.permute.xlu2 %991  ;;  %v445_v19 = vadd.f32 %v10098_v25, %v444_v18 }
 0x10c   : > { %v894_v5 = vpop.permute.xlu0 %893 }
 0x10d   : > { %v858_v36 = vpop.permute.xlu1 %857  ;;  %v493_v39 = vmax.f32 %v436_v0, 0.0 }
 0x10e   : > { %v1081_v22 = vsel %vm1079_vm3, %v475_v1, %v858_v36 }
 0x10f   : > { %v1099_v8 = vsel %vm1079_vm3, %v493_v39, %v894_v5  ;;  %v1114_v24 = vsel %vm1112_vm4, %v1081_v22, %v10031_v16  ;;  %v1297_v29 = vld [vmem:[#allocation2 + $0x47] sm:$0xff]  ;;  %v391_v39 = vadd.f32 %v10098_v25, %v10047_v31  ;;  %v394_v22 = vadd.f32 %v10098_v25, %v10077_v62 }
 0x110   : > { %1228 = vst.msk [vmem:[#allocation2 + $0x50] sm:$0xff] %vm1145_vm2, %v1114_v24  ;;  %v1749_v5 = vld [vmem:[#allocation2 + $0x48] sm:$0xff]  ;;  %8296 = vmatmul.msk.f32.gmra.mxu1 %vm1145_vm2, %v1297_v29 }
 0x111   : > { %8360 = vmatmul.msk.f32.gmra.mxu3 %vm1145_vm2, %v1749_v5  ;;  %v10187_v36 = vpop.f32.mrf.mxu0  ;;  %v478_v54 = vmax.f32 %v391_v39, 0.0  ;;  %v397_v39 = vadd.f32 %v10098_v25, %v10110_v48  ;;  %v2328_v48 = vld [vmem:[%s14333_s3 + $0x48] sm:$0xff] }
 0x112   : > { %v447_v46 = vpop.f32.mrf.mxu3  ;;  %2439 = vmatpush.msrb.mxu1 %v2328_v48 }
 0x113   : > { %v866_v58 = vpop.permute.xlu2 %865 }
 0x114   : > { %v988_v57 = vpop.permute.xlu0 %987 }
 0x115   : > { %v1022_v3 = vpop.permute.xlu1 %1021  ;;  %v1115_v11 = vsel %vm1112_vm4, %v1082_v27, %v988_v57  ;;  %v479_v27 = vmax.f32 %v394_v22, 0.0 }
 0x116   : > { %v1132_v42 = vsel %vm1112_vm4, %v1099_v8, %v1022_v3  ;;  %1229 = vst.msk [vmem:[#allocation2 + $0x68] sm:$0xff] %vm1145_vm2, %v1115_v11  ;;  %v496_v8 = vmax.f32 %v445_v19, 0.0 }
 0x117   : > { %1246 = vst.msk [vmem:[#allocation2 + $0x170] sm:$0xff] %vm1145_vm2, %v1132_v42  ;;  %v2024_v34 = vld [vmem:[#allocation2 + $0x49] sm:$0xff]  ;;  %v2025_v26 = vld [vmem:[#allocation2 + $0x51] sm:$0xff]  ;;  %v1085_v42 = vsel %vm1079_vm3, %v479_v27, %v866_v58 }
 0x118   : > { %8392 = vmatmul.msk.f32.gmra.mxu0 %vm1145_vm2, %v2024_v34  ;;  %v1298_v14 = vld [vmem:[#allocation2 + $0x4f] sm:$0xff] }
 0x119   : > { %v1750_v51 = vld [vmem:[#allocation2 + $0x50] sm:$0xff]  ;;  %8297 = vmatmul.msk.f32.gmra.mxu1 %vm1145_vm2, %v1298_v14  ;;  %v10200_v56 = vpop.f32.mrf.mxu0 }
 0x11a   : > { %8361 = vmatmul.msk.f32.gmra.mxu3 %vm1145_vm2, %v1750_v51  ;;  %v450_v53 = vpop.f32.mrf.mxu3 }
 0x11b   : > { %v1030_v11 = vpop.permute.xlu2 %1029 }
 0x11c   : > { %v862_v16 = vpop.permute.xlu0 %861 }
 0x11d   : > { %v896_v55 = vpop.permute.xlu1 %895  ;;  %v10206_v3 = vld [vmem:[#allocation2 + $0x67] sm:$0xff] }
 0x11e   : > { %v1100_v61 = vsel %vm1079_vm3, %v494_v45, %v896_v55  ;;  %v1751_v31 = vld [vmem:[#allocation2 + $0x68] sm:$0xff] }
 0x11f   : > { %v1133_v32 = vsel %vm1112_vm4, %v1100_v61, %v10108_v10  ;;  %v1083_v10 = vsel %vm1079_vm3, %v477_v60, %v862_v16 }
 0x120   : > { %1247 = vst.msk [vmem:[#allocation2 + $0x188] sm:$0xff] %vm1145_vm2, %v1133_v32  ;;  %8393 = vmatmul.msk.f32.gmra.mxu0 %vm1145_vm2, %v2025_v26  ;;  %v1292_v32 = vld [vmem:[%s14333_s3 + $0x8] sm:$0xff] }
 0x121   : > { %8298 = vmatmul.msk.f32.gmra.mxu1 %vm1145_vm2, %v10206_v3  ;;  %v10214_v62 = vpop.f32.mrf.mxu0  ;;  %1646 = vmatpush.msrb.mxu2 %v1292_v32 }
 0x122   : > { %8362 = vmatmul.msk.f32.gmra.mxu3 %vm1145_vm2, %v1751_v31  ;;  %v453_v59 = vpop.f32.mrf.mxu3 }
 0x123   : > { %v904_v60 = vpop.permute.xlu2 %903 }
 0x124   : > { %v1026_v0 = vpop.permute.xlu0 %1025 }
 0x125   : > { %v1134_v50 = vsel %vm1112_vm4, %v1101_v9, %v1026_v0  ;;  %v990_v37 = vpop.permute.xlu1 %989  ;;  %v451_v9 = vadd.f32 %v10098_v25, %v450_v53  ;;  %v480_v53 = vmax.f32 %v397_v39, 0.0 }
 0x126   : > { %1248 = vst.msk [vmem:[#allocation2 + $0x190] sm:$0xff] %vm1145_vm2, %v1134_v50  ;;  %v1116_v1 = vsel %vm1112_vm4, %v1083_v10, %v990_v37 }
 0x127   : > { %1230 = vst.msk [vmem:[#allocation2 + $0x70] sm:$0xff] %vm1145_vm2, %v1116_v1  ;;  %v498_v37 = vmax.f32 %v451_v9, 0.0 }
 0x129   : > { %v414_v5 = vpop.f32.mrf.mxu0 }
 0x12a   : > { %v10248_v22 = vpop.f32.mrf.mxu3 }
 0x12c   : > { %v900_v57 = vpop.permute.xlu0 %899 }
 0x12d   : > { %v864_v33 = vpop.permute.xlu1 %863  ;;  %v1102_v18 = vsel %vm1079_vm3, %v496_v8, %v900_v57 }
 0x12e   : > { %v1084_v6 = vsel %vm1079_vm3, %v478_v54, %v864_v33  ;;  %v2026_v24 = vld [vmem:[#allocation2 + $0x69] sm:$0xff]  ;;  %v2027_v29 = vld [vmem:[#allocation2 + $0x71] sm:$0xff] }
 0x12f   : > { %v1117_v47 = vsel %vm1112_vm4, %v1084_v6, %v992_v21  ;;  %8394 = vmatmul.msk.f32.gmra.mxu0 %vm1145_vm2, %v2026_v24  ;;  %v448_v21 = vadd.f32 %v10098_v25, %v447_v46  ;;  %v10221_v55 = vld [vmem:[#allocation2 + $0x6f] sm:$0xff]  ;;  %v415_v46 = vadd.f32 %v10098_v25, %v414_v5  ;;  %v998_v6 = vpop.permute.xlu2 %997 }
 0x130   : > { %1231 = vst.msk [vmem:[#allocation2 + $0x88] sm:$0xff] %vm1145_vm2, %v1117_v47  ;;  %v1752_v52 = vld [vmem:[#allocation2 + $0x70] sm:$0xff]  ;;  %8299 = vmatmul.msk.f32.gmra.mxu1 %vm1145_vm2, %v10221_v55 }
 0x131   : > { %8363 = vmatmul.msk.f32.gmra.mxu3 %vm1145_vm2, %v1752_v52  ;;  %v497_v34 = vmax.f32 %v448_v21, 0.0  ;;  %v486_v10 = vmax.f32 %v415_v46, 0.0 }
 0x133   : > { %v1092_v58 = vsel %vm1079_vm3, %v486_v10, %v9907_v35  ;;  %v417_v35 = vpop.f32.mrf.mxu0 }
 0x134   : > { %v994_v45 = vpop.permute.xlu0 %993  ;;  %v1125_v54 = vsel %vm1112_vm4, %v1092_v58, %v9999_v49  ;;  %v1104_v49 = vsel %vm1079_vm3, %v498_v37, %v904_v60  ;;  %v418_v57 = vadd.f32 %v10098_v25, %v417_v35 }
 0x135   : > { %v1118_v23 = vsel %vm1112_vm4, %v1085_v42, %v994_v45  ;;  %v1028_v16 = vpop.permute.xlu1 %1027  ;;  %1239 = vst.msk [vmem:[#allocation2 + $0x108] sm:$0xff] %vm1145_vm2, %v1125_v54 }
 0x136   : > { %1232 = vst.msk [vmem:[#allocation2 + $0x90] sm:$0xff] %vm1145_vm2, %v1118_v23  ;;  %v1135_v61 = vsel %vm1112_vm4, %v1102_v18, %v1028_v16  ;;  %v487_v31 = vmax.f32 %v418_v57, 0.0  ;;  %v400_v23 = vadd.f32 %v10098_v25, %v10141_v38  ;;  %v454_v38 = vadd.f32 %v10098_v25, %v453_v59 }
 0x137   : > { %1249 = vst.msk [vmem:[#allocation2 + $0x1a8] sm:$0xff] %vm1145_vm2, %v1135_v61  ;;  %8395 = vmatmul.msk.f32.gmra.mxu0 %vm1145_vm2, %v2027_v29  ;;  %v10235_v14 = vld [vmem:[#allocation2 + $0x87] sm:$0xff]  ;;  %v872_v10 = vpop.permute.xlu2 %871 }
 0x138   : > { %v10237_v51 = vld [vmem:[#allocation2 + $0x88] sm:$0xff]  ;;  %8300 = vmatmul.msk.f32.gmra.mxu1 %vm1145_vm2, %v10235_v14  ;;  %v1093_v42 = vsel %vm1079_vm3, %v487_v31, %v9961_v13  ;;  %v459_v13 = vpop.f32.mrf.mxu3  ;;  %v481_v61 = vmax.f32 %v400_v23, 0.0 }
 0x139   : > { %8364 = vmatmul.msk.f32.gmra.mxu3 %vm1145_vm2, %v10237_v51  ;;  %v1126_v45 = vsel %vm1112_vm4, %v1093_v42, %v10005_v17 }
 0x13a   : > { %1240 = vst.msk [vmem:[#allocation2 + $0x110] sm:$0xff] %vm1145_vm2, %v1126_v45 }
 0x13b   : > { %v420_v52 = vpop.f32.mrf.mxu0 }
 0x13c   : > { %v868_v0 = vpop.permute.xlu0 %867  ;;  %v1309_v16 = vld [vmem:[#allocation2 + $0x107] sm:$0xff]  ;;  %v421_v17 = vadd.f32 %v10098_v25, %v420_v52 }
 0x13d   : > { %v902_v50 = vpop.permute.xlu1 %901  ;;  %v2028_v19 = vld [vmem:[#allocation2 + $0x89] sm:$0xff]  ;;  %v1086_v8 = vsel %vm1079_vm3, %v480_v53, %v868_v0  ;;  %v2029_v21 = vld [vmem:[#allocation2 + $0x91] sm:$0xff]  ;;  %8308 = vmatmul.msk.f32.vlgmr.msra.gmra.mxu2 %vm1145_vm2, %v1309_v16 }
 0x13e   : > { %v1103_v1 = vsel %vm1079_vm3, %v497_v34, %v902_v50  ;;  %v10263_v27 = vld [vmem:[#allocation2 + $0x8f] sm:$0xff]  ;;  %v488_v29 = vmax.f32 %v421_v17, 0.0  ;;  %v403_v34 = vadd.f32 %v10098_v25, %v10173_v15  ;;  %v499_v50 = vmax.f32 %v454_v38, 0.0 }
 0x13f   : > { %v1136_v26 = vsel %vm1112_vm4, %v1103_v1, %v1030_v11  ;;  %8396 = vmatmul.msk.f32.gmra.mxu0 %vm1145_vm2, %v2028_v19  ;;  %v10265_v11 = vld [vmem:[#allocation2 + $0x90] sm:$0xff] }
 0x140   : > { %1250 = vst.msk [vmem:[#allocation2 + $0x1b0] sm:$0xff] %vm1145_vm2, %v1136_v26  ;;  %8301 = vmatmul.msk.f32.gmra.mxu1 %vm1145_vm2, %v10263_v27  ;;  %v1094_v0 = vsel %vm1079_vm3, %v488_v29, %v9806_v30  ;;  %v482_v30 = vmax.f32 %v403_v34, 0.0  ;;  %v10307_v26 = vpop.f32.mrf.mxu3 }
 0x141   : > { %8365 = vmatmul.msk.f32.gmra.mxu3 %vm1145_vm2, %v10265_v11  ;;  %v1127_v37 = vsel %vm1112_vm4, %v1094_v0, %v9903_v12  ;;  %v1310_v1 = vld [vmem:[#allocation2 + $0x10f] sm:$0xff] }
 0x142   : > { %1241 = vst.msk [vmem:[#allocation2 + $0x128] sm:$0xff] %vm1145_vm2, %v1127_v37  ;;  %v1088_v12 = vsel %vm1079_vm3, %v482_v30, %v872_v10  ;;  %v409_v37 = vadd.f32 %v10098_v25, %v10200_v56  ;;  %v2327_v30 = vld [vmem:[%s14333_s3 + $0x40] sm:$0xff] }
 0x143   : > { %v423_v15 = vpop.f32.mrf.mxu0  ;;  %2440 = vmatpush.msrb.mxu1 %v2327_v30  ;;  %v10446_v30 = vld [vmem:[#allocation2 + $0x110] sm:$0xff] }
 0x144   : > { %v1032_v33 = vpop.permute.xlu0 %1031  ;;  %v424_v58 = vadd.f32 %v10098_v25, %v423_v15 }
 0x145   : > { %v1137_v47 = vsel %vm1112_vm4, %v1104_v49, %v1032_v33  ;;  %v996_v24 = vpop.permute.xlu1 %995  ;;  %8309 = vmatmul.msk.f32.gmra.mxu2 %vm1145_vm2, %v1310_v1  ;;  %v457_v49 = vadd.f32 %v10098_v25, %v10248_v22 }
 0x146   : > { %1251 = vst.msk [vmem:[#allocation2 + $0x1c8] sm:$0xff] %vm1145_vm2, %v1137_v47  ;;  %v1119_v18 = vsel %vm1112_vm4, %v1086_v8, %v996_v24  ;;  %v489_v54 = vmax.f32 %v424_v58, 0.0  ;;  %v1036_v8 = vpop.permute.xlu2 %1035  ;;  %v484_v58 = vmax.f32 %v409_v37, 0.0 }
 0x147   : > { %1233 = vst.msk [vmem:[#allocation2 + $0xa8] sm:$0xff] %vm1145_vm2, %v1119_v18  ;;  %8397 = vmatmul.msk.f32.gmra.mxu0 %vm1145_vm2, %v2029_v21  ;;  %v500_v24 = vmax.f32 %v457_v49, 0.0  ;;  %v460_v18 = vadd.f32 %v10098_v25, %v459_v13  ;;  %v406_v13 = vadd.f32 %v10098_v25, %v10187_v36 }
 0x148   : > { %v1095_v53 = vsel %vm1079_vm3, %v489_v54, %v9955_v2  ;;  %v10332_v21 = vpop.f32.mrf.mxu3 }
 0x149   : > { %v1128_v47 = vsel %vm1112_vm4, %v1095_v53, %v10035_v20  ;;  %v1311_v22 = vld [vmem:[#allocation2 + $0x127] sm:$0xff]  ;;  %v501_v16 = vmax.f32 %v460_v18, 0.0 }
 0x14a   : > { %1242 = vst.msk [vmem:[#allocation2 + $0x130] sm:$0xff] %vm1145_vm2, %v1128_v47 }
 0x14b   : > { %v10395_v47 = vpop.f32.mrf.mxu1 }
 0x14c   : > { %v906_v32 = vpop.permute.xlu0 %905  ;;  %v426_v2 = vpop.f32.mrf.mxu0  ;;  %14348 = vst [vmem:[#allocation7_spill] sm:$0xff] %v10395_v47 }
 0x14d   : > { %v870_v5 = vpop.permute.xlu1 %869  ;;  %v1105_v39 = vsel %vm1079_vm3, %v499_v50, %v906_v32  ;;  %8310 = vmatmul.msk.f32.gmra.mxu2 %vm1145_vm2, %v1311_v22  ;;  %v427_v42 = vadd.f32 %v10098_v25, %v426_v2 }
 0x14e   : > { %v1087_v9 = vsel %vm1079_vm3, %v481_v61, %v870_v5  ;;  %v10288_v46 = vld [vmem:[#allocation2 + $0xa7] sm:$0xff] }
 0x14f   : > { %v10290_v60 = vld [vmem:[#allocation2 + $0xa8] sm:$0xff]  ;;  %v1120_v59 = vsel %vm1112_vm4, %v1087_v9, %v998_v6  ;;  %8302 = vmatmul.msk.f32.gmra.mxu1 %vm1145_vm2, %v10288_v46  ;;  %v490_v45 = vmax.f32 %v427_v42, 0.0 }
 0x150   : > { %1234 = vst.msk [vmem:[#allocation2 + $0xb0] sm:$0xff] %vm1145_vm2, %v1120_v59  ;;  %8366 = vmatmul.msk.f32.gmra.mxu3 %vm1145_vm2, %v10290_v60  ;;  %v10365_v1 = vpop.f32.mrf.mxu3  ;;  %v1315_v42 = vld [vmem:[#allocation2 + $0x167] sm:$0xff] }
 0x151   : > { %v1096_v61 = vsel %vm1079_vm3, %v490_v45, %v9856_v41  ;;  %v10346_v34 = vld [vmem:[#allocation2 + $0x12f] sm:$0xff]  ;;  %v910_v41 = vpop.permute.xlu2 %909 }
 0x152   : > { %v1129_v5 = vsel %vm1112_vm4, %v1096_v61, %v10029_v63  ;;  %v1107_v36 = vsel %vm1079_vm3, %v501_v16, %v910_v41  ;;  %v483_v63 = vmax.f32 %v406_v13, 0.0  ;;  %v1316_v13 = vld [vmem:[#allocation2 + $0x16f] sm:$0xff]  ;;  %v1291_v41 = vld [vmem:[%s14333_s3] sm:$0xff] }
 0x153   : > { %1243 = vst.msk [vmem:[#allocation2 + $0x148] sm:$0xff] %vm1145_vm2, %v1129_v5  ;;  %v10417_v61 = vpop.f32.mrf.mxu1  ;;  %1647 = vmatpush.msrb.mxu2 %v1291_v41  ;;  %v2299_v41 = vld [vmem:[#allocation2 + $0x4a] sm:$0xff] }
 0x154   : > { %v1000_v19 = vpop.permute.xlu0 %999  ;;  %14351 = vst [vmem:[#allocation10_spill] sm:$0xff] %v10417_v61  ;;  %v10751_v61 = vld [vmem:[#allocation2 + $0x4f] sm:$0xff] }
 0x155   : > { %v1121_v35 = vsel %vm1112_vm4, %v1088_v12, %v1000_v19  ;;  %v1034_v48 = vpop.permute.xlu1 %1033  ;;  %8311 = vmatmul.msk.f32.gmra.mxu2 %vm1145_vm2, %v10346_v34  ;;  %14417 = vst [vmem:[#allocation76_spill] sm:$0xff] %v10751_v61 }
 0x156   : > { %1235 = vst.msk [vmem:[#allocation2 + $0xc8] sm:$0xff] %vm1145_vm2, %v1121_v35  ;;  %v1138_v57 = vsel %vm1112_vm4, %v1105_v39, %v1034_v48  ;;  %v412_v48 = vadd.f32 %v10098_v25, %v10214_v62 }
 0x157   : > { %1252 = vst.msk [vmem:[#allocation2 + $0x1d0] sm:$0xff] %vm1145_vm2, %v1138_v57  ;;  %v10317_v33 = vld [vmem:[#allocation2 + $0xaf] sm:$0xff] }
 0x158   : > { %v10319_v31 = vld [vmem:[#allocation2 + $0xb0] sm:$0xff]  ;;  %8303 = vmatmul.msk.f32.gmra.mxu1 %vm1145_vm2, %v10317_v33  ;;  %v10390_v53 = vpop.f32.mrf.mxu3  ;;  %v485_v25 = vmax.f32 %v412_v48, 0.0 }
 0x159   : > { %v2030_v6 = vld [vmem:[#allocation2 + $0xa9] sm:$0xff]  ;;  %8367 = vmatmul.msk.f32.gmra.mxu3 %vm1145_vm2, %v10319_v31  ;;  %v2031_v29 = vld [vmem:[#allocation2 + $0xb1] sm:$0xff]  ;;  %v1004_v39 = vpop.permute.xlu2 %1003 }
 0x15a   : > { %8398 = vmatmul.msk.f32.gmra.mxu0 %vm1145_vm2, %v2030_v6  ;;  %v10367_v15 = vld [vmem:[#allocation2 + $0x147] sm:$0xff]  ;;  %v10388_v57 = vld [vmem:[#allocation2 + $0x14f] sm:$0xff] }
 0x15c   : > { %v874_v20 = vpop.permute.xlu0 %873 }
 0x15d   : > { %v908_v23 = vpop.permute.xlu1 %907  ;;  %v10335_v17 = vld [vmem:[#allocation2 + $0xc7] sm:$0xff]  ;;  %v1089_v0 = vsel %vm1079_vm3, %v483_v63, %v874_v20  ;;  %8312 = vmatmul.msk.f32.gmra.mxu2 %vm1145_vm2, %v10367_v15  ;;  %v10409_v20 = vpop.f32.mrf.mxu0 }
 0x15e   : > { %v1106_v52 = vsel %vm1079_vm3, %v500_v24, %v908_v23  ;;  %v10337_v38 = vld [vmem:[#allocation2 + $0xc8] sm:$0xff]  ;;  %14349 = vst [vmem:[#allocation8_spill] sm:$0xff] %v10409_v20  ;;  %v2314_v20 = vld [vmem:[#allocation2 + $0x132] sm:$0xff] }
 0x15f   : > { %v1139_v32 = vsel %vm1112_vm4, %v1106_v52, %v1036_v8  ;;  %v10433_v63 = vld [vmem:[#allocation2 + $0x108] sm:$0xff] }
 0x160   : > { %1253 = vst.msk [vmem:[#allocation2 + $0x1e8] sm:$0xff] %vm1145_vm2, %v1139_v32  ;;  %8304 = vmatmul.msk.f32.gmra.mxu1 %vm1145_vm2, %v10335_v17  ;;  %v10411_v45 = vpop.f32.mrf.mxu3 }
 0x161   : > { %8368 = vmatmul.msk.f32.gmra.mxu3 %vm1145_vm2, %v10337_v38  ;;  %14350 = vst [vmem:[#allocation9_spill] sm:$0xff] %v10411_v45 }
 0x162   : > { %8399 = vmatmul.msk.f32.gmra.mxu0 %vm1145_vm2, %v2031_v29  ;;  %v2295_v29 = vld [vmem:[#allocation2 + $0xa] sm:$0xff] }
 0x164   : > { %v1038_v9 = vpop.permute.xlu0 %1037 }
 0x165   : > { %v1002_v10 = vpop.permute.xlu1 %1001  ;;  %v1140_v50 = vsel %vm1112_vm4, %v1107_v36, %v1038_v9  ;;  %8313 = vmatmul.msk.f32.gmra.mxu2 %vm1145_vm2, %v10388_v57  ;;  %v10425_v32 = vpop.f32.mrf.mxu0  ;;  %v1317_v9 = vld [vmem:[#allocation2 + $0x187] sm:$0xff] }
 0x166   : > { %v1122_v59 = vsel %vm1112_vm4, %v1089_v0, %v1002_v10  ;;  %1254 = vst.msk [vmem:[#allocation2 + $0x1f0] sm:$0xff] %vm1145_vm2, %v1140_v50  ;;  %v10438_v0 = vpop.f32.mrf.mxu1  ;;  %v2296_v10 = vld [vmem:[#allocation2 + $0x12] sm:$0xff] }
 0x167   : > { %1236 = vst.msk [vmem:[#allocation2 + $0xd0] sm:$0xff] %vm1145_vm2, %v1122_v59  ;;  %v2036_v59 = vld [vmem:[#allocation2 + $0x109] sm:$0xff] }
 0x168   : > { %14352 = vst [vmem:[#allocation11_spill] sm:$0xff] %v10425_v32  ;;  %v10427_v5 = vpop.f32.mrf.mxu3 }
 0x169   : > { %14353 = vst [vmem:[#allocation12_spill] sm:$0xff] %v10427_v5 }
 0x16a   : > { %14354 = vst [vmem:[#allocation13_spill] sm:$0xff] %v10438_v0  ;;  %v2313_v0 = vld [vmem:[#allocation2 + $0x12a] sm:$0xff] }
 0x16c   : > { %v878_v6 = vpop.permute.xlu0 %877 }
 0x16d   : > { %v876_v12 = vpop.permute.xlu1 %875  ;;  %v1091_v62 = vsel %vm1079_vm3, %v485_v25, %v878_v6  ;;  %8314 = vmatmul.msk.f32.gmra.mxu2 %vm1145_vm2, %v1315_v42  ;;  %v10441_v50 = vpop.f32.mrf.mxu0  ;;  %v2298_v25 = vld [vmem:[#allocation2 + $0x32] sm:$0xff] }
 0x16e   : > { %v1090_v19 = vsel %vm1079_vm3, %v484_v58, %v876_v12  ;;  %v10375_v54 = vld [vmem:[#allocation2 + $0xcf] sm:$0xff]  ;;  %14355 = vst [vmem:[#allocation14_spill] sm:$0xff] %v10441_v50 }
 0x16f   : > { %v10377_v56 = vld [vmem:[#allocation2 + $0xd0] sm:$0xff]  ;;  %v1123_v49 = vsel %vm1112_vm4, %v1090_v19, %v1004_v39  ;;  %8305 = vmatmul.msk.f32.gmra.mxu1 %vm1145_vm2, %v10375_v54  ;;  %v10452_v39 = vpop.f32.mrf.mxu1 }
 0x170   : > { %v2032_v35 = vld [vmem:[#allocation2 + $0xc9] sm:$0xff]  ;;  %8369 = vmatmul.msk.f32.gmra.mxu3 %vm1145_vm2, %v10377_v56  ;;  %1237 = vst.msk [vmem:[#allocation2 + $0xe8] sm:$0xff] %vm1145_vm2, %v1123_v49  ;;  %v2033_v2 = vld [vmem:[#allocation2 + $0xd1] sm:$0xff]  ;;  %v10443_v37 = vpop.f32.mrf.mxu3 }
 0x171   : > { %8400 = vmatmul.msk.f32.gmra.mxu0 %vm1145_vm2, %v2032_v35  ;;  %14356 = vst [vmem:[#allocation15_spill] sm:$0xff] %v10443_v37  ;;  %v1318_v58 = vld [vmem:[#allocation2 + $0x18f] sm:$0xff]  ;;  %v1319_v49 = vld [vmem:[#allocation2 + $0x1a7] sm:$0xff] }
 0x172   : > { %14357 = vst [vmem:[#allocation16_spill] sm:$0xff] %v10452_v39  ;;  %v2297_v12 = vld [vmem:[#allocation2 + $0x2a] sm:$0xff] }
 0x173   : > { %v2037_v19 = vld [vmem:[#allocation2 + $0x111] sm:$0xff]  ;;  %v10455_v35 = vld [vmem:[#allocation2 + $0x128] sm:$0xff] }
 0x174   : > { %v2847_v37 = vld [vmem:[#allocation2 + $0x2f] sm:$0xff] }
 0x175   : > { %v1006_v8 = vpop.permute.xlu1 %1005  ;;  %8315 = vmatmul.msk.f32.gmra.mxu2 %vm1145_vm2, %v1316_v13  ;;  %v10458_v48 = vpop.f32.mrf.mxu0 }
 0x176   : > { %v1124_v22 = vsel %vm1112_vm4, %v1091_v62, %v1006_v8  ;;  %14358 = vst [vmem:[#allocation17_spill] sm:$0xff] %v10458_v48  ;;  %v2038_v8 = vld [vmem:[#allocation2 + $0x129] sm:$0xff] }
 0x177   : > { %1238 = vst.msk [vmem:[#allocation2 + $0xf0] sm:$0xff] %vm1145_vm2, %v1124_v22  ;;  %v10399_v24 = vld [vmem:[#allocation2 + $0xe7] sm:$0xff]  ;;  %v10468_v22 = vld [vmem:[#allocation2 + $0x130] sm:$0xff] }
 0x178   : > { %v10401_v18 = vld [vmem:[#allocation2 + $0xe8] sm:$0xff]  ;;  %8306 = vmatmul.msk.f32.gmra.mxu1 %vm1145_vm2, %v10399_v24  ;;  %v10462_v6 = vpop.f32.mrf.mxu3 }
 0x179   : > { %8401 = vmatmul.msk.f32.gmra.mxu0 %vm1145_vm2, %v2033_v2  ;;  %8370 = vmatmul.msk.f32.gmra.mxu3 %vm1145_vm2, %v10401_v18  ;;  %14359 = vst [vmem:[#allocation18_spill] sm:$0xff] %v10462_v6  ;;  %v1320_v2 = vld [vmem:[#allocation2 + $0x1af] sm:$0xff]  ;;  %v645_v48 = vld [vmem:[#allocation3 + $0x227] sm:$0xff] }
 0x17d   : > { %8316 = vmatmul.msk.f32.gmra.mxu2 %vm1145_vm2, %v1317_v9  ;;  %v1321_v9 = vld [vmem:[#allocation2 + $0x1c7] sm:$0xff]  ;;  %v914_v45 = vpop.permute.xlu1 %913 }
 0x17e   : > { %v2034_v23 = vld [vmem:[#allocation2 + $0xe9] sm:$0xff]  ;;  %v2035_v36 = vld [vmem:[#allocation2 + $0xf1] sm:$0xff] }
 0x17f   : > { %v10413_v16 = vld [vmem:[#allocation2 + $0xef] sm:$0xff] }
 0x180   : > { %v10415_v52 = vld [vmem:[#allocation2 + $0xf0] sm:$0xff]  ;;  %8307 = vmatmul.msk.f32.gmra.mxu1 %vm1145_vm2, %v10413_v16 }
 0x181   : > { %8402 = vmatmul.msk.f32.gmra.mxu0 %vm1145_vm2, %v2034_v23  ;;  %8371 = vmatmul.msk.f32.gmra.mxu3 %vm1145_vm2, %v10415_v52 }
 0x185   : > { %8317 = vmatmul.msk.f32.gmra.mxu2 %vm1145_vm2, %v1318_v58 }
 0x188   : > { %8420 = vmatmul.msk.f32.vlgmr.msrb.gmra.mxu1 %vm1145_vm2, %v2295_v29  ;;  %v2039_v29 = vld [vmem:[#allocation2 + $0x131] sm:$0xff] }
 0x189   : > { %8403 = vmatmul.msk.f32.gmra.mxu0 %vm1145_vm2, %v2035_v36  ;;  %8372 = vmatmul.msk.f32.gmra.mxu3 %vm1145_vm2, %v10433_v63  ;;  %v10481_v36 = vld [vmem:[#allocation2 + $0x148] sm:$0xff] }
 0x18d   : > { %8318 = vmatmul.msk.f32.gmra.mxu2 %vm1145_vm2, %v1319_v49  ;;  %v10465_v62 = vpop.f32.mrf.mxu1  ;;  %v751_v49 = vld [vmem:[#allocation3 + $0x209] sm:$0xff] }
 0x18e   : > { %14360 = vst [vmem:[#allocation19_spill] sm:$0xff] %v10465_v62  ;;  %v753_v62 = vld [vmem:[#allocation3 + $0x229] sm:$0xff] }
 0x190   : > { %8421 = vmatmul.msk.f32.gmra.mxu1 %vm1145_vm2, %v2296_v10 }
 0x191   : > { %8404 = vmatmul.msk.f32.gmra.mxu0 %vm1145_vm2, %v2036_v59  ;;  %8373 = vmatmul.msk.f32.gmra.mxu3 %vm1145_vm2, %v10446_v30 }
 0x194   : > { %v10476_v23 = vpop.f32.mrf.mxu3 }
 0x195   : > { %8319 = vmatmul.msk.f32.gmra.mxu2 %vm1145_vm2, %v1320_v2  ;;  %v10474_v42 = vpop.f32.mrf.mxu0  ;;  %14362 = vst [vmem:[#allocation21_spill] sm:$0xff] %v10476_v23 }
 0x196   : > { %14361 = vst [vmem:[#allocation20_spill] sm:$0xff] %v10474_v42  ;;  %v10478_v13 = vpop.f32.mrf.mxu1 }
 0x197   : > { %14363 = vst [vmem:[#allocation22_spill] sm:$0xff] %v10478_v13  ;;  %v682_v13 = vld [vmem:[#allocation3 + $0x230] sm:$0xff] }
 0x198   : > { %8422 = vmatmul.msk.f32.gmra.mxu1 %vm1145_vm2, %v2297_v12  ;;  %v643_v12 = vld [vmem:[#allocation3 + $0x207] sm:$0xff] }
 0x199   : > { %8405 = vmatmul.msk.f32.gmra.mxu0 %vm1145_vm2, %v2037_v19  ;;  %8374 = vmatmul.msk.f32.gmra.mxu3 %vm1145_vm2, %v10455_v35  ;;  %v679_v19 = vld [vmem:[#allocation3 + $0x208] sm:$0xff] }
 0x19a   : > { %v715_v2 = vmax.f32 %v643_v12, %v679_v19  ;;  %v2041_v19 = vld [vmem:[#allocation2 + $0x151] sm:$0xff] }
 0x19d   : > { %8320 = vmatmul.msk.f32.gmra.mxu2 %vm1145_vm2, %v1321_v9  ;;  %v10487_v10 = vpop.f32.mrf.mxu3  ;;  %v10489_v59 = vpop.f32.mrf.mxu0  ;;  %v1322_v9 = vld [vmem:[#allocation2 + $0x1cf] sm:$0xff] }
 0x19e   : > { %14364 = vst [vmem:[#allocation23_spill] sm:$0xff] %v10487_v10  ;;  %v10491_v58 = vpop.f32.mrf.mxu1 }
 0x19f   : > { %14365 = vst [vmem:[#allocation24_spill] sm:$0xff] %v10489_v59  ;;  %v787_v59 = vmax.f32 %v715_v2, %v751_v49  ;;  %v2604_v49 = vld [vmem:[%s14333_s3 + $0x58] sm:$0xff]  ;;  %v1323_v2 = vld [vmem:[#allocation2 + $0x1e7] sm:$0xff] }
 0x1a0   : > { %8423 = vmatmul.msk.f32.gmra.mxu1 %vm1145_vm2, %v2298_v25  ;;  %14366 = vst [vmem:[#allocation25_spill] sm:$0xff] %v10491_v58  ;;  %v2040_v25 = vld [vmem:[#allocation2 + $0x149] sm:$0xff]  ;;  %2715 = vmatpush.msra.mxu2 %v2604_v49 }
 0x1a1   : > { %8406 = vmatmul.msk.f32.gmra.mxu0 %vm1145_vm2, %v2038_v8  ;;  %8375 = vmatmul.msk.f32.gmra.mxu3 %vm1145_vm2, %v10468_v22  ;;  %v2300_v8 = vld [vmem:[#allocation2 + $0x52] sm:$0xff] }
 0x1a2   : > { %v646_v49 = vld [vmem:[#allocation3 + $0x22f] sm:$0xff] }
 0x1a5   : > { %8321 = vmatmul.msk.f32.gmra.mxu2 %vm1145_vm2, %v1322_v9  ;;  %v10502_v10 = vpop.f32.mrf.mxu3  ;;  %v2042_v9 = vld [vmem:[#allocation2 + $0x169] sm:$0xff] }
 0x1a6   : > { %14367 = vst [vmem:[#allocation26_spill] sm:$0xff] %v10502_v10  ;;  %v680_v10 = vld [vmem:[#allocation3 + $0x210] sm:$0xff] }
 0x1a8   : > { %8424 = vmatmul.msk.f32.gmra.mxu1 %vm1145_vm2, %v2299_v41  ;;  %v10496_v41 = vld [vmem:[#allocation2 + $0x150] sm:$0xff] }
 0x1a9   : > { %8407 = vmatmul.msk.f32.gmra.mxu0 %vm1145_vm2, %v2039_v29  ;;  %8376 = vmatmul.msk.f32.gmra.mxu3 %vm1145_vm2, %v10481_v36  ;;  %v819_v29 = vmax.f32 %v9832_v4, %v9946_v43 }
 0x1ab   : > { %v851_v58 = vmax.f32 %v819_v29, %v787_v59 }
 0x1ac   : > { %v10504_v12 = vpop.f32.mrf.mxu0 }
 0x1ad   : > { %14368 = vst [vmem:[#allocation27_spill] sm:$0xff] %v10504_v12  ;;  %1039 = vrot.lane.b32.xlu0 %v851_v58, %s9217_s13  ;;  %v10507_v4 = vpop.f32.mrf.mxu1  ;;  %v2879_v58 = vld [vmem:[%s14333_s3 + $0x68] sm:$0xff]  ;;  %8322 = vmatmul.msk.f32.gmra.mxu2 %vm1145_vm2, %v1323_v2  ;;  %v10528_v12 = vld [vmem:[#allocation2 + $0x170] sm:$0xff] }
 0x1ae   : > { %14369 = vst [vmem:[#allocation28_spill] sm:$0xff] %v10507_v4  ;;  %2990 = vmatpush.msra.mxu3 %v2879_v58  ;;  %v644_v4 = vld [vmem:[#allocation3 + $0x20f] sm:$0xff] }
 0x1af   : > { %v716_v23 = vmax.f32 %v644_v4, %v680_v10  ;;  %v752_v2 = vld [vmem:[#allocation3 + $0x211] sm:$0xff] }
 0x1b0   : > { %8425 = vmatmul.msk.f32.gmra.mxu1 %vm1145_vm2, %v2300_v8  ;;  %v10510_v8 = vld [vmem:[#allocation2 + $0x168] sm:$0xff]  ;;  %v754_v58 = vld [vmem:[#allocation3 + $0x231] sm:$0xff] }
 0x1b1   : > { %8408 = vmatmul.msk.f32.gmra.mxu0 %vm1145_vm2, %v2040_v25  ;;  %8377 = vmatmul.msk.f32.gmra.mxu3 %vm1145_vm2, %v10496_v41  ;;  %v2301_v25 = vld [vmem:[#allocation2 + $0x6a] sm:$0xff]  ;;  %v788_v6 = vmax.f32 %v716_v23, %v752_v2  ;;  %v3154_v10 = vld [vmem:[%s14333_s3 + $0x78] sm:$0xff] }
 0x1b2   : > { %3265 = vmatpush.msra.mxu0 %v3154_v10  ;;  %v3429_v23 = vld [vmem:[%s14333_s3 + $0x88] sm:$0xff]  ;;  %v2043_v2 = vld [vmem:[#allocation2 + $0x171] sm:$0xff] }
 0x1b3   : > { %3540 = vmatpush.msra.mxu1 %v3429_v23 }
 0x1b4   : > { %v10522_v29 = vpop.f32.mrf.mxu3  ;;  %v10530_v42 = vpop.f32.mrf.mxu0 }
 0x1b5   : > { %14370 = vst [vmem:[#allocation29_spill] sm:$0xff] %v10522_v29  ;;  %915 = vrot.lane.b32.xlu0 %v9795_v28, %s9216_s12  ;;  %v718_v29 = vmax.f32 %v646_v49, %v682_v13  ;;  %v681_v28 = vld [vmem:[#allocation3 + $0x228] sm:$0xff]  ;;  %v822_v13 = vmax.f32 %v9987_v7, %v788_v6 }
 0x1b6   : > { %14372 = vst [vmem:[#allocation31_spill] sm:$0xff] %v10530_v42  ;;  %v717_v50 = vmax.f32 %v645_v48, %v681_v28  ;;  %v821_v42 = vmax.f32 %v9946_v43, %v787_v59  ;;  %v820_v43 = vmax.f32 %v9923_v40, %v9987_v7  ;;  %v1260_v28 = vld [vmem:[#allocation2 + $0xe] sm:$0xff] }
 0x1b7   : > { %v790_v4 = vmax.f32 %v718_v29, %v754_v58  ;;  %v1259_v29 = vld [vmem:[#allocation2 + $0x6] sm:$0xff]  ;;  %v2304_v58 = vld [vmem:[#allocation2 + $0x92] sm:$0xff] }
 0x1b8   : > { %8426 = vmatmul.msk.f32.gmra.mxu1 %vm1145_vm2, %v2301_v25  ;;  %v10526_v25 = vpop.f32.mrf.mxu1  ;;  %v852_v49 = vmax.f32 %v820_v43, %v788_v6  ;;  %v2045_v43 = vld [vmem:[#allocation2 + $0x191] sm:$0xff] }
 0x1b9   : > { %8409 = vmatmul.msk.f32.gmra.mxu0 %vm1145_vm2, %v2041_v19  ;;  %8378 = vmatmul.msk.f32.gmra.mxu3 %vm1145_vm2, %v10510_v8  ;;  %v2302_v19 = vld [vmem:[#allocation2 + $0x72] sm:$0xff]  ;;  %14371 = vst [vmem:[#allocation30_spill] sm:$0xff] %v10526_v25  ;;  %v854_v48 = vmax.f32 %v822_v13, %v790_v4 }
 0x1ba   : > { %v1324_v25 = vld [vmem:[#allocation2 + $0x1ef] sm:$0xff]  ;;  %1041 = vrot.lane.b32.xlu2 %v852_v49, %s9217_s13 }
 0x1bb   : > { %8323 = vmatmul.msk.f32.gmra.mxu2 %vm1145_vm2, %v1324_v25  ;;  %v2303_v25 = vld [vmem:[#allocation2 + $0x8a] sm:$0xff] }
 0x1bc   : > { %v10557_v40 = vpop.f32.mrf.mxu0  ;;  %v10570_v4 = vld [vmem:[#allocation2 + $0x190] sm:$0xff]  ;;  %v10587_v49 = vld [vmem:[#allocation2 + $0x1a8] sm:$0xff] }
 0x1bd   : > { %1045 = vrot.lane.b32.xlu0 %v854_v48, %s9217_s13  ;;  %14375 = vst [vmem:[#allocation34_spill] sm:$0xff] %v10557_v40  ;;  %v2305_v48 = vld [vmem:[#allocation2 + $0xaa] sm:$0xff] }
 0x1be   : > { %v10684_v40 = vld [vmem:[#allocation2 + $0x6e] sm:$0xff] }
 0x1c0   : > { %8427 = vmatmul.msk.f32.gmra.mxu1 %vm1145_vm2, %v2302_v19  ;;  %v10542_v19 = vpop.f32.mrf.mxu3  ;;  %v10563_v7 = vpop.f32.mrf.mxu2 }
 0x1c1   : > { %8410 = vmatmul.msk.f32.gmra.mxu0 %vm1145_vm2, %v2042_v9  ;;  %8379 = vmatmul.msk.f32.gmra.mxu3 %vm1145_vm2, %v10528_v12  ;;  %v789_v9 = vmax.f32 %v717_v50, %v753_v62  ;;  %14373 = vst [vmem:[#allocation32_spill] sm:$0xff] %v10542_v19  ;;  %v10551_v50 = vpop.f32.mrf.mxu1  ;;  %v10554_v62 = vld [vmem:[#allocation2 + $0x188] sm:$0xff] }
 0x1c2   : > { %14374 = vst [vmem:[#allocation33_spill] sm:$0xff] %v10551_v50  ;;  %917 = vrot.lane.b32.xlu2 %v9811_v44, %s9216_s12  ;;  %v2051_v50 = vld [vmem:[#allocation2 + $0x1f1] sm:$0xff] }
 0x1c3   : > { %v853_v59 = vmax.f32 %v821_v42, %v789_v9  ;;  %8324 = vmatmul.msk.f32.vlgmr.msrb.gmra.mxu2 %vm1145_vm2, %v1259_v29  ;;  %14376 = vst [vmem:[#allocation35_spill] sm:$0xff] %v10563_v7  ;;  %v2044_v42 = vld [vmem:[#allocation2 + $0x189] sm:$0xff]  ;;  %v2047_v7 = vld [vmem:[#allocation2 + $0x1b1] sm:$0xff] }
 0x1c4   : > { %v10578_v13 = vpop.f32.mrf.mxu0  ;;  %v2046_v29 = vld [vmem:[#allocation2 + $0x1a9] sm:$0xff] }
 0x1c5   : > { %1043 = vrot.lane.b32.xlu1 %v853_v59, %s9217_s13  ;;  %14379 = vst [vmem:[#allocation38_spill] sm:$0xff] %v10578_v13  ;;  %v10584_v59 = vld [vmem:[#allocation2 + $0x26] sm:$0xff]  ;;  %s9171_s13 = scalar_lea.hbm %s14335_s5, 512 }
 0x1c6   : > { %v2309_v13 = vld [vmem:[#allocation2 + $0xea] sm:$0xff]  ;;  %p9173_p1 = scmp.lt.s32.totalorder %s9171_s13, %s9167_s10 }
 0x1c7   : > { %v2311_v19 = vld [vmem:[#allocation2 + $0x10a] sm:$0xff] }
 0x1c8   : > { %8428 = vmatmul.msk.f32.gmra.mxu1 %vm1145_vm2, %v2303_v25  ;;  %v10565_v6 = vpop.f32.mrf.mxu3  ;;  %v10580_v9 = vpop.f32.mrf.mxu2  ;;  %p9174_p2 = por %p9173_p1, %p9172_p0 }
 0x1c9   : > { %8411 = vmatmul.msk.f32.gmra.mxu0 %vm1145_vm2, %v2043_v2  ;;  %8380 = vmatmul.msk.f32.gmra.mxu3 %vm1145_vm2, %v10554_v62  ;;  %14377 = vst [vmem:[#allocation36_spill] sm:$0xff] %v10565_v6  ;;  %v2310_v6 = vld [vmem:[#allocation2 + $0xf2] sm:$0xff] }
 0x1ca   : > { %14380 = vst [vmem:[#allocation39_spill] sm:$0xff] %v10580_v9  ;;  %p9175_p3 = pnand %p9174_p2, %p9170_p13 }
 0x1cb   : > { %8325 = vmatmul.msk.f32.gmra.mxu2 %vm1145_vm2, %v1260_v28 }
 0x1cc   : > { %v10567_v10 = vpop.f32.mrf.mxu1 }
 0x1cd   : > { %14378 = vst [vmem:[#allocation37_spill] sm:$0xff] %v10567_v10 }
 0x1d0   : > { %8429 = vmatmul.msk.f32.gmra.mxu1 %vm1145_vm2, %v2304_v58  ;;  %v10598_v25 = vpop.f32.mrf.mxu2  ;;  %v10600_v58 = vld [vmem:[#allocation2 + $0x2e] sm:$0xff] }
 0x1d1   : > { %8412 = vmatmul.msk.f32.gmra.mxu0 %vm1145_vm2, %v2044_v42  ;;  %8381 = vmatmul.msk.f32.gmra.mxu3 %vm1145_vm2, %v10570_v4  ;;  %14384 = vst [vmem:[#allocation43_spill] sm:$0xff] %v10598_v25  ;;  %v2306_v42 = vld [vmem:[#allocation2 + $0xb2] sm:$0xff] }
 0x1d3   : > { %v10582_v23 = vpop.f32.mrf.mxu3  ;;  %8326 = vmatmul.msk.f32.gmra.mxu2 %vm1145_vm2, %v10584_v59 }
 0x1d4   : > { %14381 = vst [vmem:[#allocation40_spill] sm:$0xff] %v10582_v23  ;;  %v2308_v23 = vld [vmem:[#allocation2 + $0xd2] sm:$0xff] }
 0x1d5   : > { %v10592_v44 = vpop.f32.mrf.mxu1 }
 0x1d6   : > { %14382 = vst [vmem:[#allocation41_spill] sm:$0xff] %v10592_v44  ;;  %v2048_v44 = vld [vmem:[#allocation2 + $0x1c9] sm:$0xff] }
 0x1d7   : > { %v10596_v2 = vpop.f32.mrf.mxu0 }
 0x1d8   : > { %8430 = vmatmul.msk.f32.gmra.mxu1 %vm1145_vm2, %v2305_v48  ;;  %14383 = vst [vmem:[#allocation42_spill] sm:$0xff] %v10596_v2  ;;  %v10616_v9 = vpop.f32.mrf.mxu2  ;;  %v3153_v2 = vld [vmem:[%s14333_s3 + $0x70] sm:$0xff] }
 0x1d9   : > { %8413 = vmatmul.msk.f32.gmra.mxu0 %vm1145_vm2, %v2045_v43  ;;  %8382 = vmatmul.msk.f32.gmra.mxu3 %vm1145_vm2, %v10587_v49  ;;  %v10605_v43 = vld [vmem:[#allocation2 + $0x1b0] sm:$0xff]  ;;  %14388 = vst [vmem:[#allocation47_spill] sm:$0xff] %v10616_v9 }
 0x1da   : > { %3266 = vmatpush.msra.mxu0 %v3153_v2 }
 0x1db   : > { %8327 = vmatmul.msk.f32.gmra.mxu2 %vm1145_vm2, %v10600_v58 }
 0x1dc   : > { %v10602_v28 = vpop.f32.mrf.mxu3 }
 0x1dd   : > { %14385 = vst [vmem:[#allocation44_spill] sm:$0xff] %v10602_v28  ;;  %v10612_v48 = vpop.f32.mrf.mxu1  ;;  %v2307_v28 = vld [vmem:[#allocation2 + $0xca] sm:$0xff] }
 0x1de   : > { %14386 = vst [vmem:[#allocation45_spill] sm:$0xff] %v10612_v48  ;;  %v10627_v48 = vld [vmem:[#allocation2 + $0x46] sm:$0xff] }
 0x1df   : > { %v10614_v25 = vpop.f32.mrf.mxu0 }
 0x1e0   : > { %8431 = vmatmul.msk.f32.gmra.mxu1 %vm1145_vm2, %v2306_v42  ;;  %14387 = vst [vmem:[#allocation46_spill] sm:$0xff] %v10614_v25  ;;  %v2878_v42 = vld [vmem:[%s14333_s3 + $0x60] sm:$0xff] }
 0x1e1   : > { %8414 = vmatmul.msk.f32.gmra.mxu0 %vm1145_vm2, %v2046_v29  ;;  %8383 = vmatmul.msk.f32.gmra.mxu3 %vm1145_vm2, %v10605_v43  ;;  %v10619_v29 = vld [vmem:[#allocation2 + $0x1c8] sm:$0xff] }
 0x1e2   : > { %2991 = vmatpush.msra.mxu3 %v2878_v42  ;;  %v10648_v42 = vld [vmem:[#allocation2 + $0x4e] sm:$0xff] }
 0x1e3   : > { %8328 = vmatmul.msk.f32.gmra.mxu2 %vm1145_vm2, %v10627_v48 }
 0x1e4   : > { %v10629_v25 = vpop.f32.mrf.mxu3 }
 0x1e5   : > { %14389 = vst [vmem:[#allocation48_spill] sm:$0xff] %v10629_v25  ;;  %v10643_v25 = vld [vmem:[#allocation2 + $0x1d0] sm:$0xff] }
 0x1e8   : > { %8432 = vmatmul.msk.f32.gmra.mxu1 %vm1145_vm2, %v2307_v28  ;;  %v10637_v28 = vpop.f32.mrf.mxu2 }
 0x1e9   : > { %8415 = vmatmul.msk.f32.gmra.mxu0 %vm1145_vm2, %v2047_v7  ;;  %8384 = vmatmul.msk.f32.gmra.mxu3 %vm1145_vm2, %v10619_v29  ;;  %14392 = vst [vmem:[#allocation51_spill] sm:$0xff] %v10637_v28 }
 0x1eb   : > { %8329 = vmatmul.msk.f32.gmra.mxu2 %vm1145_vm2, %v10648_v42 }
 0x1ec   : > { %v10633_v7 = vpop.f32.mrf.mxu1 }
 0x1ed   : > { %14390 = vst [vmem:[#allocation49_spill] sm:$0xff] %v10633_v7 }
 0x1ee   : > { %v10635_v9 = vpop.f32.mrf.mxu0 }
 0x1ef   : > { %14391 = vst [vmem:[#allocation50_spill] sm:$0xff] %v10635_v9 }
 0x1f0   : > { %8433 = vmatmul.msk.f32.gmra.mxu1 %vm1145_vm2, %v2308_v23  ;;  %v10658_v7 = vpop.f32.mrf.mxu2  ;;  %v10661_v23 = vld [vmem:[#allocation2 + $0x1e8] sm:$0xff] }
 0x1f1   : > { %8416 = vmatmul.msk.f32.gmra.mxu0 %vm1145_vm2, %v2048_v44  ;;  %8385 = vmatmul.msk.f32.gmra.mxu3 %vm1145_vm2, %v10643_v25  ;;  %14396 = vst [vmem:[#allocation55_spill] sm:$0xff] %v10658_v7  ;;  %v2049_v44 = vld [vmem:[#allocation2 + $0x1d1] sm:$0xff] }
 0x1f3   : > { %v10650_v9 = vpop.f32.mrf.mxu3 }
 0x1f4   : > { %14393 = vst [vmem:[#allocation52_spill] sm:$0xff] %v10650_v9  ;;  %v10666_v9 = vld [vmem:[#allocation2 + $0x66] sm:$0xff] }
 0x1f5   : > { %v10656_v2 = vpop.f32.mrf.mxu1  ;;  %8330 = vmatmul.msk.f32.gmra.mxu2 %vm1145_vm2, %v10666_v9 }
 0x1f6   : > { %v10654_v28 = vpop.f32.mrf.mxu0  ;;  %14395 = vst [vmem:[#allocation54_spill] sm:$0xff] %v10656_v2 }
 0x1f7   : > { %14394 = vst [vmem:[#allocation53_spill] sm:$0xff] %v10654_v28 }
 0x1f8   : > { %8434 = vmatmul.msk.f32.gmra.mxu1 %vm1145_vm2, %v2309_v13  ;;  %v10676_v10 = vpop.f32.mrf.mxu2  ;;  %v10679_v13 = vld [vmem:[#allocation2 + $0x1f0] sm:$0xff] }
 0x1f9   : > { %8417 = vmatmul.msk.f32.gmra.mxu0 %vm1145_vm2, %v2049_v44  ;;  %8386 = vmatmul.msk.f32.gmra.mxu3 %vm1145_vm2, %v10661_v23  ;;  %14400 = vst [vmem:[#allocation59_spill] sm:$0xff] %v10676_v10  ;;  %v2050_v44 = vld [vmem:[#allocation2 + $0x1e9] sm:$0xff] }
 0x1fc   : > { %v10670_v28 = vpop.f32.mrf.mxu3 }
 0x1fd   : > { %14397 = vst [vmem:[#allocation56_spill] sm:$0xff] %v10670_v28  ;;  %v10674_v7 = vpop.f32.mrf.mxu1  ;;  %8331 = vmatmul.msk.f32.gmra.mxu2 %vm1145_vm2, %v10684_v40  ;;  %v2846_v28 = vld [vmem:[#allocation2 + $0x27] sm:$0xff] }
 0x1fe   : > { %v10672_v2 = vpop.f32.mrf.mxu0  ;;  %14399 = vst [vmem:[#allocation58_spill] sm:$0xff] %v10674_v7 }
 0x1ff   : > { %14398 = vst [vmem:[#allocation57_spill] sm:$0xff] %v10672_v2 }
 0x200   : > { %8435 = vmatmul.msk.f32.gmra.mxu1 %vm1145_vm2, %v2310_v6  ;;  %v10699_v6 = vld [vmem:[#allocation2 + $0x86] sm:$0xff] }
 0x201   : > { %8418 = vmatmul.msk.f32.gmra.mxu0 %vm1145_vm2, %v2050_v44  ;;  %8387 = vmatmul.msk.f32.gmra.mxu3 %vm1145_vm2, %v10679_v13  ;;  %v10694_v44 = vpop.f32.mrf.mxu2 }
 0x202   : > { %14404 = vst [vmem:[#allocation63_spill] sm:$0xff] %v10694_v44  ;;  %v3121_v44 = vld [vmem:[#allocation2 + $0x28] sm:$0xff] }
 0x204   : > { %v10688_v2 = vpop.f32.mrf.mxu3 }
 0x205   : > { %14401 = vst [vmem:[#allocation60_spill] sm:$0xff] %v10688_v2  ;;  %v10692_v10 = vpop.f32.mrf.mxu1  ;;  %8332 = vmatmul.msk.f32.gmra.mxu2 %vm1145_vm2, %v10699_v6 }
 0x206   : > { %v10690_v7 = vpop.f32.mrf.mxu0  ;;  %14403 = vst [vmem:[#allocation62_spill] sm:$0xff] %v10692_v10 }
 0x207   : > { %14402 = vst [vmem:[#allocation61_spill] sm:$0xff] %v10690_v7 }
 0x208   : > { %8436 = vmatmul.msk.f32.gmra.mxu1 %vm1145_vm2, %v2311_v19  ;;  %v10714_v19 = vld [vmem:[#allocation2 + $0x8e] sm:$0xff] }
 0x209   : > { %8419 = vmatmul.msk.f32.gmra.mxu0 %vm1145_vm2, %v2051_v50  ;;  %8484 = vmatmul.msk.f32.vlgmr.msra.gmra.mxu3 %vm1145_vm2, %v2846_v28  ;;  %v10709_v32 = vpop.f32.mrf.mxu2  ;;  %v2312_v50 = vld [vmem:[#allocation2 + $0x112] sm:$0xff] }
 0x20a   : > { %14408 = vst [vmem:[#allocation67_spill] sm:$0xff] %v10709_v32 }
 0x20c   : > { %v10703_v2 = vpop.f32.mrf.mxu3 }
 0x20d   : > { %14405 = vst [vmem:[#allocation64_spill] sm:$0xff] %v10703_v2  ;;  %v10707_v39 = vpop.f32.mrf.mxu1  ;;  %8333 = vmatmul.msk.f32.gmra.mxu2 %vm1145_vm2, %v10714_v19 }
 0x20e   : > { %v10705_v7 = vpop.f32.mrf.mxu0  ;;  %14407 = vst [vmem:[#allocation66_spill] sm:$0xff] %v10707_v39  ;;  %v3122_v39 = vld [vmem:[#allocation2 + $0x30] sm:$0xff] }
 0x20f   : > { %14406 = vst [vmem:[#allocation65_spill] sm:$0xff] %v10705_v7 }
 0x210   : > { %8437 = vmatmul.msk.f32.gmra.mxu1 %vm1145_vm2, %v2312_v50 }
 0x211   : > { %8516 = vmatmul.msk.f32.vlgmr.msra.gmra.mxu0 %vm1145_vm2, %v3121_v44  ;;  %8485 = vmatmul.msk.f32.gmra.mxu3 %vm1145_vm2, %v2847_v37  ;;  %v10724_v32 = vpop.f32.mrf.mxu2  ;;  %v10728_v37 = vld [vmem:[#allocation2 + $0x47] sm:$0xff]  ;;  %v9148_v44 = vld [vmem:[%s14332_s2] ss:$0 sm:$0xff] }
 0x212   : > { %14412 = vst [vmem:[#allocation71_spill] sm:$0xff] %v10724_v32  ;;  %v466_v50 = vadd.f32 %v9148_v44, %v10332_v21  ;;  %v3123_v21 = vld [vmem:[#allocation2 + $0x48] sm:$0xff] }
 0x214   : > { %v10718_v28 = vpop.f32.mrf.mxu3  ;;  %v503_v32 = vmax.f32 %v466_v50, 0.0 }
 0x215   : > { %14409 = vst [vmem:[#allocation68_spill] sm:$0xff] %v10718_v28  ;;  %v10722_v2 = vpop.f32.mrf.mxu1  ;;  %v912_v28 = vpop.permute.xlu2 %911 }
 0x216   : > { %v10720_v7 = vpop.f32.mrf.mxu0  ;;  %14411 = vst [vmem:[#allocation70_spill] sm:$0xff] %v10722_v2  ;;  %v1109_v50 = vsel %vm1079_vm3, %v503_v32, %v914_v45  ;;  %v2315_v45 = vld [vmem:[#allocation2 + $0x14a] sm:$0xff] }
 0x217   : > { %14410 = vst [vmem:[#allocation69_spill] sm:$0xff] %v10720_v7  ;;  %v10736_v7 = vld [vmem:[#allocation2 + $0xa6] sm:$0xff] }
 0x218   : > { %8438 = vmatmul.msk.f32.gmra.mxu1 %vm1145_vm2, %v2313_v0  ;;  %8334 = vmatmul.msk.f32.gmra.mxu2 %vm1145_vm2, %v10736_v7  ;;  %v463_v0 = vadd.f32 %v9148_v44, %v10307_v26  ;;  %v10755_v26 = vld [vmem:[#allocation2 + $0xae] sm:$0xff] }
 0x219   : > { %8517 = vmatmul.msk.f32.gmra.mxu0 %vm1145_vm2, %v3122_v39  ;;  %8486 = vmatmul.msk.f32.gmra.mxu3 %vm1145_vm2, %v10728_v37  ;;  %v10747_v5 = vpop.f32.mrf.mxu2 }
 0x21a   : > { %14416 = vst [vmem:[#allocation75_spill] sm:$0xff] %v10747_v5  ;;  %v502_v47 = vmax.f32 %v463_v0, 0.0 }
 0x21c   : > { %v10740_v39 = vpop.f32.mrf.mxu3  ;;  %v1108_v0 = vsel %vm1079_vm3, %v502_v47, %v912_v28 }
 0x21d   : > { %14413 = vst [vmem:[#allocation72_spill] sm:$0xff] %v10740_v39  ;;  %v10745_v10 = vpop.f32.mrf.mxu1  ;;  %v1042_v5 = vpop.permute.xlu2 %1041 }
 0x21e   : > { %v10743_v2 = vpop.f32.mrf.mxu0  ;;  %14415 = vst [vmem:[#allocation74_spill] sm:$0xff] %v10745_v10 }
 0x21f   : > { %14414 = vst [vmem:[#allocation73_spill] sm:$0xff] %v10743_v2  ;;  %v1040_v32 = vpop.permute.xlu0 %1039 }
 0x220   : > { %8439 = vmatmul.msk.f32.gmra.mxu1 %vm1145_vm2, %v2314_v20  ;;  %8335 = vmatmul.msk.f32.gmra.mxu2 %vm1145_vm2, %v10755_v26 }
 0x221   : > { %8518 = vmatmul.msk.f32.gmra.mxu0 %vm1145_vm2, %v3123_v21  ;;  %8487 = vmatmul.msk.f32.gmra.mxu3 %vm1145_vm2, %v10751_v61  ;;  %v1142_v21 = vsel %vm1112_vm4, %v1109_v50, %v1042_v5  ;;  %v10769_v10 = vpop.f32.mrf.mxu2  ;;  %v3124_v61 = vld [vmem:[#allocation2 + $0x50] sm:$0xff]  ;;  %v10776_v5 = vld [vmem:[#allocation2 + $0xc6] sm:$0xff] }
 0x222   : > { %1256 = vst.msk [vmem:[#allocation2 + $0x210] sm:$0xff] %vm1145_vm2, %v1142_v21  ;;  %v469_v21 = vadd.f32 %v9148_v44, %v10365_v1 }
 0x223   : > { %14420 = vst [vmem:[#allocation79_spill] sm:$0xff] %v10769_v10 }
 0x224   : > { %v10760_v2 = vpop.f32.mrf.mxu3 }
 0x225   : > { %14418 = vst [vmem:[#allocation77_spill] sm:$0xff] %v10760_v2  ;;  %v10765_v39 = vpop.f32.mrf.mxu1  ;;  %v1141_v2 = vsel %vm1112_vm4, %v1108_v0, %v1040_v32  ;;  %v472_v0 = vadd.f32 %v9148_v44, %v10390_v53  ;;  %v918_v53 = vpop.permute.xlu2 %917 }
 0x226   : > { %v10763_v20 = vpop.f32.mrf.mxu0  ;;  %1255 = vst.msk [vmem:[#allocation2 + $0x208] sm:$0xff] %vm1145_vm2, %v1141_v2  ;;  %v10795_v2 = vld [vmem:[#allocation2 + $0xce] sm:$0xff] }
 0x227   : > { %14419 = vst [vmem:[#allocation78_spill] sm:$0xff] %v10763_v20  ;;  %v916_v32 = vpop.permute.xlu0 %915  ;;  %v505_v10 = vmax.f32 %v472_v0, 0.0  ;;  %v9149_v0 = vld [vmem:[#allocation2 + $0x70] sm:$0xff] }
 0x228   : > { %8440 = vmatmul.msk.f32.gmra.mxu1 %vm1145_vm2, %v2315_v45  ;;  %8336 = vmatmul.msk.f32.gmra.mxu2 %vm1145_vm2, %v10776_v5  ;;  %v2316_v45 = vld [vmem:[#allocation2 + $0x152] sm:$0xff] }
 0x229   : > { %8519 = vmatmul.msk.f32.gmra.mxu0 %vm1145_vm2, %v3124_v61  ;;  %8488 = vmatmul.msk.f32.gmra.mxu3 %vm1145_vm2, %v10206_v3  ;;  %v10787_v61 = vpop.f32.mrf.mxu2  ;;  %v3125_v3 = vld [vmem:[#allocation2 + $0x68] sm:$0xff] }
 0x22a   : > { %14423 = vst [vmem:[#allocation82_spill] sm:$0xff] %v10787_v61  ;;  %v504_v61 = vmax.f32 %v469_v21, 0.0  ;;  %v1111_v21 = vsel %vm1079_vm3, %v505_v10, %v918_v53 }
 0x22c   : > { %v10781_v47 = vpop.f32.mrf.mxu3 }
 0x22d   : > { %14421 = vst [vmem:[#allocation80_spill] sm:$0xff] %v10781_v47  ;;  %v10785_v50 = vpop.f32.mrf.mxu1  ;;  %v1110_v47 = vsel %vm1079_vm3, %v504_v61, %v916_v32 }
 0x22e   : > { %v10783_v28 = vpop.f32.mrf.mxu0 }
 0x22f   : > { %14422 = vst [vmem:[#allocation81_spill] sm:$0xff] %v10783_v28 }
 0x230   : > { %8441 = vmatmul.msk.f32.gmra.mxu1 %vm1145_vm2, %v2316_v45  ;;  %8337 = vmatmul.msk.f32.gmra.mxu2 %vm1145_vm2, %v10795_v2 }
 0x231   : > { %8520 = vmatmul.msk.f32.gmra.mxu0 %vm1145_vm2, %v3125_v3  ;;  %8489 = vmatmul.msk.f32.gmra.mxu3 %vm1145_vm2, %v10221_v55  ;;  %v2603_v3 = vld [vmem:[%s14333_s3 + $0x50] sm:$0xff]  ;;  %v10808_v45 = vpop.f32.mrf.mxu2 }
 0x232   : > { %14426 = vst [vmem:[#allocation85_spill] sm:$0xff] %v10808_v45  ;;  %2716 = vmatpush.msra.mxu2 %v2603_v3  ;;  %v2317_v55 = vld [vmem:[#allocation2 + $0x16a] sm:$0xff] }
 0x234   : > { %v10799_v1 = vpop.f32.mrf.mxu3 }
 0x235   : > { %14424 = vst [vmem:[#allocation83_spill] sm:$0xff] %v10799_v1  ;;  %v10803_v28 = vpop.f32.mrf.mxu1  ;;  %v1046_v1 = vpop.permute.xlu0 %1045 }
 0x236   : > { %v10801_v44 = vpop.f32.mrf.mxu0  ;;  %v1144_v3 = vsel %vm1112_vm4, %v1111_v21, %v1046_v1  ;;  %v3428_v1 = vld [vmem:[%s14333_s3 + $0x80] sm:$0xff] }
 0x237   : > { %14425 = vst [vmem:[#allocation84_spill] sm:$0xff] %v10801_v44  ;;  %v10816_v44 = vld [vmem:[#allocation2 + $0xe6] sm:$0xff]  ;;  %v1044_v20 = vpop.permute.xlu1 %1043  ;;  %3541 = vmatpush.msra.mxu1 %v3428_v1 }
 0x238   : > { %8442 = vmatmul.msk.f32.gmra.mxu1 %vm1145_vm2, %v2317_v55  ;;  %8338 = vmatmul.msk.f32.gmra.mxu2 %vm1145_vm2, %v10816_v44  ;;  %v1143_v61 = vsel %vm1112_vm4, %v1110_v47, %v1044_v20  ;;  %1258 = vst.msk [vmem:[#allocation2 + $0x230] sm:$0xff] %vm1145_vm2, %v1144_v3  ;;  %v2318_v55 = vld [vmem:[#allocation2 + $0x172] sm:$0xff]  ;;  %v2319_v3 = vld [vmem:[#allocation2 + $0x18a] sm:$0xff] }
 0x239   : > { %8521 = vmatmul.msk.f32.gmra.mxu0 %vm1145_vm2, %v9149_v0  ;;  %8490 = vmatmul.msk.f32.gmra.mxu3 %vm1145_vm2, %v10235_v14  ;;  %1257 = vst.msk [vmem:[#allocation2 + $0x228] sm:$0xff] %vm1145_vm2, %v1143_v61  ;;  %v10830_v53 = vpop.f32.mrf.mxu2  ;;  %v10837_v20 = vld [vmem:[#allocation2 + $0xee] sm:$0xff] }
 0x23a   : > { %14429 = vst [vmem:[#allocation88_spill] sm:$0xff] %v10830_v53  ;;  %v2320_v53 = vld [vmem:[#allocation2 + $0x192] sm:$0xff] }
 0x23c   : > { %v10823_v10 = vpop.f32.mrf.mxu3 }
 0x23d   : > { %14427 = vst [vmem:[#allocation86_spill] sm:$0xff] %v10823_v10  ;;  %v10828_v14 = vpop.f32.mrf.mxu1  ;;  %v2325_v10 = vld [vmem:[#allocation2 + $0x1ea] sm:$0xff] }
 0x23e   : > { %v10826_v32 = vpop.f32.mrf.mxu0 }
 0x23f   : > { %14428 = vst [vmem:[#allocation87_spill] sm:$0xff] %v10826_v32  ;;  %v2324_v32 = vld [vmem:[#allocation2 + $0x1d2] sm:$0xff] }
 0x240   : > { %8443 = vmatmul.msk.f32.gmra.mxu1 %vm1145_vm2, %v2318_v55  ;;  %8339 = vmatmul.msk.f32.gmra.mxu2 %vm1145_vm2, %v10837_v20 }
 0x241   : > { %8522 = vmatmul.msk.f32.gmra.mxu0 %vm1145_vm2, %v10237_v51  ;;  %8491 = vmatmul.msk.f32.gmra.mxu3 %vm1145_vm2, %v10263_v27  ;;  %v10850_v51 = vpop.f32.mrf.mxu2  ;;  %v10857_v27 = vld [vmem:[#allocation2 + $0x106] sm:$0xff] }
 0x242   : > { %14432 = vst [vmem:[#allocation91_spill] sm:$0xff] %v10850_v51 }
 0x244   : > { %v10841_v47 = vpop.f32.mrf.mxu3 }
 0x245   : > { %14430 = vst [vmem:[#allocation89_spill] sm:$0xff] %v10841_v47  ;;  %v10848_v0 = vpop.f32.mrf.mxu1  ;;  %v2323_v47 = vld [vmem:[#allocation2 + $0x1ca] sm:$0xff] }
 0x246   : > { %v10846_v21 = vpop.f32.mrf.mxu0 }
 0x247   : > { %14431 = vst [vmem:[#allocation90_spill] sm:$0xff] %v10846_v21  ;;  %v2322_v21 = vld [vmem:[#allocation2 + $0x1b2] sm:$0xff] }
 0x248   : > { %8444 = vmatmul.msk.f32.gmra.mxu1 %vm1145_vm2, %v2319_v3  ;;  %8340 = vmatmul.msk.f32.gmra.mxu2 %vm1145_vm2, %v10857_v27 }
 0x249   : > { %8523 = vmatmul.msk.f32.gmra.mxu0 %vm1145_vm2, %v10265_v11  ;;  %8492 = vmatmul.msk.f32.gmra.mxu3 %vm1145_vm2, %v10288_v46  ;;  %v10867_v51 = vpop.f32.mrf.mxu2  ;;  %v10874_v11 = vld [vmem:[#allocation2 + $0x10e] sm:$0xff] }
 0x24c   : > { %v10861_v61 = vpop.f32.mrf.mxu3 }
 0x24d   : > { %14433 = vst [vmem:[#allocation92_spill] sm:$0xff] %v10861_v61  ;;  %v10865_v1 = vpop.f32.mrf.mxu1  ;;  %v2321_v61 = vld [vmem:[#allocation2 + $0x1aa] sm:$0xff] }
 0x24e   : > { %v10863_v55 = vpop.f32.mrf.mxu0  ;;  %14435 = vst [vmem:[#allocation94_spill] sm:$0xff] %v10865_v1 }
 0x24f   : > { %14434 = vst [vmem:[#allocation93_spill] sm:$0xff] %v10863_v55 }
 0x250   : > { %8445 = vmatmul.msk.f32.gmra.mxu1 %vm1145_vm2, %v2320_v53  ;;  %8341 = vmatmul.msk.f32.gmra.mxu2 %vm1145_vm2, %v10874_v11 }
 0x251   : > { %8524 = vmatmul.msk.f32.gmra.mxu0 %vm1145_vm2, %v10290_v60  ;;  %8493 = vmatmul.msk.f32.gmra.mxu3 %vm1145_vm2, %v10317_v33  ;;  %v10884_v55 = vpop.f32.mrf.mxu2  ;;  %v10891_v60 = vld [vmem:[#allocation2 + $0x126] sm:$0xff] }
 0x254   : > { %v10878_v46 = vpop.f32.mrf.mxu3 }
 0x255   : > { %14436 = vst [vmem:[#allocation95_spill] sm:$0xff] %v10878_v46  ;;  %v10882_v45 = vpop.f32.mrf.mxu1 }
 0x256   : > { %v10880_v3 = vpop.f32.mrf.mxu0  ;;  %14438 = vst [vmem:[#allocation97_spill] sm:$0xff] %v10882_v45  ;;  %v3397_v45 = vld [vmem:[#allocation2 + $0x31] sm:$0xff] }
 0x257   : > { %14437 = vst [vmem:[#allocation96_spill] sm:$0xff] %v10880_v3 }
 0x258   : > { %8446 = vmatmul.msk.f32.gmra.mxu1 %vm1145_vm2, %v2321_v61  ;;  %8342 = vmatmul.msk.f32.gmra.mxu2 %vm1145_vm2, %v10891_v60 }
 0x259   : > { %8525 = vmatmul.msk.f32.gmra.mxu0 %vm1145_vm2, %v10319_v31  ;;  %8494 = vmatmul.msk.f32.gmra.mxu3 %vm1145_vm2, %v10335_v17  ;;  %v10901_v46 = vpop.f32.mrf.mxu2  ;;  %v10908_v31 = vld [vmem:[#allocation2 + $0x12e] sm:$0xff] }
 0x25c   : > { %v10895_v33 = vpop.f32.mrf.mxu3 }
 0x25d   : > { %14439 = vst [vmem:[#allocation98_spill] sm:$0xff] %v10895_v33  ;;  %v10899_v3 = vpop.f32.mrf.mxu1 }
 0x25e   : > { %v10897_v53 = vpop.f32.mrf.mxu0  ;;  %14441 = vst [vmem:[#allocation100_spill] sm:$0xff] %v10899_v3  ;;  %v10996_v3 = vld [vmem:[#allocation2 + $0x186] sm:$0xff] }
 0x25f   : > { %14440 = vst [vmem:[#allocation99_spill] sm:$0xff] %v10897_v53 }
 0x260   : > { %8447 = vmatmul.msk.f32.gmra.mxu1 %vm1145_vm2, %v2322_v21  ;;  %8343 = vmatmul.msk.f32.gmra.mxu2 %vm1145_vm2, %v10908_v31 }
 0x261   : > { %8526 = vmatmul.msk.f32.gmra.mxu0 %vm1145_vm2, %v10337_v38  ;;  %8495 = vmatmul.msk.f32.gmra.mxu3 %vm1145_vm2, %v10375_v54  ;;  %v10918_v33 = vpop.f32.mrf.mxu2  ;;  %v10925_v38 = vld [vmem:[#allocation2 + $0x146] sm:$0xff] }
 0x264   : > { %v10912_v17 = vpop.f32.mrf.mxu3 }
 0x265   : > { %14442 = vst [vmem:[#allocation101_spill] sm:$0xff] %v10912_v17  ;;  %v10916_v53 = vpop.f32.mrf.mxu1 }
 0x266   : > { %v10914_v61 = vpop.f32.mrf.mxu0  ;;  %14444 = vst [vmem:[#allocation103_spill] sm:$0xff] %v10916_v53  ;;  %v3396_v53 = vld [vmem:[#allocation2 + $0x29] sm:$0xff] }
 0x267   : > { %14443 = vst [vmem:[#allocation102_spill] sm:$0xff] %v10914_v61 }
 0x268   : > { %8448 = vmatmul.msk.f32.gmra.mxu1 %vm1145_vm2, %v2323_v47  ;;  %8344 = vmatmul.msk.f32.gmra.mxu2 %vm1145_vm2, %v10925_v38 }
 0x269   : > { %8527 = vmatmul.msk.f32.gmra.mxu0 %vm1145_vm2, %v10377_v56  ;;  %8496 = vmatmul.msk.f32.gmra.mxu3 %vm1145_vm2, %v10399_v24  ;;  %v10935_v17 = vpop.f32.mrf.mxu2  ;;  %v10942_v56 = vld [vmem:[#allocation2 + $0x14e] sm:$0xff] }
 0x26c   : > { %v10929_v54 = vpop.f32.mrf.mxu3 }
 0x26d   : > { %14445 = vst [vmem:[#allocation104_spill] sm:$0xff] %v10929_v54  ;;  %v10933_v61 = vpop.f32.mrf.mxu1 }
 0x26e   : > { %v10931_v21 = vpop.f32.mrf.mxu0  ;;  %14447 = vst [vmem:[#allocation106_spill] sm:$0xff] %v10933_v61  ;;  %v10980_v61 = vld [vmem:[#allocation2 + $0x16e] sm:$0xff] }
 0x26f   : > { %14446 = vst [vmem:[#allocation105_spill] sm:$0xff] %v10931_v21 }
 0x270   : > { %8449 = vmatmul.msk.f32.gmra.mxu1 %vm1145_vm2, %v2324_v32  ;;  %8345 = vmatmul.msk.f32.gmra.mxu2 %vm1145_vm2, %v10942_v56 }
 0x271   : > { %8528 = vmatmul.msk.f32.gmra.mxu0 %vm1145_vm2, %v10401_v18  ;;  %8497 = vmatmul.msk.f32.gmra.mxu3 %vm1145_vm2, %v10413_v16  ;;  %v10952_v54 = vpop.f32.mrf.mxu2  ;;  %v10957_v18 = vld [vmem:[#allocation2 + $0x107] sm:$0xff] }
 0x272   : > { %v10961_v16 = vld [vmem:[#allocation2 + $0x166] sm:$0xff] }
 0x274   : > { %v10946_v24 = vpop.f32.mrf.mxu3 }
 0x275   : > { %14448 = vst [vmem:[#allocation107_spill] sm:$0xff] %v10946_v24  ;;  %v10950_v21 = vpop.f32.mrf.mxu1 }
 0x276   : > { %v10948_v47 = vpop.f32.mrf.mxu0  ;;  %14450 = vst [vmem:[#allocation109_spill] sm:$0xff] %v10950_v21 }
 0x277   : > { %14449 = vst [vmem:[#allocation108_spill] sm:$0xff] %v10948_v47 }
 0x278   : > { %8450 = vmatmul.msk.f32.gmra.mxu1 %vm1145_vm2, %v2325_v10  ;;  %8346 = vmatmul.msk.f32.gmra.mxu2 %vm1145_vm2, %v10961_v16  ;;  %v10976_v10 = vld [vmem:[#allocation2 + $0x10f] sm:$0xff] }
 0x279   : > { %8529 = vmatmul.msk.f32.gmra.mxu0 %vm1145_vm2, %v10415_v52  ;;  %8498 = vmatmul.msk.f32.gmra.mxu3 %vm1145_vm2, %v10957_v18  ;;  %v10971_v21 = vpop.f32.mrf.mxu2  ;;  %v2326_v52 = vld [vmem:[#allocation2 + $0x1f2] sm:$0xff] }
 0x27c   : > { %v10965_v32 = vpop.f32.mrf.mxu3 }
 0x27d   : > { %14451 = vst [vmem:[#allocation110_spill] sm:$0xff] %v10965_v32  ;;  %v10969_v24 = vpop.f32.mrf.mxu1 }
 0x27e   : > { %v10967_v47 = vpop.f32.mrf.mxu0  ;;  %14453 = vst [vmem:[#allocation112_spill] sm:$0xff] %v10969_v24 }
 0x27f   : > { %14452 = vst [vmem:[#allocation111_spill] sm:$0xff] %v10967_v47 }
 0x280   : > { %8451 = vmatmul.msk.f32.gmra.mxu1 %vm1145_vm2, %v2326_v52  ;;  %8347 = vmatmul.msk.f32.gmra.mxu2 %vm1145_vm2, %v10980_v61  ;;  %v9150_v52 = vld [vmem:[#allocation2 + $0x127] sm:$0xff] }
 0x281   : > { %8530 = vmatmul.msk.f32.gmra.mxu0 %vm1145_vm2, %v10433_v63  ;;  %8499 = vmatmul.msk.f32.gmra.mxu3 %vm1145_vm2, %v10976_v10  ;;  %v10990_v63 = vpop.f32.mrf.mxu2 }
 0x284   : > { %v10984_v47 = vpop.f32.mrf.mxu3 }
 0x285   : > { %14454 = vst [vmem:[#allocation113_spill] sm:$0xff] %v10984_v47  ;;  %v10988_v24 = vpop.f32.mrf.mxu1 }
 0x286   : > { %v10986_v32 = vpop.f32.mrf.mxu0  ;;  %14456 = vst [vmem:[#allocation115_spill] sm:$0xff] %v10988_v24 }
 0x287   : > { %14455 = vst [vmem:[#allocation114_spill] sm:$0xff] %v10986_v32 }
 0x288   : > { %8548 = vmatmul.msk.f32.vlgmr.msra.gmra.mxu1 %vm1145_vm2, %v3396_v53  ;;  %8348 = vmatmul.msk.f32.gmra.mxu2 %vm1145_vm2, %v10996_v3 }
 0x289   : > { %8531 = vmatmul.msk.f32.gmra.mxu0 %vm1145_vm2, %v10446_v30  ;;  %8500 = vmatmul.msk.f32.gmra.mxu3 %vm1145_vm2, %v9150_v52  ;;  %v11006_v1 = vpop.f32.mrf.mxu2  ;;  %v11013_v30 = vld [vmem:[#allocation2 + $0x18e] sm:$0xff] }
 0x28c   : > { %v11000_v47 = vpop.f32.mrf.mxu3 }
 0x28d   : > { %14457 = vst [vmem:[#allocation116_spill] sm:$0xff] %v11000_v47  ;;  %v11004_v24 = vpop.f32.mrf.mxu1 }
 0x28e   : > { %v11002_v32 = vpop.f32.mrf.mxu0  ;;  %14459 = vst [vmem:[#allocation118_spill] sm:$0xff] %v11004_v24  ;;  %v3398_v24 = vld [vmem:[#allocation2 + $0x49] sm:$0xff] }
 0x28f   : > { %14458 = vst [vmem:[#allocation117_spill] sm:$0xff] %v11002_v32 }
 0x290   : > { %8549 = vmatmul.msk.f32.gmra.mxu1 %vm1145_vm2, %v3397_v45  ;;  %8349 = vmatmul.msk.f32.gmra.mxu2 %vm1145_vm2, %v11013_v30 }
 0x291   : > { %8532 = vmatmul.msk.f32.gmra.mxu0 %vm1145_vm2, %v10455_v35  ;;  %8501 = vmatmul.msk.f32.gmra.mxu3 %vm1145_vm2, %v10346_v34  ;;  %v11023_v47 = vpop.f32.mrf.mxu2  ;;  %v11030_v34 = vld [vmem:[#allocation2 + $0x1a6] sm:$0xff] }
 0x294   : > { %v11017_v53 = vpop.f32.mrf.mxu3 }
 0x295   : > { %14460 = vst [vmem:[#allocation119_spill] sm:$0xff] %v11017_v53  ;;  %v11021_v32 = vpop.f32.mrf.mxu1 }
 0x296   : > { %v11019_v52 = vpop.f32.mrf.mxu0  ;;  %14462 = vst [vmem:[#allocation121_spill] sm:$0xff] %v11021_v32  ;;  %v3399_v32 = vld [vmem:[#allocation2 + $0x51] sm:$0xff] }
 0x297   : > { %14461 = vst [vmem:[#allocation120_spill] sm:$0xff] %v11019_v52 }
 0x298   : > { %8550 = vmatmul.msk.f32.gmra.mxu1 %vm1145_vm2, %v3398_v24  ;;  %8350 = vmatmul.msk.f32.gmra.mxu2 %vm1145_vm2, %v11030_v34 }
 0x299   : > { %8533 = vmatmul.msk.f32.gmra.mxu0 %vm1145_vm2, %v10468_v22  ;;  %8502 = vmatmul.msk.f32.gmra.mxu3 %vm1145_vm2, %v10367_v15  ;;  %v11047_v15 = vld [vmem:[#allocation2 + $0x1ae] sm:$0xff] }
 0x29b   : > { %v11040_v53 = vpop.f32.mrf.mxu2 }
 0x29c   : > { %v11034_v35 = vpop.f32.mrf.mxu3 }
 0x29d   : > { %14463 = vst [vmem:[#allocation122_spill] sm:$0xff] %v11034_v35  ;;  %v11038_v52 = vpop.f32.mrf.mxu1 }
 0x29e   : > { %v11036_v45 = vpop.f32.mrf.mxu0  ;;  %14465 = vst [vmem:[#allocation124_spill] sm:$0xff] %v11038_v52  ;;  %v3400_v52 = vld [vmem:[#allocation2 + $0x69] sm:$0xff] }
 0x29f   : > { %14464 = vst [vmem:[#allocation123_spill] sm:$0xff] %v11036_v45 }
 0x2a0   : > { %8551 = vmatmul.msk.f32.gmra.mxu1 %vm1145_vm2, %v3399_v32  ;;  %8351 = vmatmul.msk.f32.gmra.mxu2 %vm1145_vm2, %v11047_v15 }
 0x2a1   : > { %8534 = vmatmul.msk.f32.gmra.mxu0 %vm1145_vm2, %v10481_v36  ;;  %8503 = vmatmul.msk.f32.gmra.mxu3 %vm1145_vm2, %v10388_v57  ;;  %v11061_v36 = vld [vmem:[#allocation2 + $0x167] sm:$0xff] }
 0x2a2   : > { %14469 = vst [vmem:[#allocation128_spill] sm:$0xff] %v11061_v36  ;;  %v11066_v57 = vld [vmem:[#allocation2 + $0x1c6] sm:$0xff] }
 0x2a3   : > { %v11057_v35 = vpop.f32.mrf.mxu2 }
 0x2a4   : > { %v11051_v22 = vpop.f32.mrf.mxu3 }
 0x2a5   : > { %14466 = vst [vmem:[#allocation125_spill] sm:$0xff] %v11051_v22  ;;  %v11055_v45 = vpop.f32.mrf.mxu1 }
 0x2a6   : > { %v11053_v24 = vpop.f32.mrf.mxu0  ;;  %14468 = vst [vmem:[#allocation127_spill] sm:$0xff] %v11055_v45 }
 0x2a7   : > { %14467 = vst [vmem:[#allocation126_spill] sm:$0xff] %v11053_v24 }
 0x2a8   : > { %8552 = vmatmul.msk.f32.gmra.mxu1 %vm1145_vm2, %v3400_v52  ;;  %8352 = vmatmul.msk.f32.gmra.mxu2 %vm1145_vm2, %v11066_v57  ;;  %v11080_v52 = vld [vmem:[#allocation2 + $0x16f] sm:$0xff] }
 0x2a9   : > { %8535 = vmatmul.msk.f32.gmra.mxu0 %vm1145_vm2, %v10496_v41  ;;  %8504 = vmatmul.msk.f32.gmra.mxu3 %vm1145_vm2, %v11061_v36  ;;  %v3401_v41 = vld [vmem:[#allocation2 + $0x71] sm:$0xff]  ;;  %14474 = vst [vmem:[#allocation133_spill] sm:$0xff] %v11080_v52 }
 0x2aa   : > { %v11085_v36 = vld [vmem:[#allocation2 + $0x1ce] sm:$0xff] }
 0x2ab   : > { %v11076_v45 = vpop.f32.mrf.mxu2 }
 0x2ac   : > { %v11070_v32 = vpop.f32.mrf.mxu3  ;;  %14473 = vst [vmem:[#allocation132_spill] sm:$0xff] %v11076_v45 }
 0x2ad   : > { %14470 = vst [vmem:[#allocation129_spill] sm:$0xff] %v11070_v32  ;;  %v11074_v22 = vpop.f32.mrf.mxu1 }
 0x2ae   : > { %v11072_v24 = vpop.f32.mrf.mxu0  ;;  %14472 = vst [vmem:[#allocation131_spill] sm:$0xff] %v11074_v22 }
 0x2af   : > { %14471 = vst [vmem:[#allocation130_spill] sm:$0xff] %v11072_v24 }
 0x2b0   : > { %8553 = vmatmul.msk.f32.gmra.mxu1 %vm1145_vm2, %v3401_v41  ;;  %8353 = vmatmul.msk.f32.gmra.mxu2 %vm1145_vm2, %v11085_v36  ;;  %v11099_v41 = vld [vmem:[#allocation2 + $0x187] sm:$0xff] }
 0x2b1   : > { %8536 = vmatmul.msk.f32.gmra.mxu0 %vm1145_vm2, %v10510_v8  ;;  %8505 = vmatmul.msk.f32.gmra.mxu3 %vm1145_vm2, %v11080_v52  ;;  %v3402_v8 = vld [vmem:[#allocation2 + $0x89] sm:$0xff]  ;;  %14479 = vst [vmem:[#allocation138_spill] sm:$0xff] %v11099_v41  ;;  %v3704_v52 = vld [vmem:[%s14333_s3 + $0x98] sm:$0xff] }
 0x2b2   : > { %3815 = vmatpush.msrb.mxu2 %v3704_v52  ;;  %v11124_v52 = vld [vmem:[#allocation2 + $0x18f] sm:$0xff] }
 0x2b3   : > { %v11095_v45 = vpop.f32.mrf.mxu2  ;;  %14485 = vst [vmem:[#allocation144_spill] sm:$0xff] %v11124_v52 }
 0x2b4   : > { %v11089_v24 = vpop.f32.mrf.mxu3  ;;  %14478 = vst [vmem:[#allocation137_spill] sm:$0xff] %v11095_v45 }
 0x2b5   : > { %14475 = vst [vmem:[#allocation134_spill] sm:$0xff] %v11089_v24  ;;  %v11093_v22 = vpop.f32.mrf.mxu1  ;;  %v3979_v24 = vld [vmem:[%s14333_s3 + $0xa8] sm:$0xff] }
 0x2b6   : > { %v11091_v32 = vpop.f32.mrf.mxu0  ;;  %14477 = vst [vmem:[#allocation136_spill] sm:$0xff] %v11093_v22  ;;  %4090 = vmatpush.msrb.mxu3 %v3979_v24  ;;  %v11129_v24 = vld [vmem:[#allocation2 + $0x1ee] sm:$0xff] }
 0x2b7   : > { %14476 = vst [vmem:[#allocation135_spill] sm:$0xff] %v11091_v32  ;;  %v11107_v32 = vld [vmem:[#allocation2 + $0x1e6] sm:$0xff] }
 0x2b8   : > { %8554 = vmatmul.msk.f32.gmra.mxu1 %vm1145_vm2, %v3402_v8  ;;  %14480 = vst [vmem:[#allocation139_spill] sm:$0xff] %v11107_v32  ;;  %8354 = vmatmul.msk.f32.gmra.mxu2 %vm1145_vm2, %v11107_v32  ;;  %v11149_v32 = vld [vmem:[#allocation2 + $0x1a7] sm:$0xff] }
 0x2b9   : > { %8537 = vmatmul.msk.f32.gmra.mxu0 %vm1145_vm2, %v10528_v12  ;;  %8506 = vmatmul.msk.f32.gmra.mxu3 %vm1145_vm2, %v11099_v41  ;;  %v3403_v41 = vld [vmem:[#allocation2 + $0x91] sm:$0xff] }
 0x2bb   : > { %v11120_v45 = vpop.f32.mrf.mxu2 }
 0x2bc   : > { %v11114_v12 = vpop.f32.mrf.mxu3  ;;  %14484 = vst [vmem:[#allocation143_spill] sm:$0xff] %v11120_v45  ;;  %v3404_v45 = vld [vmem:[#allocation2 + $0xa9] sm:$0xff] }
 0x2bd   : > { %14481 = vst [vmem:[#allocation140_spill] sm:$0xff] %v11114_v12  ;;  %v11118_v22 = vpop.f32.mrf.mxu1 }
 0x2be   : > { %v11116_v8 = vpop.f32.mrf.mxu0  ;;  %14483 = vst [vmem:[#allocation142_spill] sm:$0xff] %v11118_v22 }
 0x2bf   : > { %14482 = vst [vmem:[#allocation141_spill] sm:$0xff] %v11116_v8  ;;  %v4254_v8 = vld [vmem:[%s14333_s3 + $0xb8] sm:$0xff] }
 0x2c0   : > { %8555 = vmatmul.msk.f32.gmra.mxu1 %vm1145_vm2, %v3403_v41  ;;  %8355 = vmatmul.msk.f32.gmra.mxu2 %vm1145_vm2, %v11129_v24 }
 0x2c1   : > { %8538 = vmatmul.msk.f32.gmra.mxu0 %vm1145_vm2, %v10554_v62  ;;  %8507 = vmatmul.msk.f32.gmra.mxu3 %vm1145_vm2, %v11124_v52  ;;  %v4529_v62 = vld [vmem:[%s14333_s3 + $0xc8] sm:$0xff] }
 0x2c2   : > { %4365 = vmatpush.msrb.mxu0 %v4254_v8  ;;  %4640 = vmatpush.msrb.mxu1 %v4529_v62 }
 0x2c3   : > { %v11145_v52 = vpop.f32.mrf.mxu2 }
 0x2c4   : > { %v11136_v12 = vpop.f32.mrf.mxu3 }
 0x2c5   : > { %14486 = vst [vmem:[#allocation145_spill] sm:$0xff] %v11136_v12  ;;  %v11143_v22 = vpop.f32.mrf.mxu1 }
 0x2c6   : > { %v11141_v41 = vpop.f32.mrf.mxu0  ;;  %14488 = vst [vmem:[#allocation147_spill] sm:$0xff] %v11143_v22  ;;  %v3405_v22 = vld [vmem:[#allocation2 + $0xb1] sm:$0xff] }
 0x2c7   : > { %14487 = vst [vmem:[#allocation146_spill] sm:$0xff] %v11141_v41 }
 0x2c8   : > { %8556 = vmatmul.msk.f32.gmra.mxu1 %vm1145_vm2, %v3404_v45  ;;  %8452 = vmatmul.msk.f32.vlgmr.msra.gmra.mxu2 %vm1145_vm2, %v10584_v59 }
 0x2c9   : > { %8539 = vmatmul.msk.f32.gmra.mxu0 %vm1145_vm2, %v10570_v4  ;;  %8508 = vmatmul.msk.f32.gmra.mxu3 %vm1145_vm2, %v11149_v32  ;;  %v11166_v4 = vld [vmem:[#allocation2 + $0x1af] sm:$0xff] }
 0x2cb   : > { %v11162_v12 = vpop.f32.mrf.mxu2 }
 0x2cc   : > { %v11156_v8 = vpop.f32.mrf.mxu3 }
 0x2cd   : > { %14489 = vst [vmem:[#allocation148_spill] sm:$0xff] %v11156_v8  ;;  %v11160_v62 = vpop.f32.mrf.mxu1 }
 0x2ce   : > { %v11158_v41 = vpop.f32.mrf.mxu0  ;;  %14491 = vst [vmem:[#allocation150_spill] sm:$0xff] %v11160_v62  ;;  %v3406_v62 = vld [vmem:[#allocation2 + $0xc9] sm:$0xff] }
 0x2cf   : > { %14490 = vst [vmem:[#allocation149_spill] sm:$0xff] %v11158_v41 }
 0x2d0   : > { %8557 = vmatmul.msk.f32.gmra.mxu1 %vm1145_vm2, %v3405_v22  ;;  %8453 = vmatmul.msk.f32.gmra.mxu2 %vm1145_vm2, %v10600_v58 }
 0x2d1   : > { %8540 = vmatmul.msk.f32.gmra.mxu0 %vm1145_vm2, %v10587_v49  ;;  %8509 = vmatmul.msk.f32.gmra.mxu3 %vm1145_vm2, %v11166_v4  ;;  %v11183_v49 = vld [vmem:[#allocation2 + $0x1c7] sm:$0xff] }
 0x2d3   : > { %v11179_v8 = vpop.f32.mrf.mxu2 }
 0x2d4   : > { %v11173_v59 = vpop.f32.mrf.mxu3 }
 0x2d5   : > { %14492 = vst [vmem:[#allocation151_spill] sm:$0xff] %v11173_v59  ;;  %v11177_v41 = vpop.f32.mrf.mxu1 }
 0x2d6   : > { %v11175_v45 = vpop.f32.mrf.mxu0  ;;  %14494 = vst [vmem:[#allocation153_spill] sm:$0xff] %v11177_v41  ;;  %v3407_v41 = vld [vmem:[#allocation2 + $0xd1] sm:$0xff] }
 0x2d7   : > { %14493 = vst [vmem:[#allocation152_spill] sm:$0xff] %v11175_v45 }
 0x2d8   : > { %8558 = vmatmul.msk.f32.gmra.mxu1 %vm1145_vm2, %v3406_v62  ;;  %8454 = vmatmul.msk.f32.gmra.mxu2 %vm1145_vm2, %v10627_v48 }
 0x2d9   : > { %8541 = vmatmul.msk.f32.gmra.mxu0 %vm1145_vm2, %v10605_v43  ;;  %8510 = vmatmul.msk.f32.gmra.mxu3 %vm1145_vm2, %v11183_v49  ;;  %v11200_v43 = vld [vmem:[#allocation2 + $0x1cf] sm:$0xff] }
 0x2db   : > { %v11196_v59 = vpop.f32.mrf.mxu2 }
 0x2dc   : > { %v11190_v58 = vpop.f32.mrf.mxu3  ;;  %14498 = vst [vmem:[#allocation157_spill] sm:$0xff] %v11196_v59  ;;  %v3408_v59 = vld [vmem:[#allocation2 + $0xe9] sm:$0xff] }
 0x2dd   : > { %14495 = vst [vmem:[#allocation154_spill] sm:$0xff] %v11190_v58  ;;  %v11194_v45 = vpop.f32.mrf.mxu1 }
 0x2de   : > { %v11192_v22 = vpop.f32.mrf.mxu0  ;;  %14497 = vst [vmem:[#allocation156_spill] sm:$0xff] %v11194_v45 }
 0x2df   : > { %14496 = vst [vmem:[#allocation155_spill] sm:$0xff] %v11192_v22 }
 0x2e0   : > { %8559 = vmatmul.msk.f32.gmra.mxu1 %vm1145_vm2, %v3407_v41  ;;  %8455 = vmatmul.msk.f32.gmra.mxu2 %vm1145_vm2, %v10648_v42  ;;  %v3978_v41 = vld [vmem:[%s14333_s3 + $0xa0] sm:$0xff] }
 0x2e1   : > { %8542 = vmatmul.msk.f32.gmra.mxu0 %vm1145_vm2, %v10619_v29  ;;  %8511 = vmatmul.msk.f32.gmra.mxu3 %vm1145_vm2, %v11200_v43  ;;  %v11217_v29 = vld [vmem:[#allocation2 + $0x1e7] sm:$0xff] }
 0x2e2   : > { %14503 = vst [vmem:[#allocation162_spill] sm:$0xff] %v11217_v29  ;;  %4091 = vmatpush.msrb.mxu3 %v3978_v41 }
 0x2e3   : > { %v11213_v45 = vpop.f32.mrf.mxu2 }
 0x2e4   : > { %v11207_v62 = vpop.f32.mrf.mxu3  ;;  %14502 = vst [vmem:[#allocation161_spill] sm:$0xff] %v11213_v45  ;;  %v3409_v45 = vld [vmem:[#allocation2 + $0xf1] sm:$0xff] }
 0x2e5   : > { %14499 = vst [vmem:[#allocation158_spill] sm:$0xff] %v11207_v62  ;;  %v11211_v58 = vpop.f32.mrf.mxu1 }
 0x2e6   : > { %v11209_v22 = vpop.f32.mrf.mxu0  ;;  %14501 = vst [vmem:[#allocation160_spill] sm:$0xff] %v11211_v58 }
 0x2e7   : > { %14500 = vst [vmem:[#allocation159_spill] sm:$0xff] %v11209_v22 }
 0x2e8   : > { %8560 = vmatmul.msk.f32.gmra.mxu1 %vm1145_vm2, %v3408_v59  ;;  %8456 = vmatmul.msk.f32.gmra.mxu2 %vm1145_vm2, %v10666_v9  ;;  %v4253_v59 = vld [vmem:[%s14333_s3 + $0xb0] sm:$0xff] }
 0x2e9   : > { %8543 = vmatmul.msk.f32.gmra.mxu0 %vm1145_vm2, %v10643_v25  ;;  %8512 = vmatmul.msk.f32.gmra.mxu3 %vm1145_vm2, %v11217_v29  ;;  %v11240_v29 = vld [vmem:[#allocation2 + $0x1ef] sm:$0xff] }
 0x2ea   : > { %4366 = vmatpush.msrb.mxu0 %v4253_v59  ;;  %14507 = vst [vmem:[#allocation166_spill] sm:$0xff] %v11240_v29 }
 0x2eb   : > { %v11236_v58 = vpop.f32.mrf.mxu2 }
 0x2ec   : > { %v11227_v22 = vpop.f32.mrf.mxu3 }
 0x2ed   : > { %14504 = vst [vmem:[#allocation163_spill] sm:$0xff] %v11227_v22  ;;  %v11231_v25 = vpop.f32.mrf.mxu1 }
 0x2ee   : > { %v11229_v62 = vpop.f32.mrf.mxu0  ;;  %14506 = vst [vmem:[#allocation165_spill] sm:$0xff] %v11231_v25  ;;  %v3410_v25 = vld [vmem:[#allocation2 + $0x109] sm:$0xff] }
 0x2ef   : > { %14505 = vst [vmem:[#allocation164_spill] sm:$0xff] %v11229_v62 }
 0x2f0   : > { %8561 = vmatmul.msk.f32.gmra.mxu1 %vm1145_vm2, %v3409_v45  ;;  %8457 = vmatmul.msk.f32.gmra.mxu2 %vm1145_vm2, %v10684_v40 }
 0x2f1   : > { %8544 = vmatmul.msk.f32.gmra.mxu0 %vm1145_vm2, %v10661_v23  ;;  %8513 = vmatmul.msk.f32.gmra.mxu3 %vm1145_vm2, %v11240_v29  ;;  %v11257_v23 = vld [vmem:[#allocation2 + $0x207] sm:$0xff]  ;;  %v11273_v29 = vld [vmem:[#allocation2 + $0x20f] sm:$0xff] }
 0x2f3   : > { %v11253_v59 = vpop.f32.mrf.mxu2 }
 0x2f4   : > { %v11247_v41 = vpop.f32.mrf.mxu3  ;;  %14511 = vst [vmem:[#allocation170_spill] sm:$0xff] %v11253_v59  ;;  %v3151_v59 = vld [vmem:[#allocation2 + $0x208] sm:$0xff] }
 0x2f5   : > { %14508 = vst [vmem:[#allocation167_spill] sm:$0xff] %v11247_v41  ;;  %v11251_v22 = vpop.f32.mrf.mxu1 }
 0x2f6   : > { %v11249_v62 = vpop.f32.mrf.mxu0  ;;  %14510 = vst [vmem:[#allocation169_spill] sm:$0xff] %v11251_v22 }
 0x2f7   : > { %14509 = vst [vmem:[#allocation168_spill] sm:$0xff] %v11249_v62 }
 0x2f8   : > { %8562 = vmatmul.msk.f32.gmra.mxu1 %vm1145_vm2, %v3410_v25  ;;  %8458 = vmatmul.msk.f32.gmra.mxu2 %vm1145_vm2, %v10699_v6 }
 0x2f9   : > { %8545 = vmatmul.msk.f32.gmra.mxu0 %vm1145_vm2, %v10679_v13  ;;  %8514 = vmatmul.msk.f32.gmra.mxu3 %vm1145_vm2, %v11257_v23  ;;  %v3411_v13 = vld [vmem:[#allocation2 + $0x111] sm:$0xff] }
 0x2fb   : > { %v11270_v22 = vpop.f32.mrf.mxu2 }
 0x2fc   : > { %v11264_v45 = vpop.f32.mrf.mxu3  ;;  %14515 = vst [vmem:[#allocation174_spill] sm:$0xff] %v11270_v22  ;;  %v3152_v22 = vld [vmem:[#allocation2 + $0x210] sm:$0xff] }
 0x2fd   : > { %14512 = vst [vmem:[#allocation171_spill] sm:$0xff] %v11264_v45  ;;  %v11268_v41 = vpop.f32.mrf.mxu1 }
 0x2fe   : > { %v11266_v62 = vpop.f32.mrf.mxu0  ;;  %14514 = vst [vmem:[#allocation173_spill] sm:$0xff] %v11268_v41 }
 0x2ff   : > { %14513 = vst [vmem:[#allocation172_spill] sm:$0xff] %v11266_v62 }
 0x300   : > { %8563 = vmatmul.msk.f32.gmra.mxu1 %vm1145_vm2, %v3411_v13  ;;  %8459 = vmatmul.msk.f32.gmra.mxu2 %vm1145_vm2, %v10714_v19 }
 0x301   : > { %8546 = vmatmul.msk.f32.gmra.mxu0 %vm1145_vm2, %v3151_v59  ;;  %8515 = vmatmul.msk.f32.gmra.mxu3 %vm1145_vm2, %v11273_v29  ;;  %v3412_v59 = vld [vmem:[#allocation2 + $0x129] sm:$0xff] }
 0x303   : > { %v11286_v41 = vpop.f32.mrf.mxu2 }
 0x304   : > { %v11280_v25 = vpop.f32.mrf.mxu3  ;;  %14519 = vst [vmem:[#allocation178_spill] sm:$0xff] %v11286_v41  ;;  %v3413_v41 = vld [vmem:[#allocation2 + $0x131] sm:$0xff] }
 0x305   : > { %14516 = vst [vmem:[#allocation175_spill] sm:$0xff] %v11280_v25  ;;  %v11284_v45 = vpop.f32.mrf.mxu1 }
 0x306   : > { %v11282_v62 = vpop.f32.mrf.mxu0  ;;  %14518 = vst [vmem:[#allocation177_spill] sm:$0xff] %v11284_v45 }
 0x307   : > { %14517 = vst [vmem:[#allocation176_spill] sm:$0xff] %v11282_v62 }
 0x308   : > { %8564 = vmatmul.msk.f32.gmra.mxu1 %vm1145_vm2, %v3412_v59  ;;  %8460 = vmatmul.msk.f32.gmra.mxu2 %vm1145_vm2, %v10736_v7 }
 0x309   : > { %8547 = vmatmul.msk.f32.gmra.mxu0 %vm1145_vm2, %v3152_v22  ;;  %8612 = vmatmul.msk.f32.vlgmr.msrb.gmra.mxu3 %vm1145_vm2, %v10627_v48 }
 0x30b   : > { %v11300_v45 = vpop.f32.mrf.mxu2 }
 0x30c   : > { %v11294_v13 = vpop.f32.mrf.mxu3 }
 0x30d   : > { %14520 = vst [vmem:[#allocation179_spill] sm:$0xff] %v11294_v13  ;;  %v11298_v62 = vpop.f32.mrf.mxu1  ;;  %v3414_v13 = vld [vmem:[#allocation2 + $0x149] sm:$0xff] }
 0x30e   : > { %v11296_v25 = vpop.f32.mrf.mxu0  ;;  %14522 = vst [vmem:[#allocation181_spill] sm:$0xff] %v11298_v62  ;;  %v14526_v62 = vld [vmem:[#allocation76_spill] sm:$0xff] }
 0x30f   : > { %14521 = vst [vmem:[#allocation180_spill] sm:$0xff] %v11296_v25 }
 0x310   : > { %8565 = vmatmul.msk.f32.gmra.mxu1 %vm1145_vm2, %v3413_v41  ;;  %8461 = vmatmul.msk.f32.gmra.mxu2 %vm1145_vm2, %v10755_v26 }
 0x311   : > { %8644 = vmatmul.msk.f32.vlgmr.msrb.gmra.mxu0 %vm1145_vm2, %v10728_v37  ;;  %8613 = vmatmul.msk.f32.gmra.mxu3 %vm1145_vm2, %v10648_v42 }
 0x313   : > { %v11315_v25 = vpop.f32.mrf.mxu2 }
 0x314   : > { %v11309_v48 = vpop.f32.mrf.mxu3 }
 0x315   : > { %14523 = vst [vmem:[#allocation182_spill] sm:$0xff] %v11309_v48  ;;  %v11313_v59 = vpop.f32.mrf.mxu1  ;;  %v4223_v48 = vld [vmem:[#allocation2 + $0x67] sm:$0xff] }
 0x316   : > { %v11311_v22 = vpop.f32.mrf.mxu0  ;;  %14525 = vst [vmem:[#allocation184_spill] sm:$0xff] %v11313_v59  ;;  %v3415_v59 = vld [vmem:[#allocation2 + $0x151] sm:$0xff] }
 0x317   : > { %14524 = vst [vmem:[#allocation183_spill] sm:$0xff] %v11311_v22 }
 0x318   : > { %8566 = vmatmul.msk.f32.gmra.mxu1 %vm1145_vm2, %v3414_v13  ;;  %8462 = vmatmul.msk.f32.gmra.mxu2 %vm1145_vm2, %v10776_v5 }
 0x319   : > { %8645 = vmatmul.msk.f32.gmra.mxu0 %vm1145_vm2, %v14526_v62  ;;  %8614 = vmatmul.msk.f32.gmra.mxu3 %vm1145_vm2, %v10666_v9 }
 0x31b   : > { %v11330_v22 = vpop.f32.mrf.mxu2 }
 0x31c   : > { %v11324_v42 = vpop.f32.mrf.mxu3 }
 0x31d   : > { %14527 = vst [vmem:[#allocation76_spill] sm:$0xff] %v11324_v42  ;;  %v11328_v41 = vpop.f32.mrf.mxu1  ;;  %v4224_v42 = vld [vmem:[#allocation2 + $0x6f] sm:$0xff] }
 0x31e   : > { %v11326_v37 = vpop.f32.mrf.mxu0  ;;  %14529 = vst [vmem:[#allocation186_spill] sm:$0xff] %v11328_v41  ;;  %v3416_v41 = vld [vmem:[#allocation2 + $0x169] sm:$0xff] }
 0x31f   : > { %14528 = vst [vmem:[#allocation185_spill] sm:$0xff] %v11326_v37 }
 0x320   : > { %8567 = vmatmul.msk.f32.gmra.mxu1 %vm1145_vm2, %v3415_v59  ;;  %8463 = vmatmul.msk.f32.gmra.mxu2 %vm1145_vm2, %v10795_v2 }
 0x321   : > { %8646 = vmatmul.msk.f32.gmra.mxu0 %vm1145_vm2, %v4223_v48  ;;  %8615 = vmatmul.msk.f32.gmra.mxu3 %vm1145_vm2, %v10684_v40 }
 0x323   : > { %v11344_v37 = vpop.f32.mrf.mxu2 }
 0x324   : > { %v11338_v9 = vpop.f32.mrf.mxu3  ;;  %14533 = vst [vmem:[#allocation190_spill] sm:$0xff] %v11344_v37 }
 0x325   : > { %14530 = vst [vmem:[#allocation187_spill] sm:$0xff] %v11338_v9  ;;  %v11342_v13 = vpop.f32.mrf.mxu1  ;;  %v4225_v9 = vld [vmem:[#allocation2 + $0x87] sm:$0xff] }
 0x326   : > { %v11340_v62 = vpop.f32.mrf.mxu0  ;;  %14532 = vst [vmem:[#allocation189_spill] sm:$0xff] %v11342_v13  ;;  %v3417_v13 = vld [vmem:[#allocation2 + $0x171] sm:$0xff] }
 0x327   : > { %14531 = vst [vmem:[#allocation188_spill] sm:$0xff] %v11340_v62 }
 0x328   : > { %8568 = vmatmul.msk.f32.gmra.mxu1 %vm1145_vm2, %v3416_v41  ;;  %8464 = vmatmul.msk.f32.gmra.mxu2 %vm1145_vm2, %v10816_v44 }
 0x329   : > { %8647 = vmatmul.msk.f32.gmra.mxu0 %vm1145_vm2, %v4224_v42  ;;  %8616 = vmatmul.msk.f32.gmra.mxu3 %vm1145_vm2, %v10699_v6 }
 0x32b   : > { %v11358_v62 = vpop.f32.mrf.mxu2 }
 0x32c   : > { %v11352_v40 = vpop.f32.mrf.mxu3  ;;  %14537 = vst [vmem:[#allocation194_spill] sm:$0xff] %v11358_v62 }
 0x32d   : > { %14534 = vst [vmem:[#allocation191_spill] sm:$0xff] %v11352_v40  ;;  %v11356_v59 = vpop.f32.mrf.mxu1 }
 0x32e   : > { %v11354_v48 = vpop.f32.mrf.mxu0  ;;  %14536 = vst [vmem:[#allocation193_spill] sm:$0xff] %v11356_v59  ;;  %v3419_v59 = vld [vmem:[#allocation2 + $0x191] sm:$0xff] }
 0x32f   : > { %14535 = vst [vmem:[#allocation192_spill] sm:$0xff] %v11354_v48  ;;  %v3703_v48 = vld [vmem:[%s14333_s3 + $0x90] sm:$0xff] }
 0x330   : > { %8569 = vmatmul.msk.f32.gmra.mxu1 %vm1145_vm2, %v3417_v13  ;;  %8465 = vmatmul.msk.f32.gmra.mxu2 %vm1145_vm2, %v10837_v20  ;;  %v3418_v13 = vld [vmem:[#allocation2 + $0x189] sm:$0xff] }
 0x331   : > { %8648 = vmatmul.msk.f32.gmra.mxu0 %vm1145_vm2, %v4225_v9  ;;  %8617 = vmatmul.msk.f32.gmra.mxu3 %vm1145_vm2, %v10714_v19  ;;  %v4226_v9 = vld [vmem:[#allocation2 + $0x8f] sm:$0xff] }
 0x332   : > { %3816 = vmatpush.msrb.mxu2 %v3703_v48  ;;  %v4227_v48 = vld [vmem:[#allocation2 + $0xa7] sm:$0xff] }
 0x333   : > { %v11375_v40 = vpop.f32.mrf.mxu2 }
 0x334   : > { %v11366_v6 = vpop.f32.mrf.mxu3  ;;  %14541 = vst [vmem:[#allocation198_spill] sm:$0xff] %v11375_v40 }
 0x335   : > { %14538 = vst [vmem:[#allocation195_spill] sm:$0xff] %v11366_v6  ;;  %v11370_v41 = vpop.f32.mrf.mxu1 }
 0x336   : > { %v11368_v42 = vpop.f32.mrf.mxu0  ;;  %14540 = vst [vmem:[#allocation197_spill] sm:$0xff] %v11370_v41 }
 0x337   : > { %14539 = vst [vmem:[#allocation196_spill] sm:$0xff] %v11368_v42 }
 0x338   : > { %8570 = vmatmul.msk.f32.gmra.mxu1 %vm1145_vm2, %v3418_v13  ;;  %8466 = vmatmul.msk.f32.gmra.mxu2 %vm1145_vm2, %v10857_v27 }
 0x339   : > { %8649 = vmatmul.msk.f32.gmra.mxu0 %vm1145_vm2, %v4226_v9  ;;  %8618 = vmatmul.msk.f32.gmra.mxu3 %vm1145_vm2, %v10736_v7  ;;  %v14546_v9 = vld [vmem:[#allocation7_spill] sm:$0xff] }
 0x33a   : > { %v1650_v7 = vadd.f32 %v10867_v51, %v14546_v9  ;;  %v4228_v9 = vld [vmem:[#allocation2 + $0xaf] sm:$0xff] }
 0x33b   : > { %v11389_v41 = vpop.f32.mrf.mxu2 }
 0x33c   : > { %v11383_v19 = vpop.f32.mrf.mxu3  ;;  %14545 = vst [vmem:[#allocation202_spill] sm:$0xff] %v11389_v41 }
 0x33d   : > { %14542 = vst [vmem:[#allocation199_spill] sm:$0xff] %v11383_v19  ;;  %v11387_v6 = vpop.f32.mrf.mxu1  ;;  %v14548_v19 = vld [vmem:[#allocation9_spill] sm:$0xff] }
 0x33e   : > { %v11385_v42 = vpop.f32.mrf.mxu0  ;;  %14544 = vst [vmem:[#allocation201_spill] sm:$0xff] %v11387_v6  ;;  %v1988_v6 = vadd.f32 %v14548_v19, %v1650_v7  ;;  %v14553_v19 = vld [vmem:[#allocation8_spill] sm:$0xff] }
 0x33f   : > { %14543 = vst [vmem:[#allocation200_spill] sm:$0xff] %v11385_v42  ;;  %v4528_v42 = vld [vmem:[%s14333_s3 + $0xc0] sm:$0xff] }
 0x340   : > { %8571 = vmatmul.msk.f32.gmra.mxu1 %vm1145_vm2, %v3419_v59  ;;  %8467 = vmatmul.msk.f32.gmra.mxu2 %vm1145_vm2, %v10874_v11  ;;  %v2263_v7 = vadd.f32 %v14553_v19, %v1988_v6 }
 0x341   : > { %8650 = vmatmul.msk.f32.gmra.mxu0 %vm1145_vm2, %v4227_v48  ;;  %8619 = vmatmul.msk.f32.gmra.mxu3 %vm1145_vm2, %v10755_v26  ;;  %v3420_v26 = vld [vmem:[#allocation2 + $0x1a9] sm:$0xff] }
 0x342   : > { %4641 = vmatpush.msrb.mxu1 %v4528_v42 }
 0x343   : > { %v11409_v51 = vpop.f32.mrf.mxu2 }
 0x344   : > { %v11399_v13 = vpop.f32.mrf.mxu3  ;;  %14551 = vst [vmem:[#allocation204_spill] sm:$0xff] %v11409_v51 }
 0x345   : > { %14547 = vst [vmem:[#allocation7_spill] sm:$0xff] %v11399_v13  ;;  %v11407_v59 = vpop.f32.mrf.mxu1  ;;  %v14552_v13 = vld [vmem:[#allocation10_spill] sm:$0xff] }
 0x346   : > { %v11405_v48 = vpop.f32.mrf.mxu0  ;;  %14550 = vst [vmem:[#allocation203_spill] sm:$0xff] %v11407_v59  ;;  %v1653_v41 = vadd.f32 %v10884_v55, %v14552_v13  ;;  %v4229_v55 = vld [vmem:[#allocation2 + $0xc7] sm:$0xff]  ;;  %v3421_v13 = vld [vmem:[#allocation2 + $0x1b1] sm:$0xff] }
 0x347   : > { %14549 = vst [vmem:[#allocation9_spill] sm:$0xff] %v11405_v48  ;;  %v14555_v48 = vld [vmem:[#allocation12_spill] sm:$0xff] }
 0x348   : > { %8572 = vmatmul.msk.f32.gmra.mxu1 %vm1145_vm2, %v3420_v26  ;;  %8468 = vmatmul.msk.f32.gmra.mxu2 %vm1145_vm2, %v10891_v60  ;;  %v1989_v59 = vadd.f32 %v14555_v48, %v1653_v41  ;;  %v14557_v26 = vld [vmem:[#allocation62_spill] sm:$0xff]  ;;  %v14559_v41 = vld [vmem:[#allocation11_spill] sm:$0xff] }
 0x349   : > { %8651 = vmatmul.msk.f32.gmra.mxu0 %vm1145_vm2, %v4228_v9  ;;  %8620 = vmatmul.msk.f32.gmra.mxu3 %vm1145_vm2, %v10776_v5  ;;  %v2538_v40 = vadd.f32 %v14557_v26, %v2263_v7  ;;  %v14558_v5 = vld [vmem:[#allocation13_spill] sm:$0xff]  ;;  %v14561_v7 = vld [vmem:[#allocation15_spill] sm:$0xff] }
 0x34a   : > { %v1656_v6 = vadd.f32 %v10901_v46, %v14558_v5  ;;  %v2264_v48 = vadd.f32 %v14559_v41, %v1989_v59  ;;  %v4230_v46 = vld [vmem:[#allocation2 + $0xcf] sm:$0xff] }
 0x34b   : > { %v2718_v62 = vpop.f32.mrf.mxu2  ;;  %v3422_v5 = vld [vmem:[#allocation2 + $0x1c9] sm:$0xff] }
 0x34c   : > { %v11420_v42 = vpop.f32.mrf.mxu3  ;;  %v11428_v37 = vadd.f32 %v2718_v62, %v2538_v40  ;;  %v1990_v62 = vadd.f32 %v14561_v7, %v1656_v6  ;;  %v14565_v6 = vld [vmem:[#allocation14_spill] sm:$0xff] }
 0x34d   : > { %14554 = vst [vmem:[#allocation10_spill] sm:$0xff] %v11420_v42  ;;  %v11425_v9 = vpop.f32.mrf.mxu1  ;;  %v14567_v7 = vld [vmem:[#allocation18_spill] sm:$0xff] }
 0x34e   : > { %v11423_v51 = vpop.f32.mrf.mxu0  ;;  %v2265_v41 = vadd.f32 %v14565_v6, %v1990_v62 }
 0x34f   : > { %14556 = vst [vmem:[#allocation8_spill] sm:$0xff] %v11423_v51 }
 0x350   : > { %8573 = vmatmul.msk.f32.gmra.mxu1 %vm1145_vm2, %v3421_v13  ;;  %8469 = vmatmul.msk.f32.gmra.mxu2 %vm1145_vm2, %v10908_v31 }
 0x351   : > { %8652 = vmatmul.msk.f32.gmra.mxu0 %vm1145_vm2, %v4229_v55  ;;  %8621 = vmatmul.msk.f32.gmra.mxu3 %vm1145_vm2, %v10795_v2  ;;  %v14563_v55 = vld [vmem:[#allocation66_spill] sm:$0xff]  ;;  %v14564_v2 = vld [vmem:[#allocation16_spill] sm:$0xff] }
 0x352   : > { %v2539_v13 = vadd.f32 %v14563_v55, %v2264_v48  ;;  %v1659_v59 = vadd.f32 %v10918_v33, %v14564_v2  ;;  %v4231_v33 = vld [vmem:[#allocation2 + $0xe7] sm:$0xff]  ;;  %v3423_v2 = vld [vmem:[#allocation2 + $0x1d1] sm:$0xff] }
 0x353   : > { %v2721_v51 = vpop.f32.mrf.mxu2 }
 0x354   : > { %v11439_v19 = vpop.f32.mrf.mxu3  ;;  %v11447_v42 = vadd.f32 %v2721_v51, %v2539_v13  ;;  %v1991_v51 = vadd.f32 %v14567_v7, %v1659_v59  ;;  %v14571_v59 = vld [vmem:[#allocation17_spill] sm:$0xff] }
 0x355   : > { %14560 = vst [vmem:[#allocation12_spill] sm:$0xff] %v11439_v19  ;;  %v11444_v26 = vpop.f32.mrf.mxu1  ;;  %v14573_v7 = vld [vmem:[#allocation21_spill] sm:$0xff] }
 0x356   : > { %v11442_v40 = vpop.f32.mrf.mxu0  ;;  %v2266_v6 = vadd.f32 %v14571_v59, %v1991_v51 }
 0x357   : > { %14562 = vst [vmem:[#allocation62_spill] sm:$0xff] %v11442_v40 }
 0x358   : > { %8574 = vmatmul.msk.f32.gmra.mxu1 %vm1145_vm2, %v3422_v5  ;;  %8470 = vmatmul.msk.f32.gmra.mxu2 %vm1145_vm2, %v10925_v38 }
 0x359   : > { %8653 = vmatmul.msk.f32.gmra.mxu0 %vm1145_vm2, %v4230_v46  ;;  %8622 = vmatmul.msk.f32.gmra.mxu3 %vm1145_vm2, %v10816_v44  ;;  %v14569_v46 = vld [vmem:[#allocation70_spill] sm:$0xff]  ;;  %v14570_v44 = vld [vmem:[#allocation19_spill] sm:$0xff] }
 0x35a   : > { %v2540_v5 = vadd.f32 %v14569_v46, %v2265_v41  ;;  %v1662_v62 = vadd.f32 %v10935_v17, %v14570_v44  ;;  %v4232_v17 = vld [vmem:[#allocation2 + $0xef] sm:$0xff] }
 0x35b   : > { %v2724_v40 = vpop.f32.mrf.mxu2  ;;  %v3424_v44 = vld [vmem:[#allocation2 + $0x1e9] sm:$0xff] }
 0x35c   : > { %v11458_v48 = vpop.f32.mrf.mxu3  ;;  %v11466_v19 = vadd.f32 %v2724_v40, %v2540_v5  ;;  %v1992_v40 = vadd.f32 %v14573_v7, %v1662_v62  ;;  %v14577_v62 = vld [vmem:[#allocation20_spill] sm:$0xff]  ;;  %v14579_v7 = vld [vmem:[#allocation23_spill] sm:$0xff] }
 0x35d   : > { %14566 = vst [vmem:[#allocation13_spill] sm:$0xff] %v11458_v48  ;;  %v11463_v13 = vpop.f32.mrf.mxu1 }
 0x35e   : > { %v11461_v55 = vpop.f32.mrf.mxu0  ;;  %v2267_v59 = vadd.f32 %v14577_v62, %v1992_v40 }
 0x35f   : > { %14568 = vst [vmem:[#allocation11_spill] sm:$0xff] %v11461_v55 }
 0x360   : > { %8575 = vmatmul.msk.f32.gmra.mxu1 %vm1145_vm2, %v3423_v2  ;;  %8471 = vmatmul.msk.f32.gmra.mxu2 %vm1145_vm2, %v10942_v56 }
 0x361   : > { %8654 = vmatmul.msk.f32.gmra.mxu0 %vm1145_vm2, %v4231_v33  ;;  %8623 = vmatmul.msk.f32.gmra.mxu3 %vm1145_vm2, %v10837_v20  ;;  %v14575_v33 = vld [vmem:[#allocation74_spill] sm:$0xff] }
 0x362   : > { %v2541_v2 = vadd.f32 %v14575_v33, %v2266_v6  ;;  %v14576_v20 = vld [vmem:[#allocation22_spill] sm:$0xff] }
 0x363   : > { %v2727_v55 = vpop.f32.mrf.mxu2  ;;  %v1665_v51 = vadd.f32 %v10952_v54, %v14576_v20  ;;  %v3425_v54 = vld [vmem:[#allocation2 + $0x1f1] sm:$0xff] }
 0x364   : > { %v11477_v41 = vpop.f32.mrf.mxu3  ;;  %v11485_v48 = vadd.f32 %v2727_v55, %v2541_v2 }
 0x365   : > { %14572 = vst [vmem:[#allocation15_spill] sm:$0xff] %v11477_v41  ;;  %v11482_v5 = vpop.f32.mrf.mxu1  ;;  %v1993_v55 = vadd.f32 %v14579_v7, %v1665_v51  ;;  %v14582_v51 = vld [vmem:[#allocation24_spill] sm:$0xff]  ;;  %v4505_v41 = vld [vmem:[#allocation2 + $0xd0] sm:$0xff] }
 0x366   : > { %v11480_v46 = vpop.f32.mrf.mxu0 }
 0x367   : > { %14574 = vst [vmem:[#allocation66_spill] sm:$0xff] %v11480_v46  ;;  %v2268_v62 = vadd.f32 %v14582_v51, %v1993_v55  ;;  %v14587_v55 = vld [vmem:[#allocation27_spill] sm:$0xff]  ;;  %v14589_v51 = vld [vmem:[#allocation29_spill] sm:$0xff] }
 0x368   : > { %8576 = vmatmul.msk.f32.gmra.mxu1 %vm1145_vm2, %v3424_v44  ;;  %8472 = vmatmul.msk.f32.gmra.mxu2 %vm1145_vm2, %v10961_v16 }
 0x369   : > { %8655 = vmatmul.msk.f32.gmra.mxu0 %vm1145_vm2, %v4232_v17  ;;  %8624 = vmatmul.msk.f32.gmra.mxu3 %vm1145_vm2, %v10857_v27  ;;  %v2542_v17 = vadd.f32 %v10765_v39, %v2267_v59  ;;  %v14581_v27 = vld [vmem:[#allocation25_spill] sm:$0xff]  ;;  %v14584_v59 = vld [vmem:[#allocation26_spill] sm:$0xff] }
 0x36a   : > { %v1668_v40 = vadd.f32 %v10971_v21, %v14581_v27  ;;  %v3426_v21 = vld [vmem:[#allocation2 + $0x209] sm:$0xff] }
 0x36b   : > { %v2730_v44 = vpop.f32.mrf.mxu2 }
 0x36c   : > { %v11496_v6 = vpop.f32.mrf.mxu3  ;;  %v11504_v20 = vadd.f32 %v2730_v44, %v2542_v17  ;;  %v1994_v7 = vadd.f32 %v14584_v59, %v1668_v40  ;;  %v2543_v44 = vadd.f32 %v10785_v50, %v2268_v62 }
 0x36d   : > { %14578 = vst [vmem:[#allocation16_spill] sm:$0xff] %v11496_v6  ;;  %v11501_v2 = vpop.f32.mrf.mxu1  ;;  %v14662_v6 = vld [vmem:[#allocation115_spill] sm:$0xff] }
 0x36e   : > { %v11499_v33 = vpop.f32.mrf.mxu0  ;;  %v2269_v40 = vadd.f32 %v14587_v55, %v1994_v7  ;;  %v14592_v7 = vld [vmem:[#allocation31_spill] sm:$0xff]  ;;  %v14594_v55 = vld [vmem:[#allocation32_spill] sm:$0xff] }
 0x36f   : > { %14580 = vst [vmem:[#allocation14_spill] sm:$0xff] %v11499_v33 }
 0x370   : > { %8577 = vmatmul.msk.f32.gmra.mxu1 %vm1145_vm2, %v3425_v54  ;;  %8473 = vmatmul.msk.f32.gmra.mxu2 %vm1145_vm2, %v10980_v61 }
 0x371   : > { %8656 = vmatmul.msk.f32.gmra.mxu0 %vm1145_vm2, %v10957_v18  ;;  %8625 = vmatmul.msk.f32.gmra.mxu3 %vm1145_vm2, %v10874_v11  ;;  %v14586_v11 = vld [vmem:[#allocation28_spill] sm:$0xff] }
 0x372   : > { %v1671_v61 = vadd.f32 %v10990_v63, %v14586_v11  ;;  %v4235_v63 = vld [vmem:[#allocation2 + $0x127] sm:$0xff] }
 0x373   : > { %v2733_v54 = vpop.f32.mrf.mxu2 }
 0x374   : > { %v11516_v39 = vpop.f32.mrf.mxu3  ;;  %v11524_v27 = vadd.f32 %v2733_v54, %v2543_v44  ;;  %v1995_v62 = vadd.f32 %v14589_v51, %v1671_v61  ;;  %v2544_v44 = vadd.f32 %v10803_v28, %v2269_v40 }
 0x375   : > { %14583 = vst [vmem:[#allocation18_spill] sm:$0xff] %v11516_v39  ;;  %v11521_v18 = vpop.f32.mrf.mxu1  ;;  %v4504_v39 = vld [vmem:[#allocation2 + $0xc8] sm:$0xff] }
 0x376   : > { %v11519_v17 = vpop.f32.mrf.mxu0  ;;  %v2270_v61 = vadd.f32 %v14592_v7, %v1995_v62  ;;  %v14597_v62 = vld [vmem:[#allocation34_spill] sm:$0xff]  ;;  %v14599_v7 = vld [vmem:[#allocation36_spill] sm:$0xff] }
 0x377   : > { %14585 = vst [vmem:[#allocation70_spill] sm:$0xff] %v11519_v17  ;;  %v11720_v17 = vld [vmem:[#allocation2 + $0x1ae] sm:$0xff] }
 0x378   : > { %8578 = vmatmul.msk.f32.gmra.mxu1 %vm1145_vm2, %v3426_v21  ;;  %8474 = vmatmul.msk.f32.gmra.mxu2 %vm1145_vm2, %v10996_v3  ;;  %v3427_v21 = vld [vmem:[#allocation2 + $0x211] sm:$0xff] }
 0x379   : > { %8657 = vmatmul.msk.f32.gmra.mxu0 %vm1145_vm2, %v10976_v10  ;;  %8626 = vmatmul.msk.f32.gmra.mxu3 %vm1145_vm2, %v10891_v60  ;;  %v14591_v3 = vld [vmem:[#allocation30_spill] sm:$0xff] }
 0x37a   : > { %v1674_v60 = vadd.f32 %v11006_v1, %v14591_v3  ;;  %v4236_v1 = vld [vmem:[#allocation2 + $0x12f] sm:$0xff] }
 0x37b   : > { %v2736_v54 = vpop.f32.mrf.mxu2 }
 0x37c   : > { %v11536_v50 = vpop.f32.mrf.mxu3  ;;  %v11544_v11 = vadd.f32 %v2736_v54, %v2544_v44  ;;  %v1996_v40 = vadd.f32 %v14594_v55, %v1674_v60  ;;  %v2545_v54 = vadd.f32 %v10828_v14, %v2270_v61 }
 0x37d   : > { %14588 = vst [vmem:[#allocation19_spill] sm:$0xff] %v11536_v50  ;;  %v11541_v10 = vpop.f32.mrf.mxu1  ;;  %v14641_v50 = vld [vmem:[#allocation144_spill] sm:$0xff] }
 0x37e   : > { %v11539_v59 = vpop.f32.mrf.mxu0  ;;  %v2271_v60 = vadd.f32 %v14597_v62, %v1996_v40  ;;  %v14602_v40 = vld [vmem:[#allocation38_spill] sm:$0xff]  ;;  %v14604_v62 = vld [vmem:[#allocation40_spill] sm:$0xff] }
 0x37f   : > { %14590 = vst [vmem:[#allocation17_spill] sm:$0xff] %v11539_v59 }
 0x380   : > { %8579 = vmatmul.msk.f32.gmra.mxu1 %vm1145_vm2, %v3427_v21  ;;  %8475 = vmatmul.msk.f32.gmra.mxu2 %vm1145_vm2, %v11013_v30  ;;  %v4496_v21 = vld [vmem:[#allocation2 + $0x48] sm:$0xff] }
 0x381   : > { %8658 = vmatmul.msk.f32.gmra.mxu0 %vm1145_vm2, %v4235_v63  ;;  %8627 = vmatmul.msk.f32.gmra.mxu3 %vm1145_vm2, %v10908_v31  ;;  %v14596_v31 = vld [vmem:[#allocation33_spill] sm:$0xff] }
 0x382   : > { %v1677_v30 = vadd.f32 %v11023_v47, %v14596_v31  ;;  %v4237_v47 = vld [vmem:[#allocation2 + $0x147] sm:$0xff] }
 0x383   : > { %v2739_v63 = vpop.f32.mrf.mxu2 }
 0x384   : > { %v11555_v28 = vpop.f32.mrf.mxu3  ;;  %v11563_v3 = vadd.f32 %v2739_v63, %v2545_v54  ;;  %v1997_v61 = vadd.f32 %v14599_v7, %v1677_v30  ;;  %v2546_v63 = vadd.f32 %v10848_v0, %v2271_v60 }
 0x385   : > { %14593 = vst [vmem:[#allocation21_spill] sm:$0xff] %v11555_v28  ;;  %v11560_v44 = vpop.f32.mrf.mxu1  ;;  %v14632_v28 = vld [vmem:[#allocation138_spill] sm:$0xff] }
 0x386   : > { %v11558_v51 = vpop.f32.mrf.mxu0  ;;  %v2272_v30 = vadd.f32 %v14602_v40, %v1997_v61  ;;  %v14608_v61 = vld [vmem:[#allocation42_spill] sm:$0xff] }
 0x387   : > { %14595 = vst [vmem:[#allocation74_spill] sm:$0xff] %v11558_v51 }
 0x388   : > { %8676 = vmatmul.msk.f32.vlgmr.msrb.gmra.mxu1 %vm1145_vm2, %v4496_v21  ;;  %8476 = vmatmul.msk.f32.gmra.mxu2 %vm1145_vm2, %v11030_v34  ;;  %v4497_v21 = vld [vmem:[#allocation2 + $0x50] sm:$0xff] }
 0x389   : > { %8659 = vmatmul.msk.f32.gmra.mxu0 %vm1145_vm2, %v4236_v1  ;;  %8628 = vmatmul.msk.f32.gmra.mxu3 %vm1145_vm2, %v10925_v38  ;;  %v14601_v38 = vld [vmem:[#allocation37_spill] sm:$0xff] }
 0x38a   : > { %v1680_v34 = vadd.f32 %v11040_v53, %v14601_v38  ;;  %v4238_v53 = vld [vmem:[#allocation2 + $0x14f] sm:$0xff] }
 0x38b   : > { %v2742_v1 = vpop.f32.mrf.mxu2  ;;  %v4498_v38 = vld [vmem:[#allocation2 + $0x68] sm:$0xff] }
 0x38c   : > { %v11574_v14 = vpop.f32.mrf.mxu3  ;;  %v11582_v31 = vadd.f32 %v2742_v1, %v2546_v63  ;;  %v1998_v60 = vadd.f32 %v14604_v62, %v1680_v34  ;;  %v14606_v1 = vld [vmem:[#allocation94_spill] sm:$0xff] }
 0x38d   : > { %14598 = vst [vmem:[#allocation22_spill] sm:$0xff] %v11574_v14  ;;  %v11579_v54 = vpop.f32.mrf.mxu1 }
 0x38e   : > { %v11577_v55 = vpop.f32.mrf.mxu0  ;;  %v2273_v34 = vadd.f32 %v14608_v61, %v1998_v60  ;;  %v11624_v60 = vld [vmem:[#allocation2 + $0x16e] sm:$0xff] }
 0x38f   : > { %14600 = vst [vmem:[#allocation20_spill] sm:$0xff] %v11577_v55  ;;  %v14615_v61 = vld [vmem:[#allocation132_spill] sm:$0xff] }
 0x390   : > { %8677 = vmatmul.msk.f32.gmra.mxu1 %vm1145_vm2, %v4497_v21  ;;  %8477 = vmatmul.msk.f32.gmra.mxu2 %vm1145_vm2, %v11047_v15 }
 0x391   : > { %8660 = vmatmul.msk.f32.gmra.mxu0 %vm1145_vm2, %v4237_v47  ;;  %8629 = vmatmul.msk.f32.gmra.mxu3 %vm1145_vm2, %v10942_v56  ;;  %v2547_v47 = vadd.f32 %v14606_v1, %v2272_v30  ;;  %v14607_v56 = vld [vmem:[#allocation41_spill] sm:$0xff]  ;;  %v14610_v30 = vld [vmem:[#allocation44_spill] sm:$0xff] }
 0x392   : > { %v1683_v15 = vadd.f32 %v11057_v35, %v14607_v56  ;;  %v4499_v35 = vld [vmem:[#allocation2 + $0x70] sm:$0xff] }
 0x393   : > { %v2745_v21 = vpop.f32.mrf.mxu2 }
 0x394   : > { %v11593_v0 = vpop.f32.mrf.mxu3  ;;  %v11601_v55 = vadd.f32 %v2745_v21, %v2547_v47  ;;  %v1999_v62 = vadd.f32 %v14610_v30, %v1683_v15  ;;  %v14612_v21 = vld [vmem:[#allocation97_spill] sm:$0xff]  ;;  %v14616_v30 = vld [vmem:[#allocation46_spill] sm:$0xff] }
 0x395   : > { %14603 = vst [vmem:[#allocation23_spill] sm:$0xff] %v11593_v0  ;;  %v11598_v63 = vpop.f32.mrf.mxu1  ;;  %v14622_v0 = vld [vmem:[#allocation133_spill] sm:$0xff] }
 0x396   : > { %v11596_v7 = vpop.f32.mrf.mxu0 }
 0x397   : > { %14605 = vst [vmem:[#allocation25_spill] sm:$0xff] %v11596_v7 }
 0x398   : > { %8678 = vmatmul.msk.f32.gmra.mxu1 %vm1145_vm2, %v4498_v38  ;;  %8478 = vmatmul.msk.f32.gmra.mxu2 %vm1145_vm2, %v11066_v57  ;;  %v14614_v57 = vld [vmem:[#allocation45_spill] sm:$0xff] }
 0x399   : > { %8661 = vmatmul.msk.f32.gmra.mxu0 %vm1145_vm2, %v4238_v53  ;;  %8630 = vmatmul.msk.f32.gmra.mxu3 %vm1145_vm2, %v10961_v16  ;;  %v2548_v53 = vadd.f32 %v14612_v21, %v2273_v34  ;;  %v14613_v16 = vld [vmem:[#allocation128_spill] sm:$0xff]  ;;  %v1686_v15 = vadd.f32 %v14615_v61, %v14614_v57 }
 0x39a   : > { %v14618_v21 = vld [vmem:[#allocation48_spill] sm:$0xff] }
 0x39b   : > { %v2748_v38 = vpop.f32.mrf.mxu2  ;;  %v4500_v57 = vld [vmem:[#allocation2 + $0x88] sm:$0xff] }
 0x39c   : > { %v11612_v40 = vpop.f32.mrf.mxu3  ;;  %v11620_v56 = vadd.f32 %v2748_v38, %v2548_v53  ;;  %v2000_v53 = vadd.f32 %v14618_v21, %v1686_v15  ;;  %v14625_v21 = vld [vmem:[#allocation50_spill] sm:$0xff] }
 0x39d   : > { %14609 = vst [vmem:[#allocation24_spill] sm:$0xff] %v11612_v40  ;;  %v11617_v47 = vpop.f32.mrf.mxu1 }
 0x39e   : > { %v11615_v1 = vpop.f32.mrf.mxu0 }
 0x39f   : > { %14611 = vst [vmem:[#allocation26_spill] sm:$0xff] %v11615_v1  ;;  %v2274_v1 = vadd.f32 %v14616_v30, %v1999_v62  ;;  %v11646_v62 = vld [vmem:[#allocation2 + $0x186] sm:$0xff]  ;;  %v14624_v30 = vld [vmem:[#allocation137_spill] sm:$0xff] }
 0x3a0   : > { %8679 = vmatmul.msk.f32.gmra.mxu1 %vm1145_vm2, %v4499_v35  ;;  %8479 = vmatmul.msk.f32.gmra.mxu2 %vm1145_vm2, %v11085_v36  ;;  %v14621_v35 = vld [vmem:[#allocation100_spill] sm:$0xff]  ;;  %v14623_v36 = vld [vmem:[#allocation49_spill] sm:$0xff] }
 0x3a1   : > { %8662 = vmatmul.msk.f32.gmra.mxu0 %vm1145_vm2, %v14613_v16  ;;  %8631 = vmatmul.msk.f32.gmra.mxu3 %vm1145_vm2, %v11624_v60  ;;  %v2549_v40 = vadd.f32 %v14621_v35, %v2274_v1  ;;  %v1689_v15 = vadd.f32 %v14624_v30, %v14623_v36  ;;  %v14626_v1 = vld [vmem:[#allocation139_spill] sm:$0xff]  ;;  %v4501_v36 = vld [vmem:[#allocation2 + $0x90] sm:$0xff] }
 0x3a3   : > { %v2751_v7 = vpop.f32.mrf.mxu2 }
 0x3a4   : > { %v11634_v34 = vpop.f32.mrf.mxu3  ;;  %v11642_v61 = vadd.f32 %v2751_v7, %v2549_v40  ;;  %v14628_v40 = vld [vmem:[#allocation52_spill] sm:$0xff] }
 0x3a5   : > { %14617 = vst [vmem:[#allocation28_spill] sm:$0xff] %v11634_v34  ;;  %v11639_v16 = vpop.f32.mrf.mxu1  ;;  %v2001_v35 = vadd.f32 %v14628_v40, %v1689_v15  ;;  %v14635_v40 = vld [vmem:[#allocation53_spill] sm:$0xff] }
 0x3a6   : > { %v11637_v38 = vpop.f32.mrf.mxu0  ;;  %14620 = vst [vmem:[#allocation29_spill] sm:$0xff] %v11639_v16  ;;  %v4251_v16 = vld [vmem:[#allocation2 + $0x227] sm:$0xff] }
 0x3a7   : > { %14619 = vst [vmem:[#allocation27_spill] sm:$0xff] %v11637_v38  ;;  %v2275_v38 = vadd.f32 %v14625_v21, %v2000_v53  ;;  %v11668_v53 = vld [vmem:[#allocation2 + $0x18e] sm:$0xff]  ;;  %v14633_v21 = vld [vmem:[#allocation54_spill] sm:$0xff] }
 0x3a8   : > { %8680 = vmatmul.msk.f32.gmra.mxu1 %vm1145_vm2, %v4500_v57  ;;  %8480 = vmatmul.msk.f32.gmra.mxu2 %vm1145_vm2, %v14626_v1  ;;  %v14631_v57 = vld [vmem:[#allocation103_spill] sm:$0xff] }
 0x3a9   : > { %8663 = vmatmul.msk.f32.gmra.mxu0 %vm1145_vm2, %v14622_v0  ;;  %8632 = vmatmul.msk.f32.gmra.mxu3 %vm1145_vm2, %v11646_v62  ;;  %v2550_v14 = vadd.f32 %v14631_v57, %v2275_v38  ;;  %v14634_v1 = vld [vmem:[#allocation143_spill] sm:$0xff] }
 0x3aa   : > { %v1692_v15 = vadd.f32 %v14634_v1, %v14633_v21  ;;  %v4502_v21 = vld [vmem:[#allocation2 + $0xa8] sm:$0xff] }
 0x3ab   : > { %v2754_v51 = vpop.f32.mrf.mxu2 }
 0x3ac   : > { %v11656_v7 = vpop.f32.mrf.mxu3  ;;  %v11664_v30 = vadd.f32 %v2754_v51, %v2550_v14  ;;  %v14637_v14 = vld [vmem:[#allocation56_spill] sm:$0xff] }
 0x3ad   : > { %14627 = vst [vmem:[#allocation30_spill] sm:$0xff] %v11656_v7  ;;  %v11661_v34 = vpop.f32.mrf.mxu1  ;;  %v2002_v38 = vadd.f32 %v14637_v14, %v1692_v15  ;;  %v14642_v15 = vld [vmem:[#allocation58_spill] sm:$0xff] }
 0x3ae   : > { %v11659_v0 = vpop.f32.mrf.mxu0  ;;  %14630 = vst [vmem:[#allocation32_spill] sm:$0xff] %v11661_v34  ;;  %v14687_v34 = vld [vmem:[#allocation166_spill] sm:$0xff] }
 0x3af   : > { %14629 = vst [vmem:[#allocation31_spill] sm:$0xff] %v11659_v0  ;;  %v2276_v0 = vadd.f32 %v14635_v40, %v2001_v35  ;;  %v11690_v35 = vld [vmem:[#allocation2 + $0x1a6] sm:$0xff]  ;;  %v1695_v40 = vadd.f32 %v11145_v52, %v14642_v15 }
 0x3b0   : > { %8681 = vmatmul.msk.f32.gmra.mxu1 %vm1145_vm2, %v4501_v36  ;;  %8481 = vmatmul.msk.f32.gmra.mxu2 %vm1145_vm2, %v11129_v24  ;;  %v14640_v36 = vld [vmem:[#allocation106_spill] sm:$0xff] }
 0x3b1   : > { %8664 = vmatmul.msk.f32.gmra.mxu0 %vm1145_vm2, %v14632_v28  ;;  %8633 = vmatmul.msk.f32.gmra.mxu3 %vm1145_vm2, %v11668_v53  ;;  %v2551_v7 = vadd.f32 %v14640_v36, %v2276_v0  ;;  %v4804_v24 = vld [vmem:[%s14333_s3 + $0xd8] sm:$0xff]  ;;  %v11700_v0 = vld [vmem:[#allocation2 + $0x206] sm:$0xff] }
 0x3b2   : > { %4915 = vmatpush.msra.mxu2 %v4804_v24  ;;  %v14645_v36 = vld [vmem:[#allocation60_spill] sm:$0xff]  ;;  %v4503_v24 = vld [vmem:[#allocation2 + $0xb0] sm:$0xff] }
 0x3b3   : > { %v2757_v59 = vpop.f32.mrf.mxu2  ;;  %v2003_v52 = vadd.f32 %v14645_v36, %v1695_v40  ;;  %v11727_v36 = vld [vmem:[#allocation2 + $0x20e] sm:$0xff] }
 0x3b4   : > { %v11678_v51 = vpop.f32.mrf.mxu3  ;;  %v11686_v1 = vadd.f32 %v2757_v59, %v2551_v7  ;;  %v14643_v59 = vld [vmem:[#allocation57_spill] sm:$0xff] }
 0x3b5   : > { %14636 = vst [vmem:[#allocation33_spill] sm:$0xff] %v11678_v51  ;;  %v11683_v57 = vpop.f32.mrf.mxu1  ;;  %v2277_v7 = vadd.f32 %v14643_v59, %v2002_v38 }
 0x3b6   : > { %v11681_v28 = vpop.f32.mrf.mxu0  ;;  %14639 = vst [vmem:[#allocation36_spill] sm:$0xff] %v11683_v57 }
 0x3b7   : > { %14638 = vst [vmem:[#allocation34_spill] sm:$0xff] %v11681_v28  ;;  %v14648_v28 = vld [vmem:[#allocation109_spill] sm:$0xff] }
 0x3b8   : > { %8682 = vmatmul.msk.f32.gmra.mxu1 %vm1145_vm2, %v4502_v21  ;;  %8482 = vmatmul.msk.f32.gmra.mxu2 %vm1145_vm2, %v11700_v0  ;;  %v2552_v51 = vadd.f32 %v14648_v28, %v2277_v7  ;;  %v14650_v28 = vld [vmem:[#allocation61_spill] sm:$0xff] }
 0x3b9   : > { %8665 = vmatmul.msk.f32.gmra.mxu0 %vm1145_vm2, %v14641_v50  ;;  %8634 = vmatmul.msk.f32.gmra.mxu3 %vm1145_vm2, %v11690_v35  ;;  %v5079_v50 = vld [vmem:[%s14333_s3 + $0xe8] sm:$0xff]  ;;  %v2278_v7 = vadd.f32 %v14650_v28, %v2003_v52 }
 0x3ba   : > { %5190 = vmatpush.msra.mxu3 %v5079_v50  ;;  %v14649_v50 = vld [vmem:[#allocation35_spill] sm:$0xff]  ;;  %v14655_v52 = vld [vmem:[#allocation112_spill] sm:$0xff] }
 0x3bb   : > { %v2760_v38 = vpop.f32.mrf.mxu2  ;;  %v1698_v40 = vadd.f32 %v11162_v12, %v14649_v50  ;;  %v5630_v12 = vld [vmem:[%s14333_s3 + $0x108] sm:$0xff]  ;;  %v2553_v28 = vadd.f32 %v14655_v52, %v2278_v7  ;;  %v14657_v7 = vld [vmem:[#allocation65_spill] sm:$0xff] }
 0x3bc   : > { %v11708_v14 = vpop.f32.mrf.mxu3  ;;  %v11716_v59 = vadd.f32 %v2760_v38, %v2552_v51  ;;  %v5355_v51 = vld [vmem:[%s14333_s3 + $0xf8] sm:$0xff]  ;;  %v14652_v38 = vld [vmem:[#allocation64_spill] sm:$0xff]  ;;  %5741 = vmatpush.msra.mxu1 %v5630_v12 }
 0x3bd   : > { %14644 = vst [vmem:[#allocation37_spill] sm:$0xff] %v11708_v14  ;;  %v11713_v15 = vpop.f32.mrf.mxu1  ;;  %5466 = vmatpush.msra.mxu0 %v5355_v51  ;;  %v3671_v51 = vld [vmem:[#allocation2 + $0x2a] sm:$0xff] }
 0x3be   : > { %v11711_v21 = vpop.f32.mrf.mxu0  ;;  %14647 = vst [vmem:[#allocation40_spill] sm:$0xff] %v11713_v15  ;;  %v14659_v52 = vld [vmem:[#allocation68_spill] sm:$0xff]  ;;  %v14679_v15 = vld [vmem:[#allocation162_spill] sm:$0xff] }
 0x3bf   : > { %14646 = vst [vmem:[#allocation38_spill] sm:$0xff] %v11711_v21 }
 0x3c0   : > { %8683 = vmatmul.msk.f32.gmra.mxu1 %vm1145_vm2, %v4503_v24  ;;  %8483 = vmatmul.msk.f32.gmra.mxu2 %vm1145_vm2, %v11727_v36  ;;  %v2004_v24 = vadd.f32 %v14652_v38, %v1698_v40  ;;  %v14656_v40 = vld [vmem:[#allocation39_spill] sm:$0xff] }
 0x3c1   : > { %8666 = vmatmul.msk.f32.gmra.mxu0 %vm1145_vm2, %v11149_v32  ;;  %8635 = vmatmul.msk.f32.gmra.mxu3 %vm1145_vm2, %v11720_v17  ;;  %v1701_v38 = vadd.f32 %v11179_v8, %v14656_v40  ;;  %v3672_v40 = vld [vmem:[#allocation2 + $0x32] sm:$0xff] }
 0x3c2   : > { %v2279_v12 = vadd.f32 %v14657_v7, %v2004_v24  ;;  %v11771_v24 = vld [vmem:[#allocation2 + $0x1ce] sm:$0xff] }
 0x3c3   : > { %v2763_v14 = vpop.f32.mrf.mxu2 }
 0x3c4   : > { %v11735_v32 = vpop.f32.mrf.mxu3  ;;  %v11746_v33 = vadd.f32 %v2763_v14, %v2553_v28  ;;  %v2005_v28 = vadd.f32 %v14659_v52, %v1701_v38  ;;  %v14664_v38 = vld [vmem:[#allocation157_spill] sm:$0xff] }
 0x3c5   : > { %14651 = vst [vmem:[#allocation94_spill] sm:$0xff] %v11735_v32  ;;  %v11743_v21 = vpop.f32.mrf.mxu1  ;;  %v11750_v32 = vld [vmem:[#allocation2 + $0x1c6] sm:$0xff]  ;;  %v14665_v52 = vld [vmem:[#allocation69_spill] sm:$0xff] }
 0x3c6   : > { %v11741_v50 = vpop.f32.mrf.mxu0  ;;  %14654 = vst [vmem:[#allocation42_spill] sm:$0xff] %v11743_v21  ;;  %v4506_v21 = vld [vmem:[#allocation2 + $0xe8] sm:$0xff] }
 0x3c7   : > { %14653 = vst [vmem:[#allocation41_spill] sm:$0xff] %v11741_v50 }
 0x3c8   : > { %8684 = vmatmul.msk.f32.gmra.mxu1 %vm1145_vm2, %v4504_v39  ;;  %8580 = vmatmul.msk.f32.vlgmr.msrb.gmra.mxu2 %vm1145_vm2, %v3671_v51  ;;  %v2554_v39 = vadd.f32 %v14662_v6, %v2279_v12  ;;  %v14663_v51 = vld [vmem:[#allocation43_spill] sm:$0xff]  ;;  %v2280_v6 = vadd.f32 %v14665_v52, %v2005_v28  ;;  %v14667_v12 = vld [vmem:[#allocation72_spill] sm:$0xff] }
 0x3c9   : > { %8667 = vmatmul.msk.f32.gmra.mxu0 %vm1145_vm2, %v11166_v4  ;;  %8636 = vmatmul.msk.f32.gmra.mxu3 %vm1145_vm2, %v11750_v32  ;;  %v1704_v7 = vadd.f32 %v14664_v38, %v14663_v51  ;;  %v11792_v28 = vld [vmem:[#allocation2 + $0x1e6] sm:$0xff]  ;;  %v14672_v38 = vld [vmem:[#allocation161_spill] sm:$0xff] }
 0x3ca   : > { %v11799_v52 = vld [vmem:[#allocation2 + $0x4a] sm:$0xff] }
 0x3cb   : > { %v2766_v46 = vpop.f32.mrf.mxu2 }
 0x3cc   : > { %v11759_v14 = vpop.f32.mrf.mxu3  ;;  %v11767_v8 = vadd.f32 %v2766_v46, %v2554_v39  ;;  %v2006_v39 = vadd.f32 %v14667_v12, %v1704_v7 }
 0x3cd   : > { %14658 = vst [vmem:[#allocation44_spill] sm:$0xff] %v11759_v14  ;;  %v11764_v4 = vpop.f32.mrf.mxu1  ;;  %v14670_v14 = vld [vmem:[#allocation118_spill] sm:$0xff] }
 0x3ce   : > { %v11762_v50 = vpop.f32.mrf.mxu0  ;;  %14661 = vst [vmem:[#allocation128_spill] sm:$0xff] %v11764_v4 }
 0x3cf   : > { %14660 = vst [vmem:[#allocation97_spill] sm:$0xff] %v11762_v50 }
 0x3d0   : > { %8685 = vmatmul.msk.f32.gmra.mxu1 %vm1145_vm2, %v4505_v41  ;;  %8581 = vmatmul.msk.f32.gmra.mxu2 %vm1145_vm2, %v3672_v40  ;;  %v2555_v41 = vadd.f32 %v14670_v14, %v2280_v6  ;;  %v14671_v40 = vld [vmem:[#allocation47_spill] sm:$0xff]  ;;  %v14673_v14 = vld [vmem:[#allocation73_spill] sm:$0xff] }
 0x3d1   : > { %8668 = vmatmul.msk.f32.gmra.mxu0 %vm1145_vm2, %v11183_v49  ;;  %8637 = vmatmul.msk.f32.gmra.mxu3 %vm1145_vm2, %v11771_v24  ;;  %v1707_v7 = vadd.f32 %v14672_v38, %v14671_v40  ;;  %v2281_v6 = vadd.f32 %v14673_v14, %v2006_v39  ;;  %v11816_v39 = vld [vmem:[#allocation2 + $0x1ee] sm:$0xff]  ;;  %v14680_v14 = vld [vmem:[#allocation51_spill] sm:$0xff] }
 0x3d3   : > { %v2769_v4 = vpop.f32.mrf.mxu2 }
 0x3d4   : > { %v11780_v46 = vpop.f32.mrf.mxu3  ;;  %v11788_v51 = vadd.f32 %v2769_v4, %v2555_v41 }
 0x3d5   : > { %14666 = vst [vmem:[#allocation45_spill] sm:$0xff] %v11780_v46  ;;  %v11785_v49 = vpop.f32.mrf.mxu1  ;;  %v4507_v46 = vld [vmem:[#allocation2 + $0xf0] sm:$0xff] }
 0x3d6   : > { %v11783_v50 = vpop.f32.mrf.mxu0  ;;  %14669 = vst [vmem:[#allocation46_spill] sm:$0xff] %v11785_v49 }
 0x3d7   : > { %14668 = vst [vmem:[#allocation132_spill] sm:$0xff] %v11783_v50  ;;  %v14678_v50 = vld [vmem:[#allocation121_spill] sm:$0xff] }
 0x3d8   : > { %8686 = vmatmul.msk.f32.gmra.mxu1 %vm1145_vm2, %v4506_v21  ;;  %8582 = vmatmul.msk.f32.gmra.mxu2 %vm1145_vm2, %v11799_v52  ;;  %v2556_v40 = vadd.f32 %v14678_v50, %v2281_v6  ;;  %v14681_v50 = vld [vmem:[#allocation78_spill] sm:$0xff] }
 0x3d9   : > { %8669 = vmatmul.msk.f32.gmra.mxu0 %vm1145_vm2, %v11200_v43  ;;  %8638 = vmatmul.msk.f32.gmra.mxu3 %vm1145_vm2, %v11792_v28  ;;  %v14675_v43 = vld [vmem:[#allocation77_spill] sm:$0xff] }
 0x3da   : > { %v2007_v12 = vadd.f32 %v14675_v43, %v1707_v7  ;;  %v1710_v7 = vadd.f32 %v11236_v58, %v14680_v14  ;;  %v11823_v43 = vld [vmem:[#allocation2 + $0x52] sm:$0xff] }
 0x3db   : > { %v2772_v38 = vpop.f32.mrf.mxu2 }
 0x3dc   : > { %v11804_v4 = vpop.f32.mrf.mxu3  ;;  %v11812_v49 = vadd.f32 %v2772_v38, %v2556_v40  ;;  %v2282_v6 = vadd.f32 %v14681_v50, %v2007_v12  ;;  %v5078_v12 = vld [vmem:[%s14333_s3 + $0xe0] sm:$0xff]  ;;  %v14689_v50 = vld [vmem:[#allocation170_spill] sm:$0xff] }
 0x3dd   : > { %14674 = vst [vmem:[#allocation48_spill] sm:$0xff] %v11804_v4  ;;  %v11809_v21 = vpop.f32.mrf.mxu1  ;;  %v14686_v4 = vld [vmem:[#allocation124_spill] sm:$0xff]  ;;  %5191 = vmatpush.msra.mxu3 %v5078_v12  ;;  %v14696_v12 = vld [vmem:[#allocation59_spill] sm:$0xff] }
 0x3de   : > { %v11807_v41 = vpop.f32.mrf.mxu0  ;;  %14677 = vst [vmem:[#allocation133_spill] sm:$0xff] %v11809_v21  ;;  %v2557_v58 = vadd.f32 %v14686_v4, %v2282_v6  ;;  %v4508_v21 = vld [vmem:[#allocation2 + $0x108] sm:$0xff]  ;;  %v14690_v6 = vld [vmem:[#allocation81_spill] sm:$0xff] }
 0x3df   : > { %14676 = vst [vmem:[#allocation100_spill] sm:$0xff] %v11807_v41  ;;  %v11848_v4 = vld [vmem:[#allocation2 + $0x6a] sm:$0xff] }
 0x3e0   : > { %8687 = vmatmul.msk.f32.gmra.mxu1 %vm1145_vm2, %v4507_v46  ;;  %8583 = vmatmul.msk.f32.gmra.mxu2 %vm1145_vm2, %v11823_v43 }
 0x3e1   : > { %8670 = vmatmul.msk.f32.gmra.mxu0 %vm1145_vm2, %v14679_v15  ;;  %8639 = vmatmul.msk.f32.gmra.mxu3 %vm1145_vm2, %v11816_v39  ;;  %v14683_v15 = vld [vmem:[#allocation80_spill] sm:$0xff] }
 0x3e2   : > { %v2008_v38 = vadd.f32 %v14683_v15, %v1710_v7  ;;  %v14688_v7 = vld [vmem:[#allocation55_spill] sm:$0xff] }
 0x3e3   : > { %v2775_v14 = vpop.f32.mrf.mxu2  ;;  %v1713_v15 = vadd.f32 %v14689_v50, %v14688_v7  ;;  %v14695_v7 = vld [vmem:[#allocation127_spill] sm:$0xff] }
 0x3e4   : > { %v11828_v40 = vpop.f32.mrf.mxu3  ;;  %v11836_v57 = vadd.f32 %v2775_v14, %v2557_v58  ;;  %v2283_v58 = vadd.f32 %v14690_v6, %v2008_v38  ;;  %v4509_v38 = vld [vmem:[#allocation2 + $0x110] sm:$0xff] }
 0x3e5   : > { %14682 = vst [vmem:[#allocation49_spill] sm:$0xff] %v11828_v40  ;;  %v11833_v46 = vpop.f32.mrf.mxu1 }
 0x3e6   : > { %v11831_v41 = vpop.f32.mrf.mxu0  ;;  %14685 = vst [vmem:[#allocation50_spill] sm:$0xff] %v11833_v46  ;;  %v2558_v50 = vadd.f32 %v14695_v7, %v2283_v58  ;;  %v11873_v58 = vld [vmem:[#allocation2 + $0x72] sm:$0xff]  ;;  %v14698_v7 = vld [vmem:[#allocation84_spill] sm:$0xff] }
 0x3e7   : > { %14684 = vst [vmem:[#allocation137_spill] sm:$0xff] %v11831_v41 }
 0x3e8   : > { %8688 = vmatmul.msk.f32.gmra.mxu1 %vm1145_vm2, %v4508_v21  ;;  %8584 = vmatmul.msk.f32.gmra.mxu2 %vm1145_vm2, %v11848_v4  ;;  %v14692_v21 = vld [vmem:[#allocation83_spill] sm:$0xff] }
 0x3e9   : > { %8671 = vmatmul.msk.f32.gmra.mxu0 %vm1145_vm2, %v14687_v34  ;;  %8640 = vmatmul.msk.f32.gmra.mxu3 %vm1145_vm2, %v11700_v0  ;;  %v2009_v14 = vadd.f32 %v14692_v21, %v1713_v15  ;;  %v5354_v0 = vld [vmem:[%s14333_s3 + $0xf0] sm:$0xff]  ;;  %v14697_v15 = vld [vmem:[#allocation174_spill] sm:$0xff] }
 0x3ea   : > { %5467 = vmatpush.msra.mxu0 %v5354_v0  ;;  %v1716_v21 = vadd.f32 %v14697_v15, %v14696_v12 }
 0x3eb   : > { %v2778_v46 = vpop.f32.mrf.mxu2 }
 0x3ec   : > { %v11853_v34 = vpop.f32.mrf.mxu3  ;;  %v11864_v6 = vadd.f32 %v2778_v46, %v2558_v50  ;;  %v14700_v50 = vld [vmem:[#allocation86_spill] sm:$0xff] }
 0x3ed   : > { %14691 = vst [vmem:[#allocation139_spill] sm:$0xff] %v11853_v34  ;;  %v11858_v40 = vpop.f32.mrf.mxu1  ;;  %v2010_v0 = vadd.f32 %v14700_v50, %v1716_v21  ;;  %v14703_v34 = vld [vmem:[#allocation131_spill] sm:$0xff]  ;;  %v11897_v50 = vld [vmem:[#allocation2 + $0x8a] sm:$0xff] }
 0x3ee   : > { %v11856_v41 = vpop.f32.mrf.mxu0  ;;  %14694 = vst [vmem:[#allocation103_spill] sm:$0xff] %v11858_v40  ;;  %v4510_v40 = vld [vmem:[#allocation2 + $0x128] sm:$0xff] }
 0x3ef   : > { %14693 = vst [vmem:[#allocation52_spill] sm:$0xff] %v11856_v41  ;;  %v2284_v41 = vadd.f32 %v14698_v7, %v2009_v14  ;;  %v11890_v14 = vld [vmem:[#allocation2 + $0x226] sm:$0xff] }
 0x3f0   : > { %8689 = vmatmul.msk.f32.gmra.mxu1 %vm1145_vm2, %v4509_v38  ;;  %8585 = vmatmul.msk.f32.gmra.mxu2 %vm1145_vm2, %v11873_v58  ;;  %14705 = vst [vmem:[#allocation56_spill] sm:$0xff] %v11890_v14  ;;  %v14706_v7 = vld [vmem:[#allocation63_spill] sm:$0xff] }
 0x3f1   : > { %8672 = vmatmul.msk.f32.gmra.mxu0 %vm1145_vm2, %v11257_v23  ;;  %8641 = vmatmul.msk.f32.gmra.mxu3 %vm1145_vm2, %v11727_v36  ;;  %v2559_v12 = vadd.f32 %v14703_v34, %v2284_v41  ;;  %v14708_v41 = vld [vmem:[#allocation87_spill] sm:$0xff] }
 0x3f2   : > { %v2285_v34 = vadd.f32 %v14708_v41, %v2010_v0  ;;  %v11913_v0 = vld [vmem:[#allocation2 + $0x22e] sm:$0xff]  ;;  %v14716_v41 = vld [vmem:[#allocation67_spill] sm:$0xff] }
 0x3f3   : > { %v2781_v15 = vpop.f32.mrf.mxu2  ;;  %14715 = vst [vmem:[#allocation60_spill] sm:$0xff] %v11913_v0 }
 0x3f4   : > { %v11878_v46 = vpop.f32.mrf.mxu3  ;;  %v11886_v36 = vadd.f32 %v2781_v15, %v2559_v12 }
 0x3f5   : > { %14699 = vst [vmem:[#allocation138_spill] sm:$0xff] %v11878_v46  ;;  %v11883_v38 = vpop.f32.mrf.mxu1  ;;  %v14707_v46 = vld [vmem:[#allocation178_spill] sm:$0xff] }
 0x3f6   : > { %v11881_v23 = vpop.f32.mrf.mxu0  ;;  %14702 = vst [vmem:[#allocation143_spill] sm:$0xff] %v11883_v38  ;;  %v1719_v21 = vadd.f32 %v14707_v46, %v14706_v7  ;;  %v14713_v38 = vld [vmem:[#allocation136_spill] sm:$0xff] }
 0x3f7   : > { %14701 = vst [vmem:[#allocation54_spill] sm:$0xff] %v11881_v23  ;;  %v2560_v46 = vadd.f32 %v14713_v38, %v2285_v34  ;;  %v14717_v38 = vld [vmem:[#allocation90_spill] sm:$0xff] }
 0x3f8   : > { %14704 = vst [vmem:[#allocation53_spill] sm:$0xff] %v11886_v36  ;;  %8690 = vmatmul.msk.f32.gmra.mxu1 %vm1145_vm2, %v4510_v40  ;;  %8586 = vmatmul.msk.f32.gmra.mxu2 %vm1145_vm2, %v11897_v50 }
 0x3f9   : > { %8673 = vmatmul.msk.f32.gmra.mxu0 %vm1145_vm2, %v11273_v29  ;;  %8642 = vmatmul.msk.f32.gmra.mxu3 %vm1145_vm2, %v11890_v14  ;;  %v14710_v29 = vld [vmem:[#allocation89_spill] sm:$0xff] }
 0x3fa   : > { %v2011_v15 = vadd.f32 %v14710_v29, %v1719_v21  ;;  %v4511_v14 = vld [vmem:[#allocation2 + $0x130] sm:$0xff]  ;;  %v1722_v21 = vadd.f32 %v11300_v45, %v14716_v41 }
 0x3fb   : > { %v2784_v7 = vpop.f32.mrf.mxu2  ;;  %v11920_v29 = vld [vmem:[#allocation2 + $0x92] sm:$0xff] }
 0x3fc   : > { %v11902_v12 = vpop.f32.mrf.mxu3  ;;  %v11910_v36 = vadd.f32 %v2784_v7, %v2560_v46  ;;  %v2286_v34 = vadd.f32 %v14717_v38, %v2011_v15  ;;  %v14723_v15 = vld [vmem:[#allocation71_spill] sm:$0xff] }
 0x3fd   : > { %14709 = vst [vmem:[#allocation106_spill] sm:$0xff] %v11902_v12  ;;  %v11907_v40 = vpop.f32.mrf.mxu1  ;;  %v14722_v12 = vld [vmem:[#allocation142_spill] sm:$0xff]  ;;  %v1725_v38 = vadd.f32 %v11315_v25, %v14723_v15 }
 0x3fe   : > { %v11905_v23 = vpop.f32.mrf.mxu0  ;;  %14712 = vst [vmem:[#allocation58_spill] sm:$0xff] %v11907_v40  ;;  %v2561_v45 = vadd.f32 %v14722_v12, %v2286_v34  ;;  %v4252_v40 = vld [vmem:[#allocation2 + $0x22f] sm:$0xff]  ;;  %v14726_v34 = vld [vmem:[#allocation95_spill] sm:$0xff] }
 0x3ff   : > { %14711 = vst [vmem:[#allocation144_spill] sm:$0xff] %v11905_v23 }
 0x400   : > { %14714 = vst [vmem:[#allocation57_spill] sm:$0xff] %v11910_v36  ;;  %8691 = vmatmul.msk.f32.gmra.mxu1 %vm1145_vm2, %v4511_v14  ;;  %8587 = vmatmul.msk.f32.gmra.mxu2 %vm1145_vm2, %v11920_v29 }
 0x401   : > { %8674 = vmatmul.msk.f32.gmra.mxu0 %vm1145_vm2, %v4251_v16  ;;  %8643 = vmatmul.msk.f32.gmra.mxu3 %vm1145_vm2, %v11913_v0  ;;  %v14719_v16 = vld [vmem:[#allocation92_spill] sm:$0xff] }
 0x402   : > { %v2012_v7 = vadd.f32 %v14719_v16, %v1722_v21  ;;  %v4512_v0 = vld [vmem:[#allocation2 + $0x148] sm:$0xff]  ;;  %v14724_v16 = vld [vmem:[#allocation93_spill] sm:$0xff] }
 0x403   : > { %v2787_v41 = vpop.f32.mrf.mxu2  ;;  %v11941_v21 = vld [vmem:[#allocation2 + $0xaa] sm:$0xff] }
 0x404   : > { %v11925_v46 = vpop.f32.mrf.mxu3  ;;  %v11933_v36 = vadd.f32 %v2787_v41, %v2561_v45  ;;  %v2013_v45 = vadd.f32 %v14726_v34, %v1725_v38  ;;  %v14729_v41 = vld [vmem:[#allocation147_spill] sm:$0xff]  ;;  %v11962_v38 = vld [vmem:[#allocation2 + $0xb2] sm:$0xff]  ;;  %v14731_v34 = vld [vmem:[#allocation96_spill] sm:$0xff] }
 0x405   : > { %14718 = vst [vmem:[#allocation109_spill] sm:$0xff] %v11925_v46  ;;  %v11930_v14 = vpop.f32.mrf.mxu1  ;;  %v5322_v46 = vld [vmem:[#allocation2 + $0x66] sm:$0xff] }
 0x406   : > { %v11928_v23 = vpop.f32.mrf.mxu0  ;;  %14721 = vst [vmem:[#allocation61_spill] sm:$0xff] %v11930_v14 }
 0x407   : > { %14720 = vst [vmem:[#allocation35_spill] sm:$0xff] %v11928_v23  ;;  %v2287_v23 = vadd.f32 %v14724_v16, %v2012_v7  ;;  %v14730_v7 = vld [vmem:[#allocation75_spill] sm:$0xff] }
 0x408   : > { %8692 = vmatmul.msk.f32.gmra.mxu1 %vm1145_vm2, %v4512_v0  ;;  %8588 = vmatmul.msk.f32.gmra.mxu2 %vm1145_vm2, %v11941_v21  ;;  %v1728_v16 = vadd.f32 %v11330_v22, %v14730_v7 }
 0x409   : > { %8675 = vmatmul.msk.f32.gmra.mxu0 %vm1145_vm2, %v4252_v40  ;;  %8740 = vmatmul.msk.f32.vlgmr.msra.gmra.mxu3 %vm1145_vm2, %v11799_v52  ;;  %v2562_v25 = vadd.f32 %v14729_v41, %v2287_v23  ;;  %v4513_v52 = vld [vmem:[#allocation2 + $0x150] sm:$0xff]  ;;  %v14733_v41 = vld [vmem:[#allocation98_spill] sm:$0xff] }
 0x40b   : > { %v2790_v15 = vpop.f32.mrf.mxu2 }
 0x40c   : > { %v11946_v12 = vpop.f32.mrf.mxu3  ;;  %v11954_v14 = vadd.f32 %v2790_v15, %v2562_v25  ;;  %v2014_v25 = vadd.f32 %v14733_v41, %v1728_v16  ;;  %v11983_v16 = vld [vmem:[#allocation2 + $0xca] sm:$0xff]  ;;  %v14740_v41 = vld [vmem:[#allocation99_spill] sm:$0xff] }
 0x40d   : > { %14725 = vst [vmem:[#allocation64_spill] sm:$0xff] %v11946_v12  ;;  %v11951_v0 = vpop.f32.mrf.mxu1  ;;  %v5323_v12 = vld [vmem:[#allocation2 + $0x6e] sm:$0xff] }
 0x40e   : > { %v11949_v40 = vpop.f32.mrf.mxu0  ;;  %14728 = vst [vmem:[#allocation39_spill] sm:$0xff] %v11951_v0 }
 0x40f   : > { %14727 = vst [vmem:[#allocation112_spill] sm:$0xff] %v11949_v40  ;;  %v2288_v40 = vadd.f32 %v14731_v34, %v2013_v45  ;;  %v14738_v45 = vld [vmem:[#allocation79_spill] sm:$0xff]  ;;  %v14739_v34 = vld [vmem:[#allocation190_spill] sm:$0xff] }
 0x410   : > { %8693 = vmatmul.msk.f32.gmra.mxu1 %vm1145_vm2, %v4513_v52  ;;  %8589 = vmatmul.msk.f32.gmra.mxu2 %vm1145_vm2, %v11962_v38  ;;  %v14736_v52 = vld [vmem:[#allocation150_spill] sm:$0xff] }
 0x411   : > { %8772 = vmatmul.msk.f32.vlgmr.msra.gmra.mxu0 %vm1145_vm2, %v5322_v46  ;;  %8741 = vmatmul.msk.f32.gmra.mxu3 %vm1145_vm2, %v11823_v43  ;;  %v2563_v22 = vadd.f32 %v14736_v52, %v2288_v40  ;;  %v4514_v43 = vld [vmem:[#allocation2 + $0x168] sm:$0xff]  ;;  %v14742_v52 = vld [vmem:[#allocation101_spill] sm:$0xff] }
 0x413   : > { %v2793_v7 = vpop.f32.mrf.mxu2 }
 0x414   : > { %v11967_v23 = vpop.f32.mrf.mxu3  ;;  %v11975_v0 = vadd.f32 %v2793_v7, %v2563_v22 }
 0x415   : > { %14732 = vst [vmem:[#allocation65_spill] sm:$0xff] %v11967_v23  ;;  %v11972_v15 = vpop.f32.mrf.mxu1  ;;  %v1731_v23 = vadd.f32 %v14739_v34, %v14738_v45 }
 0x416   : > { %v11970_v46 = vpop.f32.mrf.mxu0  ;;  %14735 = vst [vmem:[#allocation115_spill] sm:$0xff] %v11972_v15  ;;  %v5324_v15 = vld [vmem:[#allocation2 + $0x86] sm:$0xff] }
 0x417   : > { %14734 = vst [vmem:[#allocation68_spill] sm:$0xff] %v11970_v46  ;;  %v2289_v46 = vadd.f32 %v14740_v41, %v2014_v25  ;;  %v2015_v22 = vadd.f32 %v14742_v52, %v1731_v23  ;;  %v14747_v25 = vld [vmem:[#allocation82_spill] sm:$0xff] }
 0x418   : > { %14737 = vst [vmem:[#allocation43_spill] sm:$0xff] %v11975_v0  ;;  %8694 = vmatmul.msk.f32.gmra.mxu1 %vm1145_vm2, %v4514_v43  ;;  %8590 = vmatmul.msk.f32.gmra.mxu2 %vm1145_vm2, %v11983_v16  ;;  %v14745_v43 = vld [vmem:[#allocation153_spill] sm:$0xff]  ;;  %v14748_v41 = vld [vmem:[#allocation194_spill] sm:$0xff] }
 0x419   : > { %8773 = vmatmul.msk.f32.gmra.mxu0 %vm1145_vm2, %v5323_v12  ;;  %8742 = vmatmul.msk.f32.gmra.mxu3 %vm1145_vm2, %v11848_v4  ;;  %v2564_v45 = vadd.f32 %v14745_v43, %v2289_v46  ;;  %v4515_v4 = vld [vmem:[#allocation2 + $0x170] sm:$0xff]  ;;  %v14749_v52 = vld [vmem:[#allocation102_spill] sm:$0xff]  ;;  %v14751_v43 = vld [vmem:[#allocation104_spill] sm:$0xff] }
 0x41a   : > { %v12004_v23 = vld [vmem:[#allocation2 + $0xd2] sm:$0xff] }
 0x41b   : > { %v2796_v34 = vpop.f32.mrf.mxu2 }
 0x41c   : > { %v11988_v40 = vpop.f32.mrf.mxu3  ;;  %v11996_v0 = vadd.f32 %v2796_v34, %v2564_v45 }
 0x41d   : > { %14741 = vst [vmem:[#allocation157_spill] sm:$0xff] %v11988_v40  ;;  %v11993_v7 = vpop.f32.mrf.mxu1  ;;  %v1734_v40 = vadd.f32 %v14748_v41, %v14747_v25 }
 0x41e   : > { %v11991_v12 = vpop.f32.mrf.mxu0  ;;  %14744 = vst [vmem:[#allocation72_spill] sm:$0xff] %v11993_v7  ;;  %v5325_v7 = vld [vmem:[#allocation2 + $0x8e] sm:$0xff] }
 0x41f   : > { %14743 = vst [vmem:[#allocation69_spill] sm:$0xff] %v11991_v12  ;;  %v2290_v12 = vadd.f32 %v14749_v52, %v2015_v22  ;;  %v2016_v45 = vadd.f32 %v14751_v43, %v1734_v40  ;;  %v14756_v22 = vld [vmem:[#allocation85_spill] sm:$0xff]  ;;  %v14757_v52 = vld [vmem:[#allocation198_spill] sm:$0xff] }
 0x420   : > { %14746 = vst [vmem:[#allocation118_spill] sm:$0xff] %v11996_v0  ;;  %8695 = vmatmul.msk.f32.gmra.mxu1 %vm1145_vm2, %v4515_v4  ;;  %8591 = vmatmul.msk.f32.gmra.mxu2 %vm1145_vm2, %v12004_v23  ;;  %v14754_v4 = vld [vmem:[#allocation156_spill] sm:$0xff]  ;;  %v14758_v43 = vld [vmem:[#allocation105_spill] sm:$0xff] }
 0x421   : > { %8774 = vmatmul.msk.f32.gmra.mxu0 %vm1145_vm2, %v5324_v15  ;;  %8743 = vmatmul.msk.f32.gmra.mxu3 %vm1145_vm2, %v11873_v58  ;;  %v2565_v25 = vadd.f32 %v14754_v4, %v2290_v12  ;;  %v4516_v58 = vld [vmem:[#allocation2 + $0x188] sm:$0xff]  ;;  %v14760_v4 = vld [vmem:[#allocation107_spill] sm:$0xff] }
 0x422   : > { %v12025_v40 = vld [vmem:[#allocation2 + $0xea] sm:$0xff] }
 0x423   : > { %v2799_v41 = vpop.f32.mrf.mxu2 }
 0x424   : > { %v12009_v46 = vpop.f32.mrf.mxu3  ;;  %v12017_v0 = vadd.f32 %v2799_v41, %v2565_v25 }
 0x425   : > { %14750 = vst [vmem:[#allocation47_spill] sm:$0xff] %v12009_v46  ;;  %v12014_v34 = vpop.f32.mrf.mxu1  ;;  %v1737_v46 = vadd.f32 %v14757_v52, %v14756_v22 }
 0x426   : > { %v12012_v15 = vpop.f32.mrf.mxu0  ;;  %14753 = vst [vmem:[#allocation73_spill] sm:$0xff] %v12014_v34  ;;  %v5326_v34 = vld [vmem:[#allocation2 + $0xa6] sm:$0xff] }
 0x427   : > { %14752 = vst [vmem:[#allocation161_spill] sm:$0xff] %v12012_v15  ;;  %v2291_v15 = vadd.f32 %v14758_v43, %v2016_v45  ;;  %v2017_v25 = vadd.f32 %v14760_v4, %v1737_v46  ;;  %v14765_v45 = vld [vmem:[#allocation88_spill] sm:$0xff]  ;;  %v14766_v43 = vld [vmem:[#allocation202_spill] sm:$0xff] }
 0x428   : > { %14755 = vst [vmem:[#allocation77_spill] sm:$0xff] %v12017_v0  ;;  %8696 = vmatmul.msk.f32.gmra.mxu1 %vm1145_vm2, %v4516_v58  ;;  %8592 = vmatmul.msk.f32.gmra.mxu2 %vm1145_vm2, %v12025_v40  ;;  %v14763_v58 = vld [vmem:[#allocation160_spill] sm:$0xff]  ;;  %v12046_v46 = vld [vmem:[#allocation2 + $0xf2] sm:$0xff] }
 0x429   : > { %8775 = vmatmul.msk.f32.gmra.mxu0 %vm1145_vm2, %v5325_v7  ;;  %8744 = vmatmul.msk.f32.gmra.mxu3 %vm1145_vm2, %v11897_v50  ;;  %v2566_v22 = vadd.f32 %v14763_v58, %v2291_v15  ;;  %v4517_v50 = vld [vmem:[#allocation2 + $0x190] sm:$0xff]  ;;  %v14767_v4 = vld [vmem:[#allocation108_spill] sm:$0xff]  ;;  %v14769_v58 = vld [vmem:[#allocation110_spill] sm:$0xff] }
 0x42b   : > { %v2802_v52 = vpop.f32.mrf.mxu2 }
 0x42c   : > { %v12030_v12 = vpop.f32.mrf.mxu3  ;;  %v12038_v0 = vadd.f32 %v2802_v52, %v2566_v22 }
 0x42d   : > { %14759 = vst [vmem:[#allocation121_spill] sm:$0xff] %v12030_v12  ;;  %v12035_v41 = vpop.f32.mrf.mxu1  ;;  %v1740_v12 = vadd.f32 %v14766_v43, %v14765_v45 }
 0x42e   : > { %v12033_v7 = vpop.f32.mrf.mxu0  ;;  %14762 = vst [vmem:[#allocation51_spill] sm:$0xff] %v12035_v41 }
 0x42f   : > { %14761 = vst [vmem:[#allocation162_spill] sm:$0xff] %v12033_v7  ;;  %v2292_v7 = vadd.f32 %v14767_v4, %v2017_v25  ;;  %v2018_v22 = vadd.f32 %v14769_v58, %v1740_v12  ;;  %v5327_v25 = vld [vmem:[#allocation2 + $0xae] sm:$0xff]  ;;  %v14774_v12 = vld [vmem:[#allocation91_spill] sm:$0xff] }
 0x430   : > { %14764 = vst [vmem:[#allocation78_spill] sm:$0xff] %v12038_v0  ;;  %8697 = vmatmul.msk.f32.gmra.mxu1 %vm1145_vm2, %v4517_v50  ;;  %8593 = vmatmul.msk.f32.gmra.mxu2 %vm1145_vm2, %v12046_v46  ;;  %v14772_v50 = vld [vmem:[#allocation165_spill] sm:$0xff]  ;;  %v4518_v4 = vld [vmem:[#allocation2 + $0x1a8] sm:$0xff] }
 0x431   : > { %8776 = vmatmul.msk.f32.gmra.mxu0 %vm1145_vm2, %v5326_v34  ;;  %8745 = vmatmul.msk.f32.gmra.mxu3 %vm1145_vm2, %v11920_v29  ;;  %v2567_v45 = vadd.f32 %v14772_v50, %v2292_v7  ;;  %v4803_v29 = vld [vmem:[%s14333_s3 + $0xd0] sm:$0xff]  ;;  %v14775_v58 = vld [vmem:[#allocation204_spill] sm:$0xff]  ;;  %v14776_v50 = vld [vmem:[#allocation111_spill] sm:$0xff] }
 0x432   : > { %4916 = vmatpush.msra.mxu2 %v4803_v29  ;;  %v12070_v7 = vld [vmem:[#allocation2 + $0x10a] sm:$0xff] }
 0x433   : > { %v2805_v43 = vpop.f32.mrf.mxu2 }
 0x434   : > { %v12051_v15 = vpop.f32.mrf.mxu3  ;;  %v12062_v41 = vadd.f32 %v2805_v43, %v2567_v45  ;;  %v14778_v45 = vld [vmem:[#allocation113_spill] sm:$0xff] }
 0x435   : > { %14768 = vst [vmem:[#allocation80_spill] sm:$0xff] %v12051_v15  ;;  %v12056_v52 = vpop.f32.mrf.mxu1  ;;  %v2293_v15 = vadd.f32 %v14776_v50, %v2018_v22  ;;  %v12089_v22 = vld [vmem:[#allocation2 + $0x112] sm:$0xff] }
 0x436   : > { %v12054_v34 = vpop.f32.mrf.mxu0  ;;  %14771 = vst [vmem:[#allocation166_spill] sm:$0xff] %v12056_v52  ;;  %v14781_v52 = vld [vmem:[#allocation169_spill] sm:$0xff] }
 0x437   : > { %14770 = vst [vmem:[#allocation124_spill] sm:$0xff] %v12054_v34  ;;  %v1743_v34 = vadd.f32 %v14775_v58, %v14774_v12  ;;  %v2568_v12 = vadd.f32 %v14781_v52, %v2293_v15  ;;  %v5629_v52 = vld [vmem:[%s14333_s3 + $0x100] sm:$0xff] }
 0x438   : > { %14773 = vst [vmem:[#allocation55_spill] sm:$0xff] %v12062_v41  ;;  %8698 = vmatmul.msk.f32.gmra.mxu1 %vm1145_vm2, %v4518_v4  ;;  %8594 = vmatmul.msk.f32.gmra.mxu2 %vm1145_vm2, %v12070_v7  ;;  %v5328_v41 = vld [vmem:[#allocation2 + $0xc6] sm:$0xff] }
 0x439   : > { %8777 = vmatmul.msk.f32.gmra.mxu0 %vm1145_vm2, %v5327_v25  ;;  %8746 = vmatmul.msk.f32.gmra.mxu3 %vm1145_vm2, %v11941_v21  ;;  %v2019_v43 = vadd.f32 %v14778_v45, %v1743_v34  ;;  %v4519_v21 = vld [vmem:[#allocation2 + $0x1b0] sm:$0xff]  ;;  %v14782_v34 = vld [vmem:[#allocation114_spill] sm:$0xff] }
 0x43a   : > { %5742 = vmatpush.msra.mxu1 %v5629_v52  ;;  %v14790_v52 = vld [vmem:[#allocation119_spill] sm:$0xff] }
 0x43b   : > { %v2808_v58 = vpop.f32.mrf.mxu2  ;;  %v2294_v50 = vadd.f32 %v14782_v34, %v2019_v43  ;;  %v5329_v34 = vld [vmem:[#allocation2 + $0xce] sm:$0xff] }
 0x43c   : > { %v12075_v29 = vpop.f32.mrf.mxu3  ;;  %v12083_v0 = vadd.f32 %v2808_v58, %v2568_v12 }
 0x43d   : > { %14777 = vst [vmem:[#allocation170_spill] sm:$0xff] %v12075_v29  ;;  %v12080_v4 = vpop.f32.mrf.mxu1 }
 0x43e   : > { %v12078_v25 = vpop.f32.mrf.mxu0  ;;  %14780 = vst [vmem:[#allocation83_spill] sm:$0xff] %v12080_v4 }
 0x43f   : > { %14779 = vst [vmem:[#allocation81_spill] sm:$0xff] %v12078_v25  ;;  %v4520_v25 = vld [vmem:[#allocation2 + $0x1c8] sm:$0xff] }
 0x440   : > { %8699 = vmatmul.msk.f32.gmra.mxu1 %vm1145_vm2, %v4519_v21  ;;  %8595 = vmatmul.msk.f32.gmra.mxu2 %vm1145_vm2, %v12089_v22 }
 0x441   : > { %8778 = vmatmul.msk.f32.gmra.mxu0 %vm1145_vm2, %v5328_v41  ;;  %8747 = vmatmul.msk.f32.gmra.mxu3 %vm1145_vm2, %v11962_v38  ;;  %v14784_v41 = vld [vmem:[#allocation116_spill] sm:$0xff]  ;;  %v14787_v38 = vld [vmem:[#allocation173_spill] sm:$0xff] }
 0x442   : > { %v3089_v45 = vadd.f32 %v14784_v41, %v11428_v37  ;;  %v2569_v21 = vadd.f32 %v14787_v38, %v2294_v50  ;;  %v12112_v37 = vld [vmem:[#allocation2 + $0x12a] sm:$0xff]  ;;  %v3090_v38 = vadd.f32 %v14790_v52, %v11447_v42  ;;  %v14796_v52 = vld [vmem:[#allocation122_spill] sm:$0xff] }
 0x443   : > { %v2811_v43 = vpop.f32.mrf.mxu2  ;;  %v14788_v41 = vld [vmem:[#allocation117_spill] sm:$0xff]  ;;  %v14794_v42 = vld [vmem:[#allocation120_spill] sm:$0xff] }
 0x444   : > { %v12094_v15 = vpop.f32.mrf.mxu3  ;;  %v12106_v29 = vadd.f32 %v2811_v43, %v2569_v21 }
 0x445   : > { %14783 = vst [vmem:[#allocation127_spill] sm:$0xff] %v12094_v15  ;;  %v12103_v58 = vpop.f32.mrf.mxu1 }
 0x446   : > { %v12101_v12 = vpop.f32.mrf.mxu0  ;;  %14786 = vst [vmem:[#allocation174_spill] sm:$0xff] %v12103_v58  ;;  %v4521_v58 = vld [vmem:[#allocation2 + $0x1d0] sm:$0xff] }
 0x447   : > { %14785 = vst [vmem:[#allocation59_spill] sm:$0xff] %v12101_v12  ;;  %v3364_v12 = vadd.f32 %v14788_v41, %v3089_v45  ;;  %v12132_v45 = vld [vmem:[#allocation2 + $0x132] sm:$0xff]  ;;  %v3365_v41 = vadd.f32 %v14794_v42, %v3090_v38  ;;  %v12152_v38 = vld [vmem:[#allocation2 + $0x14a] sm:$0xff] }
 0x448   : > { %8700 = vmatmul.msk.f32.gmra.mxu1 %vm1145_vm2, %v4520_v25  ;;  %8596 = vmatmul.msk.f32.gmra.mxu2 %vm1145_vm2, %v12112_v37  ;;  %v14793_v25 = vld [vmem:[#allocation177_spill] sm:$0xff] }
 0x449   : > { %8779 = vmatmul.msk.f32.gmra.mxu0 %vm1145_vm2, %v5329_v34  ;;  %8748 = vmatmul.msk.f32.gmra.mxu3 %vm1145_vm2, %v11983_v16  ;;  %v3639_v34 = vadd.f32 %v14793_v25, %v3364_v12  ;;  %v5330_v16 = vld [vmem:[#allocation2 + $0xe6] sm:$0xff] }
 0x44b   : > { %v3818_v15 = vpop.f32.mrf.mxu2 }
 0x44c   : > { %v12117_v50 = vpop.f32.mrf.mxu3  ;;  %v12126_v4 = vadd.f32 %v3818_v15, %v3639_v34  ;;  %v3091_v15 = vadd.f32 %v14796_v52, %v11466_v19  ;;  %v14800_v19 = vld [vmem:[#allocation123_spill] sm:$0xff]  ;;  %v14802_v52 = vld [vmem:[#allocation125_spill] sm:$0xff] }
 0x44d   : > { %14789 = vst [vmem:[#allocation84_spill] sm:$0xff] %v12117_v50  ;;  %v12123_v43 = vpop.f32.mrf.mxu1  ;;  %v4522_v50 = vld [vmem:[#allocation2 + $0x1e8] sm:$0xff] }
 0x44e   : > { %v12121_v21 = vpop.f32.mrf.mxu0  ;;  %14792 = vst [vmem:[#allocation131_spill] sm:$0xff] %v12123_v43  ;;  %v3366_v42 = vadd.f32 %v14800_v19, %v3091_v15  ;;  %v12172_v15 = vld [vmem:[#allocation2 + $0x152] sm:$0xff] }
 0x44f   : > { %14791 = vst [vmem:[#allocation86_spill] sm:$0xff] %v12121_v21 }
 0x450   : > { %8701 = vmatmul.msk.f32.gmra.mxu1 %vm1145_vm2, %v4521_v58  ;;  %8597 = vmatmul.msk.f32.gmra.mxu2 %vm1145_vm2, %v12132_v45  ;;  %v14799_v58 = vld [vmem:[#allocation181_spill] sm:$0xff] }
 0x451   : > { %8780 = vmatmul.msk.f32.gmra.mxu0 %vm1145_vm2, %v5330_v16  ;;  %8749 = vmatmul.msk.f32.gmra.mxu3 %vm1145_vm2, %v12004_v23  ;;  %v3640_v16 = vadd.f32 %v14799_v58, %v3365_v41  ;;  %v5331_v23 = vld [vmem:[#allocation2 + $0xee] sm:$0xff] }
 0x453   : > { %v3821_v21 = vpop.f32.mrf.mxu2 }
 0x454   : > { %v12137_v12 = vpop.f32.mrf.mxu3  ;;  %v12146_v43 = vadd.f32 %v3821_v21, %v3640_v16  ;;  %v3092_v21 = vadd.f32 %v14802_v52, %v11485_v48  ;;  %v14806_v48 = vld [vmem:[#allocation126_spill] sm:$0xff]  ;;  %v14808_v52 = vld [vmem:[#allocation129_spill] sm:$0xff] }
 0x455   : > { %14795 = vst [vmem:[#allocation63_spill] sm:$0xff] %v12137_v12  ;;  %v12143_v34 = vpop.f32.mrf.mxu1  ;;  %v4523_v12 = vld [vmem:[#allocation2 + $0x1f0] sm:$0xff] }
 0x456   : > { %v12141_v25 = vpop.f32.mrf.mxu0  ;;  %14798 = vst [vmem:[#allocation87_spill] sm:$0xff] %v12143_v34  ;;  %v3367_v19 = vadd.f32 %v14806_v48, %v3092_v21  ;;  %v12192_v21 = vld [vmem:[#allocation2 + $0x16a] sm:$0xff] }
 0x457   : > { %14797 = vst [vmem:[#allocation178_spill] sm:$0xff] %v12141_v25 }
 0x458   : > { %8702 = vmatmul.msk.f32.gmra.mxu1 %vm1145_vm2, %v4522_v50  ;;  %8598 = vmatmul.msk.f32.gmra.mxu2 %vm1145_vm2, %v12152_v38  ;;  %v14805_v50 = vld [vmem:[#allocation184_spill] sm:$0xff] }
 0x459   : > { %8781 = vmatmul.msk.f32.gmra.mxu0 %vm1145_vm2, %v5331_v23  ;;  %8750 = vmatmul.msk.f32.gmra.mxu3 %vm1145_vm2, %v12025_v40  ;;  %v3641_v23 = vadd.f32 %v14805_v50, %v3366_v42  ;;  %v5332_v40 = vld [vmem:[#allocation2 + $0x106] sm:$0xff] }
 0x45b   : > { %v3824_v25 = vpop.f32.mrf.mxu2 }
 0x45c   : > { %v12157_v41 = vpop.f32.mrf.mxu3  ;;  %v12166_v34 = vadd.f32 %v3824_v25, %v3641_v23  ;;  %v3093_v25 = vadd.f32 %v14808_v52, %v11504_v20  ;;  %v14812_v20 = vld [vmem:[#allocation130_spill] sm:$0xff] }
 0x45d   : > { %14801 = vst [vmem:[#allocation89_spill] sm:$0xff] %v12157_v41  ;;  %v12163_v16 = vpop.f32.mrf.mxu1  ;;  %v4524_v41 = vld [vmem:[#allocation2 + $0x208] sm:$0xff]  ;;  %v14814_v52 = vld [vmem:[#allocation134_spill] sm:$0xff] }
 0x45e   : > { %v12161_v58 = vpop.f32.mrf.mxu0  ;;  %14804 = vst [vmem:[#allocation67_spill] sm:$0xff] %v12163_v16  ;;  %v3368_v48 = vadd.f32 %v14812_v20, %v3093_v25  ;;  %v12212_v25 = vld [vmem:[#allocation2 + $0x172] sm:$0xff] }
 0x45f   : > { %14803 = vst [vmem:[#allocation136_spill] sm:$0xff] %v12161_v58 }
 0x460   : > { %8703 = vmatmul.msk.f32.gmra.mxu1 %vm1145_vm2, %v4523_v12  ;;  %8599 = vmatmul.msk.f32.gmra.mxu2 %vm1145_vm2, %v12172_v15  ;;  %v14811_v12 = vld [vmem:[#allocation186_spill] sm:$0xff] }
 0x461   : > { %8782 = vmatmul.msk.f32.gmra.mxu0 %vm1145_vm2, %v5332_v40  ;;  %8751 = vmatmul.msk.f32.gmra.mxu3 %vm1145_vm2, %v12046_v46  ;;  %v3642_v40 = vadd.f32 %v14811_v12, %v3367_v19  ;;  %v5333_v46 = vld [vmem:[#allocation2 + $0x10e] sm:$0xff] }
 0x463   : > { %v3827_v58 = vpop.f32.mrf.mxu2 }
 0x464   : > { %v12177_v42 = vpop.f32.mrf.mxu3  ;;  %v12186_v16 = vadd.f32 %v3827_v58, %v3642_v40  ;;  %v3094_v58 = vadd.f32 %v14814_v52, %v11524_v27  ;;  %v14818_v27 = vld [vmem:[#allocation135_spill] sm:$0xff]  ;;  %v14820_v52 = vld [vmem:[#allocation140_spill] sm:$0xff] }
 0x465   : > { %14807 = vst [vmem:[#allocation90_spill] sm:$0xff] %v12177_v42  ;;  %v12183_v23 = vpop.f32.mrf.mxu1  ;;  %v4525_v42 = vld [vmem:[#allocation2 + $0x210] sm:$0xff] }
 0x466   : > { %v12181_v50 = vpop.f32.mrf.mxu0  ;;  %14810 = vst [vmem:[#allocation142_spill] sm:$0xff] %v12183_v23  ;;  %v3369_v20 = vadd.f32 %v14818_v27, %v3094_v58  ;;  %v12232_v58 = vld [vmem:[#allocation2 + $0x18a] sm:$0xff] }
 0x467   : > { %14809 = vst [vmem:[#allocation92_spill] sm:$0xff] %v12181_v50 }
 0x468   : > { %8704 = vmatmul.msk.f32.gmra.mxu1 %vm1145_vm2, %v4524_v41  ;;  %8600 = vmatmul.msk.f32.gmra.mxu2 %vm1145_vm2, %v12192_v21  ;;  %v14817_v41 = vld [vmem:[#allocation189_spill] sm:$0xff] }
 0x469   : > { %8783 = vmatmul.msk.f32.gmra.mxu0 %vm1145_vm2, %v5333_v46  ;;  %8752 = vmatmul.msk.f32.gmra.mxu3 %vm1145_vm2, %v12070_v7  ;;  %v3643_v46 = vadd.f32 %v14817_v41, %v3368_v48  ;;  %v5334_v7 = vld [vmem:[#allocation2 + $0x126] sm:$0xff] }
 0x46b   : > { %v3830_v50 = vpop.f32.mrf.mxu2 }
 0x46c   : > { %v12197_v19 = vpop.f32.mrf.mxu3  ;;  %v12206_v23 = vadd.f32 %v3830_v50, %v3643_v46  ;;  %v3095_v50 = vadd.f32 %v14820_v52, %v11544_v11  ;;  %v14824_v11 = vld [vmem:[#allocation141_spill] sm:$0xff] }
 0x46d   : > { %14813 = vst [vmem:[#allocation71_spill] sm:$0xff] %v12197_v19  ;;  %v12203_v40 = vpop.f32.mrf.mxu1  ;;  %v4526_v19 = vld [vmem:[#allocation2 + $0x228] sm:$0xff]  ;;  %v14826_v52 = vld [vmem:[#allocation145_spill] sm:$0xff] }
 0x46e   : > { %v12201_v12 = vpop.f32.mrf.mxu0  ;;  %14816 = vst [vmem:[#allocation95_spill] sm:$0xff] %v12203_v40  ;;  %v3370_v27 = vadd.f32 %v14824_v11, %v3095_v50  ;;  %v12252_v50 = vld [vmem:[#allocation2 + $0x192] sm:$0xff] }
 0x46f   : > { %14815 = vst [vmem:[#allocation93_spill] sm:$0xff] %v12201_v12 }
 0x470   : > { %8705 = vmatmul.msk.f32.gmra.mxu1 %vm1145_vm2, %v4525_v42  ;;  %8601 = vmatmul.msk.f32.gmra.mxu2 %vm1145_vm2, %v12212_v25  ;;  %v14823_v42 = vld [vmem:[#allocation193_spill] sm:$0xff] }
 0x471   : > { %8784 = vmatmul.msk.f32.gmra.mxu0 %vm1145_vm2, %v5334_v7  ;;  %8753 = vmatmul.msk.f32.gmra.mxu3 %vm1145_vm2, %v12089_v22  ;;  %v3644_v7 = vadd.f32 %v14823_v42, %v3369_v20  ;;  %v5335_v22 = vld [vmem:[#allocation2 + $0x12e] sm:$0xff] }
 0x473   : > { %v3833_v12 = vpop.f32.mrf.mxu2 }
 0x474   : > { %v12217_v48 = vpop.f32.mrf.mxu3  ;;  %v12226_v40 = vadd.f32 %v3833_v12, %v3644_v7  ;;  %v3096_v12 = vadd.f32 %v14826_v52, %v11563_v3  ;;  %v14830_v3 = vld [vmem:[#allocation146_spill] sm:$0xff]  ;;  %v14832_v52 = vld [vmem:[#allocation148_spill] sm:$0xff] }
 0x475   : > { %14819 = vst [vmem:[#allocation147_spill] sm:$0xff] %v12217_v48  ;;  %v12223_v46 = vpop.f32.mrf.mxu1  ;;  %v4527_v48 = vld [vmem:[#allocation2 + $0x230] sm:$0xff] }
 0x476   : > { %v12221_v41 = vpop.f32.mrf.mxu0  ;;  %14822 = vst [vmem:[#allocation96_spill] sm:$0xff] %v12223_v46  ;;  %v3371_v11 = vadd.f32 %v14830_v3, %v3096_v12  ;;  %v12272_v12 = vld [vmem:[#allocation2 + $0x1aa] sm:$0xff] }
 0x477   : > { %14821 = vst [vmem:[#allocation75_spill] sm:$0xff] %v12221_v41 }
 0x478   : > { %8706 = vmatmul.msk.f32.gmra.mxu1 %vm1145_vm2, %v4526_v19  ;;  %8602 = vmatmul.msk.f32.gmra.mxu2 %vm1145_vm2, %v12232_v58  ;;  %v14829_v19 = vld [vmem:[#allocation197_spill] sm:$0xff] }
 0x479   : > { %8785 = vmatmul.msk.f32.gmra.mxu0 %vm1145_vm2, %v5335_v22  ;;  %8754 = vmatmul.msk.f32.gmra.mxu3 %vm1145_vm2, %v12112_v37  ;;  %v3645_v22 = vadd.f32 %v14829_v19, %v3370_v27  ;;  %v5336_v37 = vld [vmem:[#allocation2 + $0x146] sm:$0xff] }
 0x47b   : > { %v3836_v41 = vpop.f32.mrf.mxu2 }
 0x47c   : > { %v12237_v20 = vpop.f32.mrf.mxu3  ;;  %v12246_v46 = vadd.f32 %v3836_v41, %v3645_v22  ;;  %v3097_v41 = vadd.f32 %v14832_v52, %v11582_v31  ;;  %v14836_v31 = vld [vmem:[#allocation149_spill] sm:$0xff]  ;;  %v14838_v52 = vld [vmem:[#allocation151_spill] sm:$0xff] }
 0x47d   : > { %14825 = vst [vmem:[#allocation98_spill] sm:$0xff] %v12237_v20  ;;  %v12243_v7 = vpop.f32.mrf.mxu1  ;;  %v5597_v20 = vld [vmem:[#allocation2 + $0x67] sm:$0xff] }
 0x47e   : > { %v12241_v42 = vpop.f32.mrf.mxu0  ;;  %14828 = vst [vmem:[#allocation79_spill] sm:$0xff] %v12243_v7  ;;  %v3372_v3 = vadd.f32 %v14836_v31, %v3097_v41  ;;  %v12292_v41 = vld [vmem:[#allocation2 + $0x1b2] sm:$0xff] }
 0x47f   : > { %14827 = vst [vmem:[#allocation150_spill] sm:$0xff] %v12241_v42 }
 0x480   : > { %8707 = vmatmul.msk.f32.gmra.mxu1 %vm1145_vm2, %v4527_v48  ;;  %8603 = vmatmul.msk.f32.gmra.mxu2 %vm1145_vm2, %v12252_v50  ;;  %v14835_v48 = vld [vmem:[#allocation201_spill] sm:$0xff] }
 0x481   : > { %8786 = vmatmul.msk.f32.gmra.mxu0 %vm1145_vm2, %v5336_v37  ;;  %8755 = vmatmul.msk.f32.gmra.mxu3 %vm1145_vm2, %v12132_v45  ;;  %v3646_v37 = vadd.f32 %v14835_v48, %v3371_v11  ;;  %v5337_v45 = vld [vmem:[#allocation2 + $0x14e] sm:$0xff] }
 0x483   : > { %v3839_v42 = vpop.f32.mrf.mxu2 }
 0x484   : > { %v12257_v27 = vpop.f32.mrf.mxu3  ;;  %v12266_v7 = vadd.f32 %v3839_v42, %v3646_v37  ;;  %v3098_v42 = vadd.f32 %v14838_v52, %v11601_v55  ;;  %v14841_v55 = vld [vmem:[#allocation152_spill] sm:$0xff]  ;;  %v14843_v52 = vld [vmem:[#allocation154_spill] sm:$0xff] }
 0x485   : > { %14831 = vst [vmem:[#allocation190_spill] sm:$0xff] %v12257_v27  ;;  %v12263_v22 = vpop.f32.mrf.mxu1  ;;  %v5598_v27 = vld [vmem:[#allocation2 + $0x6f] sm:$0xff] }
 0x486   : > { %v12261_v19 = vpop.f32.mrf.mxu0  ;;  %14834 = vst [vmem:[#allocation101_spill] sm:$0xff] %v12263_v22  ;;  %v3373_v31 = vadd.f32 %v14841_v55, %v3098_v42  ;;  %v12313_v42 = vld [vmem:[#allocation2 + $0x1ca] sm:$0xff] }
 0x487   : > { %14833 = vst [vmem:[#allocation99_spill] sm:$0xff] %v12261_v19 }
 0x488   : > { %8804 = vmatmul.msk.f32.vlgmr.msra.gmra.mxu1 %vm1145_vm2, %v5597_v20  ;;  %8604 = vmatmul.msk.f32.gmra.mxu2 %vm1145_vm2, %v12272_v12  ;;  %v14840_v20 = vld [vmem:[#allocation203_spill] sm:$0xff] }
 0x489   : > { %8787 = vmatmul.msk.f32.gmra.mxu0 %vm1145_vm2, %v5337_v45  ;;  %8756 = vmatmul.msk.f32.gmra.mxu3 %vm1145_vm2, %v12152_v38  ;;  %v3647_v45 = vadd.f32 %v14840_v20, %v3372_v3  ;;  %v5338_v38 = vld [vmem:[#allocation2 + $0x166] sm:$0xff] }
 0x48b   : > { %v3842_v19 = vpop.f32.mrf.mxu2 }
 0x48c   : > { %v12277_v11 = vpop.f32.mrf.mxu3  ;;  %v12286_v22 = vadd.f32 %v3842_v19, %v3647_v45  ;;  %v3099_v19 = vadd.f32 %v14843_v52, %v11620_v56  ;;  %v14845_v56 = vld [vmem:[#allocation155_spill] sm:$0xff] }
 0x48d   : > { %14837 = vst [vmem:[#allocation153_spill] sm:$0xff] %v12277_v11  ;;  %v12283_v37 = vpop.f32.mrf.mxu1 }
 0x48e   : > { %v12281_v48 = vpop.f32.mrf.mxu0  ;;  %v3374_v55 = vadd.f32 %v14845_v56, %v3099_v19  ;;  %v12334_v19 = vld [vmem:[#allocation2 + $0x1d2] sm:$0xff] }
 0x48f   : > { %14839 = vst [vmem:[#allocation82_spill] sm:$0xff] %v12281_v48 }
 0x490   : > { %8805 = vmatmul.msk.f32.gmra.mxu1 %vm1145_vm2, %v5598_v27  ;;  %8605 = vmatmul.msk.f32.gmra.mxu2 %vm1145_vm2, %v12292_v41  ;;  %v3648_v27 = vadd.f32 %v11425_v9, %v3373_v31  ;;  %v14847_v31 = vld [vmem:[#allocation158_spill] sm:$0xff] }
 0x491   : > { %8788 = vmatmul.msk.f32.gmra.mxu0 %vm1145_vm2, %v5338_v38  ;;  %8757 = vmatmul.msk.f32.gmra.mxu3 %vm1145_vm2, %v12172_v15  ;;  %v5599_v15 = vld [vmem:[#allocation2 + $0x87] sm:$0xff]  ;;  %v3100_v52 = vadd.f32 %v14847_v31, %v11642_v61 }
 0x492   : > { %v14849_v61 = vld [vmem:[#allocation159_spill] sm:$0xff] }
 0x493   : > { %v3845_v38 = vpop.f32.mrf.mxu2  ;;  %v3375_v56 = vadd.f32 %v14849_v61, %v3100_v52  ;;  %v12355_v52 = vld [vmem:[#allocation2 + $0x1ea] sm:$0xff] }
 0x494   : > { %v12297_v3 = vpop.f32.mrf.mxu3  ;;  %v12306_v48 = vadd.f32 %v3845_v38, %v3648_v27  ;;  %v3649_v38 = vadd.f32 %v11444_v26, %v3374_v55  ;;  %v14851_v55 = vld [vmem:[#allocation163_spill] sm:$0xff] }
 0x495   : > { %14842 = vst [vmem:[#allocation194_spill] sm:$0xff] %v12297_v3  ;;  %v12303_v45 = vpop.f32.mrf.mxu1  ;;  %v3101_v31 = vadd.f32 %v14851_v55, %v11664_v30  ;;  %v14853_v30 = vld [vmem:[#allocation164_spill] sm:$0xff] }
 0x496   : > { %v12301_v20 = vpop.f32.mrf.mxu0 }
 0x497   : > { %14844 = vst [vmem:[#allocation102_spill] sm:$0xff] %v12301_v20  ;;  %v3376_v61 = vadd.f32 %v14853_v30, %v3101_v31  ;;  %v12376_v31 = vld [vmem:[#allocation2 + $0x1f2] sm:$0xff] }
 0x498   : > { %8806 = vmatmul.msk.f32.gmra.mxu1 %vm1145_vm2, %v5599_v15  ;;  %8606 = vmatmul.msk.f32.gmra.mxu2 %vm1145_vm2, %v12313_v42 }
 0x499   : > { %8789 = vmatmul.msk.f32.gmra.mxu0 %vm1145_vm2, %v11624_v60  ;;  %8758 = vmatmul.msk.f32.gmra.mxu3 %vm1145_vm2, %v12192_v21  ;;  %v5600_v21 = vld [vmem:[#allocation2 + $0x8f] sm:$0xff] }
 0x49b   : > { %v3848_v15 = vpop.f32.mrf.mxu2 }
 0x49c   : > { %v12318_v9 = vpop.f32.mrf.mxu3  ;;  %v12327_v20 = vadd.f32 %v3848_v15, %v3649_v38  ;;  %v3650_v15 = vadd.f32 %v11463_v13, %v3375_v56  ;;  %v14855_v56 = vld [vmem:[#allocation167_spill] sm:$0xff] }
 0x49d   : > { %14846 = vst [vmem:[#allocation104_spill] sm:$0xff] %v12318_v9  ;;  %v12324_v60 = vpop.f32.mrf.mxu1  ;;  %v3102_v55 = vadd.f32 %v14855_v56, %v11686_v1  ;;  %v14857_v1 = vld [vmem:[#allocation168_spill] sm:$0xff] }
 0x49e   : > { %v12322_v27 = vpop.f32.mrf.mxu0  ;;  %v5613_v9 = vld [vmem:[#allocation2 + $0x167] sm:$0xff] }
 0x49f   : > { %14848 = vst [vmem:[#allocation156_spill] sm:$0xff] %v12322_v27  ;;  %v3377_v30 = vadd.f32 %v14857_v1, %v3102_v55  ;;  %v5905_v55 = vld [vmem:[%s14333_s3 + $0x118] sm:$0xff]  ;;  %v14861_v1 = vld [vmem:[#allocation172_spill] sm:$0xff] }
 0x4a0   : > { %8807 = vmatmul.msk.f32.gmra.mxu1 %vm1145_vm2, %v5600_v21  ;;  %8607 = vmatmul.msk.f32.gmra.mxu2 %vm1145_vm2, %v12334_v19 }
 0x4a1   : > { %8790 = vmatmul.msk.f32.gmra.mxu0 %vm1145_vm2, %v11646_v62  ;;  %8759 = vmatmul.msk.f32.gmra.mxu3 %vm1145_vm2, %v12212_v25  ;;  %v5601_v25 = vld [vmem:[#allocation2 + $0xa7] sm:$0xff] }
 0x4a2   : > { %6016 = vmatpush.msrb.mxu2 %v5905_v55  ;;  %v5604_v55 = vld [vmem:[#allocation2 + $0xcf] sm:$0xff] }
 0x4a3   : > { %v3851_v21 = vpop.f32.mrf.mxu2 }
 0x4a4   : > { %v12339_v26 = vpop.f32.mrf.mxu3  ;;  %v12348_v27 = vadd.f32 %v3851_v21, %v3650_v15  ;;  %v3651_v21 = vadd.f32 %v11482_v5, %v3376_v61  ;;  %v14859_v61 = vld [vmem:[#allocation171_spill] sm:$0xff] }
 0x4a5   : > { %14850 = vst [vmem:[#allocation85_spill] sm:$0xff] %v12339_v26  ;;  %v12345_v62 = vpop.f32.mrf.mxu1  ;;  %v3103_v56 = vadd.f32 %v14859_v61, %v11716_v59  ;;  %v12400_v59 = vld [vmem:[#allocation2 + $0x20a] sm:$0xff]  ;;  %v14863_v61 = vld [vmem:[#allocation175_spill] sm:$0xff] }
 0x4a6   : > { %v12343_v38 = vpop.f32.mrf.mxu0 }
 0x4a7   : > { %14852 = vst [vmem:[#allocation198_spill] sm:$0xff] %v12343_v38 }
 0x4a8   : > { %8808 = vmatmul.msk.f32.gmra.mxu1 %vm1145_vm2, %v5601_v25  ;;  %8608 = vmatmul.msk.f32.gmra.mxu2 %vm1145_vm2, %v12355_v52 }
 0x4a9   : > { %8791 = vmatmul.msk.f32.gmra.mxu0 %vm1145_vm2, %v11668_v53  ;;  %8760 = vmatmul.msk.f32.gmra.mxu3 %vm1145_vm2, %v12232_v58  ;;  %v5602_v58 = vld [vmem:[#allocation2 + $0xaf] sm:$0xff] }
 0x4ab   : > { %v3854_v25 = vpop.f32.mrf.mxu2 }
 0x4ac   : > { %v12360_v13 = vpop.f32.mrf.mxu3  ;;  %v12369_v38 = vadd.f32 %v3854_v25, %v3651_v21  ;;  %v3652_v25 = vadd.f32 %v11501_v2, %v3377_v30  ;;  %v3378_v2 = vadd.f32 %v14861_v1, %v3103_v56  ;;  %v6180_v30 = vld [vmem:[%s14333_s3 + $0x128] sm:$0xff] }
 0x4ad   : > { %14854 = vst [vmem:[#allocation105_spill] sm:$0xff] %v12360_v13  ;;  %v12366_v53 = vpop.f32.mrf.mxu1  ;;  %6291 = vmatpush.msrb.mxu3 %v6180_v30  ;;  %v12424_v30 = vld [vmem:[#allocation2 + $0x212] sm:$0xff] }
 0x4ae   : > { %v12364_v15 = vpop.f32.mrf.mxu0  ;;  %v3653_v56 = vadd.f32 %v11521_v18, %v3378_v2  ;;  %v6455_v18 = vld [vmem:[%s14333_s3 + $0x138] sm:$0xff] }
 0x4af   : > { %14856 = vst [vmem:[#allocation107_spill] sm:$0xff] %v12364_v15  ;;  %6566 = vmatpush.msrb.mxu0 %v6455_v18  ;;  %v14869_v18 = vld [vmem:[#allocation180_spill] sm:$0xff] }
 0x4b0   : > { %8809 = vmatmul.msk.f32.gmra.mxu1 %vm1145_vm2, %v5602_v58  ;;  %8609 = vmatmul.msk.f32.gmra.mxu2 %vm1145_vm2, %v12376_v31 }
 0x4b1   : > { %8792 = vmatmul.msk.f32.gmra.mxu0 %vm1145_vm2, %v11690_v35  ;;  %8761 = vmatmul.msk.f32.gmra.mxu3 %vm1145_vm2, %v12252_v50  ;;  %v5603_v50 = vld [vmem:[#allocation2 + $0xc7] sm:$0xff] }
 0x4b3   : > { %v3857_v58 = vpop.f32.mrf.mxu2 }
 0x4b4   : > { %v12381_v5 = vpop.f32.mrf.mxu3  ;;  %v12390_v15 = vadd.f32 %v3857_v58, %v3652_v25  ;;  %v3104_v25 = vadd.f32 %v14863_v61, %v11746_v33  ;;  %v14865_v33 = vld [vmem:[#allocation176_spill] sm:$0xff] }
 0x4b5   : > { %14858 = vst [vmem:[#allocation160_spill] sm:$0xff] %v12381_v5  ;;  %v12387_v35 = vpop.f32.mrf.mxu1  ;;  %v5612_v5 = vld [vmem:[#allocation2 + $0x14f] sm:$0xff] }
 0x4b6   : > { %v12385_v21 = vpop.f32.mrf.mxu0  ;;  %v3379_v61 = vadd.f32 %v14865_v33, %v3104_v25 }
 0x4b7   : > { %14860 = vst [vmem:[#allocation88_spill] sm:$0xff] %v12385_v21 }
 0x4b8   : > { %8810 = vmatmul.msk.f32.gmra.mxu1 %vm1145_vm2, %v5603_v50  ;;  %8610 = vmatmul.msk.f32.gmra.mxu2 %vm1145_vm2, %v12400_v59 }
 0x4b9   : > { %8793 = vmatmul.msk.f32.gmra.mxu0 %vm1145_vm2, %v11720_v17  ;;  %8762 = vmatmul.msk.f32.gmra.mxu3 %vm1145_vm2, %v12272_v12 }
 0x4bb   : > { %v3860_v50 = vpop.f32.mrf.mxu2 }
 0x4bc   : > { %v12408_v17 = vpop.f32.mrf.mxu3  ;;  %v12417_v1 = vadd.f32 %v3860_v50, %v3653_v56 }
 0x4bd   : > { %14862 = vst [vmem:[#allocation202_spill] sm:$0xff] %v12408_v17  ;;  %v12414_v12 = vpop.f32.mrf.mxu1 }
 0x4be   : > { %v12412_v58 = vpop.f32.mrf.mxu0 }
 0x4bf   : > { %14864 = vst [vmem:[#allocation108_spill] sm:$0xff] %v12412_v58  ;;  %v5605_v58 = vld [vmem:[#allocation2 + $0xe7] sm:$0xff] }
 0x4c0   : > { %8811 = vmatmul.msk.f32.gmra.mxu1 %vm1145_vm2, %v5604_v55  ;;  %8611 = vmatmul.msk.f32.gmra.mxu2 %vm1145_vm2, %v12424_v30  ;;  %v3654_v55 = vadd.f32 %v11541_v10, %v3379_v61  ;;  %v14871_v10 = vld [vmem:[#allocation182_spill] sm:$0xff] }
 0x4c1   : > { %8794 = vmatmul.msk.f32.gmra.mxu0 %vm1145_vm2, %v11750_v32  ;;  %8763 = vmatmul.msk.f32.gmra.mxu3 %vm1145_vm2, %v12292_v41  ;;  %v6731_v32 = vld [vmem:[%s14333_s3 + $0x148] sm:$0xff]  ;;  %v14867_v41 = vld [vmem:[#allocation179_spill] sm:$0xff]  ;;  %v3106_v61 = vadd.f32 %v14871_v10, %v11788_v51 }
 0x4c2   : > { %v3105_v56 = vadd.f32 %v14867_v41, %v11767_v8  ;;  %6842 = vmatpush.msrb.mxu1 %v6731_v32  ;;  %v4771_v8 = vld [vmem:[#allocation2 + $0x49] sm:$0xff]  ;;  %v14873_v51 = vld [vmem:[#allocation183_spill] sm:$0xff] }
 0x4c3   : > { %v3863_v33 = vpop.f32.mrf.mxu2 }
 0x4c4   : > { %v12432_v2 = vpop.f32.mrf.mxu3  ;;  %v12444_v17 = vadd.f32 %v3863_v33, %v3654_v55  ;;  %v3380_v41 = vadd.f32 %v14869_v18, %v3105_v56  ;;  %v5606_v33 = vld [vmem:[#allocation2 + $0xef] sm:$0xff]  ;;  %v3381_v56 = vadd.f32 %v14873_v51, %v3106_v61 }
 0x4c5   : > { %14866 = vst [vmem:[#allocation110_spill] sm:$0xff] %v12432_v2  ;;  %v12441_v25 = vpop.f32.mrf.mxu1 }
 0x4c6   : > { %v12439_v50 = vpop.f32.mrf.mxu0 }
 0x4c7   : > { %14868 = vst [vmem:[#allocation165_spill] sm:$0xff] %v12439_v50 }
 0x4c8   : > { %8812 = vmatmul.msk.f32.gmra.mxu1 %vm1145_vm2, %v5605_v58  ;;  %8708 = vmatmul.msk.f32.vlgmr.msra.gmra.mxu2 %vm1145_vm2, %v4771_v8 }
 0x4c9   : > { %8795 = vmatmul.msk.f32.gmra.mxu0 %vm1145_vm2, %v11771_v24  ;;  %8764 = vmatmul.msk.f32.gmra.mxu3 %vm1145_vm2, %v12313_v42  ;;  %v3655_v24 = vadd.f32 %v11560_v44, %v3380_v41  ;;  %v4772_v42 = vld [vmem:[#allocation2 + $0x51] sm:$0xff]  ;;  %v14875_v44 = vld [vmem:[#allocation76_spill] sm:$0xff] }
 0x4ca   : > { %v3107_v18 = vadd.f32 %v14875_v44, %v11812_v49  ;;  %v14877_v49 = vld [vmem:[#allocation185_spill] sm:$0xff] }
 0x4cb   : > { %v3866_v58 = vpop.f32.mrf.mxu2 }
 0x4cc   : > { %v12453_v50 = vpop.f32.mrf.mxu3  ;;  %v12462_v2 = vadd.f32 %v3866_v58, %v3655_v24  ;;  %v5607_v58 = vld [vmem:[#allocation2 + $0x107] sm:$0xff]  ;;  %v3382_v61 = vadd.f32 %v14877_v49, %v3107_v18  ;;  %v12507_v18 = vld [vmem:[#allocation2 + $0x71] sm:$0xff] }
 0x4cd   : > { %14870 = vst [vmem:[#allocation91_spill] sm:$0xff] %v12453_v50  ;;  %v12459_v55 = vpop.f32.mrf.mxu1  ;;  %v14901_v50 = vld [vmem:[#allocation60_spill] sm:$0xff] }
 0x4ce   : > { %v12457_v32 = vpop.f32.mrf.mxu0  ;;  %v3657_v44 = vadd.f32 %v11598_v63, %v3382_v61  ;;  %v14883_v61 = vld [vmem:[#allocation191_spill] sm:$0xff] }
 0x4cf   : > { %14872 = vst [vmem:[#allocation204_spill] sm:$0xff] %v12457_v32 }
 0x4d0   : > { %8813 = vmatmul.msk.f32.gmra.mxu1 %vm1145_vm2, %v5606_v33  ;;  %8709 = vmatmul.msk.f32.gmra.mxu2 %vm1145_vm2, %v4772_v42  ;;  %v14879_v42 = vld [vmem:[#allocation187_spill] sm:$0xff] }
 0x4d1   : > { %8796 = vmatmul.msk.f32.gmra.mxu0 %vm1145_vm2, %v11792_v28  ;;  %8765 = vmatmul.msk.f32.gmra.mxu3 %vm1145_vm2, %v12334_v19  ;;  %v3656_v28 = vadd.f32 %v11579_v54, %v3381_v56  ;;  %v12487_v19 = vld [vmem:[#allocation2 + $0x69] sm:$0xff]  ;;  %v3108_v51 = vadd.f32 %v14879_v42, %v11836_v57  ;;  %v3109_v42 = vadd.f32 %v14883_v61, %v11864_v6 }
 0x4d2   : > { %v14881_v57 = vld [vmem:[#allocation188_spill] sm:$0xff]  ;;  %v14888_v61 = vld [vmem:[#allocation53_spill] sm:$0xff] }
 0x4d3   : > { %v3869_v24 = vpop.f32.mrf.mxu2  ;;  %v3383_v49 = vadd.f32 %v14881_v57, %v3108_v51  ;;  %v6179_v51 = vld [vmem:[%s14333_s3 + $0x120] sm:$0xff]  ;;  %v12530_v6 = vld [vmem:[#allocation2 + $0x89] sm:$0xff] }
 0x4d4   : > { %v12471_v8 = vpop.f32.mrf.mxu3  ;;  %v12480_v33 = vadd.f32 %v3869_v24, %v3656_v28  ;;  %v5608_v24 = vld [vmem:[#allocation2 + $0x10f] sm:$0xff]  ;;  %6292 = vmatpush.msrb.mxu3 %v6179_v51 }
 0x4d5   : > { %14874 = vst [vmem:[#allocation111_spill] sm:$0xff] %v12471_v8  ;;  %v12477_v10 = vpop.f32.mrf.mxu1  ;;  %v14886_v57 = vld [vmem:[#allocation192_spill] sm:$0xff] }
 0x4d6   : > { %v12475_v41 = vpop.f32.mrf.mxu0  ;;  %v14893_v51 = vld [vmem:[#allocation56_spill] sm:$0xff] }
 0x4d7   : > { %14876 = vst [vmem:[#allocation113_spill] sm:$0xff] %v12475_v41 }
 0x4d8   : > { %8814 = vmatmul.msk.f32.gmra.mxu1 %vm1145_vm2, %v5607_v58  ;;  %8710 = vmatmul.msk.f32.gmra.mxu2 %vm1145_vm2, %v12487_v19 }
 0x4d9   : > { %8797 = vmatmul.msk.f32.gmra.mxu0 %vm1145_vm2, %v11816_v39  ;;  %8766 = vmatmul.msk.f32.gmra.mxu3 %vm1145_vm2, %v12355_v52  ;;  %v5348_v52 = vld [vmem:[#allocation2 + $0x206] sm:$0xff] }
 0x4db   : > { %v3872_v28 = vpop.f32.mrf.mxu2 }
 0x4dc   : > { %v12492_v54 = vpop.f32.mrf.mxu3  ;;  %v12501_v58 = vadd.f32 %v3872_v28, %v3657_v44 }
 0x4dd   : > { %14878 = vst [vmem:[#allocation169_spill] sm:$0xff] %v12492_v54  ;;  %v12498_v39 = vpop.f32.mrf.mxu1 }
 0x4de   : > { %v12496_v56 = vpop.f32.mrf.mxu0 }
 0x4df   : > { %14880 = vst [vmem:[#allocation114_spill] sm:$0xff] %v12496_v56  ;;  %v5609_v56 = vld [vmem:[#allocation2 + $0x127] sm:$0xff] }
 0x4e0   : > { %8815 = vmatmul.msk.f32.gmra.mxu1 %vm1145_vm2, %v5608_v24  ;;  %8711 = vmatmul.msk.f32.gmra.mxu2 %vm1145_vm2, %v12507_v18 }
 0x4e1   : > { %8798 = vmatmul.msk.f32.gmra.mxu0 %vm1145_vm2, %v5348_v52  ;;  %8767 = vmatmul.msk.f32.gmra.mxu3 %vm1145_vm2, %v12376_v31  ;;  %v3658_v52 = vadd.f32 %v11617_v47, %v3383_v49  ;;  %v5349_v31 = vld [vmem:[#allocation2 + $0x20e] sm:$0xff]  ;;  %v3384_v47 = vadd.f32 %v14886_v57, %v3109_v42 }
 0x4e2   : > { %v5610_v57 = vld [vmem:[#allocation2 + $0x12f] sm:$0xff] }
 0x4e3   : > { %v3875_v24 = vpop.f32.mrf.mxu2 }
 0x4e4   : > { %v12512_v63 = vpop.f32.mrf.mxu3  ;;  %v12521_v54 = vadd.f32 %v3875_v24, %v3658_v52  ;;  %v14889_v52 = vld [vmem:[#allocation195_spill] sm:$0xff] }
 0x4e5   : > { %14882 = vst [vmem:[#allocation116_spill] sm:$0xff] %v12512_v63  ;;  %v12518_v28 = vpop.f32.mrf.mxu1 }
 0x4e6   : > { %v12516_v44 = vpop.f32.mrf.mxu0  ;;  %14885 = vst [vmem:[#allocation117_spill] sm:$0xff] %v12518_v28 }
 0x4e7   : > { %14884 = vst [vmem:[#allocation173_spill] sm:$0xff] %v12516_v44  ;;  %v14892_v44 = vld [vmem:[#allocation29_spill] sm:$0xff] }
 0x4e8   : > { %8816 = vmatmul.msk.f32.gmra.mxu1 %vm1145_vm2, %v5609_v56  ;;  %8712 = vmatmul.msk.f32.gmra.mxu2 %vm1145_vm2, %v12530_v6  ;;  %v3110_v56 = vadd.f32 %v14889_v52, %v14888_v61  ;;  %v3659_v63 = vadd.f32 %v14892_v44, %v3384_v47  ;;  %v12554_v61 = vld [vmem:[#allocation2 + $0x91] sm:$0xff]  ;;  %v14894_v44 = vld [vmem:[#allocation196_spill] sm:$0xff] }
 0x4e9   : > { %8799 = vmatmul.msk.f32.gmra.mxu0 %vm1145_vm2, %v5349_v31  ;;  %8768 = vmatmul.msk.f32.gmra.mxu3 %vm1145_vm2, %v12400_v59  ;;  %v6454_v59 = vld [vmem:[%s14333_s3 + $0x130] sm:$0xff] }
 0x4ea   : > { %6567 = vmatpush.msrb.mxu0 %v6454_v59  ;;  %v3385_v47 = vadd.f32 %v14894_v44, %v3110_v56  ;;  %v14896_v59 = vld [vmem:[#allocation57_spill] sm:$0xff] }
 0x4eb   : > { %v3878_v42 = vpop.f32.mrf.mxu2  ;;  %v12572_v56 = vld [vmem:[#allocation2 + $0x22a] sm:$0xff] }
 0x4ec   : > { %v12535_v49 = vpop.f32.mrf.mxu3  ;;  %v12547_v41 = vadd.f32 %v3878_v42, %v3659_v63  ;;  %v14897_v63 = vld [vmem:[#allocation199_spill] sm:$0xff]  ;;  %v12577_v44 = vld [vmem:[#allocation2 + $0xa9] sm:$0xff] }
 0x4ed   : > { %14887 = vst [vmem:[#allocation119_spill] sm:$0xff] %v12535_v49  ;;  %v12541_v31 = vpop.f32.mrf.mxu1  ;;  %v3111_v42 = vadd.f32 %v14897_v63, %v14896_v59  ;;  %v14902_v59 = vld [vmem:[#allocation200_spill] sm:$0xff] }
 0x4ee   : > { %v12539_v24 = vpop.f32.mrf.mxu0  ;;  %14891 = vst [vmem:[#allocation120_spill] sm:$0xff] %v12541_v31 }
 0x4ef   : > { %14890 = vst [vmem:[#allocation177_spill] sm:$0xff] %v12539_v24  ;;  %v3386_v63 = vadd.f32 %v14902_v59, %v3111_v42  ;;  %v12594_v42 = vld [vmem:[#allocation2 + $0x232] sm:$0xff] }
 0x4f0   : > { %8817 = vmatmul.msk.f32.gmra.mxu1 %vm1145_vm2, %v5610_v57  ;;  %8713 = vmatmul.msk.f32.gmra.mxu2 %vm1145_vm2, %v12554_v61  ;;  %v14900_v57 = vld [vmem:[#allocation32_spill] sm:$0xff]  ;;  %v14908_v59 = vld [vmem:[#allocation9_spill] sm:$0xff] }
 0x4f1   : > { %8800 = vmatmul.msk.f32.gmra.mxu0 %vm1145_vm2, %v14893_v51  ;;  %8769 = vmatmul.msk.f32.gmra.mxu3 %vm1145_vm2, %v12424_v30  ;;  %v3660_v49 = vadd.f32 %v14900_v57, %v3385_v47  ;;  %v5611_v30 = vld [vmem:[#allocation2 + $0x147] sm:$0xff] }
 0x4f3   : > { %v3881_v8 = vpop.f32.mrf.mxu2 }
 0x4f4   : > { %v12559_v52 = vpop.f32.mrf.mxu3  ;;  %v12568_v32 = vadd.f32 %v3881_v8, %v3660_v49  ;;  %v14904_v8 = vld [vmem:[#allocation7_spill] sm:$0xff] }
 0x4f5   : > { %14895 = vst [vmem:[#allocation122_spill] sm:$0xff] %v12559_v52  ;;  %v12565_v51 = vpop.f32.mrf.mxu1  ;;  %v3112_v49 = vadd.f32 %v14904_v8, %v11933_v36  ;;  %v12599_v36 = vld [vmem:[#allocation2 + $0xb1] sm:$0xff] }
 0x4f6   : > { %v12563_v24 = vpop.f32.mrf.mxu0  ;;  %14899 = vst [vmem:[#allocation123_spill] sm:$0xff] %v12565_v51 }
 0x4f7   : > { %14898 = vst [vmem:[#allocation181_spill] sm:$0xff] %v12563_v24  ;;  %v14907_v24 = vld [vmem:[#allocation36_spill] sm:$0xff]  ;;  %v3387_v8 = vadd.f32 %v14908_v59, %v3112_v49 }
 0x4f8   : > { %8818 = vmatmul.msk.f32.gmra.mxu1 %vm1145_vm2, %v5611_v30  ;;  %8714 = vmatmul.msk.f32.gmra.mxu2 %vm1145_vm2, %v12577_v44  ;;  %v5352_v30 = vld [vmem:[#allocation2 + $0x246] sm:$0xff]  ;;  %v3661_v52 = vadd.f32 %v14907_v24, %v3386_v63 }
 0x4f9   : > { %8801 = vmatmul.msk.f32.gmra.mxu0 %vm1145_vm2, %v14901_v50  ;;  %8770 = vmatmul.msk.f32.gmra.mxu3 %vm1145_vm2, %v12572_v56  ;;  %v12619_v49 = vld [vmem:[#allocation2 + $0xc9] sm:$0xff] }
 0x4fb   : > { %v3884_v21 = vpop.f32.mrf.mxu2 }
 0x4fc   : > { %v12582_v47 = vpop.f32.mrf.mxu3  ;;  %v12591_v13 = vadd.f32 %v3884_v21, %v3661_v52  ;;  %v14910_v21 = vld [vmem:[#allocation10_spill] sm:$0xff] }
 0x4fd   : > { %14903 = vst [vmem:[#allocation125_spill] sm:$0xff] %v12582_v47  ;;  %v12588_v57 = vpop.f32.mrf.mxu1  ;;  %v3113_v52 = vadd.f32 %v14910_v21, %v11954_v14  ;;  %v14914_v14 = vld [vmem:[#allocation8_spill] sm:$0xff] }
 0x4fe   : > { %v12586_v50 = vpop.f32.mrf.mxu0  ;;  %14906 = vst [vmem:[#allocation126_spill] sm:$0xff] %v12588_v57 }
 0x4ff   : > { %14905 = vst [vmem:[#allocation184_spill] sm:$0xff] %v12586_v50  ;;  %v14913_v50 = vld [vmem:[#allocation40_spill] sm:$0xff]  ;;  %v3388_v59 = vadd.f32 %v14914_v14, %v3113_v52  ;;  %v12639_v52 = vld [vmem:[#allocation2 + $0xd1] sm:$0xff] }
 0x500   : > { %8819 = vmatmul.msk.f32.gmra.mxu1 %vm1145_vm2, %v5612_v5  ;;  %8715 = vmatmul.msk.f32.gmra.mxu2 %vm1145_vm2, %v12599_v36  ;;  %v5353_v5 = vld [vmem:[#allocation2 + $0x24e] sm:$0xff]  ;;  %v3662_v47 = vadd.f32 %v14913_v50, %v3387_v8  ;;  %v14916_v50 = vld [vmem:[#allocation43_spill] sm:$0xff]  ;;  %v14921_v14 = vld [vmem:[#allocation62_spill] sm:$0xff] }
 0x501   : > { %8802 = vmatmul.msk.f32.gmra.mxu0 %vm1145_vm2, %v5352_v30  ;;  %8771 = vmatmul.msk.f32.gmra.mxu3 %vm1145_vm2, %v12594_v42  ;;  %v14917_v8 = vld [vmem:[#allocation12_spill] sm:$0xff] }
 0x503   : > { %v3887_v26 = vpop.f32.mrf.mxu2 }
 0x504   : > { %v12604_v24 = vpop.f32.mrf.mxu3  ;;  %v12613_v3 = vadd.f32 %v3887_v26, %v3662_v47  ;;  %v3114_v26 = vadd.f32 %v14917_v8, %v14916_v50  ;;  %v14923_v8 = vld [vmem:[#allocation118_spill] sm:$0xff] }
 0x505   : > { %14909 = vst [vmem:[#allocation129_spill] sm:$0xff] %v12604_v24  ;;  %v12610_v30 = vpop.f32.mrf.mxu1 }
 0x506   : > { %v12608_v63 = vpop.f32.mrf.mxu0  ;;  %14912 = vst [vmem:[#allocation130_spill] sm:$0xff] %v12610_v30  ;;  %v5614_v30 = vld [vmem:[#allocation2 + $0x16f] sm:$0xff]  ;;  %v3389_v50 = vadd.f32 %v14921_v14, %v3114_v26  ;;  %v14928_v14 = vld [vmem:[#allocation11_spill] sm:$0xff] }
 0x507   : > { %14911 = vst [vmem:[#allocation186_spill] sm:$0xff] %v12608_v63  ;;  %v12659_v26 = vld [vmem:[#allocation2 + $0xe9] sm:$0xff] }
 0x508   : > { %8820 = vmatmul.msk.f32.gmra.mxu1 %vm1145_vm2, %v5613_v9  ;;  %8716 = vmatmul.msk.f32.gmra.mxu2 %vm1145_vm2, %v12619_v49  ;;  %v14920_v9 = vld [vmem:[#allocation42_spill] sm:$0xff] }
 0x509   : > { %8803 = vmatmul.msk.f32.gmra.mxu0 %vm1145_vm2, %v5353_v5  ;;  %8868 = vmatmul.msk.f32.vlgmr.msrb.gmra.mxu3 %vm1145_vm2, %v12487_v19  ;;  %v3663_v63 = vadd.f32 %v14920_v9, %v3388_v59  ;;  %v6422_v19 = vld [vmem:[#allocation2 + $0x6a] sm:$0xff] }
 0x50a   : > { %v14924_v9 = vld [vmem:[#allocation13_spill] sm:$0xff] }
 0x50b   : > { %v3890_v24 = vpop.f32.mrf.mxu2 }
 0x50c   : > { %v12624_v21 = vpop.f32.mrf.mxu3  ;;  %v12633_v57 = vadd.f32 %v3890_v24, %v3663_v63  ;;  %v3115_v24 = vadd.f32 %v14924_v9, %v14923_v8  ;;  %v14930_v9 = vld [vmem:[#allocation77_spill] sm:$0xff] }
 0x50d   : > { %14915 = vst [vmem:[#allocation134_spill] sm:$0xff] %v12624_v21  ;;  %v12630_v5 = vpop.f32.mrf.mxu1 }
 0x50e   : > { %v12628_v47 = vpop.f32.mrf.mxu0  ;;  %14919 = vst [vmem:[#allocation135_spill] sm:$0xff] %v12630_v5  ;;  %v5615_v5 = vld [vmem:[#allocation2 + $0x187] sm:$0xff]  ;;  %v3390_v8 = vadd.f32 %v14928_v14, %v3115_v24  ;;  %v12679_v24 = vld [vmem:[#allocation2 + $0xf1] sm:$0xff] }
 0x50f   : > { %14918 = vst [vmem:[#allocation189_spill] sm:$0xff] %v12628_v47  ;;  %v14935_v14 = vld [vmem:[#allocation66_spill] sm:$0xff] }
 0x510   : > { %8821 = vmatmul.msk.f32.gmra.mxu1 %vm1145_vm2, %v5614_v30  ;;  %8717 = vmatmul.msk.f32.gmra.mxu2 %vm1145_vm2, %v12639_v52  ;;  %v14927_v30 = vld [vmem:[#allocation128_spill] sm:$0xff] }
 0x511   : > { %8900 = vmatmul.msk.f32.vlgmr.msrb.gmra.mxu0 %vm1145_vm2, %v6422_v19  ;;  %8869 = vmatmul.msk.f32.gmra.mxu3 %vm1145_vm2, %v12507_v18  ;;  %v3664_v47 = vadd.f32 %v14927_v30, %v3389_v50  ;;  %v6423_v18 = vld [vmem:[#allocation2 + $0x72] sm:$0xff]  ;;  %v14931_v30 = vld [vmem:[#allocation15_spill] sm:$0xff] }
 0x513   : > { %v3893_v21 = vpop.f32.mrf.mxu2 }
 0x514   : > { %v12644_v59 = vpop.f32.mrf.mxu3  ;;  %v12653_v11 = vadd.f32 %v3893_v21, %v3664_v47  ;;  %v3116_v21 = vadd.f32 %v14931_v30, %v14930_v9  ;;  %v14937_v30 = vld [vmem:[#allocation78_spill] sm:$0xff] }
 0x515   : > { %14922 = vst [vmem:[#allocation140_spill] sm:$0xff] %v12644_v59  ;;  %v12650_v19 = vpop.f32.mrf.mxu1 }
 0x516   : > { %v12648_v63 = vpop.f32.mrf.mxu0  ;;  %14926 = vst [vmem:[#allocation141_spill] sm:$0xff] %v12650_v19  ;;  %v5616_v19 = vld [vmem:[#allocation2 + $0x18f] sm:$0xff]  ;;  %v3391_v9 = vadd.f32 %v14935_v14, %v3116_v21  ;;  %v14942_v14 = vld [vmem:[#allocation14_spill] sm:$0xff] }
 0x517   : > { %14925 = vst [vmem:[#allocation193_spill] sm:$0xff] %v12648_v63  ;;  %v12699_v21 = vld [vmem:[#allocation2 + $0x109] sm:$0xff] }
 0x518   : > { %8822 = vmatmul.msk.f32.gmra.mxu1 %vm1145_vm2, %v5615_v5  ;;  %8718 = vmatmul.msk.f32.gmra.mxu2 %vm1145_vm2, %v12659_v26  ;;  %v14934_v5 = vld [vmem:[#allocation46_spill] sm:$0xff] }
 0x519   : > { %8901 = vmatmul.msk.f32.gmra.mxu0 %vm1145_vm2, %v6423_v18  ;;  %8870 = vmatmul.msk.f32.gmra.mxu3 %vm1145_vm2, %v12530_v6  ;;  %v3665_v63 = vadd.f32 %v14934_v5, %v3390_v8  ;;  %v6424_v6 = vld [vmem:[#allocation2 + $0x8a] sm:$0xff] }
 0x51a   : > { %v14938_v5 = vld [vmem:[#allocation16_spill] sm:$0xff] }
 0x51b   : > { %v3896_v59 = vpop.f32.mrf.mxu2 }
 0x51c   : > { %v12664_v50 = vpop.f32.mrf.mxu3  ;;  %v12673_v51 = vadd.f32 %v3896_v59, %v3665_v63  ;;  %v3117_v59 = vadd.f32 %v14938_v5, %v14937_v30  ;;  %v14944_v5 = vld [vmem:[#allocation55_spill] sm:$0xff] }
 0x51d   : > { %14929 = vst [vmem:[#allocation145_spill] sm:$0xff] %v12664_v50  ;;  %v12670_v18 = vpop.f32.mrf.mxu1 }
 0x51e   : > { %v12668_v47 = vpop.f32.mrf.mxu0  ;;  %14933 = vst [vmem:[#allocation146_spill] sm:$0xff] %v12670_v18  ;;  %v5617_v18 = vld [vmem:[#allocation2 + $0x1a7] sm:$0xff]  ;;  %v3392_v30 = vadd.f32 %v14942_v14, %v3117_v59  ;;  %v12719_v59 = vld [vmem:[#allocation2 + $0x111] sm:$0xff] }
 0x51f   : > { %14932 = vst [vmem:[#allocation197_spill] sm:$0xff] %v12668_v47  ;;  %v14949_v14 = vld [vmem:[#allocation70_spill] sm:$0xff] }
 0x520   : > { %8823 = vmatmul.msk.f32.gmra.mxu1 %vm1145_vm2, %v5616_v19  ;;  %8719 = vmatmul.msk.f32.gmra.mxu2 %vm1145_vm2, %v12679_v24  ;;  %v14941_v19 = vld [vmem:[#allocation133_spill] sm:$0xff] }
 0x521   : > { %8902 = vmatmul.msk.f32.gmra.mxu0 %vm1145_vm2, %v6424_v6  ;;  %8871 = vmatmul.msk.f32.gmra.mxu3 %vm1145_vm2, %v12554_v61  ;;  %v3666_v47 = vadd.f32 %v14941_v19, %v3391_v9  ;;  %v6425_v61 = vld [vmem:[#allocation2 + $0x92] sm:$0xff] }
 0x522   : > { %v14945_v19 = vld [vmem:[#allocation18_spill] sm:$0xff] }
 0x523   : > { %v3899_v50 = vpop.f32.mrf.mxu2 }
 0x524   : > { %v12684_v8 = vpop.f32.mrf.mxu3  ;;  %v12693_v31 = vadd.f32 %v3899_v50, %v3666_v47  ;;  %v3118_v50 = vadd.f32 %v14945_v19, %v14944_v5  ;;  %v14951_v19 = vld [vmem:[#allocation19_spill] sm:$0xff] }
 0x525   : > { %14936 = vst [vmem:[#allocation148_spill] sm:$0xff] %v12684_v8  ;;  %v12690_v6 = vpop.f32.mrf.mxu1 }
 0x526   : > { %v12688_v63 = vpop.f32.mrf.mxu0  ;;  %14940 = vst [vmem:[#allocation149_spill] sm:$0xff] %v12690_v6  ;;  %v5618_v6 = vld [vmem:[#allocation2 + $0x1af] sm:$0xff]  ;;  %v3393_v5 = vadd.f32 %v14949_v14, %v3118_v50  ;;  %v5619_v14 = vld [vmem:[#allocation2 + $0x1c7] sm:$0xff] }
 0x527   : > { %14939 = vst [vmem:[#allocation201_spill] sm:$0xff] %v12688_v63  ;;  %v6427_v50 = vld [vmem:[#allocation2 + $0xb2] sm:$0xff] }
 0x528   : > { %8824 = vmatmul.msk.f32.gmra.mxu1 %vm1145_vm2, %v5617_v18  ;;  %8720 = vmatmul.msk.f32.gmra.mxu2 %vm1145_vm2, %v12699_v21  ;;  %v14948_v18 = vld [vmem:[#allocation50_spill] sm:$0xff] }
 0x529   : > { %8903 = vmatmul.msk.f32.gmra.mxu0 %vm1145_vm2, %v6425_v61  ;;  %8872 = vmatmul.msk.f32.gmra.mxu3 %vm1145_vm2, %v12577_v44  ;;  %v3667_v63 = vadd.f32 %v14948_v18, %v3392_v30  ;;  %v6426_v44 = vld [vmem:[#allocation2 + $0xaa] sm:$0xff] }
 0x52b   : > { %v3902_v8 = vpop.f32.mrf.mxu2 }
 0x52c   : > { %v12704_v9 = vpop.f32.mrf.mxu3  ;;  %v12713_v28 = vadd.f32 %v3902_v8, %v3667_v63  ;;  %v3119_v8 = vadd.f32 %v14951_v19, %v12083_v0  ;;  %v12742_v0 = vld [vmem:[#allocation2 + $0x129] sm:$0xff] }
 0x52d   : > { %14943 = vst [vmem:[#allocation151_spill] sm:$0xff] %v12704_v9  ;;  %v12710_v61 = vpop.f32.mrf.mxu1 }
 0x52e   : > { %v12708_v47 = vpop.f32.mrf.mxu0  ;;  %14947 = vst [vmem:[#allocation152_spill] sm:$0xff] %v12710_v61 }
 0x52f   : > { %14946 = vst [vmem:[#allocation203_spill] sm:$0xff] %v12708_v47 }
 0x530   : > { %8825 = vmatmul.msk.f32.gmra.mxu1 %vm1145_vm2, %v5618_v6  ;;  %8721 = vmatmul.msk.f32.gmra.mxu2 %vm1145_vm2, %v12719_v59  ;;  %v14954_v6 = vld [vmem:[#allocation103_spill] sm:$0xff] }
 0x531   : > { %8904 = vmatmul.msk.f32.gmra.mxu0 %vm1145_vm2, %v6426_v44  ;;  %8873 = vmatmul.msk.f32.gmra.mxu3 %vm1145_vm2, %v12599_v36  ;;  %v3668_v44 = vadd.f32 %v14954_v6, %v3393_v5  ;;  %v5904_v36 = vld [vmem:[%s14333_s3 + $0x110] sm:$0xff] }
 0x532   : > { %6017 = vmatpush.msrb.mxu2 %v5904_v36  ;;  %v14955_v5 = vld [vmem:[#allocation17_spill] sm:$0xff] }
 0x533   : > { %v3905_v47 = vpop.f32.mrf.mxu2  ;;  %v3394_v19 = vadd.f32 %v14955_v5, %v3119_v8  ;;  %v14957_v36 = vld [vmem:[#allocation21_spill] sm:$0xff] }
 0x534   : > { %v12724_v30 = vpop.f32.mrf.mxu3  ;;  %v12736_v9 = vadd.f32 %v3905_v47, %v3668_v44  ;;  %v3120_v47 = vadd.f32 %v14957_v36, %v12106_v29  ;;  %v12762_v8 = vld [vmem:[#allocation2 + $0x131] sm:$0xff] }
 0x535   : > { %14950 = vst [vmem:[#allocation154_spill] sm:$0xff] %v12724_v30  ;;  %v12730_v18 = vpop.f32.mrf.mxu1  ;;  %v14961_v29 = vld [vmem:[#allocation74_spill] sm:$0xff] }
 0x536   : > { %v12728_v63 = vpop.f32.mrf.mxu0  ;;  %14953 = vst [vmem:[#allocation158_spill] sm:$0xff] %v12730_v18  ;;  %v5620_v18 = vld [vmem:[#allocation2 + $0x1cf] sm:$0xff]  ;;  %v3395_v5 = vadd.f32 %v14961_v29, %v3120_v47 }
 0x537   : > { %14952 = vst [vmem:[#allocation155_spill] sm:$0xff] %v12728_v63  ;;  %v6429_v29 = vld [vmem:[#allocation2 + $0xd2] sm:$0xff] }
 0x538   : > { %8826 = vmatmul.msk.f32.gmra.mxu1 %vm1145_vm2, %v5619_v14  ;;  %8722 = vmatmul.msk.f32.gmra.mxu2 %vm1145_vm2, %v12742_v0  ;;  %v14960_v14 = vld [vmem:[#allocation143_spill] sm:$0xff] }
 0x539   : > { %8905 = vmatmul.msk.f32.gmra.mxu0 %vm1145_vm2, %v6427_v50  ;;  %8874 = vmatmul.msk.f32.gmra.mxu3 %vm1145_vm2, %v12619_v49  ;;  %v3669_v63 = vadd.f32 %v14960_v14, %v3394_v19  ;;  %v6428_v49 = vld [vmem:[#allocation2 + $0xca] sm:$0xff] }
 0x53b   : > { %v3908_v30 = vpop.f32.mrf.mxu2 }
 0x53c   : > { %v12747_v6 = vpop.f32.mrf.mxu3  ;;  %v12756_v61 = vadd.f32 %v3908_v30, %v3669_v63  ;;  %v6730_v30 = vld [vmem:[%s14333_s3 + $0x140] sm:$0xff]  ;;  %v14963_v63 = vld [vmem:[#allocation22_spill] sm:$0xff] }
 0x53d   : > { %14956 = vst [vmem:[#allocation159_spill] sm:$0xff] %v12747_v6  ;;  %v12753_v50 = vpop.f32.mrf.mxu1  ;;  %v4189_v36 = vadd.f32 %v14963_v63, %v12126_v4  ;;  %6843 = vmatpush.msrb.mxu1 %v6730_v30  ;;  %v12785_v4 = vld [vmem:[#allocation2 + $0x149] sm:$0xff]  ;;  %v14969_v30 = vld [vmem:[#allocation23_spill] sm:$0xff] }
 0x53e   : > { %v12751_v44 = vpop.f32.mrf.mxu0  ;;  %14959 = vst [vmem:[#allocation164_spill] sm:$0xff] %v12753_v50  ;;  %v14967_v63 = vld [vmem:[#allocation20_spill] sm:$0xff] }
 0x53f   : > { %14958 = vst [vmem:[#allocation163_spill] sm:$0xff] %v12751_v44  ;;  %v5621_v44 = vld [vmem:[#allocation2 + $0x1e7] sm:$0xff] }
 0x540   : > { %8827 = vmatmul.msk.f32.gmra.mxu1 %vm1145_vm2, %v5620_v18  ;;  %8723 = vmatmul.msk.f32.gmra.mxu2 %vm1145_vm2, %v12762_v8 }
 0x541   : > { %8906 = vmatmul.msk.f32.gmra.mxu0 %vm1145_vm2, %v6428_v49  ;;  %8875 = vmatmul.msk.f32.gmra.mxu3 %vm1145_vm2, %v12639_v52  ;;  %v14966_v52 = vld [vmem:[#allocation58_spill] sm:$0xff] }
 0x542   : > { %v3670_v49 = vadd.f32 %v14966_v52, %v3395_v5  ;;  %v4190_v52 = vadd.f32 %v14969_v30, %v12146_v43  ;;  %v14973_v43 = vld [vmem:[#allocation25_spill] sm:$0xff]  ;;  %v14975_v30 = vld [vmem:[#allocation24_spill] sm:$0xff] }
 0x543   : > { %v3911_v47 = vpop.f32.mrf.mxu2 }
 0x544   : > { %v12767_v19 = vpop.f32.mrf.mxu3  ;;  %v12779_v6 = vadd.f32 %v3911_v47, %v3670_v49 }
 0x545   : > { %14962 = vst [vmem:[#allocation167_spill] sm:$0xff] %v12767_v19  ;;  %v12776_v14 = vpop.f32.mrf.mxu1 }
 0x546   : > { %v12774_v18 = vpop.f32.mrf.mxu0  ;;  %14965 = vst [vmem:[#allocation171_spill] sm:$0xff] %v12776_v14  ;;  %v5622_v14 = vld [vmem:[#allocation2 + $0x1ef] sm:$0xff] }
 0x547   : > { %14964 = vst [vmem:[#allocation168_spill] sm:$0xff] %v12774_v18  ;;  %v4464_v18 = vadd.f32 %v14967_v63, %v4189_v36  ;;  %v12805_v36 = vld [vmem:[#allocation2 + $0x151] sm:$0xff]  ;;  %v4465_v63 = vadd.f32 %v14973_v43, %v4190_v52  ;;  %v12825_v52 = vld [vmem:[#allocation2 + $0x169] sm:$0xff] }
 0x548   : > { %8828 = vmatmul.msk.f32.gmra.mxu1 %vm1145_vm2, %v5621_v44  ;;  %8724 = vmatmul.msk.f32.gmra.mxu2 %vm1145_vm2, %v12785_v4  ;;  %v14972_v44 = vld [vmem:[#allocation61_spill] sm:$0xff] }
 0x549   : > { %8907 = vmatmul.msk.f32.gmra.mxu0 %vm1145_vm2, %v6429_v29  ;;  %8876 = vmatmul.msk.f32.gmra.mxu3 %vm1145_vm2, %v12659_v26  ;;  %v4739_v29 = vadd.f32 %v14972_v44, %v4464_v18  ;;  %v6430_v26 = vld [vmem:[#allocation2 + $0xea] sm:$0xff] }
 0x54b   : > { %v4918_v19 = vpop.f32.mrf.mxu2 }
 0x54c   : > { %v12790_v5 = vpop.f32.mrf.mxu3  ;;  %v12799_v50 = vadd.f32 %v4918_v19, %v4739_v29  ;;  %v4191_v19 = vadd.f32 %v14975_v30, %v12166_v34  ;;  %v14979_v34 = vld [vmem:[#allocation26_spill] sm:$0xff]  ;;  %v14981_v30 = vld [vmem:[#allocation28_spill] sm:$0xff] }
 0x54d   : > { %14968 = vst [vmem:[#allocation172_spill] sm:$0xff] %v12790_v5  ;;  %v12796_v47 = vpop.f32.mrf.mxu1  ;;  %v5623_v5 = vld [vmem:[#allocation2 + $0x207] sm:$0xff] }
 0x54e   : > { %v12794_v49 = vpop.f32.mrf.mxu0  ;;  %14971 = vst [vmem:[#allocation176_spill] sm:$0xff] %v12796_v47  ;;  %v4466_v43 = vadd.f32 %v14979_v34, %v4191_v19  ;;  %v12845_v19 = vld [vmem:[#allocation2 + $0x171] sm:$0xff] }
 0x54f   : > { %14970 = vst [vmem:[#allocation175_spill] sm:$0xff] %v12794_v49 }
 0x550   : > { %8829 = vmatmul.msk.f32.gmra.mxu1 %vm1145_vm2, %v5622_v14  ;;  %8725 = vmatmul.msk.f32.gmra.mxu2 %vm1145_vm2, %v12805_v36  ;;  %v14978_v14 = vld [vmem:[#allocation39_spill] sm:$0xff] }
 0x551   : > { %8908 = vmatmul.msk.f32.gmra.mxu0 %vm1145_vm2, %v6430_v26  ;;  %8877 = vmatmul.msk.f32.gmra.mxu3 %vm1145_vm2, %v12679_v24  ;;  %v4740_v26 = vadd.f32 %v14978_v14, %v4465_v63  ;;  %v6431_v24 = vld [vmem:[#allocation2 + $0xf2] sm:$0xff] }
 0x553   : > { %v4921_v49 = vpop.f32.mrf.mxu2 }
 0x554   : > { %v12810_v18 = vpop.f32.mrf.mxu3  ;;  %v12819_v47 = vadd.f32 %v4921_v49, %v4740_v26  ;;  %v4192_v49 = vadd.f32 %v14981_v30, %v12186_v16  ;;  %v14985_v16 = vld [vmem:[#allocation27_spill] sm:$0xff]  ;;  %v14987_v30 = vld [vmem:[#allocation30_spill] sm:$0xff] }
 0x555   : > { %14974 = vst [vmem:[#allocation179_spill] sm:$0xff] %v12810_v18  ;;  %v12816_v29 = vpop.f32.mrf.mxu1  ;;  %v5624_v18 = vld [vmem:[#allocation2 + $0x20f] sm:$0xff] }
 0x556   : > { %v12814_v44 = vpop.f32.mrf.mxu0  ;;  %14977 = vst [vmem:[#allocation182_spill] sm:$0xff] %v12816_v29  ;;  %v4467_v34 = vadd.f32 %v14985_v16, %v4192_v49  ;;  %v12865_v49 = vld [vmem:[#allocation2 + $0x189] sm:$0xff] }
 0x557   : > { %14976 = vst [vmem:[#allocation180_spill] sm:$0xff] %v12814_v44 }
 0x558   : > { %8830 = vmatmul.msk.f32.gmra.mxu1 %vm1145_vm2, %v5623_v5  ;;  %8726 = vmatmul.msk.f32.gmra.mxu2 %vm1145_vm2, %v12825_v52  ;;  %v14984_v5 = vld [vmem:[#allocation115_spill] sm:$0xff] }
 0x559   : > { %8909 = vmatmul.msk.f32.gmra.mxu0 %vm1145_vm2, %v6431_v24  ;;  %8878 = vmatmul.msk.f32.gmra.mxu3 %vm1145_vm2, %v12699_v21  ;;  %v4741_v24 = vadd.f32 %v14984_v5, %v4466_v43  ;;  %v6432_v21 = vld [vmem:[#allocation2 + $0x10a] sm:$0xff] }
 0x55b   : > { %v4924_v44 = vpop.f32.mrf.mxu2 }
 0x55c   : > { %v12830_v63 = vpop.f32.mrf.mxu3  ;;  %v12839_v29 = vadd.f32 %v4924_v44, %v4741_v24  ;;  %v4193_v44 = vadd.f32 %v14987_v30, %v12206_v23  ;;  %v14991_v23 = vld [vmem:[#allocation31_spill] sm:$0xff]  ;;  %v14993_v30 = vld [vmem:[#allocation33_spill] sm:$0xff] }
 0x55d   : > { %14980 = vst [vmem:[#allocation183_spill] sm:$0xff] %v12830_v63  ;;  %v12836_v26 = vpop.f32.mrf.mxu1  ;;  %v5625_v63 = vld [vmem:[#allocation2 + $0x227] sm:$0xff] }
 0x55e   : > { %v12834_v14 = vpop.f32.mrf.mxu0  ;;  %14983 = vst [vmem:[#allocation185_spill] sm:$0xff] %v12836_v26  ;;  %v4468_v16 = vadd.f32 %v14991_v23, %v4193_v44  ;;  %v12885_v44 = vld [vmem:[#allocation2 + $0x191] sm:$0xff] }
 0x55f   : > { %14982 = vst [vmem:[#allocation76_spill] sm:$0xff] %v12834_v14 }
 0x560   : > { %8831 = vmatmul.msk.f32.gmra.mxu1 %vm1145_vm2, %v5624_v18  ;;  %8727 = vmatmul.msk.f32.gmra.mxu2 %vm1145_vm2, %v12845_v19  ;;  %v14990_v18 = vld [vmem:[#allocation72_spill] sm:$0xff] }
 0x561   : > { %8910 = vmatmul.msk.f32.gmra.mxu0 %vm1145_vm2, %v6432_v21  ;;  %8879 = vmatmul.msk.f32.gmra.mxu3 %vm1145_vm2, %v12719_v59  ;;  %v4742_v21 = vadd.f32 %v14990_v18, %v4467_v34  ;;  %v6433_v59 = vld [vmem:[#allocation2 + $0x112] sm:$0xff] }
 0x563   : > { %v4927_v14 = vpop.f32.mrf.mxu2 }
 0x564   : > { %v12850_v43 = vpop.f32.mrf.mxu3  ;;  %v12859_v26 = vadd.f32 %v4927_v14, %v4742_v21  ;;  %v4194_v14 = vadd.f32 %v14993_v30, %v12226_v40  ;;  %v14997_v40 = vld [vmem:[#allocation34_spill] sm:$0xff]  ;;  %v14999_v30 = vld [vmem:[#allocation37_spill] sm:$0xff] }
 0x565   : > { %14986 = vst [vmem:[#allocation187_spill] sm:$0xff] %v12850_v43  ;;  %v12856_v24 = vpop.f32.mrf.mxu1  ;;  %v5626_v43 = vld [vmem:[#allocation2 + $0x22f] sm:$0xff] }
 0x566   : > { %v12854_v5 = vpop.f32.mrf.mxu0  ;;  %14989 = vst [vmem:[#allocation191_spill] sm:$0xff] %v12856_v24  ;;  %v4469_v23 = vadd.f32 %v14997_v40, %v4194_v14  ;;  %v12905_v14 = vld [vmem:[#allocation2 + $0x1a9] sm:$0xff] }
 0x567   : > { %14988 = vst [vmem:[#allocation188_spill] sm:$0xff] %v12854_v5 }
 0x568   : > { %8832 = vmatmul.msk.f32.gmra.mxu1 %vm1145_vm2, %v5625_v63  ;;  %8728 = vmatmul.msk.f32.gmra.mxu2 %vm1145_vm2, %v12865_v49  ;;  %v14996_v63 = vld [vmem:[#allocation73_spill] sm:$0xff] }
 0x569   : > { %8911 = vmatmul.msk.f32.gmra.mxu0 %vm1145_vm2, %v6433_v59  ;;  %8880 = vmatmul.msk.f32.gmra.mxu3 %vm1145_vm2, %v12742_v0  ;;  %v4743_v59 = vadd.f32 %v14996_v63, %v4468_v16  ;;  %v6434_v0 = vld [vmem:[#allocation2 + $0x12a] sm:$0xff] }
 0x56b   : > { %v4930_v5 = vpop.f32.mrf.mxu2 }
 0x56c   : > { %v12870_v34 = vpop.f32.mrf.mxu3  ;;  %v12879_v24 = vadd.f32 %v4930_v5, %v4743_v59  ;;  %v4195_v5 = vadd.f32 %v14999_v30, %v12246_v46  ;;  %v15003_v46 = vld [vmem:[#allocation38_spill] sm:$0xff] }
 0x56d   : > { %14992 = vst [vmem:[#allocation192_spill] sm:$0xff] %v12870_v34  ;;  %v12876_v21 = vpop.f32.mrf.mxu1  ;;  %v6435_v34 = vld [vmem:[#allocation2 + $0x132] sm:$0xff] }
 0x56e   : > { %v12874_v18 = vpop.f32.mrf.mxu0  ;;  %14995 = vst [vmem:[#allocation195_spill] sm:$0xff] %v12876_v21  ;;  %v4470_v40 = vadd.f32 %v15003_v46, %v4195_v5  ;;  %v12925_v5 = vld [vmem:[#allocation2 + $0x1b1] sm:$0xff] }
 0x56f   : > { %14994 = vst [vmem:[#allocation53_spill] sm:$0xff] %v12874_v18 }
 0x570   : > { %8833 = vmatmul.msk.f32.gmra.mxu1 %vm1145_vm2, %v5626_v43  ;;  %8729 = vmatmul.msk.f32.gmra.mxu2 %vm1145_vm2, %v12885_v44  ;;  %v5627_v43 = vld [vmem:[#allocation2 + $0x247] sm:$0xff] }
 0x571   : > { %8912 = vmatmul.msk.f32.gmra.mxu0 %vm1145_vm2, %v6434_v0  ;;  %8881 = vmatmul.msk.f32.gmra.mxu3 %vm1145_vm2, %v12762_v8  ;;  %v15002_v0 = vld [vmem:[#allocation51_spill] sm:$0xff] }
 0x572   : > { %v4744_v18 = vadd.f32 %v15002_v0, %v4469_v23  ;;  %v15005_v23 = vld [vmem:[#allocation94_spill] sm:$0xff] }
 0x573   : > { %v4933_v8 = vpop.f32.mrf.mxu2 }
 0x574   : > { %v12890_v16 = vpop.f32.mrf.mxu3  ;;  %v12899_v21 = vadd.f32 %v4933_v8, %v4744_v18  ;;  %v4196_v18 = vadd.f32 %v15005_v23, %v12266_v7  ;;  %v15008_v8 = vld [vmem:[#allocation166_spill] sm:$0xff]  ;;  %v15009_v7 = vld [vmem:[#allocation41_spill] sm:$0xff] }
 0x575   : > { %14998 = vst [vmem:[#allocation29_spill] sm:$0xff] %v12890_v16  ;;  %v12896_v59 = vpop.f32.mrf.mxu1  ;;  %v6436_v16 = vld [vmem:[#allocation2 + $0x14a] sm:$0xff] }
 0x576   : > { %v12894_v63 = vpop.f32.mrf.mxu0  ;;  %15001 = vst [vmem:[#allocation196_spill] sm:$0xff] %v12896_v59  ;;  %v4471_v46 = vadd.f32 %v15009_v7, %v4196_v18  ;;  %v12945_v18 = vld [vmem:[#allocation2 + $0x1c9] sm:$0xff] }
 0x577   : > { %15000 = vst [vmem:[#allocation56_spill] sm:$0xff] %v12894_v63  ;;  %v4745_v63 = vadd.f32 %v15008_v8, %v4470_v40  ;;  %v15011_v40 = vld [vmem:[#allocation44_spill] sm:$0xff] }
 0x578   : > { %8834 = vmatmul.msk.f32.gmra.mxu1 %vm1145_vm2, %v5627_v43  ;;  %8730 = vmatmul.msk.f32.gmra.mxu2 %vm1145_vm2, %v12905_v14  ;;  %v5628_v43 = vld [vmem:[#allocation2 + $0x24f] sm:$0xff] }
 0x579   : > { %8913 = vmatmul.msk.f32.gmra.mxu0 %vm1145_vm2, %v6435_v34  ;;  %8882 = vmatmul.msk.f32.gmra.mxu3 %vm1145_vm2, %v12785_v4 }
 0x57b   : > { %v4936_v4 = vpop.f32.mrf.mxu2 }
 0x57c   : > { %v12910_v30 = vpop.f32.mrf.mxu3  ;;  %v12919_v59 = vadd.f32 %v4936_v4, %v4745_v63  ;;  %v4197_v63 = vadd.f32 %v15011_v40, %v12286_v22  ;;  %v15015_v22 = vld [vmem:[#allocation97_spill] sm:$0xff] }
 0x57d   : > { %15004 = vst [vmem:[#allocation57_spill] sm:$0xff] %v12910_v30  ;;  %v12916_v34 = vpop.f32.mrf.mxu1  ;;  %v6698_v30 = vld [vmem:[#allocation2 + $0x86] sm:$0xff]  ;;  %v15017_v40 = vld [vmem:[#allocation45_spill] sm:$0xff] }
 0x57e   : > { %v12914_v0 = vpop.f32.mrf.mxu0  ;;  %15007 = vst [vmem:[#allocation32_spill] sm:$0xff] %v12916_v34  ;;  %v4472_v7 = vadd.f32 %v15015_v22, %v4197_v63  ;;  %v12965_v63 = vld [vmem:[#allocation2 + $0x1d1] sm:$0xff] }
 0x57f   : > { %15006 = vst [vmem:[#allocation199_spill] sm:$0xff] %v12914_v0 }
 0x580   : > { %8835 = vmatmul.msk.f32.gmra.mxu1 %vm1145_vm2, %v5628_v43  ;;  %8731 = vmatmul.msk.f32.gmra.mxu2 %vm1145_vm2, %v12925_v5  ;;  %v15014_v43 = vld [vmem:[#allocation83_spill] sm:$0xff] }
 0x581   : > { %8914 = vmatmul.msk.f32.gmra.mxu0 %vm1145_vm2, %v6436_v16  ;;  %8883 = vmatmul.msk.f32.gmra.mxu3 %vm1145_vm2, %v12805_v36  ;;  %v4746_v4 = vadd.f32 %v15014_v43, %v4471_v46  ;;  %v6437_v36 = vld [vmem:[#allocation2 + $0x152] sm:$0xff] }
 0x583   : > { %v4939_v0 = vpop.f32.mrf.mxu2 }
 0x584   : > { %v12930_v23 = vpop.f32.mrf.mxu3  ;;  %v12939_v34 = vadd.f32 %v4939_v0, %v4746_v4  ;;  %v4198_v0 = vadd.f32 %v15017_v40, %v12306_v48  ;;  %v15021_v48 = vld [vmem:[#allocation132_spill] sm:$0xff] }
 0x585   : > { %15010 = vst [vmem:[#allocation60_spill] sm:$0xff] %v12930_v23  ;;  %v12936_v16 = vpop.f32.mrf.mxu1  ;;  %v6699_v23 = vld [vmem:[#allocation2 + $0x8e] sm:$0xff] }
 0x586   : > { %v12934_v8 = vpop.f32.mrf.mxu0  ;;  %15013 = vst [vmem:[#allocation7_spill] sm:$0xff] %v12936_v16  ;;  %v4473_v22 = vadd.f32 %v15021_v48, %v4198_v0  ;;  %v15023_v40 = vld [vmem:[#allocation48_spill] sm:$0xff] }
 0x587   : > { %15012 = vst [vmem:[#allocation200_spill] sm:$0xff] %v12934_v8  ;;  %v12985_v0 = vld [vmem:[#allocation2 + $0x1e9] sm:$0xff] }
 0x588   : > { %8932 = vmatmul.msk.f32.vlgmr.msrb.gmra.mxu1 %vm1145_vm2, %v6698_v30  ;;  %8732 = vmatmul.msk.f32.gmra.mxu2 %vm1145_vm2, %v12945_v18  ;;  %v15020_v30 = vld [vmem:[#allocation174_spill] sm:$0xff] }
 0x589   : > { %8915 = vmatmul.msk.f32.gmra.mxu0 %vm1145_vm2, %v6437_v36  ;;  %8884 = vmatmul.msk.f32.gmra.mxu3 %vm1145_vm2, %v12825_v52  ;;  %v4747_v36 = vadd.f32 %v15020_v30, %v4472_v7  ;;  %v6438_v52 = vld [vmem:[#allocation2 + $0x16a] sm:$0xff] }
 0x58b   : > { %v4942_v8 = vpop.f32.mrf.mxu2 }
 0x58c   : > { %v12950_v46 = vpop.f32.mrf.mxu3  ;;  %v12959_v16 = vadd.f32 %v4942_v8, %v4747_v36  ;;  %v4199_v8 = vadd.f32 %v15023_v40, %v12327_v20  ;;  %v15027_v20 = vld [vmem:[#allocation100_spill] sm:$0xff]  ;;  %v15029_v40 = vld [vmem:[#allocation49_spill] sm:$0xff] }
 0x58d   : > { %15016 = vst [vmem:[#allocation36_spill] sm:$0xff] %v12950_v46  ;;  %v12956_v4 = vpop.f32.mrf.mxu1  ;;  %v6700_v46 = vld [vmem:[#allocation2 + $0xa6] sm:$0xff] }
 0x58e   : > { %v12954_v43 = vpop.f32.mrf.mxu0  ;;  %15019 = vst [vmem:[#allocation10_spill] sm:$0xff] %v12956_v4  ;;  %v4474_v48 = vadd.f32 %v15027_v20, %v4199_v8  ;;  %v13005_v8 = vld [vmem:[#allocation2 + $0x1f1] sm:$0xff] }
 0x58f   : > { %15018 = vst [vmem:[#allocation9_spill] sm:$0xff] %v12954_v43 }
 0x590   : > { %8933 = vmatmul.msk.f32.gmra.mxu1 %vm1145_vm2, %v6699_v23  ;;  %8733 = vmatmul.msk.f32.gmra.mxu2 %vm1145_vm2, %v12965_v63  ;;  %v15026_v23 = vld [vmem:[#allocation131_spill] sm:$0xff] }
 0x591   : > { %8916 = vmatmul.msk.f32.gmra.mxu0 %vm1145_vm2, %v6438_v52  ;;  %8885 = vmatmul.msk.f32.gmra.mxu3 %vm1145_vm2, %v12845_v19  ;;  %v4748_v52 = vadd.f32 %v15026_v23, %v4473_v22  ;;  %v6439_v19 = vld [vmem:[#allocation2 + $0x172] sm:$0xff] }
 0x593   : > { %v4945_v43 = vpop.f32.mrf.mxu2 }
 0x594   : > { %v12970_v7 = vpop.f32.mrf.mxu3  ;;  %v12979_v4 = vadd.f32 %v4945_v43, %v4748_v52  ;;  %v4200_v43 = vadd.f32 %v15029_v40, %v12348_v27  ;;  %v15031_v52 = vld [vmem:[#allocation87_spill] sm:$0xff]  ;;  %v15033_v27 = vld [vmem:[#allocation137_spill] sm:$0xff] }
 0x595   : > { %15022 = vst [vmem:[#allocation40_spill] sm:$0xff] %v12970_v7  ;;  %v12976_v36 = vpop.f32.mrf.mxu1  ;;  %v6701_v7 = vld [vmem:[#allocation2 + $0xae] sm:$0xff]  ;;  %v15035_v40 = vld [vmem:[#allocation139_spill] sm:$0xff] }
 0x596   : > { %v12974_v30 = vpop.f32.mrf.mxu0  ;;  %15025 = vst [vmem:[#allocation43_spill] sm:$0xff] %v12976_v36  ;;  %v4475_v20 = vadd.f32 %v15033_v27, %v4200_v43  ;;  %v13025_v43 = vld [vmem:[#allocation2 + $0x209] sm:$0xff] }
 0x597   : > { %15024 = vst [vmem:[#allocation8_spill] sm:$0xff] %v12974_v30 }
 0x598   : > { %8934 = vmatmul.msk.f32.gmra.mxu1 %vm1145_vm2, %v6700_v46  ;;  %8734 = vmatmul.msk.f32.gmra.mxu2 %vm1145_vm2, %v12985_v0 }
 0x599   : > { %8917 = vmatmul.msk.f32.gmra.mxu0 %vm1145_vm2, %v6439_v19  ;;  %8886 = vmatmul.msk.f32.gmra.mxu3 %vm1145_vm2, %v12865_v49  ;;  %v4749_v19 = vadd.f32 %v15031_v52, %v4474_v48  ;;  %v6440_v49 = vld [vmem:[#allocation2 + $0x18a] sm:$0xff] }
 0x59b   : > { %v4948_v30 = vpop.f32.mrf.mxu2 }
 0x59c   : > { %v12990_v22 = vpop.f32.mrf.mxu3  ;;  %v12999_v36 = vadd.f32 %v4948_v30, %v4749_v19  ;;  %v4201_v30 = vadd.f32 %v15035_v40, %v12369_v38  ;;  %v15037_v19 = vld [vmem:[#allocation67_spill] sm:$0xff]  ;;  %v15039_v38 = vld [vmem:[#allocation52_spill] sm:$0xff]  ;;  %v15041_v40 = vld [vmem:[#allocation138_spill] sm:$0xff] }
 0x59d   : > { %15028 = vst [vmem:[#allocation12_spill] sm:$0xff] %v12990_v22  ;;  %v12994_v23 = vpop.f32.mrf.mxu1  ;;  %v6702_v22 = vld [vmem:[#allocation2 + $0xc6] sm:$0xff] }
 0x59e   : > { %15030 = vst [vmem:[#allocation42_spill] sm:$0xff] %v12994_v23  ;;  %v12997_v46 = vpop.f32.mrf.mxu0  ;;  %v4476_v27 = vadd.f32 %v15039_v38, %v4201_v30  ;;  %v13043_v30 = vld [vmem:[#allocation2 + $0x211] sm:$0xff] }
 0x59f   : > { %15032 = vst [vmem:[#allocation62_spill] sm:$0xff] %v12997_v46  ;;  %v6441_v46 = vld [vmem:[#allocation2 + $0x192] sm:$0xff] }
 0x5a0   : > { %8935 = vmatmul.msk.f32.gmra.mxu1 %vm1145_vm2, %v6701_v7  ;;  %8735 = vmatmul.msk.f32.gmra.mxu2 %vm1145_vm2, %v13005_v8  ;;  %v15044_v38 = vld [vmem:[#allocation54_spill] sm:$0xff] }
 0x5a1   : > { %8918 = vmatmul.msk.f32.gmra.mxu0 %vm1145_vm2, %v6440_v49  ;;  %8887 = vmatmul.msk.f32.gmra.mxu3 %vm1145_vm2, %v12885_v44  ;;  %v4750_v49 = vadd.f32 %v15037_v19, %v4475_v20  ;;  %v4202_v19 = vadd.f32 %v15041_v40, %v12390_v15 }
 0x5a3   : > { %v4951_v7 = vpop.f32.mrf.mxu2  ;;  %v4477_v15 = vadd.f32 %v15044_v38, %v4202_v19  ;;  %v7006_v19 = vld [vmem:[%s14333_s3 + $0x158] sm:$0xff]  ;;  %v15050_v38 = vld [vmem:[#allocation144_spill] sm:$0xff] }
 0x5a4   : > { %v13010_v48 = vpop.f32.mrf.mxu3  ;;  %v13017_v44 = vadd.f32 %v4951_v7, %v4750_v49  ;;  %7117 = vmatpush.msra.mxu2 %v7006_v19 }
 0x5a5   : > { %15034 = vst [vmem:[#allocation118_spill] sm:$0xff] %v13010_v48  ;;  %v13014_v52 = vpop.f32.mrf.mxu1  ;;  %v6703_v48 = vld [vmem:[#allocation2 + $0xce] sm:$0xff] }
 0x5a6   : > { %15036 = vst [vmem:[#allocation13_spill] sm:$0xff] %v13014_v52  ;;  %v13019_v23 = vpop.f32.mrf.mxu0 }
 0x5a7   : > { %15038 = vst [vmem:[#allocation128_spill] sm:$0xff] %v13019_v23  ;;  %v6442_v23 = vld [vmem:[#allocation2 + $0x1aa] sm:$0xff] }
 0x5a8   : > { %8936 = vmatmul.msk.f32.gmra.mxu1 %vm1145_vm2, %v6702_v22  ;;  %8736 = vmatmul.msk.f32.gmra.mxu2 %vm1145_vm2, %v13025_v43 }
 0x5a9   : > { %8919 = vmatmul.msk.f32.gmra.mxu0 %vm1145_vm2, %v6441_v46  ;;  %8888 = vmatmul.msk.f32.gmra.mxu3 %vm1145_vm2, %v12905_v14  ;;  %v15043_v46 = vld [vmem:[#allocation142_spill] sm:$0xff] }
 0x5aa   : > { %v4751_v7 = vadd.f32 %v15043_v46, %v4476_v27  ;;  %v15047_v46 = vld [vmem:[#allocation106_spill] sm:$0xff] }
 0x5ab   : > { %v4954_v22 = vpop.f32.mrf.mxu2 }
 0x5ac   : > { %v13030_v20 = vpop.f32.mrf.mxu3  ;;  %v13037_v14 = vadd.f32 %v4954_v22, %v4751_v7  ;;  %v4203_v7 = vadd.f32 %v15047_v46, %v12417_v1  ;;  %v13066_v1 = vld [vmem:[#allocation2 + $0x229] sm:$0xff] }
 0x5ad   : > { %15040 = vst [vmem:[#allocation11_spill] sm:$0xff] %v13030_v20  ;;  %v13034_v49 = vpop.f32.mrf.mxu1 }
 0x5ae   : > { %15042 = vst [vmem:[#allocation77_spill] sm:$0xff] %v13034_v49  ;;  %v13046_v40 = vpop.f32.mrf.mxu0  ;;  %v6704_v49 = vld [vmem:[#allocation2 + $0xe6] sm:$0xff] }
 0x5af   : > { %15045 = vst [vmem:[#allocation15_spill] sm:$0xff] %v13046_v40 }
 0x5b0   : > { %8937 = vmatmul.msk.f32.gmra.mxu1 %vm1145_vm2, %v6703_v48  ;;  %8737 = vmatmul.msk.f32.gmra.mxu2 %vm1145_vm2, %v13043_v30  ;;  %v15049_v48 = vld [vmem:[#allocation95_spill] sm:$0xff] }
 0x5b1   : > { %8920 = vmatmul.msk.f32.gmra.mxu0 %vm1145_vm2, %v6442_v23  ;;  %8889 = vmatmul.msk.f32.gmra.mxu3 %vm1145_vm2, %v12925_v5  ;;  %v4752_v22 = vadd.f32 %v15049_v48, %v4477_v15  ;;  %v6443_v5 = vld [vmem:[#allocation2 + $0x1b2] sm:$0xff]  ;;  %v4478_v15 = vadd.f32 %v15050_v38, %v4203_v7  ;;  %v6444_v38 = vld [vmem:[#allocation2 + $0x1ca] sm:$0xff] }
 0x5b2   : > { %v15053_v48 = vld [vmem:[#allocation109_spill] sm:$0xff] }
 0x5b3   : > { %v4957_v20 = vpop.f32.mrf.mxu2 }
 0x5b4   : > { %v13050_v27 = vpop.f32.mrf.mxu3  ;;  %v13057_v52 = vadd.f32 %v4957_v20, %v4752_v22  ;;  %v7281_v20 = vld [vmem:[%s14333_s3 + $0x168] sm:$0xff] }
 0x5b5   : > { %15046 = vst [vmem:[#allocation46_spill] sm:$0xff] %v13050_v27  ;;  %v13054_v23 = vpop.f32.mrf.mxu1  ;;  %7392 = vmatpush.msra.mxu3 %v7281_v20  ;;  %v6705_v27 = vld [vmem:[#allocation2 + $0xee] sm:$0xff] }
 0x5b6   : > { %15048 = vst [vmem:[#allocation66_spill] sm:$0xff] %v13054_v23  ;;  %v13089_v20 = vld [vmem:[#allocation2 + $0x231] sm:$0xff] }
 0x5b8   : > { %8938 = vmatmul.msk.f32.gmra.mxu1 %vm1145_vm2, %v6704_v49  ;;  %8738 = vmatmul.msk.f32.gmra.mxu2 %vm1145_vm2, %v13066_v1  ;;  %v13074_v49 = vpop.f32.mrf.mxu0 }
 0x5b9   : > { %8921 = vmatmul.msk.f32.gmra.mxu0 %vm1145_vm2, %v6443_v5  ;;  %8890 = vmatmul.msk.f32.gmra.mxu3 %vm1145_vm2, %v12945_v18  ;;  %15051 = vst [vmem:[#allocation78_spill] sm:$0xff] %v13074_v49  ;;  %v4204_v18 = vadd.f32 %v15053_v48, %v12444_v17  ;;  %v15055_v5 = vld [vmem:[#allocation96_spill] sm:$0xff]  ;;  %v6445_v49 = vld [vmem:[#allocation2 + $0x1d2] sm:$0xff] }
 0x5ba   : > { %v4753_v7 = vadd.f32 %v15055_v5, %v4478_v15  ;;  %v7556_v15 = vld [vmem:[%s14333_s3 + $0x178] sm:$0xff]  ;;  %v7831_v48 = vld [vmem:[%s14333_s3 + $0x188] sm:$0xff] }
 0x5bb   : > { %v4960_v19 = vpop.f32.mrf.mxu2  ;;  %7667 = vmatpush.msra.mxu0 %v7556_v15  ;;  %7942 = vmatpush.msra.mxu1 %v7831_v48 }
 0x5bc   : > { %v13076_v46 = vpop.f32.mrf.mxu3  ;;  %v13083_v40 = vadd.f32 %v4960_v19, %v4753_v7 }
 0x5bd   : > { %15052 = vst [vmem:[#allocation16_spill] sm:$0xff] %v13076_v46  ;;  %v13080_v22 = vpop.f32.mrf.mxu1  ;;  %v15056_v46 = vld [vmem:[#allocation35_spill] sm:$0xff] }
 0x5be   : > { %15054 = vst [vmem:[#allocation133_spill] sm:$0xff] %v13080_v22  ;;  %v4479_v17 = vadd.f32 %v15056_v46, %v4204_v18  ;;  %v15060_v46 = vld [vmem:[#allocation79_spill] sm:$0xff] }
 0x5bf   : > { %v6706_v22 = vld [vmem:[#allocation2 + $0x106] sm:$0xff] }
 0x5c0   : > { %8939 = vmatmul.msk.f32.gmra.mxu1 %vm1145_vm2, %v6705_v27  ;;  %8739 = vmatmul.msk.f32.gmra.mxu2 %vm1145_vm2, %v13089_v20  ;;  %v15057_v27 = vld [vmem:[#allocation64_spill] sm:$0xff]  ;;  %v4754_v18 = vadd.f32 %v15060_v46, %v4479_v17  ;;  %v13107_v19 = vpop.f32.mrf.mxu0  ;;  %v15063_v17 = vld [vmem:[#allocation65_spill] sm:$0xff] }
 0x5c1   : > { %8922 = vmatmul.msk.f32.gmra.mxu0 %vm1145_vm2, %v6444_v38  ;;  %8891 = vmatmul.msk.f32.gmra.mxu3 %vm1145_vm2, %v12965_v63  ;;  %v4205_v5 = vadd.f32 %v15057_v27, %v12462_v2  ;;  %15061 = vst [vmem:[#allocation18_spill] sm:$0xff] %v13107_v19  ;;  %v5872_v2 = vld [vmem:[#allocation2 + $0x68] sm:$0xff]  ;;  %v4206_v48 = vadd.f32 %v15063_v17, %v12480_v33  ;;  %v15064_v19 = vld [vmem:[#allocation101_spill] sm:$0xff] }
 0x5c2   : > { %v15062_v27 = vld [vmem:[#allocation112_spill] sm:$0xff]  ;;  %v5873_v33 = vld [vmem:[#allocation2 + $0x70] sm:$0xff] }
 0x5c3   : > { %v4963_v38 = vpop.f32.mrf.mxu2 }
 0x5c4   : > { %v13102_v63 = vpop.f32.mrf.mxu3  ;;  %v13109_v15 = vadd.f32 %v4963_v38, %v4754_v18 }
 0x5c5   : > { %15058 = vst [vmem:[#allocation14_spill] sm:$0xff] %v13102_v63  ;;  %v13104_v7 = vpop.f32.mrf.mxu1  ;;  %v4480_v63 = vadd.f32 %v15062_v27, %v4205_v5  ;;  %v15067_v5 = vld [vmem:[#allocation68_spill] sm:$0xff] }
 0x5c6   : > { %15059 = vst [vmem:[#allocation55_spill] sm:$0xff] %v13104_v7 }
 0x5c7   : > { %v4755_v18 = vadd.f32 %v15064_v19, %v4480_v63  ;;  %v15068_v63 = vld [vmem:[#allocation157_spill] sm:$0xff] }
 0x5c8   : > { %8940 = vmatmul.msk.f32.gmra.mxu1 %vm1145_vm2, %v6706_v22  ;;  %8836 = vmatmul.msk.f32.vlgmr.msrb.gmra.mxu2 %vm1145_vm2, %v5872_v2  ;;  %v6707_v22 = vld [vmem:[#allocation2 + $0x10e] sm:$0xff]  ;;  %v4481_v2 = vadd.f32 %v15067_v5, %v4206_v48  ;;  %v4207_v19 = vadd.f32 %v15068_v63, %v12501_v58 }
 0x5c9   : > { %8923 = vmatmul.msk.f32.gmra.mxu0 %vm1145_vm2, %v6445_v49  ;;  %8892 = vmatmul.msk.f32.gmra.mxu3 %vm1145_vm2, %v12985_v0  ;;  %v6446_v49 = vld [vmem:[#allocation2 + $0x1ea] sm:$0xff]  ;;  %v13126_v0 = vpop.f32.mrf.mxu0 }
 0x5ca   : > { %15066 = vst [vmem:[#allocation70_spill] sm:$0xff] %v13126_v0  ;;  %v4756_v17 = vadd.f32 %v12283_v37, %v4481_v2  ;;  %v13147_v48 = vld [vmem:[#allocation2 + $0x88] sm:$0xff]  ;;  %v15070_v58 = vld [vmem:[#allocation69_spill] sm:$0xff]  ;;  %v15072_v37 = vld [vmem:[#allocation47_spill] sm:$0xff] }
 0x5cb   : > { %v4966_v38 = vpop.f32.mrf.mxu2  ;;  %v4208_v5 = vadd.f32 %v15072_v37, %v12521_v54  ;;  %v6721_v0 = vld [vmem:[#allocation2 + $0x1ee] sm:$0xff] }
 0x5cc   : > { %v13122_v7 = vpop.f32.mrf.mxu3  ;;  %v13124_v23 = vadd.f32 %v4966_v38, %v4755_v18  ;;  %v6447_v38 = vld [vmem:[#allocation2 + $0x1f2] sm:$0xff] }
 0x5cd   : > { %v13119_v46 = vpop.f32.mrf.mxu1  ;;  %15065 = vst [vmem:[#allocation50_spill] sm:$0xff] %v13122_v7 }
 0x5d0   : > { %8941 = vmatmul.msk.f32.gmra.mxu1 %vm1145_vm2, %v6707_v22  ;;  %8837 = vmatmul.msk.f32.gmra.mxu2 %vm1145_vm2, %v5873_v33  ;;  %v4482_v22 = vadd.f32 %v15070_v58, %v4207_v19  ;;  %v13165_v19 = vld [vmem:[#allocation2 + $0x90] sm:$0xff] }
 0x5d1   : > { %8924 = vmatmul.msk.f32.gmra.mxu0 %vm1145_vm2, %v6446_v49  ;;  %8893 = vmatmul.msk.f32.gmra.mxu3 %vm1145_vm2, %v13005_v8  ;;  %v6708_v49 = vld [vmem:[#allocation2 + $0x126] sm:$0xff]  ;;  %v13150_v33 = vpop.f32.mrf.mxu0 }
 0x5d2   : > { %15071 = vst [vmem:[#allocation103_spill] sm:$0xff] %v13150_v33  ;;  %v4757_v63 = vadd.f32 %v12303_v45, %v4482_v22  ;;  %v15076_v22 = vld [vmem:[#allocation121_spill] sm:$0xff] }
 0x5d3   : > { %v4969_v18 = vpop.f32.mrf.mxu2  ;;  %v4209_v37 = vadd.f32 %v15076_v22, %v12547_v41  ;;  %v13188_v41 = vld [vmem:[#allocation2 + $0xa8] sm:$0xff] }
 0x5d4   : > { %v13139_v7 = vadd.f32 %v4969_v18, %v4756_v17  ;;  %v13143_v8 = vpop.f32.mrf.mxu3  ;;  %v6448_v18 = vld [vmem:[#allocation2 + $0x20a] sm:$0xff] }
 0x5d5   : > { %v13136_v27 = vpop.f32.mrf.mxu1  ;;  %15069 = vst [vmem:[#allocation19_spill] sm:$0xff] %v13143_v8 }
 0x5d8   : > { %8942 = vmatmul.msk.f32.gmra.mxu1 %vm1145_vm2, %v6708_v49  ;;  %8838 = vmatmul.msk.f32.gmra.mxu2 %vm1145_vm2, %v13147_v48  ;;  %v15073_v49 = vld [vmem:[#allocation161_spill] sm:$0xff] }
 0x5d9   : > { %8925 = vmatmul.msk.f32.gmra.mxu0 %vm1145_vm2, %v6447_v38  ;;  %8894 = vmatmul.msk.f32.gmra.mxu3 %vm1145_vm2, %v13025_v43  ;;  %v6709_v38 = vld [vmem:[#allocation2 + $0x12e] sm:$0xff]  ;;  %v4483_v54 = vadd.f32 %v15073_v49, %v4208_v5  ;;  %v13172_v58 = vpop.f32.mrf.mxu0  ;;  %v7280_v5 = vld [vmem:[%s14333_s3 + $0x160] sm:$0xff]  ;;  %v15077_v49 = vld [vmem:[#allocation162_spill] sm:$0xff] }
 0x5da   : > { %15075 = vst [vmem:[#allocation21_spill] sm:$0xff] %v13172_v58  ;;  %7393 = vmatpush.msra.mxu3 %v7280_v5 }
 0x5db   : > { %v4972_v17 = vpop.f32.mrf.mxu2 }
 0x5dc   : > { %v13159_v43 = vadd.f32 %v4972_v17, %v4757_v63  ;;  %v13170_v45 = vpop.f32.mrf.mxu3  ;;  %v4758_v17 = vadd.f32 %v12324_v60, %v4483_v54  ;;  %v4484_v60 = vadd.f32 %v15077_v49, %v4209_v37  ;;  %v15078_v54 = vld [vmem:[#allocation80_spill] sm:$0xff] }
 0x5dd   : > { %v13156_v2 = vpop.f32.mrf.mxu1  ;;  %15074 = vst [vmem:[#allocation17_spill] sm:$0xff] %v13170_v45  ;;  %v4210_v22 = vadd.f32 %v15078_v54, %v12568_v32  ;;  %v6711_v49 = vld [vmem:[#allocation2 + $0x14e] sm:$0xff] }
 0x5de   : > { %v15081_v32 = vld [vmem:[#allocation124_spill] sm:$0xff] }
 0x5df   : > { %v4485_v5 = vadd.f32 %v15081_v32, %v4210_v22  ;;  %v15085_v22 = vld [vmem:[#allocation81_spill] sm:$0xff]  ;;  %v15086_v32 = vld [vmem:[#allocation127_spill] sm:$0xff] }
 0x5e0   : > { %8943 = vmatmul.msk.f32.gmra.mxu1 %vm1145_vm2, %v6709_v38  ;;  %8839 = vmatmul.msk.f32.gmra.mxu2 %vm1145_vm2, %v13165_v19  ;;  %v6710_v38 = vld [vmem:[#allocation2 + $0x146] sm:$0xff] }
 0x5e1   : > { %8926 = vmatmul.msk.f32.gmra.mxu0 %vm1145_vm2, %v6448_v18  ;;  %8895 = vmatmul.msk.f32.gmra.mxu3 %vm1145_vm2, %v13043_v30  ;;  %v6449_v30 = vld [vmem:[#allocation2 + $0x212] sm:$0xff] }
 0x5e3   : > { %v4975_v18 = vpop.f32.mrf.mxu2 }
 0x5e4   : > { %v13179_v8 = vadd.f32 %v4975_v18, %v4758_v17  ;;  %v13195_v17 = vpop.f32.mrf.mxu3 }
 0x5e5   : > { %v13176_v63 = vpop.f32.mrf.mxu1  ;;  %15079 = vst [vmem:[#allocation143_spill] sm:$0xff] %v13195_v17  ;;  %v6712_v17 = vld [vmem:[#allocation2 + $0x166] sm:$0xff] }
 0x5e8   : > { %8944 = vmatmul.msk.f32.gmra.mxu1 %vm1145_vm2, %v6710_v38  ;;  %8840 = vmatmul.msk.f32.gmra.mxu2 %vm1145_vm2, %v13188_v41  ;;  %v13203_v38 = vpop.f32.mrf.mxu0 }
 0x5e9   : > { %8927 = vmatmul.msk.f32.gmra.mxu0 %vm1145_vm2, %v6449_v30  ;;  %8896 = vmatmul.msk.f32.gmra.mxu3 %vm1145_vm2, %v13066_v1  ;;  %v4759_v30 = vadd.f32 %v12345_v62, %v4484_v60  ;;  %v7555_v1 = vld [vmem:[%s14333_s3 + $0x170] sm:$0xff]  ;;  %15080 = vst [vmem:[#allocation74_spill] sm:$0xff] %v13203_v38  ;;  %v15082_v60 = vld [vmem:[#allocation170_spill] sm:$0xff] }
 0x5ea   : > { %7668 = vmatpush.msra.mxu0 %v7555_v1  ;;  %v13212_v62 = vld [vmem:[#allocation2 + $0xb0] sm:$0xff]  ;;  %v4211_v54 = vadd.f32 %v15082_v60, %v12591_v13  ;;  %v4760_v1 = vadd.f32 %v12366_v53, %v4485_v5  ;;  %v13232_v13 = vld [vmem:[#allocation2 + $0xc8] sm:$0xff]  ;;  %v4212_v5 = vadd.f32 %v15086_v32, %v12613_v3  ;;  %v15088_v3 = vld [vmem:[#allocation59_spill] sm:$0xff] }
 0x5eb   : > { %v4978_v37 = vpop.f32.mrf.mxu2 }
 0x5ec   : > { %v13205_v45 = vadd.f32 %v4978_v37, %v4759_v30  ;;  %v4486_v53 = vadd.f32 %v15085_v22, %v4211_v54  ;;  %v4487_v22 = vadd.f32 %v15088_v3, %v4212_v5  ;;  %v13267_v5 = vld [vmem:[#allocation2 + $0xe8] sm:$0xff]  ;;  %v15091_v3 = vld [vmem:[#allocation86_spill] sm:$0xff] }
 0x5ed   : > { %v13197_v18 = vpop.f32.mrf.mxu1 }
 0x5f0   : > { %8945 = vmatmul.msk.f32.gmra.mxu1 %vm1145_vm2, %v6711_v49  ;;  %8841 = vmatmul.msk.f32.gmra.mxu2 %vm1145_vm2, %v13212_v62  ;;  %v13222_v49 = vpop.f32.mrf.mxu3  ;;  %v13226_v38 = vpop.f32.mrf.mxu0 }
 0x5f1   : > { %8928 = vmatmul.msk.f32.gmra.mxu0 %vm1145_vm2, %v12572_v56  ;;  %8897 = vmatmul.msk.f32.gmra.mxu3 %vm1145_vm2, %v13089_v20  ;;  %v6177_v56 = vld [vmem:[#allocation2 + $0x249] sm:$0xff]  ;;  %15083 = vst [vmem:[#allocation22_spill] sm:$0xff] %v13222_v49 }
 0x5f2   : > { %15084 = vst [vmem:[#allocation58_spill] sm:$0xff] %v13226_v38 }
 0x5f3   : > { %v4981_v37 = vpop.f32.mrf.mxu2 }
 0x5f4   : > { %v13224_v20 = vadd.f32 %v4981_v37, %v4760_v1  ;;  %v6452_v1 = vld [vmem:[#allocation2 + $0x24a] sm:$0xff]  ;;  %v4761_v37 = vadd.f32 %v12387_v35, %v4486_v53 }
 0x5f5   : > { %v13219_v30 = vpop.f32.mrf.mxu1  ;;  %v15090_v35 = vld [vmem:[#allocation84_spill] sm:$0xff] }
 0x5f8   : > { %8946 = vmatmul.msk.f32.gmra.mxu1 %vm1145_vm2, %v6712_v17  ;;  %8842 = vmatmul.msk.f32.gmra.mxu2 %vm1145_vm2, %v13232_v13  ;;  %v6713_v17 = vld [vmem:[#allocation2 + $0x16e] sm:$0xff]  ;;  %v13246_v54 = vpop.f32.mrf.mxu3  ;;  %v13252_v32 = vpop.f32.mrf.mxu0 }
 0x5f9   : > { %8929 = vmatmul.msk.f32.gmra.mxu0 %vm1145_vm2, %v12594_v42  ;;  %8898 = vmatmul.msk.f32.gmra.mxu3 %vm1145_vm2, %v6177_v56  ;;  %v6178_v42 = vld [vmem:[#allocation2 + $0x251] sm:$0xff]  ;;  %15087 = vst [vmem:[#allocation20_spill] sm:$0xff] %v13246_v54  ;;  %v6714_v54 = vld [vmem:[#allocation2 + $0x186] sm:$0xff] }
 0x5fa   : > { %v13249_v56 = vld [vmem:[#allocation2 + $0xd0] sm:$0xff]  ;;  %15089 = vst [vmem:[#allocation23_spill] sm:$0xff] %v13252_v32 }
 0x5fb   : > { %v4984_v49 = vpop.f32.mrf.mxu2  ;;  %v6715_v32 = vld [vmem:[#allocation2 + $0x18e] sm:$0xff] }
 0x5fc   : > { %v13242_v38 = vadd.f32 %v4984_v49, %v4761_v37  ;;  %v4213_v49 = vadd.f32 %v15090_v35, %v12633_v57  ;;  %v4762_v37 = vadd.f32 %v12414_v12, %v4487_v22  ;;  %v15094_v22 = vld [vmem:[#allocation63_spill] sm:$0xff] }
 0x5fd   : > { %v13239_v60 = vpop.f32.mrf.mxu1 }
 0x5fe   : > { %v4488_v57 = vadd.f32 %v15091_v3, %v4213_v49  ;;  %v13287_v49 = vld [vmem:[#allocation2 + $0xf0] sm:$0xff]  ;;  %v15095_v3 = vld [vmem:[#allocation178_spill] sm:$0xff] }
 0x600   : > { %8947 = vmatmul.msk.f32.gmra.mxu1 %vm1145_vm2, %v6713_v17  ;;  %8843 = vmatmul.msk.f32.gmra.mxu2 %vm1145_vm2, %v13249_v56  ;;  %v13272_v35 = vpop.f32.mrf.mxu3  ;;  %v13274_v12 = vpop.f32.mrf.mxu0 }
 0x601   : > { %8930 = vmatmul.msk.f32.gmra.mxu0 %vm1145_vm2, %v6452_v1  ;;  %8899 = vmatmul.msk.f32.gmra.mxu3 %vm1145_vm2, %v6178_v42  ;;  %v6453_v1 = vld [vmem:[#allocation2 + $0x252] sm:$0xff]  ;;  %15092 = vst [vmem:[#allocation61_spill] sm:$0xff] %v13272_v35  ;;  %v6716_v35 = vld [vmem:[#allocation2 + $0x1a6] sm:$0xff] }
 0x602   : > { %15093 = vst [vmem:[#allocation25_spill] sm:$0xff] %v13274_v12 }
 0x603   : > { %v4987_v17 = vpop.f32.mrf.mxu2 }
 0x604   : > { %v13261_v42 = vadd.f32 %v4987_v17, %v4762_v37  ;;  %v4214_v37 = vadd.f32 %v15094_v22, %v12653_v11 }
 0x605   : > { %v13258_v53 = vpop.f32.mrf.mxu1 }
 0x606   : > { %v4489_v11 = vadd.f32 %v15095_v3, %v4214_v37  ;;  %v15099_v37 = vld [vmem:[#allocation136_spill] sm:$0xff] }
 0x608   : > { %8948 = vmatmul.msk.f32.gmra.mxu1 %vm1145_vm2, %v6714_v54  ;;  %8844 = vmatmul.msk.f32.gmra.mxu2 %vm1145_vm2, %v13267_v5  ;;  %v4763_v54 = vadd.f32 %v12441_v25, %v4488_v57  ;;  %v15096_v25 = vld [vmem:[#allocation89_spill] sm:$0xff]  ;;  %v13294_v22 = vpop.f32.mrf.mxu3 }
 0x609   : > { %8931 = vmatmul.msk.f32.gmra.mxu0 %vm1145_vm2, %v6453_v1  ;;  %8996 = vmatmul.msk.f32.vlgmr.msra.gmra.mxu3 %vm1145_vm2, %v13147_v48  ;;  %v7523_v48 = vld [vmem:[#allocation2 + $0x89] sm:$0xff]  ;;  %v4215_v57 = vadd.f32 %v15096_v25, %v12673_v51  ;;  %15097 = vst [vmem:[#allocation24_spill] sm:$0xff] %v13294_v22 }
 0x60a   : > { %v13307_v51 = vld [vmem:[#allocation2 + $0x108] sm:$0xff] }
 0x60b   : > { %v4990_v17 = vpop.f32.mrf.mxu2  ;;  %v4490_v3 = vadd.f32 %v15099_v37, %v4215_v57  ;;  %v6717_v22 = vld [vmem:[#allocation2 + $0x1ae] sm:$0xff]  ;;  %v15104_v37 = vld [vmem:[#allocation71_spill] sm:$0xff] }
 0x60c   : > { %v13281_v58 = vadd.f32 %v4990_v17, %v4763_v54  ;;  %v4764_v17 = vadd.f32 %v12459_v55, %v4489_v11  ;;  %v15100_v55 = vld [vmem:[#allocation90_spill] sm:$0xff]  ;;  %v15103_v57 = vld [vmem:[#allocation92_spill] sm:$0xff] }
 0x60d   : > { %v13278_v1 = vpop.f32.mrf.mxu1  ;;  %v4216_v11 = vadd.f32 %v15100_v55, %v12693_v31  ;;  %v13327_v31 = vld [vmem:[#allocation2 + $0x110] sm:$0xff] }
 0x610   : > { %8949 = vmatmul.msk.f32.gmra.mxu1 %vm1145_vm2, %v6715_v32  ;;  %8845 = vmatmul.msk.f32.gmra.mxu2 %vm1145_vm2, %v13287_v49  ;;  %v13299_v32 = vpop.f32.mrf.mxu0 }
 0x611   : > { %9028 = vmatmul.msk.f32.vlgmr.msra.gmra.mxu0 %vm1145_vm2, %v7523_v48  ;;  %8997 = vmatmul.msk.f32.gmra.mxu3 %vm1145_vm2, %v13165_v19  ;;  %15098 = vst [vmem:[#allocation39_spill] sm:$0xff] %v13299_v32  ;;  %v7524_v19 = vld [vmem:[#allocation2 + $0x91] sm:$0xff] }
 0x613   : > { %v4993_v48 = vpop.f32.mrf.mxu2 }
 0x614   : > { %v13301_v12 = vadd.f32 %v4993_v48, %v4764_v17  ;;  %v4765_v17 = vadd.f32 %v12477_v10, %v4490_v3  ;;  %v4491_v10 = vadd.f32 %v15103_v57, %v4216_v11  ;;  %v4217_v3 = vadd.f32 %v15104_v37, %v12713_v28  ;;  %v13345_v11 = vld [vmem:[#allocation2 + $0x128] sm:$0xff]  ;;  %v15106_v28 = vld [vmem:[#allocation93_spill] sm:$0xff] }
 0x615   : > { %v13296_v54 = vpop.f32.mrf.mxu1 }
 0x616   : > { %v4492_v57 = vadd.f32 %v15106_v28, %v4217_v3  ;;  %v13363_v3 = vld [vmem:[#allocation2 + $0x130] sm:$0xff]  ;;  %v15110_v28 = vld [vmem:[#allocation75_spill] sm:$0xff] }
 0x618   : > { %8950 = vmatmul.msk.f32.gmra.mxu1 %vm1145_vm2, %v6716_v35  ;;  %8846 = vmatmul.msk.f32.gmra.mxu2 %vm1145_vm2, %v13307_v51  ;;  %v7525_v35 = vld [vmem:[#allocation2 + $0xa9] sm:$0xff]  ;;  %v13321_v32 = vpop.f32.mrf.mxu0 }
 0x619   : > { %9029 = vmatmul.msk.f32.gmra.mxu0 %vm1145_vm2, %v7524_v19  ;;  %8998 = vmatmul.msk.f32.gmra.mxu3 %vm1145_vm2, %v13188_v41  ;;  %v13317_v19 = vpop.f32.mrf.mxu3  ;;  %15102 = vst [vmem:[#allocation28_spill] sm:$0xff] %v13321_v32  ;;  %v6719_v32 = vld [vmem:[#allocation2 + $0x1ce] sm:$0xff] }
 0x61a   : > { %15101 = vst [vmem:[#allocation26_spill] sm:$0xff] %v13317_v19 }
 0x61b   : > { %v4996_v48 = vpop.f32.mrf.mxu2 }
 0x61c   : > { %v13319_v41 = vadd.f32 %v4996_v48, %v4765_v17  ;;  %v4766_v17 = vadd.f32 %v12498_v39, %v4491_v10  ;;  %v15108_v39 = vld [vmem:[#allocation147_spill] sm:$0xff] }
 0x61d   : > { %v13314_v25 = vpop.f32.mrf.mxu1  ;;  %v4218_v10 = vadd.f32 %v15108_v39, %v12736_v9 }
 0x61f   : > { %v4493_v9 = vadd.f32 %v15110_v28, %v4218_v10  ;;  %v7528_v10 = vld [vmem:[#allocation2 + $0xd1] sm:$0xff]  ;;  %v6720_v28 = vld [vmem:[#allocation2 + $0x1e6] sm:$0xff] }
 0x620   : > { %8951 = vmatmul.msk.f32.gmra.mxu1 %vm1145_vm2, %v6717_v22  ;;  %8847 = vmatmul.msk.f32.gmra.mxu2 %vm1145_vm2, %v13327_v31  ;;  %v6718_v22 = vld [vmem:[#allocation2 + $0x1c6] sm:$0xff]  ;;  %v13348_v37 = vpop.f32.mrf.mxu0 }
 0x621   : > { %9030 = vmatmul.msk.f32.gmra.mxu0 %vm1145_vm2, %v7525_v35  ;;  %8999 = vmatmul.msk.f32.gmra.mxu3 %vm1145_vm2, %v13212_v62  ;;  %v7526_v35 = vld [vmem:[#allocation2 + $0xb1] sm:$0xff]  ;;  %v13341_v62 = vpop.f32.mrf.mxu3  ;;  %15107 = vst [vmem:[#allocation27_spill] sm:$0xff] %v13348_v37 }
 0x622   : > { %15105 = vst [vmem:[#allocation115_spill] sm:$0xff] %v13341_v62  ;;  %v7527_v62 = vld [vmem:[#allocation2 + $0xc9] sm:$0xff] }
 0x623   : > { %v4999_v48 = vpop.f32.mrf.mxu2 }
 0x624   : > { %v13337_v19 = vadd.f32 %v4999_v48, %v4766_v17  ;;  %v15109_v48 = vld [vmem:[#allocation117_spill] sm:$0xff] }
 0x625   : > { %v13334_v55 = vpop.f32.mrf.mxu1 }
 0x628   : > { %8952 = vmatmul.msk.f32.gmra.mxu1 %vm1145_vm2, %v6718_v22  ;;  %8848 = vmatmul.msk.f32.gmra.mxu2 %vm1145_vm2, %v13345_v11  ;;  %v13370_v39 = vpop.f32.mrf.mxu0 }
 0x629   : > { %9031 = vmatmul.msk.f32.gmra.mxu0 %vm1145_vm2, %v7526_v35  ;;  %9000 = vmatmul.msk.f32.gmra.mxu3 %vm1145_vm2, %v13232_v13  ;;  %v4767_v35 = vadd.f32 %v15109_v48, %v4492_v57  ;;  %v13368_v57 = vpop.f32.mrf.mxu3  ;;  %15112 = vst [vmem:[#allocation72_spill] sm:$0xff] %v13370_v39  ;;  %v15113_v48 = vld [vmem:[#allocation98_spill] sm:$0xff] }
 0x62a   : > { %15111 = vst [vmem:[#allocation30_spill] sm:$0xff] %v13368_v57 }
 0x62b   : > { %v5002_v22 = vpop.f32.mrf.mxu2 }
 0x62c   : > { %v13357_v13 = vadd.f32 %v5002_v22, %v4767_v35  ;;  %v4219_v35 = vadd.f32 %v15113_v48, %v12756_v61  ;;  %v13386_v61 = vld [vmem:[#allocation2 + $0x148] sm:$0xff] }
 0x62d   : > { %v13354_v17 = vpop.f32.mrf.mxu1 }
 0x630   : > { %8953 = vmatmul.msk.f32.gmra.mxu1 %vm1145_vm2, %v6719_v32  ;;  %8849 = vmatmul.msk.f32.gmra.mxu2 %vm1145_vm2, %v13363_v3  ;;  %v15115_v32 = vld [vmem:[#allocation120_spill] sm:$0xff] }
 0x631   : > { %9032 = vmatmul.msk.f32.gmra.mxu0 %vm1145_vm2, %v7527_v62  ;;  %9001 = vmatmul.msk.f32.gmra.mxu3 %vm1145_vm2, %v13249_v56  ;;  %v4768_v22 = vadd.f32 %v15115_v32, %v4493_v9  ;;  %v7005_v56 = vld [vmem:[%s14333_s3 + $0x150] sm:$0xff]  ;;  %v15116_v9 = vld [vmem:[#allocation150_spill] sm:$0xff]  ;;  %v13393_v57 = vpop.f32.mrf.mxu3 }
 0x632   : > { %7118 = vmatpush.msra.mxu2 %v7005_v56  ;;  %v4494_v48 = vadd.f32 %v15116_v9, %v4219_v35  ;;  %v15117_v32 = vld [vmem:[#allocation190_spill] sm:$0xff]  ;;  %15118 = vst [vmem:[#allocation33_spill] sm:$0xff] %v13393_v57  ;;  %v15122_v35 = vld [vmem:[#allocation99_spill] sm:$0xff] }
 0x633   : > { %v5005_v37 = vpop.f32.mrf.mxu2  ;;  %v4220_v56 = vadd.f32 %v15117_v32, %v12779_v6  ;;  %v13406_v6 = vld [vmem:[#allocation2 + $0x150] sm:$0xff] }
 0x634   : > { %v13380_v33 = vadd.f32 %v5005_v37, %v4768_v22  ;;  %v15120_v22 = vld [vmem:[#allocation123_spill] sm:$0xff]  ;;  %v7530_v57 = vld [vmem:[#allocation2 + $0xf1] sm:$0xff] }
 0x635   : > { %v13374_v62 = vpop.f32.mrf.mxu1  ;;  %v4495_v9 = vadd.f32 %v15122_v35, %v4220_v56  ;;  %v6722_v56 = vld [vmem:[#allocation2 + $0x206] sm:$0xff] }
 0x636   : > { %15114 = vst [vmem:[#allocation31_spill] sm:$0xff] %v13374_v62 }
 0x638   : > { %8954 = vmatmul.msk.f32.gmra.mxu1 %vm1145_vm2, %v6720_v28  ;;  %8850 = vmatmul.msk.f32.gmra.mxu2 %vm1145_vm2, %v13386_v61  ;;  %v13398_v28 = vpop.f32.mrf.mxu0 }
 0x639   : > { %9033 = vmatmul.msk.f32.gmra.mxu0 %vm1145_vm2, %v7528_v10  ;;  %9002 = vmatmul.msk.f32.gmra.mxu3 %vm1145_vm2, %v13267_v5  ;;  %v4769_v10 = vadd.f32 %v15120_v22, %v4494_v48  ;;  %15121 = vst [vmem:[#allocation34_spill] sm:$0xff] %v13398_v28  ;;  %v7529_v5 = vld [vmem:[#allocation2 + $0xe9] sm:$0xff]  ;;  %v7830_v48 = vld [vmem:[%s14333_s3 + $0x180] sm:$0xff] }
 0x63a   : > { %7943 = vmatpush.msra.mxu1 %v7830_v48 }
 0x63b   : > { %v5008_v39 = vpop.f32.mrf.mxu2 }
 0x63c   : > { %v13400_v62 = vadd.f32 %v5008_v39, %v4769_v10  ;;  %v15123_v39 = vld [vmem:[#allocation153_spill] sm:$0xff] }
 0x63d   : > { %v13395_v37 = vpop.f32.mrf.mxu1  ;;  %v5289_v32 = vadd.f32 %v15123_v39, %v12799_v50  ;;  %v13429_v50 = vld [vmem:[#allocation2 + $0x168] sm:$0xff]  ;;  %v15129_v39 = vld [vmem:[#allocation194_spill] sm:$0xff] }
 0x63e   : > { %15119 = vst [vmem:[#allocation73_spill] sm:$0xff] %v13395_v37 }
 0x640   : > { %8955 = vmatmul.msk.f32.gmra.mxu1 %vm1145_vm2, %v6721_v0  ;;  %8851 = vmatmul.msk.f32.gmra.mxu2 %vm1145_vm2, %v13406_v6  ;;  %v15125_v0 = vld [vmem:[#allocation126_spill] sm:$0xff]  ;;  %v13423_v28 = vpop.f32.mrf.mxu0 }
 0x641   : > { %9034 = vmatmul.msk.f32.gmra.mxu0 %vm1145_vm2, %v7529_v5  ;;  %9003 = vmatmul.msk.f32.gmra.mxu3 %vm1145_vm2, %v13287_v49  ;;  %v4770_v10 = vadd.f32 %v15125_v0, %v4495_v9  ;;  %v13419_v5 = vpop.f32.mrf.mxu3  ;;  %15127 = vst [vmem:[#allocation38_spill] sm:$0xff] %v13423_v28  ;;  %v15128_v9 = vld [vmem:[#allocation82_spill] sm:$0xff]  ;;  %v5290_v0 = vadd.f32 %v15129_v39, %v12819_v47  ;;  %v7531_v28 = vld [vmem:[#allocation2 + $0x109] sm:$0xff] }
 0x642   : > { %15126 = vst [vmem:[#allocation51_spill] sm:$0xff] %v13419_v5  ;;  %v5565_v48 = vadd.f32 %v15128_v9, %v5289_v32  ;;  %v13447_v32 = vld [vmem:[#allocation2 + $0x170] sm:$0xff]  ;;  %v15133_v47 = vld [vmem:[#allocation102_spill] sm:$0xff] }
 0x643   : > { %v5011_v49 = vpop.f32.mrf.mxu2  ;;  %v5566_v9 = vadd.f32 %v15133_v47, %v5290_v0  ;;  %v13465_v0 = vld [vmem:[#allocation2 + $0x188] sm:$0xff] }
 0x644   : > { %v13421_v35 = vadd.f32 %v5011_v49, %v4770_v10  ;;  %v15131_v49 = vld [vmem:[#allocation130_spill] sm:$0xff]  ;;  %v15138_v47 = vld [vmem:[#allocation156_spill] sm:$0xff] }
 0x645   : > { %v13416_v22 = vpop.f32.mrf.mxu1  ;;  %v5840_v5 = vadd.f32 %v15131_v49, %v5565_v48  ;;  %v15137_v49 = vld [vmem:[#allocation135_spill] sm:$0xff] }
 0x646   : > { %15124 = vst [vmem:[#allocation37_spill] sm:$0xff] %v13416_v22 }
 0x648   : > { %8956 = vmatmul.msk.f32.gmra.mxu1 %vm1145_vm2, %v6722_v56  ;;  %8852 = vmatmul.msk.f32.gmra.mxu2 %vm1145_vm2, %v13429_v50  ;;  %v6723_v56 = vld [vmem:[#allocation2 + $0x20e] sm:$0xff]  ;;  %v13450_v39 = vpop.f32.mrf.mxu0 }
 0x649   : > { %9035 = vmatmul.msk.f32.gmra.mxu0 %vm1145_vm2, %v7530_v57  ;;  %9004 = vmatmul.msk.f32.gmra.mxu3 %vm1145_vm2, %v13307_v51  ;;  %v13443_v51 = vpop.f32.mrf.mxu3  ;;  %15134 = vst [vmem:[#allocation41_spill] sm:$0xff] %v13450_v39 }
 0x64a   : > { %15132 = vst [vmem:[#allocation166_spill] sm:$0xff] %v13443_v51  ;;  %v7532_v51 = vld [vmem:[#allocation2 + $0x111] sm:$0xff] }
 0x64b   : > { %v6019_v57 = vpop.f32.mrf.mxu2 }
 0x64c   : > { %v13439_v22 = vadd.f32 %v6019_v57, %v5840_v5  ;;  %v15135_v5 = vld [vmem:[#allocation104_spill] sm:$0xff]  ;;  %v5841_v57 = vadd.f32 %v15137_v49, %v5566_v9  ;;  %v15141_v49 = vld [vmem:[#allocation85_spill] sm:$0xff] }
 0x64d   : > { %v13436_v10 = vpop.f32.mrf.mxu1  ;;  %v5291_v48 = vadd.f32 %v15135_v5, %v12839_v29 }
 0x64e   : > { %15130 = vst [vmem:[#allocation94_spill] sm:$0xff] %v13436_v10  ;;  %v6724_v10 = vld [vmem:[#allocation2 + $0x226] sm:$0xff] }
 0x64f   : > { %v5567_v29 = vadd.f32 %v15138_v47, %v5291_v48  ;;  %v13485_v48 = vld [vmem:[#allocation2 + $0x190] sm:$0xff]  ;;  %v15144_v47 = vld [vmem:[#allocation198_spill] sm:$0xff] }
 0x650   : > { %8957 = vmatmul.msk.f32.gmra.mxu1 %vm1145_vm2, %v6723_v56  ;;  %8853 = vmatmul.msk.f32.gmra.mxu2 %vm1145_vm2, %v13447_v32  ;;  %v13472_v5 = vpop.f32.mrf.mxu0 }
 0x651   : > { %9036 = vmatmul.msk.f32.gmra.mxu0 %vm1145_vm2, %v7531_v28  ;;  %9005 = vmatmul.msk.f32.gmra.mxu3 %vm1145_vm2, %v13327_v31  ;;  %v13470_v9 = vpop.f32.mrf.mxu3  ;;  %15140 = vst [vmem:[#allocation97_spill] sm:$0xff] %v13472_v5  ;;  %v7534_v5 = vld [vmem:[#allocation2 + $0x131] sm:$0xff] }
 0x652   : > { %15139 = vst [vmem:[#allocation83_spill] sm:$0xff] %v13470_v9 }
 0x653   : > { %v6022_v56 = vpop.f32.mrf.mxu2 }
 0x654   : > { %v13459_v31 = vadd.f32 %v6022_v56, %v5841_v57  ;;  %v5292_v57 = vadd.f32 %v15141_v49, %v12859_v26 }
 0x655   : > { %v13456_v28 = vpop.f32.mrf.mxu1 }
 0x656   : > { %15136 = vst [vmem:[#allocation44_spill] sm:$0xff] %v13456_v28  ;;  %v6725_v28 = vld [vmem:[#allocation2 + $0x22e] sm:$0xff]  ;;  %v5568_v26 = vadd.f32 %v15144_v47, %v5292_v57  ;;  %v15150_v57 = vld [vmem:[#allocation107_spill] sm:$0xff] }
 0x658   : > { %8958 = vmatmul.msk.f32.gmra.mxu1 %vm1145_vm2, %v6724_v10  ;;  %8854 = vmatmul.msk.f32.gmra.mxu2 %vm1145_vm2, %v13465_v0  ;;  %v15143_v10 = vld [vmem:[#allocation141_spill] sm:$0xff]  ;;  %v13497_v9 = vpop.f32.mrf.mxu0 }
 0x659   : > { %9037 = vmatmul.msk.f32.gmra.mxu0 %vm1145_vm2, %v7532_v51  ;;  %9006 = vmatmul.msk.f32.gmra.mxu3 %vm1145_vm2, %v13345_v11  ;;  %v5842_v56 = vadd.f32 %v15143_v10, %v5567_v29  ;;  %v7533_v11 = vld [vmem:[#allocation2 + $0x129] sm:$0xff]  ;;  %v13492_v10 = vpop.f32.mrf.mxu3  ;;  %15149 = vst [vmem:[#allocation48_spill] sm:$0xff] %v13497_v9 }
 0x65a   : > { %v15145_v29 = vld [vmem:[#allocation105_spill] sm:$0xff]  ;;  %15146 = vst [vmem:[#allocation174_spill] sm:$0xff] %v13492_v10 }
 0x65b   : > { %v6025_v39 = vpop.f32.mrf.mxu2  ;;  %v5293_v49 = vadd.f32 %v15145_v29, %v12879_v24  ;;  %v13505_v24 = vld [vmem:[#allocation2 + $0x1a8] sm:$0xff] }
 0x65c   : > { %v13479_v37 = vadd.f32 %v6025_v39, %v5842_v56  ;;  %v6726_v56 = vld [vmem:[#allocation2 + $0x246] sm:$0xff] }
 0x65d   : > { %v13476_v51 = vpop.f32.mrf.mxu1  ;;  %v5569_v47 = vadd.f32 %v15150_v57, %v5293_v49  ;;  %v7535_v9 = vld [vmem:[#allocation2 + $0x149] sm:$0xff] }
 0x65e   : > { %15142 = vst [vmem:[#allocation45_spill] sm:$0xff] %v13476_v51  ;;  %v15156_v49 = vld [vmem:[#allocation88_spill] sm:$0xff] }
 0x660   : > { %8959 = vmatmul.msk.f32.gmra.mxu1 %vm1145_vm2, %v6725_v28  ;;  %8855 = vmatmul.msk.f32.gmra.mxu2 %vm1145_vm2, %v13485_v48 }
 0x661   : > { %9038 = vmatmul.msk.f32.gmra.mxu0 %vm1145_vm2, %v7533_v11  ;;  %9007 = vmatmul.msk.f32.gmra.mxu3 %vm1145_vm2, %v13363_v3  ;;  %v15148_v11 = vld [vmem:[#allocation146_spill] sm:$0xff] }
 0x662   : > { %v5843_v28 = vadd.f32 %v15148_v11, %v5568_v26  ;;  %v15151_v26 = vld [vmem:[#allocation160_spill] sm:$0xff] }
 0x663   : > { %v6028_v3 = vpop.f32.mrf.mxu2  ;;  %v5294_v29 = vadd.f32 %v15151_v26, %v12899_v21  ;;  %v13525_v21 = vld [vmem:[#allocation2 + $0x1b0] sm:$0xff] }
 0x664   : > { %v13499_v51 = vadd.f32 %v6028_v3, %v5843_v28  ;;  %v6727_v28 = vld [vmem:[#allocation2 + $0x24e] sm:$0xff] }
 0x665   : > { %v13494_v39 = vpop.f32.mrf.mxu1  ;;  %v15153_v3 = vld [vmem:[#allocation149_spill] sm:$0xff]  ;;  %v5570_v57 = vadd.f32 %v15156_v49, %v5294_v29  ;;  %v13543_v29 = vld [vmem:[#allocation2 + $0x1c8] sm:$0xff] }
 0x666   : > { %15147 = vst [vmem:[#allocation132_spill] sm:$0xff] %v13494_v39  ;;  %v13519_v39 = vpop.f32.mrf.mxu0 }
 0x667   : > { %15155 = vst [vmem:[#allocation49_spill] sm:$0xff] %v13519_v39 }
 0x668   : > { %8960 = vmatmul.msk.f32.gmra.mxu1 %vm1145_vm2, %v6726_v56  ;;  %8856 = vmatmul.msk.f32.gmra.mxu2 %vm1145_vm2, %v13505_v24  ;;  %v13515_v56 = vpop.f32.mrf.mxu3 }
 0x669   : > { %9039 = vmatmul.msk.f32.gmra.mxu0 %vm1145_vm2, %v7534_v5  ;;  %9008 = vmatmul.msk.f32.gmra.mxu3 %vm1145_vm2, %v13386_v61  ;;  %v5844_v5 = vadd.f32 %v15153_v3, %v5569_v47  ;;  %15154 = vst [vmem:[#allocation100_spill] sm:$0xff] %v13515_v56  ;;  %v15157_v47 = vld [vmem:[#allocation202_spill] sm:$0xff]  ;;  %v6728_v3 = vld [vmem:[#allocation2 + $0x266] sm:$0xff] }
 0x66b   : > { %v6031_v10 = vpop.f32.mrf.mxu2 }
 0x66c   : > { %v13517_v61 = vadd.f32 %v6031_v10, %v5844_v5  ;;  %v5295_v10 = vadd.f32 %v15157_v47, %v12919_v59  ;;  %v15159_v5 = vld [vmem:[#allocation152_spill] sm:$0xff] }
 0x66d   : > { %v13512_v11 = vpop.f32.mrf.mxu1  ;;  %v15161_v59 = vld [vmem:[#allocation108_spill] sm:$0xff] }
 0x66e   : > { %15152 = vst [vmem:[#allocation131_spill] sm:$0xff] %v13512_v11  ;;  %v5571_v49 = vadd.f32 %v15161_v59, %v5295_v10  ;;  %v13546_v47 = vpop.f32.mrf.mxu0  ;;  %v13561_v10 = vld [vmem:[#allocation2 + $0x1d0] sm:$0xff] }
 0x66f   : > { %15162 = vst [vmem:[#allocation139_spill] sm:$0xff] %v13546_v47  ;;  %v15166_v59 = vld [vmem:[#allocation165_spill] sm:$0xff] }
 0x670   : > { %8961 = vmatmul.msk.f32.gmra.mxu1 %vm1145_vm2, %v6727_v28  ;;  %8857 = vmatmul.msk.f32.gmra.mxu2 %vm1145_vm2, %v13525_v21  ;;  %v7536_v28 = vld [vmem:[#allocation2 + $0x151] sm:$0xff] }
 0x671   : > { %9040 = vmatmul.msk.f32.gmra.mxu0 %vm1145_vm2, %v7535_v9  ;;  %9009 = vmatmul.msk.f32.gmra.mxu3 %vm1145_vm2, %v13406_v6  ;;  %v5845_v9 = vadd.f32 %v15159_v5, %v5570_v57  ;;  %v13539_v6 = vpop.f32.mrf.mxu3 }
 0x672   : > { %15160 = vst [vmem:[#allocation137_spill] sm:$0xff] %v13539_v6 }
 0x673   : > { %v6034_v56 = vpop.f32.mrf.mxu2 }
 0x674   : > { %v13535_v39 = vadd.f32 %v6034_v56, %v5845_v9  ;;  %v15163_v56 = vld [vmem:[#allocation110_spill] sm:$0xff] }
 0x675   : > { %v13532_v26 = vpop.f32.mrf.mxu1  ;;  %v5296_v57 = vadd.f32 %v15163_v56, %v12939_v34  ;;  %v15165_v9 = vld [vmem:[#allocation158_spill] sm:$0xff] }
 0x676   : > { %15158 = vst [vmem:[#allocation87_spill] sm:$0xff] %v13532_v26  ;;  %v7537_v26 = vld [vmem:[#allocation2 + $0x169] sm:$0xff] }
 0x677   : > { %v5572_v34 = vadd.f32 %v15166_v59, %v5296_v57  ;;  %v13581_v57 = vld [vmem:[#allocation2 + $0x1e8] sm:$0xff] }
 0x678   : > { %8962 = vmatmul.msk.f32.gmra.mxu1 %vm1145_vm2, %v6728_v3  ;;  %8858 = vmatmul.msk.f32.gmra.mxu2 %vm1145_vm2, %v13543_v29  ;;  %v6729_v3 = vld [vmem:[#allocation2 + $0x26e] sm:$0xff] }
 0x679   : > { %9041 = vmatmul.msk.f32.gmra.mxu0 %vm1145_vm2, %v7536_v28  ;;  %9010 = vmatmul.msk.f32.gmra.mxu3 %vm1145_vm2, %v13429_v50  ;;  %v5846_v28 = vadd.f32 %v15165_v9, %v5571_v49  ;;  %v13566_v56 = vpop.f32.mrf.mxu3  ;;  %v13568_v49 = vpop.f32.mrf.mxu0  ;;  %v15172_v59 = vld [vmem:[#allocation204_spill] sm:$0xff] }
 0x67a   : > { %15167 = vst [vmem:[#allocation52_spill] sm:$0xff] %v13566_v56 }
 0x67b   : > { %v6037_v6 = vpop.f32.mrf.mxu2  ;;  %15168 = vst [vmem:[#allocation138_spill] sm:$0xff] %v13568_v49  ;;  %v7799_v49 = vld [vmem:[#allocation2 + $0x92] sm:$0xff] }
 0x67c   : > { %v13555_v50 = vadd.f32 %v6037_v6, %v5846_v28  ;;  %v15169_v6 = vld [vmem:[#allocation91_spill] sm:$0xff] }
 0x67d   : > { %v13552_v5 = vpop.f32.mrf.mxu1  ;;  %v5297_v9 = vadd.f32 %v15169_v6, %v12959_v16 }
 0x67e   : > { %15164 = vst [vmem:[#allocation67_spill] sm:$0xff] %v13552_v5  ;;  %v7798_v5 = vld [vmem:[#allocation2 + $0x8a] sm:$0xff] }
 0x67f   : > { %v5573_v16 = vadd.f32 %v15172_v59, %v5297_v9  ;;  %v15178_v9 = vld [vmem:[#allocation113_spill] sm:$0xff] }
 0x680   : > { %8963 = vmatmul.msk.f32.gmra.mxu1 %vm1145_vm2, %v6729_v3  ;;  %8859 = vmatmul.msk.f32.gmra.mxu2 %vm1145_vm2, %v13561_v10  ;;  %v15171_v3 = vld [vmem:[#allocation164_spill] sm:$0xff] }
 0x681   : > { %9042 = vmatmul.msk.f32.gmra.mxu0 %vm1145_vm2, %v7537_v26  ;;  %9011 = vmatmul.msk.f32.gmra.mxu3 %vm1145_vm2, %v13447_v32  ;;  %v5847_v28 = vadd.f32 %v15171_v3, %v5572_v34  ;;  %v7538_v32 = vld [vmem:[#allocation2 + $0x171] sm:$0xff]  ;;  %v15173_v34 = vld [vmem:[#allocation111_spill] sm:$0xff]  ;;  %v13588_v3 = vpop.f32.mrf.mxu3 }
 0x682   : > { %v5298_v6 = vadd.f32 %v15173_v34, %v12979_v4  ;;  %15174 = vst [vmem:[#allocation54_spill] sm:$0xff] %v13588_v3  ;;  %v13601_v4 = vld [vmem:[#allocation2 + $0x1f0] sm:$0xff] }
 0x683   : > { %v6040_v47 = vpop.f32.mrf.mxu2 }
 0x684   : > { %v13575_v11 = vadd.f32 %v6040_v47, %v5847_v28  ;;  %v15176_v28 = vld [vmem:[#allocation171_spill] sm:$0xff]  ;;  %v5574_v59 = vadd.f32 %v15178_v9, %v5298_v6  ;;  %v15184_v6 = vld [vmem:[#allocation114_spill] sm:$0xff] }
 0x685   : > { %v13572_v26 = vpop.f32.mrf.mxu1 }
 0x686   : > { %15170 = vst [vmem:[#allocation142_spill] sm:$0xff] %v13572_v26 }
 0x688   : > { %9060 = vmatmul.msk.f32.vlgmr.msra.gmra.mxu1 %vm1145_vm2, %v7798_v5  ;;  %8860 = vmatmul.msk.f32.gmra.mxu2 %vm1145_vm2, %v13581_v57  ;;  %v13593_v5 = vpop.f32.mrf.mxu0 }
 0x689   : > { %9043 = vmatmul.msk.f32.gmra.mxu0 %vm1145_vm2, %v7538_v32  ;;  %9012 = vmatmul.msk.f32.gmra.mxu3 %vm1145_vm2, %v13465_v0  ;;  %v5848_v32 = vadd.f32 %v15176_v28, %v5573_v16  ;;  %15177 = vst [vmem:[#allocation95_spill] sm:$0xff] %v13593_v5  ;;  %v7539_v0 = vld [vmem:[#allocation2 + $0x189] sm:$0xff]  ;;  %v13611_v3 = vpop.f32.mrf.mxu3 }
 0x68a   : > { %v15179_v16 = vld [vmem:[#allocation169_spill] sm:$0xff]  ;;  %15182 = vst [vmem:[#allocation109_spill] sm:$0xff] %v13611_v3 }
 0x68b   : > { %v6043_v56 = vpop.f32.mrf.mxu2  ;;  %v5299_v34 = vadd.f32 %v15179_v16, %v12999_v36  ;;  %v7800_v5 = vld [vmem:[#allocation2 + $0xaa] sm:$0xff] }
 0x68c   : > { %v13595_v26 = vadd.f32 %v6043_v56, %v5848_v32  ;;  %v15181_v56 = vld [vmem:[#allocation176_spill] sm:$0xff] }
 0x68d   : > { %v13590_v47 = vpop.f32.mrf.mxu1  ;;  %v5849_v32 = vadd.f32 %v15181_v56, %v5574_v59  ;;  %v13621_v36 = vld [vmem:[#allocation2 + $0x208] sm:$0xff]  ;;  %v5575_v9 = vadd.f32 %v15184_v6, %v5299_v34  ;;  %v13639_v34 = vld [vmem:[#allocation2 + $0x210] sm:$0xff] }
 0x68e   : > { %15175 = vst [vmem:[#allocation106_spill] sm:$0xff] %v13590_v47  ;;  %v15185_v59 = vld [vmem:[#allocation116_spill] sm:$0xff] }
 0x68f   : > { %v5300_v16 = vadd.f32 %v15185_v59, %v13017_v44  ;;  %v7541_v3 = vld [vmem:[#allocation2 + $0x1a9] sm:$0xff] }
 0x690   : > { %9061 = vmatmul.msk.f32.gmra.mxu1 %vm1145_vm2, %v7799_v49  ;;  %8861 = vmatmul.msk.f32.gmra.mxu2 %vm1145_vm2, %v13601_v4  ;;  %v7540_v49 = vld [vmem:[#allocation2 + $0x191] sm:$0xff]  ;;  %v13615_v47 = vpop.f32.mrf.mxu0 }
 0x691   : > { %9044 = vmatmul.msk.f32.gmra.mxu0 %vm1145_vm2, %v7539_v0  ;;  %9013 = vmatmul.msk.f32.gmra.mxu3 %vm1145_vm2, %v13485_v48  ;;  %15183 = vst [vmem:[#allocation96_spill] sm:$0xff] %v13615_v47  ;;  %v15189_v44 = vld [vmem:[#allocation173_spill] sm:$0xff] }
 0x692   : > { %v5576_v6 = vadd.f32 %v15189_v44, %v5300_v16  ;;  %v13657_v16 = vld [vmem:[#allocation2 + $0x228] sm:$0xff]  ;;  %v15194_v44 = vld [vmem:[#allocation177_spill] sm:$0xff] }
 0x693   : > { %v6046_v0 = vpop.f32.mrf.mxu2 }
 0x694   : > { %v13613_v48 = vadd.f32 %v6046_v0, %v5849_v32  ;;  %v15187_v32 = vld [vmem:[#allocation182_spill] sm:$0xff] }
 0x695   : > { %v13608_v28 = vpop.f32.mrf.mxu1  ;;  %v5850_v0 = vadd.f32 %v15187_v32, %v5575_v9  ;;  %v15191_v9 = vld [vmem:[#allocation119_spill] sm:$0xff] }
 0x696   : > { %15180 = vst [vmem:[#allocation144_spill] sm:$0xff] %v13608_v28  ;;  %v5301_v32 = vadd.f32 %v15191_v9, %v13037_v14 }
 0x698   : > { %9062 = vmatmul.msk.f32.gmra.mxu1 %vm1145_vm2, %v7800_v5  ;;  %8862 = vmatmul.msk.f32.gmra.mxu2 %vm1145_vm2, %v13621_v36  ;;  %v7801_v5 = vld [vmem:[#allocation2 + $0xb2] sm:$0xff]  ;;  %v13642_v59 = vpop.f32.mrf.mxu0  ;;  %v5577_v14 = vadd.f32 %v15194_v44, %v5301_v32 }
 0x699   : > { %9045 = vmatmul.msk.f32.gmra.mxu0 %vm1145_vm2, %v7540_v49  ;;  %9014 = vmatmul.msk.f32.gmra.mxu3 %vm1145_vm2, %v13505_v24  ;;  %v13635_v24 = vpop.f32.mrf.mxu3  ;;  %15190 = vst [vmem:[#allocation79_spill] sm:$0xff] %v13642_v59  ;;  %v13677_v32 = vld [vmem:[#allocation2 + $0x230] sm:$0xff] }
 0x69a   : > { %15188 = vst [vmem:[#allocation64_spill] sm:$0xff] %v13635_v24  ;;  %v7542_v24 = vld [vmem:[#allocation2 + $0x1b1] sm:$0xff] }
 0x69b   : > { %v6049_v49 = vpop.f32.mrf.mxu2  ;;  %v15200_v44 = vld [vmem:[#allocation181_spill] sm:$0xff] }
 0x69c   : > { %v13631_v47 = vadd.f32 %v6049_v49, %v5850_v0  ;;  %v15193_v0 = vld [vmem:[#allocation185_spill] sm:$0xff] }
 0x69d   : > { %v13628_v56 = vpop.f32.mrf.mxu1  ;;  %v5851_v49 = vadd.f32 %v15193_v0, %v5576_v6  ;;  %v15197_v0 = vld [vmem:[#allocation122_spill] sm:$0xff] }
 0x69e   : > { %15186 = vst [vmem:[#allocation35_spill] sm:$0xff] %v13628_v56  ;;  %v7802_v56 = vld [vmem:[#allocation2 + $0xca] sm:$0xff] }
 0x6a0   : > { %9063 = vmatmul.msk.f32.gmra.mxu1 %vm1145_vm2, %v7801_v5  ;;  %8863 = vmatmul.msk.f32.gmra.mxu2 %vm1145_vm2, %v13639_v34  ;;  %v13664_v9 = vpop.f32.mrf.mxu0 }
 0x6a1   : > { %9046 = vmatmul.msk.f32.gmra.mxu0 %vm1145_vm2, %v7541_v3  ;;  %9015 = vmatmul.msk.f32.gmra.mxu3 %vm1145_vm2, %v13525_v21  ;;  %v13662_v6 = vpop.f32.mrf.mxu3  ;;  %15196 = vst [vmem:[#allocation101_spill] sm:$0xff] %v13664_v9  ;;  %v7804_v9 = vld [vmem:[#allocation2 + $0xea] sm:$0xff] }
 0x6a2   : > { %15195 = vst [vmem:[#allocation65_spill] sm:$0xff] %v13662_v6 }
 0x6a3   : > { %v6052_v5 = vpop.f32.mrf.mxu2 }
 0x6a4   : > { %v13651_v21 = vadd.f32 %v6052_v5, %v5851_v49  ;;  %v5302_v49 = vadd.f32 %v15197_v0, %v13057_v52 }
 0x6a5   : > { %v13648_v3 = vpop.f32.mrf.mxu1 }
 0x6a6   : > { %15192 = vst [vmem:[#allocation112_spill] sm:$0xff] %v13648_v3  ;;  %v7803_v3 = vld [vmem:[#allocation2 + $0xd2] sm:$0xff]  ;;  %v5578_v52 = vadd.f32 %v15200_v44, %v5302_v49  ;;  %v13693_v49 = vld [vmem:[#allocation2 + $0x248] sm:$0xff] }
 0x6a8   : > { %9064 = vmatmul.msk.f32.gmra.mxu1 %vm1145_vm2, %v7802_v56  ;;  %8864 = vmatmul.msk.f32.gmra.mxu2 %vm1145_vm2, %v13657_v16  ;;  %v15199_v56 = vld [vmem:[#allocation191_spill] sm:$0xff] }
 0x6a9   : > { %9047 = vmatmul.msk.f32.gmra.mxu0 %vm1145_vm2, %v7542_v24  ;;  %9016 = vmatmul.msk.f32.gmra.mxu3 %vm1145_vm2, %v13543_v29  ;;  %v5852_v5 = vadd.f32 %v15199_v56, %v5577_v14  ;;  %v7543_v29 = vld [vmem:[#allocation2 + $0x1c9] sm:$0xff]  ;;  %v13684_v56 = vpop.f32.mrf.mxu3 }
 0x6aa   : > { %v15201_v14 = vld [vmem:[#allocation125_spill] sm:$0xff]  ;;  %15202 = vst [vmem:[#allocation157_spill] sm:$0xff] %v13684_v56 }
 0x6ab   : > { %v6055_v59 = vpop.f32.mrf.mxu2  ;;  %v5303_v0 = vadd.f32 %v15201_v14, %v13083_v40  ;;  %v15206_v40 = vld [vmem:[#allocation184_spill] sm:$0xff] }
 0x6ac   : > { %v13671_v28 = vadd.f32 %v6055_v59, %v5852_v5  ;;  %v15204_v5 = vld [vmem:[#allocation195_spill] sm:$0xff] }
 0x6ad   : > { %v13668_v24 = vpop.f32.mrf.mxu1  ;;  %v5579_v44 = vadd.f32 %v15206_v40, %v5303_v0 }
 0x6ae   : > { %15198 = vst [vmem:[#allocation68_spill] sm:$0xff] %v13668_v24 }
 0x6b0   : > { %9065 = vmatmul.msk.f32.gmra.mxu1 %vm1145_vm2, %v7803_v3  ;;  %8865 = vmatmul.msk.f32.gmra.mxu2 %vm1145_vm2, %v13677_v32  ;;  %v13689_v3 = vpop.f32.mrf.mxu0 }
 0x6b1   : > { %9048 = vmatmul.msk.f32.gmra.mxu0 %vm1145_vm2, %v7543_v29  ;;  %9017 = vmatmul.msk.f32.gmra.mxu3 %vm1145_vm2, %v13561_v10  ;;  %v5853_v29 = vadd.f32 %v15204_v5, %v5578_v52  ;;  %15205 = vst [vmem:[#allocation47_spill] sm:$0xff] %v13689_v3  ;;  %v7544_v10 = vld [vmem:[#allocation2 + $0x1d1] sm:$0xff]  ;;  %v13707_v3 = vpop.f32.mrf.mxu3 }
 0x6b2   : > { %v15207_v52 = vld [vmem:[#allocation129_spill] sm:$0xff] }
 0x6b3   : > { %v6058_v6 = vpop.f32.mrf.mxu2  ;;  %v5304_v14 = vadd.f32 %v15207_v52, %v13109_v15  ;;  %v15212_v15 = vld [vmem:[#allocation186_spill] sm:$0xff]  ;;  %v15214_v52 = vld [vmem:[#allocation32_spill] sm:$0xff] }
 0x6b4   : > { %v13691_v24 = vadd.f32 %v6058_v6, %v5853_v29  ;;  %v15209_v6 = vld [vmem:[#allocation196_spill] sm:$0xff] }
 0x6b5   : > { %v13686_v59 = vpop.f32.mrf.mxu1  ;;  %v5854_v29 = vadd.f32 %v15209_v6, %v5579_v44  ;;  %v5580_v40 = vadd.f32 %v15212_v15, %v5304_v14  ;;  %v15213_v44 = vld [vmem:[#allocation134_spill] sm:$0xff]  ;;  %v6973_v14 = vld [vmem:[#allocation2 + $0x87] sm:$0xff] }
 0x6b6   : > { %15203 = vst [vmem:[#allocation69_spill] sm:$0xff] %v13686_v59 }
 0x6b7   : > { %v5855_v6 = vadd.f32 %v15214_v52, %v5580_v40  ;;  %v15218_v40 = vld [vmem:[#allocation140_spill] sm:$0xff] }
 0x6b8   : > { %9066 = vmatmul.msk.f32.gmra.mxu1 %vm1145_vm2, %v7804_v9  ;;  %8866 = vmatmul.msk.f32.gmra.mxu2 %vm1145_vm2, %v13693_v49  ;;  %v7805_v9 = vld [vmem:[#allocation2 + $0xf2] sm:$0xff]  ;;  %v13713_v0 = vpop.f32.mrf.mxu0 }
 0x6b9   : > { %9049 = vmatmul.msk.f32.gmra.mxu0 %vm1145_vm2, %v7544_v10  ;;  %9018 = vmatmul.msk.f32.gmra.mxu3 %vm1145_vm2, %v13581_v57  ;;  %v7545_v10 = vld [vmem:[#allocation2 + $0x1e9] sm:$0xff]  ;;  %15211 = vst [vmem:[#allocation162_spill] sm:$0xff] %v13713_v0 }
 0x6ba   : > { %v13711_v57 = vld [vmem:[#allocation2 + $0x250] sm:$0xff] }
 0x6bb   : > { %v6061_v56 = vpop.f32.mrf.mxu2 }
 0x6bc   : > { %v13709_v59 = vadd.f32 %v6061_v56, %v5854_v29  ;;  %v5305_v56 = vadd.f32 %v15213_v44, %v13124_v23  ;;  %v15217_v23 = vld [vmem:[#allocation189_spill] sm:$0xff]  ;;  %v15219_v44 = vld [vmem:[#allocation7_spill] sm:$0xff] }
 0x6bd   : > { %v13704_v5 = vpop.f32.mrf.mxu1 }
 0x6be   : > { %15208 = vst [vmem:[#allocation161_spill] sm:$0xff] %v13704_v5  ;;  %v7546_v5 = vld [vmem:[#allocation2 + $0x1f1] sm:$0xff] }
 0x6bf   : > { %15210 = vst [vmem:[#allocation121_spill] sm:$0xff] %v13709_v59 }
 0x6c0   : > { %9067 = vmatmul.msk.f32.gmra.mxu1 %vm1145_vm2, %v7805_v9  ;;  %8867 = vmatmul.msk.f32.gmra.mxu2 %vm1145_vm2, %v13711_v57  ;;  %v5581_v9 = vadd.f32 %v15217_v23, %v5305_v56  ;;  %v13736_v15 = vpop.f32.mrf.mxu0  ;;  %v15221_v56 = vld [vmem:[#allocation193_spill] sm:$0xff] }
 0x6c1   : > { %9050 = vmatmul.msk.f32.gmra.mxu0 %vm1145_vm2, %v7545_v10  ;;  %9019 = vmatmul.msk.f32.gmra.mxu3 %vm1145_vm2, %v13601_v4  ;;  %v7806_v10 = vld [vmem:[#allocation2 + $0x10a] sm:$0xff]  ;;  %v13731_v4 = vpop.f32.mrf.mxu3 }
 0x6c2   : > { %v5856_v52 = vadd.f32 %v15219_v44, %v5581_v9  ;;  %v15222_v9 = vld [vmem:[#allocation145_spill] sm:$0xff]  ;;  %v15223_v44 = vld [vmem:[#allocation10_spill] sm:$0xff] }
 0x6c3   : > { %v6064_v0 = vpop.f32.mrf.mxu2 }
 0x6c4   : > { %v13727_v59 = vadd.f32 %v6064_v0, %v5855_v6  ;;  %v5306_v0 = vadd.f32 %v15218_v40, %v13139_v7  ;;  %v7547_v6 = vld [vmem:[#allocation2 + $0x209] sm:$0xff]  ;;  %v5307_v40 = vadd.f32 %v15222_v9, %v13159_v43 }
 0x6c5   : > { %v13725_v29 = vpop.f32.mrf.mxu1  ;;  %v15227_v43 = vld [vmem:[#allocation148_spill] sm:$0xff] }
 0x6c6   : > { %15215 = vst [vmem:[#allocation80_spill] sm:$0xff] %v13725_v29 }
 0x6c7   : > { %15216 = vst [vmem:[#allocation124_spill] sm:$0xff] %v13727_v59 }
 0x6c8   : > { %9068 = vmatmul.msk.f32.gmra.mxu1 %vm1145_vm2, %v7806_v10  ;;  %8964 = vmatmul.msk.f32.vlgmr.msra.gmra.mxu2 %vm1145_vm2, %v6973_v14  ;;  %v7807_v10 = vld [vmem:[#allocation2 + $0x112] sm:$0xff]  ;;  %v5582_v14 = vadd.f32 %v15221_v56, %v5306_v0  ;;  %v13754_v23 = vpop.f32.mrf.mxu0 }
 0x6c9   : > { %9051 = vmatmul.msk.f32.gmra.mxu0 %vm1145_vm2, %v7546_v5  ;;  %9020 = vmatmul.msk.f32.gmra.mxu3 %vm1145_vm2, %v13621_v36  ;;  %v6974_v36 = vld [vmem:[#allocation2 + $0x8f] sm:$0xff]  ;;  %v13752_v7 = vpop.f32.mrf.mxu3 }
 0x6ca   : > { %v15225_v0 = vld [vmem:[#allocation197_spill] sm:$0xff] }
 0x6cb   : > { %v6067_v5 = vpop.f32.mrf.mxu2 }
 0x6cc   : > { %v13742_v29 = vadd.f32 %v6067_v5, %v5856_v52  ;;  %v5857_v52 = vadd.f32 %v15223_v44, %v5582_v14  ;;  %v5308_v14 = vadd.f32 %v15227_v43, %v13179_v8  ;;  %v15228_v44 = vld [vmem:[#allocation43_spill] sm:$0xff]  ;;  %v15230_v8 = vld [vmem:[#allocation201_spill] sm:$0xff] }
 0x6cd   : > { %v13744_v59 = vpop.f32.mrf.mxu1 }
 0x6ce   : > { %15220 = vst [vmem:[#allocation170_spill] sm:$0xff] %v13744_v59 }
 0x6d0   : > { %9069 = vmatmul.msk.f32.gmra.mxu1 %vm1145_vm2, %v7807_v10  ;;  %8965 = vmatmul.msk.f32.gmra.mxu2 %vm1145_vm2, %v6974_v36  ;;  %v7808_v10 = vld [vmem:[#allocation2 + $0x12a] sm:$0xff]  ;;  %v5583_v36 = vadd.f32 %v15225_v0, %v5307_v40 }
 0x6d1   : > { %9052 = vmatmul.msk.f32.gmra.mxu0 %vm1145_vm2, %v7547_v6  ;;  %9021 = vmatmul.msk.f32.gmra.mxu3 %vm1145_vm2, %v13639_v34  ;;  %v7548_v6 = vld [vmem:[#allocation2 + $0x211] sm:$0xff]  ;;  %v6975_v34 = vld [vmem:[#allocation2 + $0xa7] sm:$0xff]  ;;  %v13771_v9 = vpop.f32.mrf.mxu3 }
 0x6d2   : > { %v6976_v40 = vld [vmem:[#allocation2 + $0xaf] sm:$0xff] }
 0x6d3   : > { %v6070_v5 = vpop.f32.mrf.mxu2 }
 0x6d4   : > { %v13759_v59 = vadd.f32 %v6070_v5, %v5857_v52  ;;  %v5858_v52 = vadd.f32 %v15228_v44, %v5583_v36  ;;  %v13774_v5 = vpop.f32.mrf.mxu0  ;;  %v15232_v36 = vld [vmem:[#allocation151_spill] sm:$0xff]  ;;  %v15233_v44 = vld [vmem:[#allocation42_spill] sm:$0xff] }
 0x6d5   : > { %v13766_v56 = vpop.f32.mrf.mxu1  ;;  %v5309_v43 = vadd.f32 %v15232_v36, %v13205_v45  ;;  %v15235_v45 = vld [vmem:[#allocation154_spill] sm:$0xff]  ;;  %v15236_v36 = vld [vmem:[#allocation13_spill] sm:$0xff] }
 0x6d6   : > { %15224 = vst [vmem:[#allocation81_spill] sm:$0xff] %v13759_v59  ;;  %v7809_v59 = vld [vmem:[#allocation2 + $0x132] sm:$0xff] }
 0x6d7   : > { %15226 = vst [vmem:[#allocation127_spill] sm:$0xff] %v13766_v56 }
 0x6d8   : > { %9070 = vmatmul.msk.f32.gmra.mxu1 %vm1145_vm2, %v7808_v10  ;;  %8966 = vmatmul.msk.f32.gmra.mxu2 %vm1145_vm2, %v6975_v34  ;;  %v7549_v10 = vld [vmem:[#allocation2 + $0x229] sm:$0xff]  ;;  %v5584_v34 = vadd.f32 %v15230_v8, %v5308_v14 }
 0x6d9   : > { %9053 = vmatmul.msk.f32.gmra.mxu0 %vm1145_vm2, %v7548_v6  ;;  %9022 = vmatmul.msk.f32.gmra.mxu3 %vm1145_vm2, %v13657_v16  ;;  %v13789_v56 = vpop.f32.mrf.mxu3  ;;  %v6977_v14 = vld [vmem:[#allocation2 + $0xc7] sm:$0xff] }
 0x6db   : > { %v6073_v6 = vpop.f32.mrf.mxu2 }
 0x6dc   : > { %v13776_v16 = vadd.f32 %v6073_v6, %v5858_v52  ;;  %v5859_v52 = vadd.f32 %v15233_v44, %v5584_v34  ;;  %v5310_v34 = vadd.f32 %v15235_v45, %v13224_v20  ;;  %v15240_v20 = vld [vmem:[#allocation159_spill] sm:$0xff] }
 0x6dd   : > { %v13784_v0 = vpop.f32.mrf.mxu1 }
 0x6de   : > { %15229 = vst [vmem:[#allocation59_spill] sm:$0xff] %v13776_v16 }
 0x6df   : > { %15231 = vst [vmem:[#allocation84_spill] sm:$0xff] %v13784_v0  ;;  %v7811_v0 = vld [vmem:[#allocation2 + $0x152] sm:$0xff] }
 0x6e0   : > { %9071 = vmatmul.msk.f32.gmra.mxu1 %vm1145_vm2, %v7809_v59  ;;  %8967 = vmatmul.msk.f32.gmra.mxu2 %vm1145_vm2, %v6976_v40  ;;  %v7810_v59 = vld [vmem:[#allocation2 + $0x14a] sm:$0xff]  ;;  %v15234_v40 = vld [vmem:[#allocation203_spill] sm:$0xff] }
 0x6e1   : > { %9054 = vmatmul.msk.f32.gmra.mxu0 %vm1145_vm2, %v7549_v10  ;;  %9023 = vmatmul.msk.f32.gmra.mxu3 %vm1145_vm2, %v13677_v32  ;;  %v7550_v10 = vld [vmem:[#allocation2 + $0x231] sm:$0xff]  ;;  %v13793_v32 = vpop.f32.mrf.mxu0  ;;  %v5585_v8 = vadd.f32 %v15234_v40, %v5309_v43  ;;  %v15239_v40 = vld [vmem:[#allocation155_spill] sm:$0xff] }
 0x6e2   : > { %v6978_v43 = vld [vmem:[#allocation2 + $0xcf] sm:$0xff] }
 0x6e3   : > { %v6076_v6 = vpop.f32.mrf.mxu2  ;;  %v5860_v44 = vadd.f32 %v15236_v36, %v5585_v8  ;;  %v15241_v8 = vld [vmem:[#allocation77_spill] sm:$0xff] }
 0x6e4   : > { %v13791_v16 = vadd.f32 %v6076_v6, %v5859_v52 }
 0x6e5   : > { %v13804_v52 = vpop.f32.mrf.mxu1 }
 0x6e6   : > { %15237 = vst [vmem:[#allocation86_spill] sm:$0xff] %v13804_v52  ;;  %v6979_v52 = vld [vmem:[#allocation2 + $0xe7] sm:$0xff] }
 0x6e8   : > { %9072 = vmatmul.msk.f32.gmra.mxu1 %vm1145_vm2, %v7810_v59  ;;  %8968 = vmatmul.msk.f32.gmra.mxu2 %vm1145_vm2, %v6977_v14  ;;  %v13809_v59 = vpop.f32.mrf.mxu3  ;;  %v5311_v14 = vadd.f32 %v15240_v20, %v13242_v38 }
 0x6e9   : > { %9055 = vmatmul.msk.f32.gmra.mxu0 %vm1145_vm2, %v7550_v10  ;;  %9024 = vmatmul.msk.f32.gmra.mxu3 %vm1145_vm2, %v13693_v49  ;;  %v5586_v49 = vadd.f32 %v15239_v40, %v5310_v34  ;;  %v15243_v34 = vld [vmem:[#allocation163_spill] sm:$0xff] }
 0x6ea   : > { %v5587_v40 = vadd.f32 %v15243_v34, %v5311_v14  ;;  %v15249_v34 = vld [vmem:[#allocation133_spill] sm:$0xff] }
 0x6eb   : > { %v6079_v6 = vpop.f32.mrf.mxu2  ;;  %v5861_v45 = vadd.f32 %v15241_v8, %v5586_v49  ;;  %v7813_v49 = vld [vmem:[#allocation2 + $0x172] sm:$0xff] }
 0x6ec   : > { %v13806_v10 = vadd.f32 %v6079_v6, %v5860_v44  ;;  %v7812_v44 = vld [vmem:[#allocation2 + $0x16a] sm:$0xff] }
 0x6ee   : > { %15238 = vst [vmem:[#allocation63_spill] sm:$0xff] %v13806_v10  ;;  %v15245_v10 = vld [vmem:[#allocation66_spill] sm:$0xff] }
 0x6ef   : > { %v5862_v38 = vadd.f32 %v15245_v10, %v5587_v40  ;;  %v7814_v10 = vld [vmem:[#allocation2 + $0x18a] sm:$0xff] }
 0x6f0   : > { %9073 = vmatmul.msk.f32.gmra.mxu1 %vm1145_vm2, %v7811_v0  ;;  %8969 = vmatmul.msk.f32.gmra.mxu2 %vm1145_vm2, %v6978_v43  ;;  %v13820_v0 = vpop.f32.mrf.mxu1 }
 0x6f1   : > { %9025 = vmatmul.msk.f32.gmra.mxu3 %vm1145_vm2, %v13711_v57  ;;  %15242 = vst [vmem:[#allocation178_spill] sm:$0xff] %v13820_v0  ;;  %v15244_v57 = vld [vmem:[#allocation167_spill] sm:$0xff] }
 0x6f2   : > { %v5312_v43 = vadd.f32 %v15244_v57, %v13261_v42 }
 0x6f3   : > { %v6082_v36 = vpop.f32.mrf.mxu2 }
 0x6f4   : > { %v13818_v6 = vadd.f32 %v6082_v36, %v5861_v45  ;;  %v6980_v45 = vld [vmem:[#allocation2 + $0xef] sm:$0xff] }
 0x6f5   : > { %v15246_v36 = vld [vmem:[#allocation168_spill] sm:$0xff] }
 0x6f6   : > { %v5588_v0 = vadd.f32 %v15246_v36, %v5312_v43 }
 0x6f8   : > { %9074 = vmatmul.msk.f32.gmra.mxu1 %vm1145_vm2, %v7812_v44  ;;  %8970 = vmatmul.msk.f32.gmra.mxu2 %vm1145_vm2, %v6979_v52  ;;  %v13832_v44 = vpop.f32.mrf.mxu1  ;;  %v15248_v52 = vld [vmem:[#allocation172_spill] sm:$0xff]  ;;  %v5863_v42 = vadd.f32 %v15249_v34, %v5588_v0  ;;  %v7815_v0 = vld [vmem:[#allocation2 + $0x192] sm:$0xff] }
 0x6f9   : > { %15247 = vst [vmem:[#allocation89_spill] sm:$0xff] %v13832_v44  ;;  %v5313_v14 = vadd.f32 %v15248_v52, %v13281_v58  ;;  %v15253_v44 = vld [vmem:[#allocation55_spill] sm:$0xff] }
 0x6fb   : > { %v6085_v20 = vpop.f32.mrf.mxu2 }
 0x6fc   : > { %v13828_v8 = vadd.f32 %v6085_v20, %v5862_v38  ;;  %v6981_v38 = vld [vmem:[#allocation2 + $0x107] sm:$0xff] }
 0x6fd   : > { %v15250_v20 = vld [vmem:[#allocation175_spill] sm:$0xff] }
 0x700   : > { %9075 = vmatmul.msk.f32.gmra.mxu1 %vm1145_vm2, %v7813_v49  ;;  %8971 = vmatmul.msk.f32.gmra.mxu2 %vm1145_vm2, %v6980_v45  ;;  %v5589_v49 = vadd.f32 %v15250_v20, %v5313_v14  ;;  %v13843_v43 = vpop.f32.mrf.mxu1  ;;  %v15252_v45 = vld [vmem:[#allocation179_spill] sm:$0xff] }
 0x701   : > { %15251 = vst [vmem:[#allocation136_spill] sm:$0xff] %v13843_v43  ;;  %v5314_v36 = vadd.f32 %v15252_v45, %v13301_v12  ;;  %v15255_v14 = vld [vmem:[#allocation183_spill] sm:$0xff] }
 0x702   : > { %v5864_v58 = vadd.f32 %v15253_v44, %v5589_v49  ;;  %v7816_v44 = vld [vmem:[#allocation2 + $0x1aa] sm:$0xff] }
 0x703   : > { %v6088_v57 = vpop.f32.mrf.mxu2  ;;  %v6983_v45 = vld [vmem:[#allocation2 + $0x127] sm:$0xff] }
 0x704   : > { %v13838_v40 = vadd.f32 %v6088_v57, %v5863_v42  ;;  %v6982_v42 = vld [vmem:[#allocation2 + $0x10f] sm:$0xff] }
 0x705   : > { %v15254_v57 = vld [vmem:[#allocation180_spill] sm:$0xff] }
 0x708   : > { %9076 = vmatmul.msk.f32.gmra.mxu1 %vm1145_vm2, %v7814_v10  ;;  %8972 = vmatmul.msk.f32.gmra.mxu2 %vm1145_vm2, %v6981_v38  ;;  %v5590_v10 = vadd.f32 %v15254_v57, %v5314_v36  ;;  %v5315_v38 = vadd.f32 %v15255_v14, %v13319_v41  ;;  %v13856_v43 = vpop.f32.mrf.mxu1  ;;  %v15257_v36 = vld [vmem:[#allocation187_spill] sm:$0xff]  ;;  %v6984_v14 = vld [vmem:[#allocation2 + $0x12f] sm:$0xff] }
 0x70a   : > { %v5865_v20 = vadd.f32 %v13119_v46, %v5590_v10  ;;  %v7817_v46 = vld [vmem:[#allocation2 + $0x1b2] sm:$0xff] }
 0x70b   : > { %v6091_v52 = vpop.f32.mrf.mxu2 }
 0x70c   : > { %v13848_v34 = vadd.f32 %v6091_v52, %v5864_v58  ;;  %v15256_v58 = vld [vmem:[#allocation76_spill] sm:$0xff] }
 0x70d   : > { %v5591_v52 = vadd.f32 %v15256_v58, %v5315_v38  ;;  %v15259_v38 = vld [vmem:[#allocation192_spill] sm:$0xff] }
 0x70f   : > { %v5866_v41 = vadd.f32 %v13136_v27, %v5591_v52  ;;  %v7818_v27 = vld [vmem:[#allocation2 + $0x1ca] sm:$0xff] }
 0x710   : > { %9077 = vmatmul.msk.f32.gmra.mxu1 %vm1145_vm2, %v7815_v0  ;;  %8973 = vmatmul.msk.f32.gmra.mxu2 %vm1145_vm2, %v6982_v42  ;;  %v5316_v0 = vadd.f32 %v15257_v36, %v13337_v19  ;;  %v13868_v10 = vpop.f32.mrf.mxu1  ;;  %v6985_v52 = vld [vmem:[#allocation2 + $0x147] sm:$0xff]  ;;  %v15260_v36 = vld [vmem:[#allocation53_spill] sm:$0xff] }
 0x713   : > { %v6094_v12 = vpop.f32.mrf.mxu2 }
 0x714   : > { %v13858_v49 = vadd.f32 %v6094_v12, %v5865_v20  ;;  %v15258_v20 = vld [vmem:[#allocation188_spill] sm:$0xff] }
 0x715   : > { %v5592_v12 = vadd.f32 %v15258_v20, %v5316_v0  ;;  %v15261_v0 = vld [vmem:[#allocation29_spill] sm:$0xff] }
 0x717   : > { %v5867_v19 = vadd.f32 %v13156_v2, %v5592_v12  ;;  %v7819_v2 = vld [vmem:[#allocation2 + $0x1d2] sm:$0xff] }
 0x718   : > { %9078 = vmatmul.msk.f32.gmra.mxu1 %vm1145_vm2, %v7816_v44  ;;  %8974 = vmatmul.msk.f32.gmra.mxu2 %vm1145_vm2, %v6983_v45  ;;  %v5317_v44 = vadd.f32 %v15259_v38, %v13357_v13  ;;  %v6986_v12 = vld [vmem:[#allocation2 + $0x14f] sm:$0xff] }
 0x719   : > { %v15262_v38 = vld [vmem:[#allocation56_spill] sm:$0xff] }
 0x71b   : > { %v6097_v42 = vpop.f32.mrf.mxu2 }
 0x71c   : > { %v13866_v57 = vadd.f32 %v6097_v42, %v5866_v41  ;;  %v5593_v41 = vadd.f32 %v15260_v36, %v5317_v44  ;;  %v13880_v42 = vpop.f32.mrf.mxu1 }
 0x71e   : > { %v5868_v13 = vadd.f32 %v13176_v63, %v5593_v41  ;;  %v7820_v63 = vld [vmem:[#allocation2 + $0x1ea] sm:$0xff] }
 0x71f   : > { %v6987_v41 = vld [vmem:[#allocation2 + $0x167] sm:$0xff] }
 0x720   : > { %9079 = vmatmul.msk.f32.gmra.mxu1 %vm1145_vm2, %v7817_v46  ;;  %8975 = vmatmul.msk.f32.gmra.mxu2 %vm1145_vm2, %v6984_v14  ;;  %v5318_v46 = vadd.f32 %v15261_v0, %v13380_v33  ;;  %v15264_v0 = vld [vmem:[#allocation199_spill] sm:$0xff] }
 0x723   : > { %v6100_v45 = vpop.f32.mrf.mxu2 }
 0x724   : > { %v13876_v58 = vadd.f32 %v6100_v45, %v5867_v19  ;;  %v5594_v19 = vadd.f32 %v15262_v38, %v5318_v46  ;;  %v13891_v44 = vpop.f32.mrf.mxu1  ;;  %v15263_v45 = vld [vmem:[#allocation57_spill] sm:$0xff]  ;;  %v13901_v46 = vpop.f32.mrf.mxu0 }
 0x725   : > { %v7821_v38 = vld [vmem:[#allocation2 + $0x1f2] sm:$0xff] }
 0x726   : > { %v5869_v33 = vadd.f32 %v13197_v18, %v5594_v19 }
 0x728   : > { %9080 = vmatmul.msk.f32.gmra.mxu1 %vm1145_vm2, %v7818_v27  ;;  %8976 = vmatmul.msk.f32.gmra.mxu2 %vm1145_vm2, %v6985_v52  ;;  %v5319_v27 = vadd.f32 %v15263_v45, %v13400_v62  ;;  %v6988_v45 = vld [vmem:[#allocation2 + $0x16f] sm:$0xff] }
 0x72b   : > { %v6103_v14 = vpop.f32.mrf.mxu2 }
 0x72c   : > { %v13886_v20 = vadd.f32 %v6103_v14, %v5868_v13  ;;  %v5595_v13 = vadd.f32 %v15264_v0, %v5319_v27  ;;  %v15265_v14 = vld [vmem:[#allocation60_spill] sm:$0xff] }
 0x72d   : > { %v7822_v0 = vld [vmem:[#allocation2 + $0x20a] sm:$0xff] }
 0x72e   : > { %v5870_v62 = vadd.f32 %v13219_v30, %v5595_v13 }
 0x730   : > { %9081 = vmatmul.msk.f32.gmra.mxu1 %vm1145_vm2, %v7819_v2  ;;  %8977 = vmatmul.msk.f32.gmra.mxu2 %vm1145_vm2, %v6986_v12  ;;  %v5320_v2 = vadd.f32 %v15265_v14, %v13421_v35  ;;  %v13906_v12 = vpop.f32.mrf.mxu1 }
 0x733   : > { %v6106_v52 = vpop.f32.mrf.mxu2 }
 0x734   : > { %v13896_v36 = vadd.f32 %v6106_v52, %v5869_v33  ;;  %v15266_v33 = vld [vmem:[#allocation200_spill] sm:$0xff] }
 0x735   : > { %v5596_v27 = vadd.f32 %v15266_v33, %v5320_v2  ;;  %v15267_v52 = vld [vmem:[#allocation36_spill] sm:$0xff]  ;;  %v15269_v2 = vld [vmem:[#allocation9_spill] sm:$0xff] }
 0x737   : > { %v5871_v35 = vadd.f32 %v13239_v60, %v5596_v27  ;;  %v7823_v27 = vld [vmem:[#allocation2 + $0x212] sm:$0xff] }
 0x738   : > { %9082 = vmatmul.msk.f32.gmra.mxu1 %vm1145_vm2, %v7820_v63  ;;  %8978 = vmatmul.msk.f32.gmra.mxu2 %vm1145_vm2, %v6987_v41  ;;  %v6390_v63 = vadd.f32 %v15267_v52, %v13439_v22  ;;  %v13916_v41 = vpop.f32.mrf.mxu0  ;;  %v13920_v14 = vpop.f32.mrf.mxu1  ;;  %v15270_v22 = vld [vmem:[#allocation40_spill] sm:$0xff] }
 0x73b   : > { %v6109_v18 = vpop.f32.mrf.mxu2 }
 0x73c   : > { %v13908_v19 = vadd.f32 %v6109_v18, %v5870_v62  ;;  %v6989_v62 = vld [vmem:[#allocation2 + $0x187] sm:$0xff]  ;;  %v6665_v18 = vadd.f32 %v15269_v2, %v6390_v63  ;;  %v6990_v63 = vld [vmem:[#allocation2 + $0x18f] sm:$0xff] }
 0x73e   : > { %v6941_v60 = vadd.f32 %v13258_v53, %v6665_v18  ;;  %v15272_v18 = vld [vmem:[#allocation12_spill] sm:$0xff] }
 0x740   : > { %9083 = vmatmul.msk.f32.gmra.mxu1 %vm1145_vm2, %v7821_v38  ;;  %8979 = vmatmul.msk.f32.gmra.mxu2 %vm1145_vm2, %v6988_v45  ;;  %v6391_v38 = vadd.f32 %v15270_v22, %v13459_v31  ;;  %v13928_v45 = vpop.f32.mrf.mxu3  ;;  %v13935_v2 = vpop.f32.mrf.mxu1  ;;  %v13943_v31 = vld [vmem:[%s14334_s4] ss:$0 sm:$0xff]  ;;  %v6392_v22 = vadd.f32 %v15272_v18, %v13479_v37  ;;  %v6991_v37 = vld [vmem:[#allocation2 + $0x1a7] sm:$0xff] }
 0x743   : > { %v6112_v30 = vpop.f32.mrf.mxu2 }
 0x744   : > { %v13918_v13 = vadd.f32 %v6112_v30, %v5871_v35  ;;  %v13930_v35 = vpop.f32.mrf.mxu0 }
 0x746   : > { %15268 = vst [vmem:[#allocation90_spill] sm:$0xff] %v13918_v13 }
 0x748   : > { %9084 = vmatmul.msk.f32.gmra.mxu1 %vm1145_vm2, %v7822_v0  ;;  %8980 = vmatmul.msk.f32.gmra.mxu2 %vm1145_vm2, %v6989_v62  ;;  %v15271_v0 = vld [vmem:[#allocation8_spill] sm:$0xff] }
 0x749   : > { %v6666_v62 = vadd.f32 %v15271_v0, %v6391_v38  ;;  %v15273_v0 = vld [vmem:[#allocation62_spill] sm:$0xff] }
 0x74a   : > { %v6667_v18 = vadd.f32 %v15273_v0, %v6392_v22 }
 0x74b   : > { %v7120_v33 = vpop.f32.mrf.mxu2  ;;  %v6942_v38 = vadd.f32 %v13278_v1, %v6666_v62  ;;  %v15274_v62 = vld [vmem:[#allocation118_spill] sm:$0xff] }
 0x74c   : > { %v7216_v52 = vadd.f32 %v7120_v33, %v6941_v60  ;;  %v7824_v33 = vld [vmem:[#allocation2 + $0x22a] sm:$0xff]  ;;  %v13957_v13 = vpop.f32.mrf.mxu0  ;;  %v6943_v22 = vadd.f32 %v13296_v54, %v6667_v18 }
 0x74e   : > { %v7491_v30 = vadd.f32 %v13707_v3, %v7216_v52 }
 0x750   : > { %9085 = vmatmul.msk.f32.gmra.mxu1 %vm1145_vm2, %v7823_v27  ;;  %8981 = vmatmul.msk.f32.gmra.mxu2 %vm1145_vm2, %v6990_v63  ;;  %v7766_v53 = vadd.f32 %v13736_v15, %v7491_v30  ;;  %v13952_v15 = vpop.f32.mrf.mxu3 }
 0x752   : > { %v8041_v3 = vadd.f32 %v13856_v43, %v7766_v53  ;;  %v13965_v43 = vpop.f32.mrf.mxu1 }
 0x753   : > { %v7123_v60 = vpop.f32.mrf.mxu2 }
 0x754   : > { %v8077_v27 = vadd.f32 %v13943_v31, %v8041_v3  ;;  %v7217_v52 = vadd.f32 %v7123_v60, %v6942_v38  ;;  %v7825_v38 = vld [vmem:[#allocation2 + $0x232] sm:$0xff] }
 0x756   : > { %v8109_v30 = vmax.f32 %v8077_v27, 0.0  ;;  %v7492_v63 = vadd.f32 %v13731_v4, %v7217_v52  ;;  %v6393_v4 = vadd.f32 %v15274_v62, %v13499_v51  ;;  %v6992_v52 = vld [vmem:[#allocation2 + $0x1af] sm:$0xff]  ;;  %v13981_v51 = vpop.f32.mrf.mxu0 }
 0x758   : > { %9086 = vmatmul.msk.f32.gmra.mxu1 %vm1145_vm2, %v7824_v33  ;;  %8982 = vmatmul.msk.f32.gmra.mxu2 %vm1145_vm2, %v6991_v37  ;;  %8142 = vst.msk [vmem:[%s13960_s23] sm:$0xff] %vm8141_vm5, %v8109_v30  ;;  %v7767_v1 = vadd.f32 %v13754_v23, %v7492_v63  ;;  %v15275_v30 = vld [vmem:[#allocation128_spill] sm:$0xff]  ;;  %v13975_v37 = vpop.f32.mrf.mxu3 }
 0x759   : > { %v6668_v63 = vadd.f32 %v15275_v30, %v6393_v4 }
 0x75a   : > { %v8042_v53 = vadd.f32 %v13868_v10, %v7767_v1  ;;  %v15276_v10 = vld [vmem:[#allocation11_spill] sm:$0xff]  ;;  %v13987_v1 = vpop.f32.mrf.mxu1 }
 0x75b   : > { %v7126_v3 = vpop.f32.mrf.mxu2  ;;  %v6394_v0 = vadd.f32 %v15276_v10, %v13517_v61 }
 0x75c   : > { %v8078_v60 = vadd.f32 %v13943_v31, %v8042_v53  ;;  %v7218_v33 = vadd.f32 %v7126_v3, %v6943_v22 }
 0x75e   : > { %v8110_v27 = vmax.f32 %v8078_v60, 0.0  ;;  %v7493_v23 = vadd.f32 %v13752_v7, %v7218_v33  ;;  %v6944_v7 = vadd.f32 %v13314_v25, %v6668_v63 }
 0x760   : > { %9087 = vmatmul.msk.f32.gmra.mxu1 %vm1145_vm2, %v7825_v38  ;;  %8983 = vmatmul.msk.f32.gmra.mxu2 %vm1145_vm2, %v6992_v52  ;;  %8143 = vst.msk [vmem:[%s13960_s23 + $0x8] sm:$0xff] %vm8141_vm5, %v8110_v27  ;;  %v7768_v54 = vadd.f32 %v13774_v5, %v7493_v23  ;;  %v6993_v38 = vld [vmem:[#allocation2 + $0x1c7] sm:$0xff]  ;;  %v13996_v25 = vpop.f32.mrf.mxu3 }
 0x761   : > { %v15277_v5 = vld [vmem:[#allocation15_spill] sm:$0xff] }
 0x762   : > { %v8043_v18 = vadd.f32 %v13880_v42, %v7768_v54  ;;  %v6669_v60 = vadd.f32 %v15277_v5, %v6394_v0  ;;  %v15278_v42 = vld [vmem:[#allocation46_spill] sm:$0xff]  ;;  %v14005_v54 = vpop.f32.mrf.mxu1  ;;  %v6994_v0 = vld [vmem:[#allocation2 + $0x1cf] sm:$0xff] }
 0x763   : > { %v7129_v62 = vpop.f32.mrf.mxu2  ;;  %v6395_v33 = vadd.f32 %v15278_v42, %v13535_v39  ;;  %v15280_v39 = vld [vmem:[#allocation16_spill] sm:$0xff] }
 0x764   : > { %v8079_v4 = vadd.f32 %v13943_v31, %v8043_v18  ;;  %v7219_v53 = vadd.f32 %v7129_v62, %v6944_v7  ;;  %v6945_v23 = vadd.f32 %v13334_v55, %v6669_v60  ;;  %v15279_v18 = vld [vmem:[#allocation78_spill] sm:$0xff] }
 0x765   : > { %v6670_v7 = vadd.f32 %v15279_v18, %v6395_v33  ;;  %v6996_v18 = vld [vmem:[#allocation2 + $0x1ef] sm:$0xff] }
 0x766   : > { %v8111_v22 = vmax.f32 %v8079_v4, 0.0  ;;  %v7494_v3 = vadd.f32 %v13771_v9, %v7219_v53  ;;  %v14002_v9 = vpop.f32.mrf.mxu0 }
 0x767   : > { %v6946_v4 = vadd.f32 %v13354_v17, %v6670_v7  ;;  %v15284_v7 = vld [vmem:[#allocation70_spill] sm:$0xff] }
 0x768   : > { %8984 = vmatmul.msk.f32.gmra.mxu2 %vm1145_vm2, %v6993_v38  ;;  %8144 = vst.msk [vmem:[%s13960_s23 + $0x10] sm:$0xff] %vm8141_vm5, %v8111_v22  ;;  %v7769_v61 = vadd.f32 %v13793_v32, %v7494_v3  ;;  %v14017_v53 = vpop.f32.mrf.mxu3 }
 0x76a   : > { %v8044_v27 = vadd.f32 %v13891_v44, %v7769_v61  ;;  %v6396_v44 = vadd.f32 %v15280_v39, %v13555_v50  ;;  %v6995_v61 = vld [vmem:[#allocation2 + $0x1e7] sm:$0xff]  ;;  %v14024_v33 = vpop.f32.mrf.mxu1  ;;  %v15282_v50 = vld [vmem:[#allocation14_spill] sm:$0xff] }
 0x76b   : > { %v7132_v52 = vpop.f32.mrf.mxu2  ;;  %v15285_v39 = vld [vmem:[#allocation50_spill] sm:$0xff] }
 0x76c   : > { %v8080_v30 = vadd.f32 %v13943_v31, %v8044_v27  ;;  %v7220_v63 = vadd.f32 %v7132_v52, %v6945_v23  ;;  %v15283_v23 = vld [vmem:[#allocation31_spill] sm:$0xff] }
 0x76e   : > { %v8112_v10 = vmax.f32 %v8080_v30, 0.0  ;;  %v7495_v32 = vadd.f32 %v13789_v56, %v7220_v63  ;;  %v14020_v38 = vpop.f32.mrf.mxu0 }
 0x770   : > { %8985 = vmatmul.msk.f32.gmra.mxu2 %vm1145_vm2, %v6994_v0  ;;  %8145 = vst.msk [vmem:[%s13960_s23 + $0x18] sm:$0xff] %vm8141_vm5, %v8112_v10  ;;  %v7770_v55 = vadd.f32 %v13901_v46, %v7495_v32  ;;  %v15281_v46 = vld [vmem:[#allocation18_spill] sm:$0xff]  ;;  %v14035_v10 = vpop.f32.mrf.mxu3 }
 0x771   : > { %v6671_v42 = vadd.f32 %v15281_v46, %v6396_v44  ;;  %v6398_v44 = vadd.f32 %v15285_v39, %v13595_v26  ;;  %v15287_v46 = vld [vmem:[#allocation103_spill] sm:$0xff]  ;;  %v15292_v39 = vld [vmem:[#allocation94_spill] sm:$0xff] }
 0x772   : > { %v8045_v62 = vadd.f32 %v13906_v12, %v7770_v55  ;;  %v6397_v12 = vadd.f32 %v15282_v50, %v13575_v11 }
 0x773   : > { %v7135_v56 = vpop.f32.mrf.mxu2  ;;  %v6947_v52 = vadd.f32 %v15283_v23, %v6671_v42  ;;  %v6673_v42 = vadd.f32 %v15287_v46, %v6398_v44 }
 0x774   : > { %v8081_v22 = vadd.f32 %v13943_v31, %v8045_v62  ;;  %v7221_v3 = vadd.f32 %v7135_v56, %v6946_v4  ;;  %v6672_v55 = vadd.f32 %v15284_v7, %v6397_v12  ;;  %v15291_v7 = vld [vmem:[#allocation17_spill] sm:$0xff] }
 0x776   : > { %v8113_v5 = vmax.f32 %v8081_v22, 0.0  ;;  %v7496_v60 = vadd.f32 %v13809_v59, %v7221_v3 }
 0x778   : > { %8986 = vmatmul.msk.f32.gmra.mxu2 %vm1145_vm2, %v6995_v61  ;;  %8146 = vst.msk [vmem:[%s13960_s23 + $0x20] sm:$0xff] %vm8141_vm5, %v8113_v5  ;;  %v7771_v17 = vadd.f32 %v13916_v41, %v7496_v60  ;;  %v14039_v41 = vpop.f32.mrf.mxu0  ;;  %v6997_v61 = vld [vmem:[#allocation2 + $0x207] sm:$0xff] }
 0x77a   : > { %v8046_v27 = vadd.f32 %v13920_v14, %v7771_v17  ;;  %v14045_v14 = vpop.f32.mrf.mxu1  ;;  %v15288_v17 = vld [vmem:[#allocation19_spill] sm:$0xff] }
 0x77b   : > { %v7138_v59 = vpop.f32.mrf.mxu2  ;;  %v6399_v50 = vadd.f32 %v15288_v17, %v13613_v48  ;;  %v7551_v17 = vld [vmem:[#allocation2 + $0x249] sm:$0xff] }
 0x77c   : > { %v8082_v30 = vadd.f32 %v13943_v31, %v8046_v27  ;;  %v7222_v63 = vadd.f32 %v7138_v59, %v6947_v52  ;;  %9056 = vmatmul.msk.f32.gmra.mxu0 %vm1145_vm2, %v7551_v17 }
 0x77e   : > { %v8114_v32 = vmax.f32 %v8082_v30, 0.0  ;;  %v7497_v0 = vadd.f32 %v13928_v45, %v7222_v63  ;;  %v15286_v45 = vld [vmem:[#allocation73_spill] sm:$0xff] }
 0x77f   : > { %v6948_v4 = vadd.f32 %v15286_v45, %v6672_v55  ;;  %v6400_v55 = vadd.f32 %v15291_v7, %v13631_v47  ;;  %v7278_v7 = vld [vmem:[#allocation2 + $0x268] sm:$0xff] }
 0x780   : > { %8987 = vmatmul.msk.f32.gmra.mxu2 %vm1145_vm2, %v6996_v18  ;;  %8147 = vst.msk [vmem:[%s13960_s23 + $0x28] sm:$0xff] %vm8141_vm5, %v8114_v32  ;;  %v7772_v11 = vadd.f32 %v13930_v35, %v7497_v0  ;;  %v14054_v35 = vpop.f32.mrf.mxu3  ;;  %v6998_v0 = vld [vmem:[#allocation2 + $0x20f] sm:$0xff]  ;;  %9026 = vmatmul.msk.f32.gmra.mxu3 %vm1145_vm2, %v7278_v7 }
 0x782   : > { %v8047_v62 = vadd.f32 %v13935_v2, %v7772_v11  ;;  %v14060_v2 = vpop.f32.mrf.mxu0  ;;  %v14066_v23 = vpop.f32.mrf.mxu1 }
 0x783   : > { %v7141_v56 = vpop.f32.mrf.mxu2 }
 0x784   : > { %v8083_v22 = vadd.f32 %v13943_v31, %v8047_v62  ;;  %v7223_v3 = vadd.f32 %v7141_v56, %v6948_v4 }
 0x786   : > { %v8115_v5 = vmax.f32 %v8083_v22, 0.0  ;;  %v7498_v60 = vadd.f32 %v13952_v15, %v7223_v3  ;;  %v15289_v15 = vld [vmem:[#allocation37_spill] sm:$0xff]  ;;  %v6999_v3 = vld [vmem:[#allocation2 + $0x227] sm:$0xff] }
 0x787   : > { %v6949_v27 = vadd.f32 %v15289_v15, %v6673_v42  ;;  %v15295_v42 = vld [vmem:[#allocation44_spill] sm:$0xff] }
 0x788   : > { %8988 = vmatmul.msk.f32.gmra.mxu2 %vm1145_vm2, %v6997_v61  ;;  %8148 = vst.msk [vmem:[%s13960_s23 + $0x30] sm:$0xff] %vm8141_vm5, %v8115_v5  ;;  %v7773_v26 = vadd.f32 %v13957_v13, %v7498_v60  ;;  %v15290_v13 = vld [vmem:[#allocation21_spill] sm:$0xff]  ;;  %v15293_v5 = vld [vmem:[#allocation74_spill] sm:$0xff] }
 0x789   : > { %v6674_v18 = vadd.f32 %v15290_v13, %v6399_v50  ;;  %v6675_v60 = vadd.f32 %v15293_v5, %v6400_v55  ;;  %v7552_v55 = vld [vmem:[#allocation2 + $0x251] sm:$0xff] }
 0x78a   : > { %v8048_v12 = vadd.f32 %v13965_v43, %v7773_v26  ;;  %v14075_v43 = vpop.f32.mrf.mxu3  ;;  %v14084_v56 = vpop.f32.mrf.mxu1  ;;  %9057 = vmatmul.msk.f32.gmra.mxu0 %vm1145_vm2, %v7552_v55  ;;  %v7003_v55 = vld [vmem:[#allocation2 + $0x267] sm:$0xff] }
 0x78b   : > { %v7144_v52 = vpop.f32.mrf.mxu2  ;;  %v6950_v44 = vadd.f32 %v15292_v39, %v6674_v18  ;;  %v6951_v26 = vadd.f32 %v15295_v42, %v6675_v60  ;;  %v15300_v60 = vld [vmem:[#allocation20_spill] sm:$0xff] }
 0x78c   : > { %v8084_v59 = vadd.f32 %v13943_v31, %v8048_v12  ;;  %v7224_v30 = vadd.f32 %v7144_v52, %v6949_v27  ;;  %v7553_v42 = vld [vmem:[#allocation2 + $0x269] sm:$0xff] }
 0x78e   : > { %v8116_v63 = vmax.f32 %v8084_v59, 0.0  ;;  %v7499_v32 = vadd.f32 %v13975_v37, %v7224_v30  ;;  %v14081_v37 = vpop.f32.mrf.mxu0  ;;  %v15296_v59 = vld [vmem:[#allocation58_spill] sm:$0xff] }
 0x790   : > { %8989 = vmatmul.msk.f32.gmra.mxu2 %vm1145_vm2, %v6998_v0  ;;  %8149 = vst.msk [vmem:[%s13960_s23 + $0x38] sm:$0xff] %vm8141_vm5, %v8116_v63  ;;  %v7774_v48 = vadd.f32 %v13981_v51, %v7499_v32  ;;  %v7826_v32 = vld [vmem:[#allocation2 + $0x24a] sm:$0xff]  ;;  %v15297_v0 = vld [vmem:[#allocation22_spill] sm:$0xff] }
 0x791   : > { %9088 = vmatmul.msk.f32.gmra.mxu1 %vm1145_vm2, %v7826_v32  ;;  %v6402_v13 = vadd.f32 %v15297_v0, %v13671_v28  ;;  %v15305_v0 = vld [vmem:[#allocation131_spill] sm:$0xff] }
 0x792   : > { %v8049_v11 = vadd.f32 %v13987_v1, %v7774_v48  ;;  %v15294_v1 = vld [vmem:[#allocation143_spill] sm:$0xff]  ;;  %v14096_v50 = vpop.f32.mrf.mxu3  ;;  %9058 = vmatmul.msk.f32.gmra.mxu0 %vm1145_vm2, %v7553_v42 }
 0x793   : > { %v7147_v62 = vpop.f32.mrf.mxu2  ;;  %v6401_v61 = vadd.f32 %v15294_v1, %v13651_v21  ;;  %v7000_v21 = vld [vmem:[#allocation2 + $0x22f] sm:$0xff] }
 0x794   : > { %v8085_v45 = vadd.f32 %v13943_v31, %v8049_v11  ;;  %v7225_v4 = vadd.f32 %v7147_v62, %v6950_v44  ;;  %v7001_v44 = vld [vmem:[#allocation2 + $0x247] sm:$0xff] }
 0x795   : > { %v6676_v30 = vadd.f32 %v15296_v59, %v6401_v61  ;;  %v15301_v1 = vld [vmem:[#allocation132_spill] sm:$0xff] }
 0x796   : > { %v8117_v22 = vmax.f32 %v8085_v45, 0.0  ;;  %v7500_v51 = vadd.f32 %v13996_v25, %v7225_v4  ;;  %v14100_v27 = vpop.f32.mrf.mxu0 }
 0x798   : > { %8990 = vmatmul.msk.f32.gmra.mxu2 %vm1145_vm2, %v6999_v3  ;;  %8150 = vst.msk [vmem:[%s13960_s23 + $0x40] sm:$0xff] %vm8141_vm5, %v8117_v22  ;;  %v7775_v47 = vadd.f32 %v14002_v9, %v7500_v51  ;;  %v7827_v3 = vld [vmem:[#allocation2 + $0x252] sm:$0xff] }
 0x799   : > { %9089 = vmatmul.msk.f32.gmra.mxu1 %vm1145_vm2, %v7827_v3 }
 0x79a   : > { %v8050_v46 = vadd.f32 %v14005_v54, %v7775_v47  ;;  %v14104_v54 = vpop.f32.mrf.mxu1  ;;  %v14118_v62 = vpop.f32.mrf.mxu3  ;;  %v6403_v47 = vadd.f32 %v15300_v60, %v13691_v24  ;;  %v15302_v24 = vld [vmem:[#allocation25_spill] sm:$0xff]  ;;  %v15309_v60 = vld [vmem:[#allocation87_spill] sm:$0xff] }
 0x79b   : > { %v7150_v25 = vpop.f32.mrf.mxu2 }
 0x79c   : > { %v8086_v12 = vadd.f32 %v13943_v31, %v8050_v46  ;;  %v7226_v15 = vadd.f32 %v7150_v25, %v6951_v26  ;;  %v7279_v46 = vld [vmem:[#allocation2 + $0x270] sm:$0xff] }
 0x79d   : > { %9027 = vmatmul.msk.f32.gmra.mxu3 %vm1145_vm2, %v7279_v46  ;;  %v7002_v25 = vld [vmem:[#allocation2 + $0x24f] sm:$0xff] }
 0x79e   : > { %v8118_v9 = vmax.f32 %v8086_v12, 0.0  ;;  %v7501_v52 = vadd.f32 %v14017_v53, %v7226_v15  ;;  %v15298_v53 = vld [vmem:[#allocation45_spill] sm:$0xff]  ;;  %v14122_v22 = vpop.f32.mrf.mxu0 }
 0x79f   : > { %v6952_v48 = vadd.f32 %v15298_v53, %v6676_v30  ;;  %v15303_v30 = vld [vmem:[#allocation121_spill] sm:$0xff] }
 0x7a0   : > { %8991 = vmatmul.msk.f32.gmra.mxu2 %vm1145_vm2, %v7000_v21  ;;  %8151 = vst.msk [vmem:[%s13960_s23 + $0x48] sm:$0xff] %vm8141_vm5, %v8118_v9  ;;  %v7776_v63 = vadd.f32 %v14020_v38, %v7501_v52  ;;  %v6678_v9 = vadd.f32 %v15302_v24, %v6403_v47  ;;  %v7828_v21 = vld [vmem:[#allocation2 + $0x26a] sm:$0xff]  ;;  %v15312_v24 = vld [vmem:[#allocation67_spill] sm:$0xff] }
 0x7a1   : > { %9090 = vmatmul.msk.f32.gmra.mxu1 %vm1145_vm2, %v7828_v21  ;;  %v7004_v46 = vld [vmem:[#allocation2 + $0x26f] sm:$0xff] }
 0x7a2   : > { %v8051_v18 = vadd.f32 %v14024_v33, %v7776_v63  ;;  %v15299_v33 = vld [vmem:[#allocation23_spill] sm:$0xff]  ;;  %v14128_v5 = vpop.f32.mrf.mxu1  ;;  %v14140_v52 = vpop.f32.mrf.mxu3  ;;  %v15304_v63 = vld [vmem:[#allocation61_spill] sm:$0xff] }
 0x7a3   : > { %v7153_v11 = vpop.f32.mrf.mxu2  ;;  %v6677_v4 = vadd.f32 %v15299_v33, %v6402_v13  ;;  %v6404_v32 = vadd.f32 %v15304_v63, %v15303_v30  ;;  %v6954_v13 = vadd.f32 %v15305_v0, %v6678_v9  ;;  %v15307_v33 = vld [vmem:[#allocation124_spill] sm:$0xff]  ;;  %v15313_v0 = vld [vmem:[#allocation27_spill] sm:$0xff] }
 0x7a4   : > { %v8087_v38 = vadd.f32 %v13943_v31, %v8051_v18  ;;  %v7227_v39 = vadd.f32 %v7153_v11, %v6952_v48  ;;  %v7554_v18 = vld [vmem:[#allocation2 + $0x271] sm:$0xff] }
 0x7a5   : > { %v6953_v61 = vadd.f32 %v15301_v1, %v6677_v4  ;;  %9059 = vmatmul.msk.f32.gmra.mxu0 %vm1145_vm2, %v7554_v18  ;;  %v15308_v4 = vld [vmem:[#allocation24_spill] sm:$0xff]  ;;  %v15315_v18 = vld [vmem:[#allocation115_spill] sm:$0xff] }
 0x7a6   : > { %v8119_v45 = vmax.f32 %v8087_v38, 0.0  ;;  %v7502_v28 = vadd.f32 %v14035_v10, %v7227_v39  ;;  %v7718_v59 = vpop.f32.mrf.mxu0  ;;  %v15306_v39 = vld [vmem:[#allocation39_spill] sm:$0xff] }
 0x7a8   : > { %8992 = vmatmul.msk.f32.gmra.mxu2 %vm1145_vm2, %v7001_v44  ;;  %8152 = vst.msk [vmem:[%s13960_s23 + $0x50] sm:$0xff] %vm8141_vm5, %v8119_v45  ;;  %v7777_v51 = vadd.f32 %v14039_v41, %v7502_v28  ;;  %v6679_v44 = vadd.f32 %v15306_v39, %v6404_v32  ;;  %v7829_v45 = vld [vmem:[#allocation2 + $0x272] sm:$0xff] }
 0x7a9   : > { %9091 = vmatmul.msk.f32.gmra.mxu1 %vm1145_vm2, %v7829_v45  ;;  %v15317_v45 = vld [vmem:[#allocation72_spill] sm:$0xff] }
 0x7aa   : > { %v8052_v10 = vadd.f32 %v14045_v14, %v7777_v51  ;;  %v7993_v53 = vpop.f32.mrf.mxu1  ;;  %v7446_v28 = vpop.f32.mrf.mxu3  ;;  %v6405_v51 = vadd.f32 %v15308_v4, %v15307_v33 }
 0x7ab   : > { %v7156_v26 = vpop.f32.mrf.mxu2 }
 0x7ac   : > { %v8088_v41 = vadd.f32 %v13943_v31, %v8052_v10  ;;  %v7228_v17 = vadd.f32 %v7156_v26, %v6953_v61 }
 0x7ae   : > { %v8120_v12 = vmax.f32 %v8088_v41, 0.0  ;;  %v7503_v15 = vadd.f32 %v14054_v35, %v7228_v17  ;;  %v7721_v47 = vpop.f32.mrf.mxu0  ;;  %v15310_v41 = vld [vmem:[#allocation28_spill] sm:$0xff] }
 0x7af   : > { %v6680_v17 = vadd.f32 %v15310_v41, %v6405_v51  ;;  %v15321_v41 = vld [vmem:[#allocation34_spill] sm:$0xff] }
 0x7b0   : > { %8993 = vmatmul.msk.f32.gmra.mxu2 %vm1145_vm2, %v7002_v25  ;;  %8153 = vst.msk [vmem:[%s13960_s23 + $0x58] sm:$0xff] %vm8141_vm5, %v8120_v12  ;;  %v7778_v14 = vadd.f32 %v14060_v2, %v7503_v15  ;;  %v15311_v25 = vld [vmem:[#allocation26_spill] sm:$0xff] }
 0x7b1   : > { %v6406_v12 = vadd.f32 %v15311_v25, %v13742_v29  ;;  %v6956_v9 = vadd.f32 %v15312_v24, %v6680_v17  ;;  %v15323_v24 = vld [vmem:[#allocation144_spill] sm:$0xff] }
 0x7b2   : > { %v8053_v35 = vadd.f32 %v14066_v23, %v7778_v14  ;;  %v7996_v42 = vpop.f32.mrf.mxu1  ;;  %v7449_v14 = vpop.f32.mrf.mxu3 }
 0x7b3   : > { %v7159_v48 = vpop.f32.mrf.mxu2 }
 0x7b4   : > { %v8089_v7 = vadd.f32 %v13943_v31, %v8053_v35  ;;  %v7229_v2 = vadd.f32 %v7159_v48, %v6954_v13  ;;  %v6681_v13 = vadd.f32 %v15313_v0, %v6406_v12  ;;  %v15322_v12 = vld [vmem:[#allocation33_spill] sm:$0xff]  ;;  %v15324_v0 = vld [vmem:[#allocation38_spill] sm:$0xff] }
 0x7b6   : > { %v8121_v11 = vmax.f32 %v8089_v7, 0.0  ;;  %v7504_v38 = vadd.f32 %v14075_v43, %v7229_v2  ;;  %v6955_v43 = vadd.f32 %v15309_v60, %v6679_v44  ;;  %v7724_v63 = vpop.f32.mrf.mxu0  ;;  %v15316_v2 = vld [vmem:[#allocation142_spill] sm:$0xff] }
 0x7b8   : > { %8994 = vmatmul.msk.f32.gmra.mxu2 %vm1145_vm2, %v7003_v55  ;;  %8154 = vst.msk [vmem:[%s13960_s23 + $0x60] sm:$0xff] %vm8141_vm5, %v8121_v11  ;;  %v7779_v23 = vadd.f32 %v14081_v37, %v7504_v38  ;;  %v6957_v55 = vadd.f32 %v15316_v2, %v6681_v13 }
 0x7ba   : > { %v8054_v3 = vadd.f32 %v14084_v56, %v7779_v23 }
 0x7bb   : > { %v7162_v10 = vpop.f32.mrf.mxu2 }
 0x7bc   : > { %v8090_v1 = vadd.f32 %v13943_v31, %v8054_v3  ;;  %v7230_v61 = vadd.f32 %v7162_v10, %v6955_v43  ;;  %v15318_v3 = vld [vmem:[#allocation59_spill] sm:$0xff]  ;;  %v15320_v10 = vld [vmem:[#allocation106_spill] sm:$0xff] }
 0x7be   : > { %v8122_v37 = vmax.f32 %v8090_v1, 0.0  ;;  %v7505_v26 = vadd.f32 %v14096_v50, %v7230_v61  ;;  %v7727_v4 = vpop.f32.mrf.mxu0 }
 0x7c0   : > { %8995 = vmatmul.msk.f32.gmra.mxu2 %vm1145_vm2, %v7004_v46  ;;  %8155 = vst.msk [vmem:[%s13960_s23 + $0x68] sm:$0xff] %vm8141_vm5, %v8122_v37  ;;  %v7780_v56 = vadd.f32 %v14100_v27, %v7505_v26  ;;  %v7999_v27 = vpop.f32.mrf.mxu1 }
 0x7c2   : > { %v8055_v15 = vadd.f32 %v14104_v54, %v7780_v56  ;;  %v15314_v54 = vld [vmem:[#allocation81_spill] sm:$0xff] }
 0x7c3   : > { %v7165_v21 = vpop.f32.mrf.mxu2  ;;  %v6407_v48 = vadd.f32 %v15315_v18, %v15314_v54  ;;  %v15325_v54 = vld [vmem:[#allocation63_spill] sm:$0xff] }
 0x7c4   : > { %v8091_v50 = vadd.f32 %v13943_v31, %v8055_v15  ;;  %v7231_v30 = vadd.f32 %v7165_v21, %v6956_v9  ;;  %v6409_v15 = vadd.f32 %v15322_v12, %v13791_v16  ;;  %v15326_v18 = vld [vmem:[#allocation51_spill] sm:$0xff] }
 0x7c5   : > { %v6682_v33 = vadd.f32 %v15317_v45, %v6407_v48  ;;  %v6410_v16 = vadd.f32 %v15326_v18, %v15325_v54  ;;  %v15327_v48 = vld [vmem:[#allocation35_spill] sm:$0xff] }
 0x7c6   : > { %v8123_v32 = vmax.f32 %v8091_v50, 0.0  ;;  %v7506_v35 = vadd.f32 %v14118_v62, %v7231_v30  ;;  %v7452_v62 = vpop.f32.mrf.mxu3  ;;  %v7730_v25 = vpop.f32.mrf.mxu0  ;;  %v6684_v13 = vadd.f32 %v15324_v0, %v6409_v15  ;;  %v15336_v0 = vld [vmem:[#allocation69_spill] sm:$0xff] }
 0x7c7   : > { %v6958_v1 = vadd.f32 %v15320_v10, %v6682_v33  ;;  %v15329_v33 = vld [vmem:[#allocation166_spill] sm:$0xff] }
 0x7c8   : > { %8156 = vst.msk [vmem:[%s13960_s23 + $0x70] sm:$0xff] %vm8141_vm5, %v8123_v32  ;;  %v7781_v29 = vadd.f32 %v14122_v22, %v7506_v35  ;;  %v8002_v51 = vpop.f32.mrf.mxu1 }
 0x7ca   : > { %v8056_v7 = vadd.f32 %v14128_v5, %v7781_v29  ;;  %v15319_v5 = vld [vmem:[#allocation30_spill] sm:$0xff] }
 0x7cb   : > { %v7168_v11 = vpop.f32.mrf.mxu2  ;;  %v6408_v60 = vadd.f32 %v15319_v5, %v15318_v3  ;;  %v15330_v3 = vld [vmem:[#allocation112_spill] sm:$0xff] }
 0x7cc   : > { %v8092_v38 = vadd.f32 %v13943_v31, %v8056_v7  ;;  %v7232_v39 = vadd.f32 %v7168_v11, %v6957_v55  ;;  %v6960_v7 = vadd.f32 %v15327_v48, %v6684_v13 }
 0x7cd   : > { %v6683_v17 = vadd.f32 %v15321_v41, %v6408_v60 }
 0x7ce   : > { %v8124_v44 = vmax.f32 %v8092_v38, 0.0  ;;  %v7507_v23 = vadd.f32 %v14140_v52, %v7232_v39  ;;  %v7455_v56 = vpop.f32.mrf.mxu3  ;;  %v7733_v2 = vpop.f32.mrf.mxu0 }
 0x7cf   : > { %v6959_v9 = vadd.f32 %v15323_v24, %v6683_v17  ;;  %v15333_v17 = vld [vmem:[#allocation68_spill] sm:$0xff] }
 0x7d0   : > { %8157 = vst.msk [vmem:[%s13960_s23 + $0x78] sm:$0xff] %vm8141_vm5, %v8124_v44  ;;  %v7782_v22 = vadd.f32 %v7718_v59, %v7507_v23  ;;  %v8005_v21 = vpop.f32.mrf.mxu1  ;;  %v15328_v23 = vld [vmem:[#allocation41_spill] sm:$0xff] }
 0x7d1   : > { %v6685_v45 = vadd.f32 %v15328_v23, %v6410_v16 }
 0x7d2   : > { %v8057_v43 = vadd.f32 %v7993_v53, %v7782_v22  ;;  %v6411_v22 = vadd.f32 %v15329_v33, %v13818_v6  ;;  %v15332_v6 = vld [vmem:[#allocation83_spill] sm:$0xff] }
 0x7d3   : > { %v7171_v61 = vpop.f32.mrf.mxu2  ;;  %v6961_v5 = vadd.f32 %v15330_v3, %v6685_v45 }
 0x7d4   : > { %v8093_v46 = vadd.f32 %v13943_v31, %v8057_v43  ;;  %v7233_v37 = vadd.f32 %v7171_v61, %v6958_v1 }
 0x7d6   : > { %v8125_v26 = vmax.f32 %v8093_v46, 0.0  ;;  %v7508_v52 = vadd.f32 %v7446_v28, %v7233_v37  ;;  %v7458_v29 = vpop.f32.mrf.mxu3  ;;  %v7736_v61 = vpop.f32.mrf.mxu0  ;;  %v15331_v37 = vld [vmem:[#allocation97_spill] sm:$0xff] }
 0x7d8   : > { %8158 = vst.msk [vmem:[%s13960_s23 + $0x80] sm:$0xff] %vm8141_vm5, %v8125_v26  ;;  %v7783_v59 = vadd.f32 %v7721_v47, %v7508_v52  ;;  %v8008_v39 = vpop.f32.mrf.mxu1  ;;  %v6686_v26 = vadd.f32 %v15331_v37, %v6411_v22 }
 0x7da   : > { %v8058_v53 = vadd.f32 %v7996_v42, %v7783_v59  ;;  %v6962_v59 = vadd.f32 %v15333_v17, %v6686_v26 }
 0x7db   : > { %v7174_v50 = vpop.f32.mrf.mxu2 }
 0x7dc   : > { %v8094_v30 = vadd.f32 %v13943_v31, %v8058_v53  ;;  %v7234_v32 = vadd.f32 %v7174_v50, %v6959_v9  ;;  %v15334_v50 = vld [vmem:[#allocation48_spill] sm:$0xff] }
 0x7de   : > { %v8126_v28 = vmax.f32 %v8094_v30, 0.0  ;;  %v7509_v35 = vadd.f32 %v7449_v14, %v7234_v32  ;;  %v7461_v60 = vpop.f32.mrf.mxu3  ;;  %v7739_v32 = vpop.f32.mrf.mxu0 }
 0x7e0   : > { %8159 = vst.msk [vmem:[%s13960_s23 + $0x88] sm:$0xff] %vm8141_vm5, %v8126_v28  ;;  %v7784_v47 = vadd.f32 %v7724_v63, %v7509_v35  ;;  %v8011_v52 = vpop.f32.mrf.mxu1 }
 0x7e2   : > { %v8059_v42 = vadd.f32 %v7999_v27, %v7784_v47 }
 0x7e3   : > { %v7177_v55 = vpop.f32.mrf.mxu2 }
 0x7e4   : > { %v8095_v11 = vadd.f32 %v13943_v31, %v8059_v42  ;;  %v7235_v38 = vadd.f32 %v7177_v55, %v6960_v7  ;;  %v15337_v42 = vld [vmem:[#allocation49_spill] sm:$0xff] }
 0x7e6   : > { %v8127_v14 = vmax.f32 %v8095_v11, 0.0  ;;  %v7510_v44 = vadd.f32 %v7452_v62, %v7235_v38  ;;  %v7464_v24 = vpop.f32.mrf.mxu3  ;;  %v7742_v55 = vpop.f32.mrf.mxu0  ;;  %v15338_v11 = vld [vmem:[#allocation100_spill] sm:$0xff] }
 0x7e8   : > { %8160 = vst.msk [vmem:[%s13960_s23 + $0x90] sm:$0xff] %vm8141_vm5, %v8127_v14  ;;  %v7785_v63 = vadd.f32 %v7727_v4, %v7510_v44  ;;  %v8014_v28 = vpop.f32.mrf.mxu1 }
 0x7ea   : > { %v8060_v27 = vadd.f32 %v8002_v51, %v7785_v63  ;;  %v6412_v51 = vadd.f32 %v15332_v6, %v13828_v8  ;;  %v15335_v8 = vld [vmem:[#allocation174_spill] sm:$0xff] }
 0x7eb   : > { %v7180_v43 = vpop.f32.mrf.mxu2 }
 0x7ec   : > { %v8096_v10 = vadd.f32 %v13943_v31, %v8060_v27  ;;  %v7236_v1 = vadd.f32 %v7180_v43, %v6961_v5  ;;  %v6687_v30 = vadd.f32 %v15334_v50, %v6412_v51  ;;  %v15340_v27 = vld [vmem:[#allocation139_spill] sm:$0xff]  ;;  %v15341_v43 = vld [vmem:[#allocation137_spill] sm:$0xff]  ;;  %v15343_v51 = vld [vmem:[#allocation138_spill] sm:$0xff] }
 0x7ee   : > { %v8128_v46 = vmax.f32 %v8096_v10, 0.0  ;;  %v7511_v62 = vadd.f32 %v7455_v56, %v7236_v1  ;;  %v6963_v13 = vadd.f32 %v15336_v0, %v6687_v30  ;;  %v7467_v7 = vpop.f32.mrf.mxu3  ;;  %v15342_v1 = vld [vmem:[#allocation80_spill] sm:$0xff] }
 0x7f0   : > { %8161 = vst.msk [vmem:[%s13960_s23 + $0x98] sm:$0xff] %vm8141_vm5, %v8128_v46  ;;  %v7786_v4 = vadd.f32 %v7730_v25, %v7511_v62  ;;  %v8017_v44 = vpop.f32.mrf.mxu1  ;;  %v7745_v46 = vpop.f32.mrf.mxu0 }
 0x7f2   : > { %v8061_v41 = vadd.f32 %v8005_v21, %v7786_v4  ;;  %v6413_v21 = vadd.f32 %v15335_v8, %v13838_v40  ;;  %v6414_v40 = vadd.f32 %v15338_v11, %v13848_v34  ;;  %v6415_v34 = vadd.f32 %v15341_v43, %v13858_v49 }
 0x7f3   : > { %v7183_v12 = vpop.f32.mrf.mxu2 }
 0x7f4   : > { %v8097_v15 = vadd.f32 %v13943_v31, %v8061_v41  ;;  %v7237_v53 = vadd.f32 %v7183_v12, %v6962_v59  ;;  %v6688_v48 = vadd.f32 %v15337_v42, %v6413_v21  ;;  %v6689_v3 = vadd.f32 %v15340_v27, %v6414_v40  ;;  %v15344_v59 = vld [vmem:[#allocation52_spill] sm:$0xff] }
 0x7f5   : > { %v6690_v41 = vadd.f32 %v15343_v51, %v6415_v34  ;;  %v6416_v49 = vadd.f32 %v15344_v59, %v13866_v57  ;;  %v15347_v57 = vld [vmem:[#allocation54_spill] sm:$0xff]  ;;  %v15355_v51 = vld [vmem:[#allocation101_spill] sm:$0xff] }
 0x7f6   : > { %v8129_v9 = vmax.f32 %v8097_v15, 0.0  ;;  %v7512_v56 = vadd.f32 %v7458_v29, %v7237_v53  ;;  %v15345_v15 = vld [vmem:[#allocation170_spill] sm:$0xff]  ;;  %v6417_v0 = vadd.f32 %v15347_v57, %v13876_v58  ;;  %v15350_v58 = vld [vmem:[#allocation109_spill] sm:$0xff] }
 0x7f7   : > { %v6966_v53 = vadd.f32 %v15345_v15, %v6690_v41  ;;  %v15359_v57 = vld [vmem:[#allocation90_spill] sm:$0xff] }
 0x7f8   : > { %8162 = vst.msk [vmem:[%s13960_s23 + $0xa0] sm:$0xff] %vm8141_vm5, %v8129_v9  ;;  %v7787_v25 = vadd.f32 %v7733_v2, %v7512_v56  ;;  %v7748_v30 = vpop.f32.mrf.mxu0 }
 0x7fa   : > { %v8062_v35 = vadd.f32 %v8008_v39, %v7787_v25  ;;  %v15339_v39 = vld [vmem:[#allocation161_spill] sm:$0xff] }
 0x7fb   : > { %v7186_v47 = vpop.f32.mrf.mxu2  ;;  %v6964_v14 = vadd.f32 %v15339_v39, %v6688_v48  ;;  %v6418_v39 = vadd.f32 %v15350_v58, %v13886_v20  ;;  %v15353_v20 = vld [vmem:[#allocation64_spill] sm:$0xff] }
 0x7fc   : > { %v8098_v54 = vadd.f32 %v13943_v31, %v8062_v35  ;;  %v7238_v18 = vadd.f32 %v7186_v47, %v6963_v13  ;;  %v15348_v47 = vld [vmem:[#allocation127_spill] sm:$0xff]  ;;  %v15363_v58 = vld [vmem:[#allocation136_spill] sm:$0xff] }
 0x7fe   : > { %v8130_v16 = vmax.f32 %v8098_v54, 0.0  ;;  %v7513_v29 = vadd.f32 %v7461_v60, %v7238_v18  ;;  %v7470_v60 = vpop.f32.mrf.mxu3 }
 0x800   : > { %8163 = vst.msk [vmem:[%s13960_s23 + $0xa8] sm:$0xff] %vm8141_vm5, %v8130_v16  ;;  %v7788_v2 = vadd.f32 %v7736_v61, %v7513_v29  ;;  %v6965_v61 = vadd.f32 %v15342_v1, %v6689_v3  ;;  %v7751_v11 = vpop.f32.mrf.mxu0  ;;  %v6419_v1 = vadd.f32 %v15353_v20, %v13896_v36 }
 0x802   : > { %v8063_v38 = vadd.f32 %v8011_v52, %v7788_v2  ;;  %v8020_v52 = vpop.f32.mrf.mxu1  ;;  %v15349_v2 = vld [vmem:[#allocation96_spill] sm:$0xff]  ;;  %v6694_v41 = vadd.f32 %v15355_v51, %v6419_v1 }
 0x803   : > { %v7189_v23 = vpop.f32.mrf.mxu2 }
 0x804   : > { %v8099_v45 = vadd.f32 %v13943_v31, %v8063_v38  ;;  %v7239_v63 = vadd.f32 %v7189_v23, %v6964_v14 }
 0x806   : > { %v8131_v33 = vmax.f32 %v8099_v45, 0.0  ;;  %v7514_v22 = vadd.f32 %v7464_v24, %v7239_v63  ;;  %v7473_v24 = vpop.f32.mrf.mxu3 }
 0x808   : > { %8164 = vst.msk [vmem:[%s13960_s23 + $0xb0] sm:$0xff] %vm8141_vm5, %v8131_v33  ;;  %v7789_v5 = vadd.f32 %v7739_v32, %v7514_v22  ;;  %v7754_v43 = vpop.f32.mrf.mxu0 }
 0x80a   : > { %v8064_v10 = vadd.f32 %v8014_v28, %v7789_v5  ;;  %v15346_v28 = vld [vmem:[#allocation95_spill] sm:$0xff]  ;;  %v8023_v21 = vpop.f32.mrf.mxu1 }
 0x80b   : > { %v7192_v62 = vpop.f32.mrf.mxu2  ;;  %v6691_v8 = vadd.f32 %v15346_v28, %v6416_v49  ;;  %v15352_v5 = vld [vmem:[#allocation79_spill] sm:$0xff] }
 0x80c   : > { %v8100_v37 = vadd.f32 %v13943_v31, %v8064_v10  ;;  %v7240_v26 = vadd.f32 %v7192_v62, %v6965_v61  ;;  %v15358_v28 = vld [vmem:[#allocation47_spill] sm:$0xff] }
 0x80d   : > { %v6967_v54 = vadd.f32 %v15348_v47, %v6691_v8  ;;  %v15361_v47 = vld [vmem:[#allocation89_spill] sm:$0xff] }
 0x80e   : > { %v8132_v4 = vmax.f32 %v8100_v37, 0.0  ;;  %v7515_v6 = vadd.f32 %v7467_v7, %v7240_v26  ;;  %v7476_v42 = vpop.f32.mrf.mxu3 }
 0x810   : > { %8165 = vst.msk [vmem:[%s13960_s23 + $0xb8] sm:$0xff] %vm8141_vm5, %v8132_v4  ;;  %v7790_v17 = vadd.f32 %v7742_v55, %v7515_v6  ;;  %v6692_v55 = vadd.f32 %v15349_v2, %v6417_v0  ;;  %v7757_v49 = vpop.f32.mrf.mxu0  ;;  %v15360_v0 = vld [vmem:[#allocation157_spill] sm:$0xff] }
 0x812   : > { %v8065_v12 = vadd.f32 %v8017_v44, %v7790_v17  ;;  %v8026_v38 = vpop.f32.mrf.mxu1  ;;  %v15351_v44 = vld [vmem:[#allocation84_spill] sm:$0xff] }
 0x813   : > { %v7195_v9 = vpop.f32.mrf.mxu2  ;;  %v6968_v23 = vadd.f32 %v15351_v44, %v6692_v55  ;;  %v15362_v55 = vld [vmem:[#allocation162_spill] sm:$0xff] }
 0x814   : > { %v8101_v56 = vadd.f32 %v13943_v31, %v8065_v12  ;;  %v7241_v50 = vadd.f32 %v7195_v9, %v6966_v53  ;;  %v15356_v12 = vld [vmem:[#allocation65_spill] sm:$0xff]  ;;  %v15357_v53 = vld [vmem:[#allocation178_spill] sm:$0xff] }
 0x815   : > { %v6420_v36 = vadd.f32 %v15356_v12, %v13908_v19  ;;  %v6421_v19 = vadd.f32 %v15360_v0, %v15359_v57 }
 0x816   : > { %v8133_v32 = vmax.f32 %v8101_v56, 0.0  ;;  %v7516_v25 = vadd.f32 %v7470_v60, %v7241_v50  ;;  %v7479_v22 = vpop.f32.mrf.mxu3  ;;  %v6693_v60 = vadd.f32 %v15352_v5, %v6418_v39 }
 0x817   : > { %v6695_v8 = vadd.f32 %v15358_v28, %v6420_v36 }
 0x818   : > { %8166 = vst.msk [vmem:[%s13960_s23 + $0xc0] sm:$0xff] %vm8141_vm5, %v8133_v32  ;;  %v7791_v35 = vadd.f32 %v7745_v46, %v7516_v25  ;;  %v15354_v46 = vld [vmem:[#allocation86_spill] sm:$0xff] }
 0x819   : > { %v6969_v62 = vadd.f32 %v15354_v46, %v6693_v60 }
 0x81a   : > { %v8066_v13 = vadd.f32 %v8020_v52, %v7791_v35  ;;  %v8029_v10 = vpop.f32.mrf.mxu1 }
 0x81b   : > { %v7198_v18 = vpop.f32.mrf.mxu2 }
 0x81c   : > { %v8102_v16 = vadd.f32 %v13943_v31, %v8066_v13  ;;  %v7242_v29 = vadd.f32 %v7198_v18, %v6967_v54  ;;  %v6971_v54 = vadd.f32 %v15361_v47, %v6695_v8 }
 0x81e   : > { %v8134_v48 = vmax.f32 %v8102_v16, 0.0  ;;  %v7517_v7 = vadd.f32 %v7473_v24, %v7242_v29  ;;  %v7482_v17 = vpop.f32.mrf.mxu3  ;;  %v6970_v24 = vadd.f32 %v15357_v53, %v6694_v41  ;;  %v7760_v16 = vpop.f32.mrf.mxu0 }
 0x820   : > { %8167 = vst.msk [vmem:[%s13960_s23 + $0xc8] sm:$0xff] %vm8141_vm5, %v8134_v48  ;;  %v7792_v40 = vadd.f32 %v7748_v30, %v7517_v7 }
 0x822   : > { %v8067_v14 = vadd.f32 %v8023_v21, %v7792_v40  ;;  %v8032_v56 = vpop.f32.mrf.mxu1 }
 0x823   : > { %v7201_v45 = vpop.f32.mrf.mxu2 }
 0x824   : > { %v8103_v63 = vadd.f32 %v13943_v31, %v8067_v14  ;;  %v7243_v33 = vadd.f32 %v7201_v45, %v6968_v23 }
 0x826   : > { %v8135_v27 = vmax.f32 %v8103_v63, 0.0  ;;  %v7518_v3 = vadd.f32 %v7476_v42, %v7243_v33  ;;  %v7485_v35 = vpop.f32.mrf.mxu3  ;;  %v7763_v63 = vpop.f32.mrf.mxu0 }
 0x828   : > { %8168 = vst.msk [vmem:[%s13960_s23 + $0xd0] sm:$0xff] %vm8141_vm5, %v8135_v27  ;;  %v7793_v34 = vadd.f32 %v7751_v11, %v7518_v3  ;;  %v6696_v11 = vadd.f32 %v15362_v55, %v6421_v19 }
 0x82a   : > { %v8068_v61 = vadd.f32 %v8026_v38, %v7793_v34  ;;  %v8035_v48 = vpop.f32.mrf.mxu1  ;;  %v6972_v39 = vadd.f32 %v15363_v58, %v6696_v11 }
 0x82b   : > { %v7204_v37 = vpop.f32.mrf.mxu2 }
 0x82c   : > { %v8104_v26 = vadd.f32 %v13943_v31, %v8068_v61  ;;  %v7244_v52 = vadd.f32 %v7204_v37, %v6969_v62 }
 0x82e   : > { %v8136_v4 = vmax.f32 %v8104_v26, 0.0  ;;  %v7519_v6 = vadd.f32 %v7479_v22, %v7244_v52  ;;  %v7488_v44 = vpop.f32.mrf.mxu3 }
 0x830   : > { %8169 = vst.msk [vmem:[%s13960_s23 + $0xd8] sm:$0xff] %vm8141_vm5, %v8136_v4  ;;  %v7794_v59 = vadd.f32 %v7754_v43, %v7519_v6 }
 0x832   : > { %v8069_v15 = vadd.f32 %v8029_v10, %v7794_v59  ;;  %v8038_v27 = vpop.f32.mrf.mxu1 }
 0x833   : > { %v7207_v9 = vpop.f32.mrf.mxu2 }
 0x834   : > { %v8105_v50 = vadd.f32 %v13943_v31, %v8069_v15  ;;  %v7245_v30 = vadd.f32 %v7207_v9, %v6970_v24 }
 0x836   : > { %v8137_v32 = vmax.f32 %v8105_v50, 0.0  ;;  %v7520_v25 = vadd.f32 %v7482_v17, %v7245_v30 }
 0x838   : > { %8170 = vst.msk [vmem:[%s13960_s23 + $0xe0] sm:$0xff] %vm8141_vm5, %v8137_v32  ;;  %v7795_v21 = vadd.f32 %v7757_v49, %v7520_v25 }
 0x83a   : > { %v8070_v13 = vadd.f32 %v8032_v56, %v7795_v21 }
 0x83b   : > { %v7210_v18 = vpop.f32.mrf.mxu2 }
 0x83c   : > { %v8106_v29 = vadd.f32 %v13943_v31, %v8070_v13  ;;  %v7246_v42 = vadd.f32 %v7210_v18, %v6971_v54 }
 0x83e   : > { %v8138_v7 = vmax.f32 %v8106_v29, 0.0  ;;  %v7521_v2 = vadd.f32 %v7485_v35, %v7246_v42 }
 0x840   : > { %8171 = vst.msk [vmem:[%s13960_s23 + $0xe8] sm:$0xff] %vm8141_vm5, %v8138_v7  ;;  %v7796_v40 = vadd.f32 %v7760_v16, %v7521_v2 }
 0x842   : > { %v8071_v38 = vadd.f32 %v8035_v48, %v7796_v40 }
 0x843   : > { %v7213_v14 = vpop.f32.mrf.mxu2 }
 0x844   : > { %v8107_v23 = vadd.f32 %v13943_v31, %v8071_v38  ;;  %v7247_v45 = vadd.f32 %v7213_v14, %v6972_v39 }
 0x846   : > { %v8139_v33 = vmax.f32 %v8107_v23, 0.0  ;;  %v7522_v22 = vadd.f32 %v7488_v44, %v7247_v45 }
 0x848   : > { %8172 = vst.msk [vmem:[%s13960_s23 + $0xf0] sm:$0xff] %vm8141_vm5, %v8139_v33  ;;  %v7797_v3 = vadd.f32 %v7763_v63, %v7522_v22 }
 0x84a   : > { %v8072_v5 = vadd.f32 %v8038_v27, %v7797_v3 }
 0x84c   : > { %v8108_v60 = vadd.f32 %v13943_v31, %v8072_v5 }
 0x84e   : > { %v8140_v43 = vmax.f32 %v8108_v60, 0.0 }
 0x850   : > { %8173 = vst.msk [vmem:[%s13960_s23 + $0xf8] sm:$0xff] %vm8141_vm5, %v8140_v43 }
 0x851   : > { %9178 = shalt.err (!%p9175_p3)
}
 0x852   : > { %s9219_s15 = smov 128  }
 0x853   : > { %9102 = dma.vmem_to_hbm [thread:$0]  (%p9288_p5), %s8188_s7, 4096, %s8190_s8, %s8175_s22, %s9219_s15, %s9219_s15, %s9216_s12  }
 0x854 PF: > { %p9108_p4 = scmp.ge.s32.totalorder %s9213_s21, 2  ;;  %s8204_s23 = sand.u32 1, %s9201_s18  }
 0x855   : > { %s8205_s25 = scalar_lea.sflag [#allocation5], %s8204_s23 }
 0x856   : > { %p9105_p7 = pnand %p9108_p4, %p9292_p6 }
 0x858   : > { %p9106_p8 = pneg %p9105_p7 }
 0x85a   : > { %9196 = dma.done.wait (%p9106_p8), %s8205_s25, 4096  }
 0x85b   : > { %9198 = vsyncadd (%p9106_p8), %s8205_s25, 4294963200  ;;  %p15_p9 = scmp.ge.s32.totalorder %s9275_s24, 4   ;;  %s15364_s18 = smov %s9205_s19 }
 0x85c   : > { %s15365_s19 = smov %s9209_s20  ;;  %s15366_s20 = smov %s9286_s27 }
 0x85d   : > { %s15367_s21 = smov %s9275_s24  ;;  %17 = sbr.rel (!%p15_p9) target bundleno = 3 (0x3), region = 80 }
 0x862   :  { %8211 = vsyncpa [#allocation5], 1 }
 0x863   :  { %8213 = vsyncpa [#allocation5 + $0x1], 1 }

</bundles_post_ra>
